<compile_context>
chip_gen: v7x
topology: tpu7x:2x2x1
jax: 0.10.0
libtpu: 0.0.40
codegen_flags: <defaults>
</compile_context>

<pallas_src>
import jax
import jax.numpy as jnp
from jax.experimental import pallas as pl
from jax.experimental.pallas import tpu as pltpu

IN_X = 2048
IN_ATT = 312
IN_ATT_PAD = 384            # 312 padded up to a lane-aligned multiple of 128
IN_DIM = IN_X + IN_ATT      # 2360
HID = 1024
OUT = 1
LRELU_SLOPE = 0.2


def _num_tensorcores() -> int:
    """2 only on parts whose JAX device exposes two TensorCores (v7x, megacore);
    on single-TC chips (v5e/v6e) a 'parallel' split would just serialize."""
    try:
        kind = jax.devices()[0].device_kind.lower()
    except Exception:
        return 1
    if ("v7" in kind) or ("v4" in kind) or ("v5p" in kind):
        return 2
    return 1


N_SPLIT = _num_tensorcores()     # HID slices == grid steps (one per TC)
HID_SLICE = HID // N_SPLIT       # 1024 or 512 (multiple of 128 either way)


def _disc_kernel(x_ref, att_ref, w1x_ref, w1a_ref, b1_ref, w2r_ref, b2_ref,
                 out_ref):
    """grid = (N_SPLIT,): one full-K fc1 slice + its fc2 partial per step."""
    # fc1 for this HID slice: bf16 MXU inputs, f32 accumulation.
    hid = jnp.dot(x_ref[...].astype(jnp.bfloat16), w1x_ref[...],
                  preferred_element_type=jnp.float32)
    hid = hid + jnp.dot(att_ref[...].astype(jnp.bfloat16), w1a_ref[...],
                        preferred_element_type=jnp.float32)
    hid = hid + b1_ref[...]                                    # (B, HID_SLICE)
    hid = jnp.where(hid > 0, hid, LRELU_SLOPE * hid)           # LeakyReLU(0.2)
    # fc2 partial: VPU multiply with the lane-dense w2 row + XLU row reduce
    # (avoids an N=1 MXU matmul).
    partial = jnp.sum(hid * w2r_ref[...], axis=-1, keepdims=True)      # (B, 1)
    # b2 is added exactly once (on slice 0); with N_SPLIT == 1 this makes the
    # pallas output final with zero JAX glue ops.
    is_first = (pl.program_id(0) == 0).astype(jnp.float32)
    res = partial + b2_ref[...] * is_first
    out_ref[...] = res.reshape(out_ref.shape)


def prepare_params(w1, b1, w2, b2):
    """One-time (out-of-hot-path) packing of the PyTorch-style parameters.

    w1: (2360, 1024) f32 -> x-part (2048, 1024) + att-part zero-padded to
                            (384, 1024), both cast to bf16
    b1: (1024,)          -> (1, 1024) f32
    w2: (1024, 1)        -> lane-dense row (1, 1024) f32
    b2: (1,)             -> (1, 1) f32
    """
    w1x = w1[:IN_X].astype(jnp.bfloat16)
    w1a = jnp.pad(
        w1[IN_X:], ((0, IN_ATT_PAD - IN_ATT), (0, 0))).astype(jnp.bfloat16)
    b1_2d = b1.reshape(1, HID).astype(jnp.float32)
    w2_row = w2.reshape(1, HID).astype(jnp.float32)
    b2_2d = b2.reshape(1, OUT).astype(jnp.float32)
    return w1x, w1a, b1_2d, w2_row, b2_2d


@jax.jit
def discriminator_forward(x, att, w1x, w1a, b1_2d, w2_row, b2_2d):
    """x: (B, 2048) f32, att: (B, 312) f32; packed params from prepare_params.
    Returns (B, 1) f32."""
    B = x.shape[0]
    # Only the tiny att operand is padded (312 -> 384, zeros are inert against
    # the zero-padded W1 att-part rows); x streams straight in, no (B, 2560)
    # concatenated h is ever materialized in HBM.
    att_p = jnp.pad(att, ((0, 0), (0, IN_ATT_PAD - IN_ATT)))

    if N_SPLIT == 1:
        out_shape = jax.ShapeDtypeStruct((B, OUT), jnp.float32)
        out_spec = pl.BlockSpec((B, OUT), lambda j: (0, 0))
    else:
        out_shape = jax.ShapeDtypeStruct((N_SPLIT, B, OUT), jnp.float32)
        out_spec = pl.BlockSpec((1, B, OUT), lambda j: (j, 0, 0))

    grid_spec = pltpu.PrefetchScalarGridSpec(
        num_scalar_prefetch=0,
        grid=(N_SPLIT,),
        in_specs=[
            pl.BlockSpec((B, IN_X), lambda j: (0, 0)),                # x
            pl.BlockSpec((B, IN_ATT_PAD), lambda j: (0, 0)),          # att (pad)
            pl.BlockSpec((IN_X, HID_SLICE), lambda j: (0, j)),        # W1 x-part
            pl.BlockSpec((IN_ATT_PAD, HID_SLICE), lambda j: (0, j)),  # W1 att
            pl.BlockSpec((1, HID_SLICE), lambda j: (0, j)),           # b1 slice
            pl.BlockSpec((1, HID_SLICE), lambda j: (0, j)),           # w2 row
            pl.BlockSpec((1, OUT), lambda j: (0, 0)),                 # b2
        ],
        out_specs=out_spec,
    )

    out = pl.pallas_call(
        _disc_kernel,
        out_shape=out_shape,
        grid_spec=grid_spec,
        compiler_params=pltpu.CompilerParams(
            # HID slices are truly independent -> sharded across TensorCores
            # on dual-TC parts; with N_SPLIT == 1 the single step is trivial.
            dimension_semantics=("parallel",),
            # Full-K bf16 W1 blocks (<= ~10 MiB double-buffered) fit with
            # headroom on every generation; explicit limit avoids a silent
            # scoped-VMEM failure if B is later scaled up.
            vmem_limit_bytes=32 * 1024 * 1024,
        ),
    )(x, att_p, w1x, w1a, b1_2d, w2_row, b2_2d)

    if N_SPLIT == 1:
        return out                       # b2 already added in-kernel
    return out.sum(axis=0)               # (B, 1); b2 added once on slice 0


def init_params(key):
    """Deterministic synthetic parameters matching the nn.Linear shapes."""
    k1, k2, k3, k4 = jax.random.split(key, 4)
    # stored as (in_features, out_features) = transpose of PyTorch layout
    bound1 = 1.0 / jnp.sqrt(IN_DIM)
    bound2 = 1.0 / jnp.sqrt(HID)
    w1 = jax.random.uniform(k1, (IN_DIM, HID), jnp.float32, -bound1, bound1)
    b1 = jax.random.uniform(k2, (HID,), jnp.float32, -bound1, bound1)
    w2 = jax.random.uniform(k3, (HID, OUT), jnp.float32, -bound2, bound2)
    b2 = jax.random.uniform(k4, (OUT,), jnp.float32, -bound2, bound2)
    return w1, b1, w2, b2


def reference_forward(x, att, w1, b1, w2, b2, cast_bf16=False):
    h = jnp.concatenate([x, att], axis=1)
    if cast_bf16:
        h = h.astype(jnp.bfloat16).astype(jnp.float32)
        w1 = w1.astype(jnp.bfloat16).astype(jnp.float32)
    hid = h @ w1 + b1
    hid = jnp.where(hid > 0, hid, LRELU_SLOPE * hid)
    return hid @ w2 + b2


if __name__ == "__main__":
    key = jax.random.PRNGKey(0)
    kx, katt, kp = jax.random.split(key, 3)

    B = 8   # kernel supports any B; batching amortizes the W1 stream
    x = jax.random.normal(kx, (B, IN_X), jnp.float32)
    att = jax.random.normal(katt, (B, IN_ATT), jnp.float32)
    w1, b1, w2, b2 = init_params(kp)

    # One-time weight packing (split + pad + bf16 cast) OUTSIDE the jitted fwd.
    w1x, w1a, b1_2d, w2_row, b2_2d = prepare_params(w1, b1, w2, b2)

    out = discriminator_forward(x, att, w1x, w1a, b1_2d, w2_row, b2_2d)
    out = jax.block_until_ready(out)
    assert out.shape == (B, OUT)

    # Tight check against a reference using the same bf16 inputs (f32 math).
    ref_bf16 = reference_forward(x, att, w1, b1, w2, b2, cast_bf16=True)
    assert jnp.allclose(out, ref_bf16, atol=2e-3, rtol=2e-3), (out, ref_bf16)

    # Looser check against the pure-f32 reference (bf16 streaming tolerance).
    ref_f32 = reference_forward(x, att, w1, b1, w2, b2, cast_bf16=False)
    assert jnp.allclose(out, ref_f32, atol=2e-2, rtol=2e-2), (out, ref_f32)

    print("KERNEL_OK")
</pallas_src>

<mosaic_0001>
module attributes {stable_mosaic.version = 11 : i64} {
  func.func @_disc_kernel(%arg0: i32, %arg1: memref<8x2048xf32, #tpu.memory_space<vmem>>, %arg2: memref<8x384xf32, #tpu.memory_space<vmem>>, %arg3: memref<2048x1024xbf16, #tpu.memory_space<vmem>>, %arg4: memref<384x1024xbf16, #tpu.memory_space<vmem>>, %arg5: memref<1x1024xf32, #tpu.memory_space<vmem>>, %arg6: memref<1x1024xf32, #tpu.memory_space<vmem>>, %arg7: memref<1x1xf32, #tpu.memory_space<vmem>>, %arg8: memref<8x1xf32, #tpu.memory_space<vmem>>) attributes {dimension_semantics = [#tpu.dimension_semantics<parallel>], iteration_bounds = array<i64: 1>, scalar_prefetch = 0 : i64, scratch_operands = 0 : i64, tpu.core_type = #tpu.core_type<tc>, window_params = [{pipeline_mode = #tpu.pipeline_mode<synchronous>, transform_indices = @transform_0, window_bounds = array<i64: 8, 2048>}, {pipeline_mode = #tpu.pipeline_mode<synchronous>, transform_indices = @transform_1, window_bounds = array<i64: 8, 384>}, {transform_indices = @transform_2, window_bounds = array<i64: 2048, 1024>}, {transform_indices = @transform_3, window_bounds = array<i64: 384, 1024>}, {transform_indices = @transform_4, window_bounds = array<i64: 1, 1024>}, {transform_indices = @transform_5, window_bounds = array<i64: 1, 1024>}, {pipeline_mode = #tpu.pipeline_mode<synchronous>, transform_indices = @transform_6, window_bounds = array<i64: 1, 1>}, {pipeline_mode = #tpu.pipeline_mode<synchronous>, transform_indices = @transform_7, window_bounds = array<i64: 8, 1>}]} {
    %c0 = arith.constant 0 : index
    %c0_0 = arith.constant 0 : index
    %0 = vector.load %arg1[%c0, %c0_0] : memref<8x2048xf32, #tpu.memory_space<vmem>>, vector<8x2048xf32>
    %1 = arith.truncf %0 : vector<8x2048xf32> to vector<8x2048xbf16>
    %c0_1 = arith.constant 0 : index
    %c0_2 = arith.constant 0 : index
    %2 = vector.load %arg3[%c0_1, %c0_2] : memref<2048x1024xbf16, #tpu.memory_space<vmem>>, vector<2048x1024xbf16>
    %cst = arith.constant dense<0.000000e+00> : vector<8x1024xf32>
    %3 = tpu.matmul %1, %2, %cst {dimension_numbers = #tpu.dot_dimension_numbers<[1], [0], [0], [1], [0, 0, 1, 1], [], []>} : vector<8x2048xbf16>, vector<2048x1024xbf16>, vector<8x1024xf32> -> vector<8x1024xf32>
    %c0_3 = arith.constant 0 : index
    %c0_4 = arith.constant 0 : index
    %4 = vector.load %arg2[%c0_3, %c0_4] : memref<8x384xf32, #tpu.memory_space<vmem>>, vector<8x384xf32>
    %5 = arith.truncf %4 : vector<8x384xf32> to vector<8x384xbf16>
    %c0_5 = arith.constant 0 : index
    %c0_6 = arith.constant 0 : index
    %6 = vector.load %arg4[%c0_5, %c0_6] : memref<384x1024xbf16, #tpu.memory_space<vmem>>, vector<384x1024xbf16>
    %cst_7 = arith.constant dense<0.000000e+00> : vector<8x1024xf32>
    %7 = tpu.matmul %5, %6, %cst_7 {dimension_numbers = #tpu.dot_dimension_numbers<[1], [0], [0], [1], [0, 0, 1, 1], [], []>} : vector<8x384xbf16>, vector<384x1024xbf16>, vector<8x1024xf32> -> vector<8x1024xf32>
    %8 = arith.addf %3, %7 : vector<8x1024xf32>
    %c0_8 = arith.constant 0 : index
    %c0_9 = arith.constant 0 : index
    %9 = vector.load %arg5[%c0_8, %c0_9] : memref<1x1024xf32, #tpu.memory_space<vmem>>, vector<1x1024xf32>
    %10 = vector.broadcast %9 : vector<1x1024xf32> to vector<8x1024xf32>
    %11 = arith.addf %8, %10 : vector<8x1024xf32>
    %cst_10 = arith.constant 0.000000e+00 : f32
    %12 = vector.broadcast %cst_10 : f32 to vector<8x1024xf32>
    %13 = arith.cmpf ogt, %11, %12 : vector<8x1024xf32>
    %cst_11 = arith.constant 2.000000e-01 : f32
    %14 = vector.broadcast %cst_11 : f32 to vector<8x1024xf32>
    %15 = arith.mulf %14, %11 : vector<8x1024xf32>
    %16 = arith.select %13, %11, %15 : vector<8x1024xi1>, vector<8x1024xf32>
    %c0_12 = arith.constant 0 : index
    %c0_13 = arith.constant 0 : index
    %17 = vector.load %arg6[%c0_12, %c0_13] : memref<1x1024xf32, #tpu.memory_space<vmem>>, vector<1x1024xf32>
    %18 = vector.broadcast %17 : vector<1x1024xf32> to vector<8x1024xf32>
    %19 = arith.mulf %16, %18 : vector<8x1024xf32>
    %cst_14 = arith.constant dense<0.000000e+00> : vector<8xf32>
    %20 = vector.multi_reduction <add>, %19, %cst_14 [1] : vector<8x1024xf32> to vector<8xf32>
    %21 = vector.shape_cast %20 : vector<8xf32> to vector<8x1xf32>
    %c0_i32 = arith.constant 0 : i32
    %22 = arith.cmpi eq, %arg0, %c0_i32 : i32
    %23 = arith.extui %22 : i1 to i32
    %24 = arith.sitofp %23 : i32 to f32
    %c0_15 = arith.constant 0 : index
    %c0_16 = arith.constant 0 : index
    %25 = vector.load %arg7[%c0_15, %c0_16] : memref<1x1xf32, #tpu.memory_space<vmem>>, vector<1x1xf32>
    %26 = vector.broadcast %24 : f32 to vector<1x1xf32>
    %27 = arith.mulf %25, %26 : vector<1x1xf32>
    %28 = vector.broadcast %27 : vector<1x1xf32> to vector<8x1xf32>
    %29 = arith.addf %21, %28 : vector<8x1xf32>
    %c0_17 = arith.constant 0 : index
    %c0_18 = arith.constant 0 : index
    %30 = vector.load %arg8[%c0_17, %c0_18] : memref<8x1xf32, #tpu.memory_space<vmem>>, vector<8x1xf32>
    tpu.vector_store %arg8[%c0_17, %c0_18], %29 {strides = array<i32>} : memref<8x1xf32, #tpu.memory_space<vmem>>, vector<8x1xf32>,
    return
  }
  func.func @transform_0(%arg0: i32) -> (i32, i32) {
    %c0_i32 = arith.constant 0 : i32
    %c0_i32_0 = arith.constant 0 : i32
    %c0_i32_1 = arith.constant 0 : i32
    return %c0_i32, %c0_i32_0 : i32, i32
  }
  func.func @transform_1(%arg0: i32) -> (i32, i32) {
    %c0_i32 = arith.constant 0 : i32
    %c0_i32_0 = arith.constant 0 : i32
    %c0_i32_1 = arith.constant 0 : i32
    return %c0_i32, %c0_i32_0 : i32, i32
  }
  func.func @transform_2(%arg0: i32) -> (i32, i32) {
    %c0_i32 = arith.constant 0 : i32
    %c0_i32_0 = arith.constant 0 : i32
    return %c0_i32, %arg0 : i32, i32
  }
  func.func @transform_3(%arg0: i32) -> (i32, i32) {
    %c0_i32 = arith.constant 0 : i32
    %c0_i32_0 = arith.constant 0 : i32
    return %c0_i32, %arg0 : i32, i32
  }
  func.func @transform_4(%arg0: i32) -> (i32, i32) {
    %c0_i32 = arith.constant 0 : i32
    %c0_i32_0 = arith.constant 0 : i32
    return %c0_i32, %arg0 : i32, i32
  }
  func.func @transform_5(%arg0: i32) -> (i32, i32) {
    %c0_i32 = arith.constant 0 : i32
    %c0_i32_0 = arith.constant 0 : i32
    return %c0_i32, %arg0 : i32, i32
  }
  func.func @transform_6(%arg0: i32) -> (i32, i32) {
    %c0_i32 = arith.constant 0 : i32
    %c0_i32_0 = arith.constant 0 : i32
    %c0_i32_1 = arith.constant 0 : i32
    return %c0_i32, %c0_i32_0 : i32, i32
  }
  func.func @transform_7(%arg0: i32) -> (i32, i32) {
    %c0_i32 = arith.constant 0 : i32
    %c0_i32_0 = arith.constant 0 : i32
    %c0_i32_1 = arith.constant 0 : i32
    return %c0_i32, %c0_i32_0 : i32, i32
  }
}

</mosaic_0001>

<bundles_post_ra>
// kernel: discriminator_forward.1
= control target key start
LH: loop header
LB: loop body
LE: loop exit
PB: predicated region body
PF: predicated region fallthrough
CT: control target
= control target key end

     0   :  { %s10933_s0 = inlined_call_operand.hbm [shape: f32[8,2048], index: 0, kind: input, shape index: {}]   ;;  %s10934_s1 = inlined_call_operand.vmem [shape: f32[8,384], index: 1, kind: input, shape index: {}]   ;;  %s10935_s2 = inlined_call_operand.hbm [shape: bf16[2048,1024], index: 2, kind: input, shape index: {}]   ;;  %s10936_s3 = inlined_call_operand.hbm [shape: bf16[384,1024], index: 3, kind: input, shape index: {}]   ;;  %s10937_s4 = inlined_call_operand.hbm [shape: f32[1,1024], index: 4, kind: input, shape index: {}]   ;;  %s10938_s5 = inlined_call_operand.hbm [shape: f32[1,1024], index: 5, kind: input, shape index: {}]   ;;  %s10939_s6 = inlined_call_operand.<no memory space> [shape: f32[1,1], index: 6, kind: input, shape index: {}]   ;;  %s10940_s7 = inlined_call_operand.vmem [shape: f32[8,1], index: 7, kind: output, shape index: {}]  }
   0x1   :  { %v12_v0 = vstv %s10939_s6 }
   0x2   :  { %13 = vst [vmem:[#allocation2] sm:$0x1] %v12_v0 }
   0x3   :  { %14 = vsyncpa [#allocation4], 0 }
   0x4   :  { %15 = vsyncpa [#allocation6], 0 }
   0x5   :  { %16 = vsyncpa [#allocation9], 0  ;;  %s10565_s26 = smov [#allocation5]   ;;  %s10449_s30 = scalar_lea.hbm %s10935_s2, 131072 }
   0x6   :  { %s34_s27 = sshll.u32 %s10565_s26, 4  ;;  %p10450_p0 = scmp.ne.s32.totalorder %s10935_s2, %s10449_s30  ;;  %s35_s27 = int_to_ptr.vmem [resolvable:$true] %s34_s27 }
   0x7   :  { %p10453_p1 = scmp.lt.u32.totalorder %s10449_s30, %s10935_s2 }
   0x9   :  { %p10455_p2 = pnand %p10453_p1, %p10450_p0 }
   0xb   :  { %10458 = shalt.err (!%p10455_p2)
}
   0xc   :  { %s10459_s6 = scalar_lea.vmem %s35_s27, 131072  ;;  %p10464_p4 = scmp.lt.s32.totalorder %s35_s27, %s35_s27 }
   0xd   :  { %p10460_p3 = scmp.ne.s32.totalorder %s35_s27, %s10459_s6  ;;  %p10465_p5 = scmp.lt.s32.totalorder %s10459_s6, %s10459_s6 }
   0xf   :  { %p10466_p6 = por %p10465_p5, %p10464_p4 }
  0x11   :  { %p10467_p7 = pnand %p10466_p6, %p10460_p3 }
  0x13   :  { %10470 = shalt.err (!%p10467_p7)
}
  0x14   :  { %s10566_s12 = smov 512   ;;  %s10567_s13 = smov 32  }
  0x15   :  { %40 = dma.hbm_to_vmem [thread:$0]  %s10935_s2, 131072, %s35_s27, [#allocation6], %s10566_s12, %s10566_s12, %s10567_s13  }
  0x16   :  { %s10568_s16 = smov [#allocation8]   ;;  %s10569_s18 = smov [#allocation3]  }
  0x17   :  { %s59_s17 = sshll.u32 %s10568_s16, 4  ;;  %s23_s19 = sshll.u32 %s10569_s18, 4  ;;  %s60_s17 = int_to_ptr.vmem [resolvable:$true] %s59_s17  ;;  %s24_s19 = int_to_ptr.vmem [resolvable:$true] %s23_s19 }
  0x18   :  { %s10471_s22 = scalar_lea.hbm %s10937_s4, 128 }
  0x19   :  { %p10472_p8 = scmp.ne.s32.totalorder %s10937_s4, %s10471_s22  ;;  %p10475_p9 = scmp.lt.u32.totalorder %s10471_s22, %s10937_s4 }
  0x1b   :  { %p10477_p10 = pnand %p10475_p9, %p10472_p8 }
  0x1d   :  { %10480 = shalt.err (!%p10477_p10)
}
  0x1e   :  { %s10481_s2 = scalar_lea.vmem %s60_s17, 128  ;;  %p10486_p12 = scmp.lt.s32.totalorder %s60_s17, %s60_s17 }
  0x1f   :  { %p10482_p11 = scmp.ne.s32.totalorder %s60_s17, %s10481_s2  ;;  %p10487_p13 = scmp.lt.s32.totalorder %s10481_s2, %s10481_s2 }
  0x21   :  { %p10488_p0 = por %p10487_p13, %p10486_p12 }
  0x23   :  { %p10489_p1 = pnand %p10488_p0, %p10482_p11 }
  0x25   :  { %10492 = shalt.err (!%p10489_p1)
}
  0x26   :  { %62 = dma.hbm_to_vmem [thread:$0]  %s10937_s4, 128, %s60_s17, [#allocation9]  }
  0x27   :  { %s10493_s8 = scalar_lea.hbm %s10933_s0, 2048 }
  0x28   :  { %p10494_p2 = scmp.ne.s32.totalorder %s10933_s0, %s10493_s8  ;;  %p10497_p3 = scmp.lt.u32.totalorder %s10493_s8, %s10933_s0 }
  0x2a   :  { %p10499_p4 = pnand %p10497_p3, %p10494_p2 }
  0x2c   :  { %10502 = shalt.err (!%p10499_p4)
}
  0x2d   :  { %s10503_s14 = scalar_lea.vmem %s24_s19, 2048  ;;  %p10508_p6 = scmp.lt.s32.totalorder %s24_s19, %s24_s19 }
  0x2e   :  { %p10504_p5 = scmp.ne.s32.totalorder %s24_s19, %s10503_s14  ;;  %p10509_p7 = scmp.lt.s32.totalorder %s10503_s14, %s10503_s14 }
  0x30   :  { %p10510_p8 = por %p10509_p7, %p10508_p6 }
  0x32   :  { %p10511_p9 = pnand %p10510_p8, %p10504_p5 }
  0x34   :  { %10514 = shalt.err (!%p10511_p9)
}
  0x35   :  { %26 = dma.hbm_to_vmem [thread:$0]  %s10933_s0, 2048, %s24_s19, [#allocation4]  }
  0x36   :  { %s10570_s16 = smov [#allocation7]   ;;  %s10571_s18 = smov [#allocation10]  }
  0x37   :  { %s46_s17 = sshll.u32 %s10570_s16, 4  ;;  %s69_s20 = sshll.u32 %s10571_s18, 4  ;;  %s47_s17 = int_to_ptr.vmem [resolvable:$true] %s46_s17  ;;  %s70_s20 = int_to_ptr.vmem [resolvable:$true] %s69_s20 }
  0x38   :  { %s10515_s23 = scalar_lea.hbm %s10936_s3, 24576 }
  0x39   :  { %p10516_p10 = scmp.ne.s32.totalorder %s10936_s3, %s10515_s23  ;;  %p10519_p11 = scmp.lt.u32.totalorder %s10515_s23, %s10936_s3 }
  0x3b   :  { %p10521_p12 = pnand %p10519_p11, %p10516_p10 }
  0x3d   :  { %10524 = shalt.err (!%p10521_p12)
}
  0x3e   :  { %s10525_s0 = scalar_lea.vmem %s47_s17, 24576  ;;  %p10530_p0 = scmp.lt.s32.totalorder %s47_s17, %s47_s17 }
  0x3f   :  { %p10526_p13 = scmp.ne.s32.totalorder %s47_s17, %s10525_s0  ;;  %p10531_p1 = scmp.lt.s32.totalorder %s10525_s0, %s10525_s0 }
  0x41   :  { %p10532_p2 = por %p10531_p1, %p10530_p0 }
  0x43   :  { %p10533_p3 = pnand %p10532_p2, %p10526_p13 }
  0x45   :  { %10536 = shalt.err (!%p10533_p3)
}
  0x46   :  { %52 = dma.hbm_to_vmem [thread:$0]  %s10936_s3, 24576, %s47_s17, [#allocation6], %s10566_s12, %s10566_s12, %s10567_s13  }
  0x47   :  { %s10537_s30 = scalar_lea.hbm %s10938_s5, 128 }
  0x48   :  { %p10538_p4 = scmp.ne.s32.totalorder %s10938_s5, %s10537_s30  ;;  %p10541_p5 = scmp.lt.u32.totalorder %s10537_s30, %s10938_s5 }
  0x4a   :  { %p10543_p6 = pnand %p10541_p5, %p10538_p4 }
  0x4c   :  { %10546 = shalt.err (!%p10543_p6)
}
  0x4d   :  { %s10547_s6 = scalar_lea.vmem %s70_s20, 128  ;;  %p10552_p8 = scmp.lt.s32.totalorder %s70_s20, %s70_s20 }
  0x4e   :  { %p10548_p7 = scmp.ne.s32.totalorder %s70_s20, %s10547_s6  ;;  %p10553_p9 = scmp.lt.s32.totalorder %s10547_s6, %s10547_s6 }
  0x50   :  { %p10554_p10 = por %p10553_p9, %p10552_p8 }
  0x52   :  { %p10555_p11 = pnand %p10554_p10, %p10548_p7 }
  0x54   :  { %10558 = shalt.err (!%p10555_p11)
}
  0x55   :  { %72 = dma.hbm_to_vmem [thread:$0]  %s10938_s5, 128, %s70_s20, [#allocation9]  }
  0x56   :  { %10559 = dma.done.wait [#allocation4], 2048  }
  0x57   :  { %10560 = vsyncadd [#allocation4], 4294965248 }
  0x58   :  { %10561 = dma.done.wait [#allocation6], 155648  }
  0x59   :  { %10562 = vsyncadd [#allocation6], 4294811648 }
  0x5a   :  { %10563 = dma.done.wait [#allocation9], 256  }
  0x5b   :  { %10564 = vsyncadd [#allocation9], 4294967040  ;;  %v10572_v1 = vmov 0   ;;  %v1153_v2 = vld [vmem:[#allocation7] sm:$0xff]  ;;  %vm9211_vm8 = vcmask 7168  }
  0x5c   :  { %2378 = vmatprep.mubr.bf16.mxu1 %v10572_v1  ;;  %v1157_v3 = vld [vmem:[#allocation7 + $0x20] sm:$0xff] }
  0x5d   :  { %v1281_v4 = vld [vmem:[#allocation7 + $0x400] sm:$0xff]  ;;  %v9221_v5 = vcombine.high %v1153_v2, %v1157_v3  ;;  %v9220_v7 = vcombine.low %v1153_v2, %v1157_v3 }
  0x5e   :  { %v1285_v6 = vld [vmem:[#allocation7 + $0x420] sm:$0xff] }
  0x5f   :  { %v1161_v8 = vld [vmem:[#allocation7 + $0x40] sm:$0xff]  ;;  %v9349_v10 = vcombine.high %v1281_v4, %v1285_v6  ;;  %v9348_v11 = vcombine.low %v1281_v4, %v1285_v6  ;;  %2305 = vmatprep.subr.bf16.mxu0 %v9221_v5  ;;  %v1154_v5 = vld [vmem:[#allocation7 + $0x8] sm:$0xff] }
  0x60   :  { %v1165_v9 = vld [vmem:[#allocation7 + $0x60] sm:$0xff]  ;;  %2306 = vmatpush1.bf16.msra.mxu0 %v9220_v7  ;;  %v1158_v6 = vld [vmem:[#allocation7 + $0x28] sm:$0xff] }
  0x61   :  { %v9229_v12 = vcombine.high %v1161_v8, %v1165_v9  ;;  %v1289_v13 = vld [vmem:[#allocation7 + $0x440] sm:$0xff]  ;;  %2346 = vmatprep.subr.bf16.mxu1 %v9349_v10  ;;  %v9228_v20 = vcombine.low %v1161_v8, %v1165_v9  ;;  %v1149_v10 = vld [vmem:[%s10934_s1 + $0x10] sm:$0xff] }
  0x62   :  { %v1293_v14 = vld [vmem:[#allocation7 + $0x460] sm:$0xff]  ;;  %2347 = vmatpush1.bf16.msra.mxu1 %v9348_v11  ;;  %v9223_v11 = vcombine.high %v1154_v5, %v1158_v6 }
  0x63   :  { %v1169_v15 = vld [vmem:[#allocation7 + $0x80] sm:$0xff]  ;;  %v9357_v16 = vcombine.high %v1289_v13, %v1293_v14  ;;  %2307 = vmatprep.subr.bf16.mxu0 %v9229_v12  ;;  %v9356_v21 = vcombine.low %v1289_v13, %v1293_v14  ;;  %v1162_v14 = vld [vmem:[#allocation7 + $0x48] sm:$0xff] }
  0x64   :  { %v1173_v17 = vld [vmem:[#allocation7 + $0xa0] sm:$0xff]  ;;  %2308 = vmatpush1.bf16.msra.mxu0 %v9228_v20 }
  0x65   :  { %v1297_v18 = vld [vmem:[#allocation7 + $0x480] sm:$0xff]  ;;  %v9237_v22 = vcombine.high %v1169_v15, %v1173_v17  ;;  %2348 = vmatprep.subr.bf16.mxu1 %v9357_v16  ;;  %v9236_v28 = vcombine.low %v1169_v15, %v1173_v17  ;;  %v1166_v15 = vld [vmem:[#allocation7 + $0x68] sm:$0xff]  ;;  %v10692_v16 = vpack.c.bf16 %v1149_v10, %v1149_v10 }
  0x66   :  { %v1301_v19 = vld [vmem:[#allocation7 + $0x4a0] sm:$0xff]  ;;  %2349 = vmatpush1.bf16.msra.mxu1 %v9356_v21  ;;  %v9231_v20 = vcombine.high %v1162_v14, %v1166_v15  ;;  %v1222_v10 = vld [vmem:[#allocation7 + $0x228] sm:$0xff] }
  0x67   :  { %v9365_v23 = vcombine.high %v1297_v18, %v1301_v19  ;;  %v1177_v24 = vld [vmem:[#allocation7 + $0xc0] sm:$0xff]  ;;  %2309 = vmatprep.subr.bf16.mxu0 %v9237_v22  ;;  %v9364_v29 = vcombine.low %v1297_v18, %v1301_v19  ;;  %v9222_v18 = vcombine.low %v1154_v5, %v1158_v6 }
  0x68   :  { %v1181_v25 = vld [vmem:[#allocation7 + $0xe0] sm:$0xff]  ;;  %2310 = vmatpush1.bf16.msra.mxu0 %v9236_v28 }
  0x69   :  { %v1305_v26 = vld [vmem:[#allocation7 + $0x4c0] sm:$0xff]  ;;  %v9245_v30 = vcombine.high %v1177_v24, %v1181_v25  ;;  %2350 = vmatprep.subr.bf16.mxu1 %v9365_v23  ;;  %v9244_v36 = vcombine.low %v1177_v24, %v1181_v25  ;;  %v1170_v23 = vld [vmem:[#allocation7 + $0x88] sm:$0xff] }
  0x6a   :  { %v1309_v27 = vld [vmem:[#allocation7 + $0x4e0] sm:$0xff]  ;;  %2351 = vmatpush1.bf16.msra.mxu1 %v9364_v29  ;;  %v1174_v24 = vld [vmem:[#allocation7 + $0xa8] sm:$0xff] }
  0x6b   :  { %v9373_v31 = vcombine.high %v1305_v26, %v1309_v27  ;;  %v1185_v32 = vld [vmem:[#allocation7 + $0x100] sm:$0xff]  ;;  %2311 = vmatprep.subr.bf16.mxu0 %v9245_v30  ;;  %v9372_v37 = vcombine.low %v1305_v26, %v1309_v27  ;;  %v9230_v26 = vcombine.low %v1162_v14, %v1166_v15  ;;  %v9239_v28 = vcombine.high %v1170_v23, %v1174_v24 }
  0x6c   :  { %v1189_v33 = vld [vmem:[#allocation7 + $0x120] sm:$0xff]  ;;  %2312 = vmatpush1.bf16.msra.mxu0 %v9244_v36 }
  0x6d   :  { %v1313_v34 = vld [vmem:[#allocation7 + $0x500] sm:$0xff]  ;;  %v9253_v38 = vcombine.high %v1185_v32, %v1189_v33  ;;  %2352 = vmatprep.subr.bf16.mxu1 %v9373_v31  ;;  %v9252_v44 = vcombine.low %v1185_v32, %v1189_v33  ;;  %v1178_v31 = vld [vmem:[#allocation7 + $0xc8] sm:$0xff] }
  0x6e   :  { %v1317_v35 = vld [vmem:[#allocation7 + $0x520] sm:$0xff]  ;;  %2353 = vmatpush1.bf16.msra.mxu1 %v9372_v37  ;;  %v1182_v32 = vld [vmem:[#allocation7 + $0xe8] sm:$0xff] }
  0x6f   :  { %v9381_v39 = vcombine.high %v1313_v34, %v1317_v35  ;;  %v1193_v40 = vld [vmem:[#allocation7 + $0x140] sm:$0xff]  ;;  %2313 = vmatprep.subr.bf16.mxu0 %v9253_v38  ;;  %v9380_v45 = vcombine.low %v1313_v34, %v1317_v35  ;;  %v9238_v34 = vcombine.low %v1170_v23, %v1174_v24  ;;  %v9247_v36 = vcombine.high %v1178_v31, %v1182_v32 }
  0x70   :  { %v1197_v41 = vld [vmem:[#allocation7 + $0x160] sm:$0xff]  ;;  %2314 = vmatpush1.bf16.msra.mxu0 %v9252_v44 }
  0x71   :  { %v1321_v42 = vld [vmem:[#allocation7 + $0x540] sm:$0xff]  ;;  %v9261_v46 = vcombine.high %v1193_v40, %v1197_v41  ;;  %2354 = vmatprep.subr.bf16.mxu1 %v9381_v39  ;;  %v9260_v52 = vcombine.low %v1193_v40, %v1197_v41  ;;  %v1186_v39 = vld [vmem:[#allocation7 + $0x108] sm:$0xff] }
  0x72   :  { %v1325_v43 = vld [vmem:[#allocation7 + $0x560] sm:$0xff]  ;;  %2355 = vmatpush1.bf16.msra.mxu1 %v9380_v45  ;;  %v1190_v40 = vld [vmem:[#allocation7 + $0x128] sm:$0xff] }
  0x73   :  { %v9389_v47 = vcombine.high %v1321_v42, %v1325_v43  ;;  %v1201_v48 = vld [vmem:[#allocation7 + $0x180] sm:$0xff]  ;;  %2315 = vmatprep.subr.bf16.mxu0 %v9261_v46  ;;  %v9388_v53 = vcombine.low %v1321_v42, %v1325_v43  ;;  %v9246_v42 = vcombine.low %v1178_v31, %v1182_v32  ;;  %v9255_v44 = vcombine.high %v1186_v39, %v1190_v40 }
  0x74   :  { %v1205_v49 = vld [vmem:[#allocation7 + $0x1a0] sm:$0xff]  ;;  %2316 = vmatpush1.bf16.msra.mxu0 %v9260_v52 }
  0x75   :  { %v1329_v50 = vld [vmem:[#allocation7 + $0x580] sm:$0xff]  ;;  %v9269_v54 = vcombine.high %v1201_v48, %v1205_v49  ;;  %2356 = vmatprep.subr.bf16.mxu1 %v9389_v47  ;;  %v9268_v62 = vcombine.low %v1201_v48, %v1205_v49  ;;  %v1194_v47 = vld [vmem:[#allocation7 + $0x148] sm:$0xff] }
  0x76   :  { %v1333_v51 = vld [vmem:[#allocation7 + $0x5a0] sm:$0xff]  ;;  %2357 = vmatpush1.bf16.msra.mxu1 %v9388_v53  ;;  %v1198_v48 = vld [vmem:[#allocation7 + $0x168] sm:$0xff] }
  0x77   :  { %v1148_v55 = vld [vmem:[%s10934_s1 + $0x8] sm:$0xff]  ;;  %v9397_v56 = vcombine.high %v1329_v50, %v1333_v51  ;;  %2317 = vmatprep.subr.bf16.mxu0 %v9269_v54  ;;  %v9396_v63 = vcombine.low %v1329_v50, %v1333_v51  ;;  %v9254_v50 = vcombine.low %v1186_v39, %v1190_v40  ;;  %v9263_v52 = vcombine.high %v1194_v47, %v1198_v48 }
  0x78   :  { %v1209_v57 = vld [vmem:[#allocation7 + $0x1c0] sm:$0xff]  ;;  %v10686_v59 = vpack.c.bf16 %v1148_v55, %v1148_v55  ;;  %2318 = vmatpush1.bf16.msra.mxu0 %v9268_v62  ;;  %v1202_v55 = vld [vmem:[#allocation7 + $0x188] sm:$0xff] }
  0x79   :  { %v1213_v58 = vld [vmem:[#allocation7 + $0x1e0] sm:$0xff]  ;;  %2358 = vmatprep.subr.bf16.mxu1 %v9397_v56  ;;  %v1206_v56 = vld [vmem:[#allocation7 + $0x1a8] sm:$0xff] }
  0x7a   :  { %v1337_v60 = vld [vmem:[#allocation7 + $0x5c0] sm:$0xff]  ;;  %2337 = vmatprep.mubr.bf16.mxu0 %v10686_v59  ;;  %v9277_v0 = vcombine.high %v1209_v57, %v1213_v58  ;;  %v9276_v7 = vcombine.low %v1209_v57, %v1213_v58  ;;  %2359 = vmatpush1.bf16.msra.mxu1 %v9396_v63  ;;  %v9262_v58 = vcombine.low %v1194_v47, %v1198_v48 }
  0x7b   :  { %v1341_v61 = vld [vmem:[#allocation7 + $0x5e0] sm:$0xff] }
  0x7c   :  { %v9405_v2 = vcombine.high %v1337_v60, %v1341_v61  ;;  %v1217_v3 = vld [vmem:[#allocation7 + $0x200] sm:$0xff]  ;;  %2319 = vmatprep.subr.bf16.mxu0 %v9277_v0  ;;  %v9404_v8 = vcombine.low %v1337_v60, %v1341_v61  ;;  %v9271_v61 = vcombine.high %v1202_v55, %v1206_v56  ;;  %v1210_v0 = vld [vmem:[#allocation7 + $0x1c8] sm:$0xff] }
  0x7d   :  { %v1221_v4 = vld [vmem:[#allocation7 + $0x220] sm:$0xff]  ;;  %2320 = vmatpush1.bf16.msra.mxu0 %v9276_v7  ;;  %v1282_v7 = vld [vmem:[#allocation7 + $0x408] sm:$0xff] }
  0x7e   :  { %v9285_v9 = vcombine.high %v1217_v3, %v1221_v4  ;;  %2360 = vmatprep.subr.bf16.mxu1 %v9405_v2  ;;  %v1225_v12 = vld [vmem:[#allocation7 + $0x240] sm:$0xff]  ;;  %v9284_v17 = vcombine.low %v1217_v3, %v1221_v4  ;;  %v1214_v2 = vld [vmem:[#allocation7 + $0x1e8] sm:$0xff]  ;;  %v9270_v4 = vcombine.low %v1202_v55, %v1206_v56 }
  0x7f   :  { %v1229_v13 = vld [vmem:[#allocation7 + $0x260] sm:$0xff]  ;;  %2361 = vmatpush1.bf16.msra.mxu1 %v9404_v8  ;;  %v9279_v6 = vcombine.high %v1210_v0, %v1214_v2  ;;  %v1286_v8 = vld [vmem:[#allocation7 + $0x428] sm:$0xff] }
  0x80   :  { %2321 = vmatprep.subr.bf16.mxu0 %v9285_v9  ;;  %v9293_v19 = vcombine.high %v1225_v12, %v1229_v13  ;;  %2387 = vmatprep.subr.bf16.mxu1 %v9223_v11  ;;  %v1233_v21 = vld [vmem:[#allocation7 + $0x280] sm:$0xff]  ;;  %v9292_v25 = vcombine.low %v1225_v12, %v1229_v13  ;;  %v1218_v9 = vld [vmem:[#allocation7 + $0x208] sm:$0xff]  ;;  %v9278_v13 = vcombine.low %v1210_v0, %v1214_v2 }
  0x81   :  { %v1237_v22 = vld [vmem:[#allocation7 + $0x2a0] sm:$0xff]  ;;  %2322 = vmatpush1.bf16.msra.mxu0 %v9284_v17  ;;  %v9351_v14 = vcombine.high %v1282_v7, %v1286_v8  ;;  %v9287_v15 = vcombine.high %v1218_v9, %v1222_v10  ;;  %v1290_v17 = vld [vmem:[#allocation7 + $0x448] sm:$0xff]  ;;  %v9286_v23 = vcombine.low %v1218_v9, %v1222_v10 }
  0x82   :  { %2379 = vmatmul.mubr.bf16.vlgmr.msra.gmra.mrb[0].mxu1 %v10692_v16  ;;  %2323 = vmatprep.subr.bf16.mxu0 %v9293_v19  ;;  %v9301_v27 = vcombine.high %v1233_v21, %v1237_v22  ;;  %v1241_v29 = vld [vmem:[#allocation7 + $0x2c0] sm:$0xff]  ;;  %v9300_v33 = vcombine.low %v1233_v21, %v1237_v22  ;;  %v1230_v21 = vld [vmem:[#allocation7 + $0x268] sm:$0xff]  ;;  %v9350_v22 = vcombine.low %v1282_v7, %v1286_v8 }
  0x83   :  { %2388 = vmatpush1.bf16.msra.mxu1 %v9222_v18  ;;  %v1245_v30 = vld [vmem:[#allocation7 + $0x2e0] sm:$0xff]  ;;  %2419 = vmatprep.mubr.bf16.mxu1 %v10686_v59  ;;  %v1294_v18 = vld [vmem:[#allocation7 + $0x468] sm:$0xff] }
  0x84   :  { %2389 = vmatprep.subr.bf16.mxu1 %v9231_v20  ;;  %v9309_v35 = vcombine.high %v1241_v29, %v1245_v30  ;;  %v1249_v37 = vld [vmem:[#allocation7 + $0x300] sm:$0xff]  ;;  %v9308_v41 = vcombine.low %v1241_v29, %v1245_v30  ;;  %v1226_v20 = vld [vmem:[#allocation7 + $0x248] sm:$0xff]  ;;  %v9359_v24 = vcombine.high %v1290_v17, %v1294_v18  ;;  %v9358_v30 = vcombine.low %v1290_v17, %v1294_v18 }
  0x85   :  { %2324 = vmatpush1.bf16.msra.mxu0 %v9292_v25  ;;  %v1253_v38 = vld [vmem:[#allocation7 + $0x320] sm:$0xff]  ;;  %v9295_v25 = vcombine.high %v1226_v20, %v1230_v21  ;;  %v1238_v29 = vld [vmem:[#allocation7 + $0x2a8] sm:$0xff]  ;;  %v9294_v31 = vcombine.low %v1226_v20, %v1230_v21 }
  0x86   :  { %2325 = vmatprep.subr.bf16.mxu0 %v9301_v27  ;;  %v9317_v43 = vcombine.high %v1249_v37, %v1253_v38  ;;  %v1257_v45 = vld [vmem:[#allocation7 + $0x340] sm:$0xff]  ;;  %v9316_v49 = vcombine.low %v1249_v37, %v1253_v38  ;;  %v1302_v27 = vld [vmem:[#allocation7 + $0x4a8] sm:$0xff] }
  0x87   :  { %2390 = vmatpush1.bf16.msra.mxu1 %v9230_v26  ;;  %v1261_v46 = vld [vmem:[#allocation7 + $0x360] sm:$0xff]  ;;  %v1298_v26 = vld [vmem:[#allocation7 + $0x488] sm:$0xff] }
  0x88   :  { %2391 = vmatprep.subr.bf16.mxu1 %v9239_v28  ;;  %v9325_v51 = vcombine.high %v1257_v45, %v1261_v46  ;;  %v1265_v53 = vld [vmem:[#allocation7 + $0x380] sm:$0xff]  ;;  %v9324_v57 = vcombine.low %v1257_v45, %v1261_v46  ;;  %v1234_v28 = vld [vmem:[#allocation7 + $0x288] sm:$0xff]  ;;  %v9367_v32 = vcombine.high %v1298_v26, %v1302_v27  ;;  %v9366_v38 = vcombine.low %v1298_v26, %v1302_v27 }
  0x89   :  { %2326 = vmatpush1.bf16.msra.mxu0 %v9300_v33  ;;  %v1269_v54 = vld [vmem:[#allocation7 + $0x3a0] sm:$0xff]  ;;  %v9303_v33 = vcombine.high %v1234_v28, %v1238_v29  ;;  %v1246_v37 = vld [vmem:[#allocation7 + $0x2e8] sm:$0xff]  ;;  %v9302_v39 = vcombine.low %v1234_v28, %v1238_v29 }
  0x8a   :  { %2327 = vmatprep.subr.bf16.mxu0 %v9309_v35  ;;  %v9333_v60 = vcombine.high %v1265_v53, %v1269_v54  ;;  %v1273_v62 = vld [vmem:[#allocation7 + $0x3c0] sm:$0xff]  ;;  %v9332_v3 = vcombine.low %v1265_v53, %v1269_v54  ;;  %v1310_v35 = vld [vmem:[#allocation7 + $0x4e8] sm:$0xff] }
  0x8b   :  { %2392 = vmatpush1.bf16.msra.mxu1 %v9238_v34  ;;  %v1277_v63 = vld [vmem:[#allocation7 + $0x3e0] sm:$0xff]  ;;  %v1306_v34 = vld [vmem:[#allocation7 + $0x4c8] sm:$0xff] }
  0x8c   :  { %2393 = vmatprep.subr.bf16.mxu1 %v9247_v36  ;;  %v9341_v5 = vcombine.high %v1273_v62, %v1277_v63  ;;  %v9340_v11 = vcombine.low %v1273_v62, %v1277_v63  ;;  %v1147_v12 = vld [vmem:[%s10934_s1] sm:$0xff]  ;;  %v1242_v36 = vld [vmem:[#allocation7 + $0x2c8] sm:$0xff]  ;;  %v9375_v40 = vcombine.high %v1306_v34, %v1310_v35  ;;  %v9374_v46 = vcombine.low %v1306_v34, %v1310_v35 }
  0x8d   :  { %2328 = vmatpush1.bf16.msra.mxu0 %v9308_v41  ;;  %v10699_v19 = vpack.c.bf16 %v1147_v12, %v1147_v12  ;;  %v9311_v41 = vcombine.high %v1242_v36, %v1246_v37  ;;  %v1254_v45 = vld [vmem:[#allocation7 + $0x328] sm:$0xff]  ;;  %v9310_v47 = vcombine.low %v1242_v36, %v1246_v37  ;;  %v1155_v12 = vld [vmem:[#allocation7 + $0x10] sm:$0xff] }
  0x8e   :  { %2329 = vmatprep.subr.bf16.mxu0 %v9317_v43  ;;  %v1318_v43 = vld [vmem:[#allocation7 + $0x528] sm:$0xff] }
  0x8f   :  { %2394 = vmatpush1.bf16.msra.mxu1 %v9246_v42  ;;  %v1314_v42 = vld [vmem:[#allocation7 + $0x508] sm:$0xff] }
  0x90   :  { %2395 = vmatprep.subr.bf16.mxu1 %v9255_v44  ;;  %v1250_v44 = vld [vmem:[#allocation7 + $0x308] sm:$0xff]  ;;  %v9383_v48 = vcombine.high %v1314_v42, %v1318_v43  ;;  %v9382_v54 = vcombine.low %v1314_v42, %v1318_v43 }
  0x91   :  { %2330 = vmatpush1.bf16.msra.mxu0 %v9316_v49  ;;  %v9319_v49 = vcombine.high %v1250_v44, %v1254_v45  ;;  %v1262_v53 = vld [vmem:[#allocation7 + $0x368] sm:$0xff]  ;;  %v9318_v55 = vcombine.low %v1250_v44, %v1254_v45 }
  0x92   :  { %2331 = vmatprep.subr.bf16.mxu0 %v9325_v51  ;;  %v1326_v51 = vld [vmem:[#allocation7 + $0x568] sm:$0xff] }
  0x93   :  { %2396 = vmatpush1.bf16.msra.mxu1 %v9254_v50  ;;  %v1322_v50 = vld [vmem:[#allocation7 + $0x548] sm:$0xff] }
  0x94   :  { %2397 = vmatprep.subr.bf16.mxu1 %v9263_v52  ;;  %v1258_v52 = vld [vmem:[#allocation7 + $0x348] sm:$0xff]  ;;  %v9391_v56 = vcombine.high %v1322_v50, %v1326_v51  ;;  %v9390_v63 = vcombine.low %v1322_v50, %v1326_v51 }
  0x95   :  { %2332 = vmatpush1.bf16.msra.mxu0 %v9324_v57  ;;  %v9327_v57 = vcombine.high %v1258_v52, %v1262_v53  ;;  %v1270_v62 = vld [vmem:[#allocation7 + $0x3a8] sm:$0xff]  ;;  %v9326_v0 = vcombine.low %v1258_v52, %v1262_v53 }
  0x96   :  { %2333 = vmatprep.subr.bf16.mxu0 %v9333_v60  ;;  %v1334_v60 = vld [vmem:[#allocation7 + $0x5a8] sm:$0xff] }
  0x97   :  { %2398 = vmatpush1.bf16.msra.mxu1 %v9262_v58  ;;  %v1330_v58 = vld [vmem:[#allocation7 + $0x588] sm:$0xff] }
  0x98   :  { %2399 = vmatprep.subr.bf16.mxu1 %v9271_v61  ;;  %v1266_v61 = vld [vmem:[#allocation7 + $0x388] sm:$0xff]  ;;  %v9399_v2 = vcombine.high %v1330_v58, %v1334_v60  ;;  %v9398_v8 = vcombine.low %v1330_v58, %v1334_v60 }
  0x99   :  { %2334 = vmatpush1.bf16.msra.mxu0 %v9332_v3  ;;  %v9335_v3 = vcombine.high %v1266_v61, %v1270_v62  ;;  %v1278_v7 = vld [vmem:[#allocation7 + $0x3e8] sm:$0xff]  ;;  %v9334_v9 = vcombine.low %v1266_v61, %v1270_v62 }
  0x9a   :  { %2335 = vmatprep.subr.bf16.mxu0 %v9341_v5  ;;  %v1342_v5 = vld [vmem:[#allocation7 + $0x5e8] sm:$0xff] }
  0x9b   :  { %2400 = vmatpush1.bf16.msra.mxu1 %v9270_v4  ;;  %v1338_v4 = vld [vmem:[#allocation7 + $0x5c8] sm:$0xff] }
  0x9c   :  { %2401 = vmatprep.subr.bf16.mxu1 %v9279_v6  ;;  %v1274_v6 = vld [vmem:[#allocation7 + $0x3c8] sm:$0xff]  ;;  %v9407_v10 = vcombine.high %v1338_v4, %v1342_v5  ;;  %v9406_v17 = vcombine.low %v1338_v4, %v1342_v5 }
  0x9d   :  { %2336 = vmatpush1.bf16.msra.mxu0 %v9340_v11  ;;  %v9343_v11 = vcombine.high %v1274_v6, %v1278_v7  ;;  %v9342_v18 = vcombine.low %v1274_v6, %v1278_v7 }
  0x9e   :  { %2428 = vmatprep.subr.bf16.mxu0 %v9351_v14  ;;  %v1283_v14 = vld [vmem:[#allocation7 + $0x410] sm:$0xff] }
  0x9f   :  { %2402 = vmatpush1.bf16.msra.mxu1 %v9278_v13  ;;  %v1159_v13 = vld [vmem:[#allocation7 + $0x30] sm:$0xff] }
  0xa0   :  { %2403 = vmatprep.subr.bf16.mxu1 %v9287_v15  ;;  %2338 = vmatmul.mubr.bf16.vlgmr.msra.gmra.mrb[0].mxu0 %v10699_v19  ;;  %v1287_v15 = vld [vmem:[#allocation7 + $0x430] sm:$0xff]  ;;  %v9225_v20 = vcombine.high %v1155_v12, %v1159_v13  ;;  %v9224_v26 = vcombine.low %v1155_v12, %v1159_v13 }
  0xa1   :  { %2429 = vmatpush1.bf16.msra.mxu0 %v9350_v22  ;;  %2460 = vmatprep.mubr.bf16.mxu0 %v10572_v1  ;;  %v9353_v21 = vcombine.high %v1283_v14, %v1287_v15  ;;  %v1163_v22 = vld [vmem:[#allocation7 + $0x50] sm:$0xff]  ;;  %v9352_v27 = vcombine.low %v1283_v14, %v1287_v15 }
  0xa2   :  { %2430 = vmatprep.subr.bf16.mxu0 %v9359_v24  ;;  %v1291_v24 = vld [vmem:[#allocation7 + $0x450] sm:$0xff] }
  0xa3   :  { %2404 = vmatpush1.bf16.msra.mxu1 %v9286_v23  ;;  %v1167_v23 = vld [vmem:[#allocation7 + $0x70] sm:$0xff] }
  0xa4   :  { %2405 = vmatprep.subr.bf16.mxu1 %v9295_v25  ;;  %v1295_v25 = vld [vmem:[#allocation7 + $0x470] sm:$0xff]  ;;  %v9233_v28 = vcombine.high %v1163_v22, %v1167_v23  ;;  %v9232_v34 = vcombine.low %v1163_v22, %v1167_v23 }
  0xa5   :  { %2431 = vmatpush1.bf16.msra.mxu0 %v9358_v30  ;;  %v9361_v29 = vcombine.high %v1291_v24, %v1295_v25  ;;  %v1171_v30 = vld [vmem:[#allocation7 + $0x90] sm:$0xff]  ;;  %v9360_v35 = vcombine.low %v1291_v24, %v1295_v25 }
  0xa6   :  { %2432 = vmatprep.subr.bf16.mxu0 %v9367_v32  ;;  %v1299_v32 = vld [vmem:[#allocation7 + $0x490] sm:$0xff] }
  0xa7   :  { %2406 = vmatpush1.bf16.msra.mxu1 %v9294_v31  ;;  %v1175_v31 = vld [vmem:[#allocation7 + $0xb0] sm:$0xff] }
  0xa8   :  { %2407 = vmatprep.subr.bf16.mxu1 %v9303_v33  ;;  %v1303_v33 = vld [vmem:[#allocation7 + $0x4b0] sm:$0xff]  ;;  %v9241_v36 = vcombine.high %v1171_v30, %v1175_v31  ;;  %v9240_v42 = vcombine.low %v1171_v30, %v1175_v31 }
  0xa9   :  { %2433 = vmatpush1.bf16.msra.mxu0 %v9366_v38  ;;  %v9369_v37 = vcombine.high %v1299_v32, %v1303_v33  ;;  %v1179_v38 = vld [vmem:[#allocation7 + $0xd0] sm:$0xff]  ;;  %v9368_v43 = vcombine.low %v1299_v32, %v1303_v33 }
  0xaa   :  { %2434 = vmatprep.subr.bf16.mxu0 %v9375_v40  ;;  %v1307_v40 = vld [vmem:[#allocation7 + $0x4d0] sm:$0xff] }
  0xab   :  { %2408 = vmatpush1.bf16.msra.mxu1 %v9302_v39  ;;  %v1183_v39 = vld [vmem:[#allocation7 + $0xf0] sm:$0xff] }
  0xac   :  { %2409 = vmatprep.subr.bf16.mxu1 %v9311_v41  ;;  %v1311_v41 = vld [vmem:[#allocation7 + $0x4f0] sm:$0xff]  ;;  %v9249_v44 = vcombine.high %v1179_v38, %v1183_v39  ;;  %v9248_v50 = vcombine.low %v1179_v38, %v1183_v39 }
  0xad   :  { %2435 = vmatpush1.bf16.msra.mxu0 %v9374_v46  ;;  %v9377_v45 = vcombine.high %v1307_v40, %v1311_v41  ;;  %v1187_v46 = vld [vmem:[#allocation7 + $0x110] sm:$0xff]  ;;  %v9376_v51 = vcombine.low %v1307_v40, %v1311_v41 }
  0xae   :  { %2436 = vmatprep.subr.bf16.mxu0 %v9383_v48  ;;  %v1315_v48 = vld [vmem:[#allocation7 + $0x510] sm:$0xff] }
  0xaf   :  { %2410 = vmatpush1.bf16.msra.mxu1 %v9310_v47  ;;  %v1191_v47 = vld [vmem:[#allocation7 + $0x130] sm:$0xff] }
  0xb0   :  { %2411 = vmatprep.subr.bf16.mxu1 %v9319_v49  ;;  %v1319_v49 = vld [vmem:[#allocation7 + $0x530] sm:$0xff]  ;;  %v9257_v52 = vcombine.high %v1187_v46, %v1191_v47  ;;  %v9256_v58 = vcombine.low %v1187_v46, %v1191_v47 }
  0xb1   :  { %2437 = vmatpush1.bf16.msra.mxu0 %v9382_v54  ;;  %v9385_v53 = vcombine.high %v1315_v48, %v1319_v49  ;;  %v1195_v54 = vld [vmem:[#allocation7 + $0x150] sm:$0xff]  ;;  %v9384_v60 = vcombine.low %v1315_v48, %v1319_v49 }
  0xb2   :  { %2438 = vmatprep.subr.bf16.mxu0 %v9391_v56  ;;  %v1323_v56 = vld [vmem:[#allocation7 + $0x550] sm:$0xff] }
  0xb3   :  { %2412 = vmatpush1.bf16.msra.mxu1 %v9318_v55  ;;  %v1199_v55 = vld [vmem:[#allocation7 + $0x170] sm:$0xff] }
  0xb4   :  { %2413 = vmatprep.subr.bf16.mxu1 %v9327_v57  ;;  %v1327_v57 = vld [vmem:[#allocation7 + $0x570] sm:$0xff]  ;;  %v9265_v61 = vcombine.high %v1195_v54, %v1199_v55  ;;  %v9264_v4 = vcombine.low %v1195_v54, %v1199_v55 }
  0xb5   :  { %2439 = vmatpush1.bf16.msra.mxu0 %v9390_v63  ;;  %v9393_v62 = vcombine.high %v1323_v56, %v1327_v57  ;;  %v1203_v63 = vld [vmem:[#allocation7 + $0x190] sm:$0xff]  ;;  %v9392_v5 = vcombine.low %v1323_v56, %v1327_v57 }
  0xb6   :  { %2440 = vmatprep.subr.bf16.mxu0 %v9399_v2  ;;  %v1331_v2 = vld [vmem:[#allocation7 + $0x590] sm:$0xff] }
  0xb7   :  { %2414 = vmatpush1.bf16.msra.mxu1 %v9326_v0  ;;  %v1207_v0 = vld [vmem:[#allocation7 + $0x1b0] sm:$0xff] }
  0xb8   :  { %2415 = vmatprep.subr.bf16.mxu1 %v9335_v3  ;;  %v1335_v3 = vld [vmem:[#allocation7 + $0x5b0] sm:$0xff]  ;;  %v9273_v6 = vcombine.high %v1203_v63, %v1207_v0  ;;  %v9272_v12 = vcombine.low %v1203_v63, %v1207_v0 }
  0xb9   :  { %2441 = vmatpush1.bf16.msra.mxu0 %v9398_v8  ;;  %v9401_v7 = vcombine.high %v1331_v2, %v1335_v3  ;;  %v1211_v8 = vld [vmem:[#allocation7 + $0x1d0] sm:$0xff]  ;;  %v9400_v13 = vcombine.low %v1331_v2, %v1335_v3 }
  0xba   :  { %2442 = vmatprep.subr.bf16.mxu0 %v9407_v10  ;;  %v1339_v10 = vld [vmem:[#allocation7 + $0x5d0] sm:$0xff] }
  0xbb   :  { %2416 = vmatpush1.bf16.msra.mxu1 %v9334_v9  ;;  %v1215_v9 = vld [vmem:[#allocation7 + $0x1f0] sm:$0xff] }
  0xbc   :  { %2417 = vmatprep.subr.bf16.mxu1 %v9343_v11  ;;  %v1343_v11 = vld [vmem:[#allocation7 + $0x5f0] sm:$0xff]  ;;  %v9281_v14 = vcombine.high %v1211_v8, %v1215_v9  ;;  %v9280_v22 = vcombine.low %v1211_v8, %v1215_v9 }
  0xbd   :  { %2443 = vmatpush1.bf16.msra.mxu0 %v9406_v17  ;;  %v9409_v15 = vcombine.high %v1339_v10, %v1343_v11  ;;  %v1219_v17 = vld [vmem:[#allocation7 + $0x210] sm:$0xff]  ;;  %v9408_v23 = vcombine.low %v1339_v10, %v1343_v11 }
  0xbe   :  { %2469 = vmatprep.subr.bf16.mxu0 %v9225_v20  ;;  %v1156_v20 = vld [vmem:[#allocation7 + $0x18] sm:$0xff]  ;;  %v1259_v57 = vld [vmem:[#allocation7 + $0x350] sm:$0xff] }
  0xbf   :  { %2418 = vmatpush1.bf16.msra.mxu1 %v9342_v18  ;;  %v1223_v18 = vld [vmem:[#allocation7 + $0x230] sm:$0xff] }
  0xc0   :  { %2510 = vmatprep.subr.bf16.mxu1 %v9353_v21  ;;  %2461 = vmatmul.mubr.bf16.vlgmr.msra.gmra.mrb[4].mxu0 %v10692_v16  ;;  %v1160_v21 = vld [vmem:[#allocation7 + $0x38] sm:$0xff]  ;;  %v9289_v24 = vcombine.high %v1219_v17, %v1223_v18  ;;  %v9288_v30 = vcombine.low %v1219_v17, %v1223_v18  ;;  %v1267_v3 = vld [vmem:[#allocation7 + $0x390] sm:$0xff] }
  0xc1   :  { %2470 = vmatpush1.bf16.msra.mxu0 %v9224_v26  ;;  %2501 = vmatprep.mubr.bf16.mxu0 %v10686_v59  ;;  %v9227_v25 = vcombine.high %v1156_v20, %v1160_v21  ;;  %v1227_v26 = vld [vmem:[#allocation7 + $0x250] sm:$0xff]  ;;  %v9226_v31 = vcombine.low %v1156_v20, %v1160_v21  ;;  %v1284_v21 = vld [vmem:[#allocation7 + $0x418] sm:$0xff] }
  0xc2   :  { %2420 = vmatmul.mubr.bf16.vlgmr.msra.gmra.mrb[4].mxu1 %v10699_v19  ;;  %2471 = vmatprep.subr.bf16.mxu0 %v9233_v28  ;;  %v1164_v28 = vld [vmem:[#allocation7 + $0x58] sm:$0xff]  ;;  %v1275_v11 = vld [vmem:[#allocation7 + $0x3d0] sm:$0xff] }
  0xc3   :  { %2511 = vmatpush1.bf16.msra.mxu1 %v9352_v27  ;;  %2542 = vmatprep.mubr.bf16.mxu1 %v10572_v1  ;;  %v1231_v27 = vld [vmem:[#allocation7 + $0x270] sm:$0xff] }
  0xc4   :  { %2512 = vmatprep.subr.bf16.mxu1 %v9361_v29  ;;  %v1168_v29 = vld [vmem:[#allocation7 + $0x78] sm:$0xff]  ;;  %v9297_v32 = vcombine.high %v1227_v26, %v1231_v27  ;;  %v9296_v38 = vcombine.low %v1227_v26, %v1231_v27 }
  0xc5   :  { %2472 = vmatpush1.bf16.msra.mxu0 %v9232_v34  ;;  %v9235_v33 = vcombine.high %v1164_v28, %v1168_v29  ;;  %v1235_v34 = vld [vmem:[#allocation7 + $0x290] sm:$0xff]  ;;  %v9234_v39 = vcombine.low %v1164_v28, %v1168_v29  ;;  %v1292_v29 = vld [vmem:[#allocation7 + $0x458] sm:$0xff] }
  0xc6   :  { %2473 = vmatprep.subr.bf16.mxu0 %v9241_v36  ;;  %v1172_v36 = vld [vmem:[#allocation7 + $0x98] sm:$0xff] }
  0xc7   :  { %2513 = vmatpush1.bf16.msra.mxu1 %v9360_v35  ;;  %v1239_v35 = vld [vmem:[#allocation7 + $0x2b0] sm:$0xff] }
  0xc8   :  { %2514 = vmatprep.subr.bf16.mxu1 %v9369_v37  ;;  %v1176_v37 = vld [vmem:[#allocation7 + $0xb8] sm:$0xff]  ;;  %v9305_v40 = vcombine.high %v1235_v34, %v1239_v35  ;;  %v9304_v46 = vcombine.low %v1235_v34, %v1239_v35 }
  0xc9   :  { %2474 = vmatpush1.bf16.msra.mxu0 %v9240_v42  ;;  %v9243_v41 = vcombine.high %v1172_v36, %v1176_v37  ;;  %v1243_v42 = vld [vmem:[#allocation7 + $0x2d0] sm:$0xff]  ;;  %v9242_v47 = vcombine.low %v1172_v36, %v1176_v37  ;;  %v1300_v37 = vld [vmem:[#allocation7 + $0x498] sm:$0xff] }
  0xca   :  { %2475 = vmatprep.subr.bf16.mxu0 %v9249_v44  ;;  %v1180_v44 = vld [vmem:[#allocation7 + $0xd8] sm:$0xff] }
  0xcb   :  { %2515 = vmatpush1.bf16.msra.mxu1 %v9368_v43  ;;  %v1247_v43 = vld [vmem:[#allocation7 + $0x2f0] sm:$0xff] }
  0xcc   :  { %2516 = vmatprep.subr.bf16.mxu1 %v9377_v45  ;;  %v1184_v45 = vld [vmem:[#allocation7 + $0xf8] sm:$0xff]  ;;  %v9313_v48 = vcombine.high %v1243_v42, %v1247_v43  ;;  %v9312_v54 = vcombine.low %v1243_v42, %v1247_v43 }
  0xcd   :  { %2476 = vmatpush1.bf16.msra.mxu0 %v9248_v50  ;;  %v9251_v49 = vcombine.high %v1180_v44, %v1184_v45  ;;  %v1251_v50 = vld [vmem:[#allocation7 + $0x310] sm:$0xff]  ;;  %v9250_v55 = vcombine.low %v1180_v44, %v1184_v45  ;;  %v1308_v45 = vld [vmem:[#allocation7 + $0x4d8] sm:$0xff] }
  0xce   :  { %2477 = vmatprep.subr.bf16.mxu0 %v9257_v52  ;;  %v1188_v52 = vld [vmem:[#allocation7 + $0x118] sm:$0xff] }
  0xcf   :  { %2517 = vmatpush1.bf16.msra.mxu1 %v9376_v51  ;;  %v1255_v51 = vld [vmem:[#allocation7 + $0x330] sm:$0xff] }
  0xd0   :  { %2518 = vmatprep.subr.bf16.mxu1 %v9385_v53  ;;  %v1192_v53 = vld [vmem:[#allocation7 + $0x138] sm:$0xff] }
  0xd1   :  { %2478 = vmatpush1.bf16.msra.mxu0 %v9256_v58  ;;  %v9259_v56 = vcombine.high %v1188_v52, %v1192_v53  ;;  %v1263_v58 = vld [vmem:[#allocation7 + $0x370] sm:$0xff]  ;;  %v9258_v63 = vcombine.low %v1188_v52, %v1192_v53  ;;  %v1316_v53 = vld [vmem:[#allocation7 + $0x518] sm:$0xff] }
  0xd2   :  { %2479 = vmatprep.subr.bf16.mxu0 %v9265_v61  ;;  %v1200_v61 = vld [vmem:[#allocation7 + $0x178] sm:$0xff]  ;;  %v9329_v0 = vcombine.high %v1259_v57, %v1263_v58 }
  0xd3   :  { %2519 = vmatpush1.bf16.msra.mxu1 %v9384_v60  ;;  %v1196_v60 = vld [vmem:[#allocation7 + $0x158] sm:$0xff] }
  0xd4   :  { %2520 = vmatprep.subr.bf16.mxu1 %v9393_v62  ;;  %v9320_v62 = vcombine.low %v1251_v50, %v1255_v51  ;;  %v9267_v2 = vcombine.high %v1196_v60, %v1200_v61  ;;  %v9266_v8 = vcombine.low %v1196_v60, %v1200_v61  ;;  %v1324_v60 = vld [vmem:[#allocation7 + $0x558] sm:$0xff] }
  0xd5   :  { %2480 = vmatpush1.bf16.msra.mxu0 %v9264_v4  ;;  %v1271_v4 = vld [vmem:[#allocation7 + $0x3b0] sm:$0xff]  ;;  %v1328_v61 = vld [vmem:[#allocation7 + $0x578] sm:$0xff] }
  0xd6   :  { %2481 = vmatprep.subr.bf16.mxu0 %v9273_v6  ;;  %v1208_v6 = vld [vmem:[#allocation7 + $0x1b8] sm:$0xff]  ;;  %v9337_v9 = vcombine.high %v1267_v3, %v1271_v4 }
  0xd7   :  { %2521 = vmatpush1.bf16.msra.mxu1 %v9392_v5  ;;  %v1204_v5 = vld [vmem:[#allocation7 + $0x198] sm:$0xff] }
  0xd8   :  { %2522 = vmatprep.subr.bf16.mxu1 %v9401_v7  ;;  %v9328_v7 = vcombine.low %v1259_v57, %v1263_v58  ;;  %v9275_v10 = vcombine.high %v1204_v5, %v1208_v6  ;;  %v9274_v17 = vcombine.low %v1204_v5, %v1208_v6  ;;  %v1332_v5 = vld [vmem:[#allocation7 + $0x598] sm:$0xff] }
  0xd9   :  { %2482 = vmatpush1.bf16.msra.mxu0 %v9272_v12  ;;  %v1279_v12 = vld [vmem:[#allocation7 + $0x3f0] sm:$0xff]  ;;  %v1336_v6 = vld [vmem:[#allocation7 + $0x5b8] sm:$0xff] }
  0xda   :  { %2483 = vmatprep.subr.bf16.mxu0 %v9281_v14  ;;  %v1216_v14 = vld [vmem:[#allocation7 + $0x1f8] sm:$0xff]  ;;  %v9345_v18 = vcombine.high %v1275_v11, %v1279_v12 }
  0xdb   :  { %2523 = vmatpush1.bf16.msra.mxu1 %v9400_v13  ;;  %v1212_v13 = vld [vmem:[#allocation7 + $0x1d8] sm:$0xff] }
  0xdc   :  { %2524 = vmatprep.subr.bf16.mxu1 %v9409_v15  ;;  %v9336_v15 = vcombine.low %v1267_v3, %v1271_v4  ;;  %v9283_v20 = vcombine.high %v1212_v13, %v1216_v14  ;;  %v9282_v26 = vcombine.low %v1212_v13, %v1216_v14  ;;  %v9395_v3 = vcombine.high %v1324_v60, %v1328_v61  ;;  %v1340_v13 = vld [vmem:[#allocation7 + $0x5d8] sm:$0xff] }
  0xdd   :  { %2484 = vmatpush1.bf16.msra.mxu0 %v9280_v22  ;;  %v1288_v22 = vld [vmem:[#allocation7 + $0x438] sm:$0xff] }
  0xde   :  { %2485 = vmatprep.subr.bf16.mxu0 %v9289_v24  ;;  %v1224_v24 = vld [vmem:[#allocation7 + $0x238] sm:$0xff]  ;;  %v9355_v27 = vcombine.high %v1284_v21, %v1288_v22 }
  0xdf   :  { %2525 = vmatpush1.bf16.msra.mxu1 %v9408_v23  ;;  %v1220_v23 = vld [vmem:[#allocation7 + $0x218] sm:$0xff] }
  0xe0   :  { %2551 = vmatprep.subr.bf16.mxu1 %v9227_v25  ;;  %v9344_v25 = vcombine.low %v1275_v11, %v1279_v12  ;;  %v9291_v28 = vcombine.high %v1220_v23, %v1224_v24  ;;  %v9290_v34 = vcombine.low %v1220_v23, %v1224_v24  ;;  %v9403_v11 = vcombine.high %v1332_v5, %v1336_v6  ;;  %v1344_v14 = vld [vmem:[#allocation7 + $0x5f8] sm:$0xff]  ;;  %v123_v23 = vld [vmem:[#allocation5] sm:$0xff] }
  0xe1   :  { %2486 = vmatpush1.bf16.msra.mxu0 %v9288_v30  ;;  %v1296_v30 = vld [vmem:[#allocation7 + $0x478] sm:$0xff]  ;;  %v127_v24 = vld [vmem:[#allocation5 + $0x20] sm:$0xff] }
  0xe2   :  { %2543 = vmatmul.mubr.bf16.vlgmr.msra.gmra.mrb[8].mxu1 %v10692_v16  ;;  %2487 = vmatprep.subr.bf16.mxu0 %v9297_v32  ;;  %v1232_v32 = vld [vmem:[#allocation7 + $0x278] sm:$0xff]  ;;  %v9363_v35 = vcombine.high %v1292_v29, %v1296_v30 }
  0xe3   :  { %2552 = vmatpush1.bf16.msra.mxu1 %v9226_v31  ;;  %2583 = vmatprep.mubr.bf16.mxu1 %v10686_v59  ;;  %v9321_v59 = vcombine.high %v1251_v50, %v1255_v51  ;;  %v1228_v31 = vld [vmem:[#allocation7 + $0x258] sm:$0xff] }
  0xe4   :  { %2553 = vmatprep.subr.bf16.mxu1 %v9235_v33  ;;  %v9354_v33 = vcombine.low %v1284_v21, %v1288_v22  ;;  %v9299_v36 = vcombine.high %v1228_v31, %v1232_v32  ;;  %v9298_v42 = vcombine.low %v1228_v31, %v1232_v32  ;;  %v9411_v21 = vcombine.high %v1340_v13, %v1344_v14  ;;  %v131_v31 = vld [vmem:[#allocation5 + $0x40] sm:$0xff] }
  0xe5   :  { %2488 = vmatpush1.bf16.msra.mxu0 %v9296_v38  ;;  %v1304_v38 = vld [vmem:[#allocation7 + $0x4b8] sm:$0xff]  ;;  %v135_v32 = vld [vmem:[#allocation5 + $0x60] sm:$0xff] }
  0xe6   :  { %2489 = vmatprep.subr.bf16.mxu0 %v9305_v40  ;;  %v1240_v40 = vld [vmem:[#allocation7 + $0x2b8] sm:$0xff]  ;;  %v9371_v43 = vcombine.high %v1300_v37, %v1304_v38 }
  0xe7   :  { %2554 = vmatpush1.bf16.msra.mxu1 %v9234_v39  ;;  %v1236_v39 = vld [vmem:[#allocation7 + $0x298] sm:$0xff] }
  0xe8   :  { %2555 = vmatprep.subr.bf16.mxu1 %v9243_v41  ;;  %v9362_v41 = vcombine.low %v1292_v29, %v1296_v30  ;;  %v9307_v44 = vcombine.high %v1236_v39, %v1240_v40  ;;  %v9306_v50 = vcombine.low %v1236_v39, %v1240_v40  ;;  %v9413_v29 = vcombine.high %v123_v23, %v127_v24 }
  0xe9   :  { %2490 = vmatpush1.bf16.msra.mxu0 %v9304_v46  ;;  %v1312_v46 = vld [vmem:[#allocation7 + $0x4f8] sm:$0xff]  ;;  %v9421_v39 = vcombine.high %v131_v31, %v135_v32 }
  0xea   :  { %2491 = vmatprep.subr.bf16.mxu0 %v9313_v48  ;;  %v1248_v48 = vld [vmem:[#allocation7 + $0x2f8] sm:$0xff]  ;;  %v9379_v51 = vcombine.high %v1308_v45, %v1312_v46 }
  0xeb   :  { %2556 = vmatpush1.bf16.msra.mxu1 %v9242_v47  ;;  %v1244_v47 = vld [vmem:[#allocation7 + $0x2d8] sm:$0xff] }
  0xec   :  { %2557 = vmatprep.subr.bf16.mxu1 %v9251_v49  ;;  %v9370_v49 = vcombine.low %v1300_v37, %v1304_v38  ;;  %v9315_v52 = vcombine.high %v1244_v47, %v1248_v48  ;;  %v94_v37 = vld [vmem:[#allocation3 + $0x18] sm:$0xff] }
  0xed   :  { %2492 = vmatpush1.bf16.msra.mxu0 %v9312_v54  ;;  %v1252_v54 = vld [vmem:[#allocation7 + $0x318] sm:$0xff] }
  0xee   :  { %2493 = vmatprep.subr.bf16.mxu0 %v9321_v59  ;;  %v9378_v59 = vcombine.low %v1308_v45, %v1312_v46  ;;  %v271_v45 = vld [vmem:[#allocation5 + $0x4a0] sm:$0xff]  ;;  %v10714_v46 = vpack.c.bf16 %v94_v37, %v94_v37 }
  0xef   :  { %2558 = vmatpush1.bf16.msra.mxu1 %v9250_v55  ;;  %v1256_v55 = vld [vmem:[#allocation7 + $0x338] sm:$0xff]  ;;  %v323_v37 = vld [vmem:[#allocation5 + $0x640] sm:$0xff] }
  0xf0   :  { %2559 = vmatprep.subr.bf16.mxu1 %v9259_v56  ;;  %v9314_v56 = vcombine.low %v1244_v47, %v1248_v48  ;;  %v9323_v58 = vcombine.high %v1252_v54, %v1256_v55  ;;  %v9420_v47 = vcombine.low %v131_v31, %v135_v32 }
  0xf1   :  { %2494 = vmatpush1.bf16.msra.mxu0 %v9320_v62  ;;  %v1260_v62 = vld [vmem:[#allocation7 + $0x358] sm:$0xff] }
  0xf2   :  { %2495 = vmatprep.subr.bf16.mxu0 %v9329_v0 }
  0xf3   :  { %2560 = vmatpush1.bf16.msra.mxu1 %v9258_v63  ;;  %v1264_v63 = vld [vmem:[#allocation7 + $0x378] sm:$0xff] }
  0xf4   :  { %2561 = vmatprep.subr.bf16.mxu1 %v9267_v2  ;;  %v9322_v2 = vcombine.low %v1252_v54, %v1256_v55  ;;  %v9331_v4 = vcombine.high %v1260_v62, %v1264_v63 }
  0xf5   :  { %2496 = vmatpush1.bf16.msra.mxu0 %v9328_v7  ;;  %v1268_v7 = vld [vmem:[#allocation7 + $0x398] sm:$0xff] }
  0xf6   :  { %2497 = vmatprep.subr.bf16.mxu0 %v9337_v9  ;;  %v9394_v9 = vcombine.low %v1324_v60, %v1328_v61 }
  0xf7   :  { %2562 = vmatpush1.bf16.msra.mxu1 %v9266_v8  ;;  %v1272_v8 = vld [vmem:[#allocation7 + $0x3b8] sm:$0xff] }
  0xf8   :  { %2563 = vmatprep.subr.bf16.mxu1 %v9275_v10  ;;  %v9330_v10 = vcombine.low %v1260_v62, %v1264_v63  ;;  %v9339_v12 = vcombine.high %v1268_v7, %v1272_v8 }
  0xf9   :  { %2498 = vmatpush1.bf16.msra.mxu0 %v9336_v15  ;;  %v1276_v15 = vld [vmem:[#allocation7 + $0x3d8] sm:$0xff] }
  0xfa   :  { %2499 = vmatprep.subr.bf16.mxu0 %v9345_v18  ;;  %v9402_v18 = vcombine.low %v1332_v5, %v1336_v6 }
  0xfb   :  { %2564 = vmatpush1.bf16.msra.mxu1 %v9274_v17  ;;  %v1280_v17 = vld [vmem:[#allocation7 + $0x3f8] sm:$0xff] }
  0xfc   :  { %2565 = vmatprep.subr.bf16.mxu1 %v9283_v20  ;;  %v9338_v20 = vcombine.low %v1268_v7, %v1272_v8  ;;  %v9347_v22 = vcombine.high %v1276_v15, %v1280_v17 }
  0xfd   :  { %2500 = vmatpush1.bf16.msra.mxu0 %v9344_v25  ;;  %v251_v25 = vld [vmem:[#allocation5 + $0x400] sm:$0xff] }
  0xfe   :  { %2592 = vmatprep.subr.bf16.mxu0 %v9355_v27  ;;  %v9410_v27 = vcombine.low %v1340_v13, %v1344_v14 }
  0xff   :  { %2566 = vmatpush1.bf16.msra.mxu1 %v9282_v26  ;;  %v255_v26 = vld [vmem:[#allocation5 + $0x420] sm:$0xff] }
 0x100   :  { %2567 = vmatprep.subr.bf16.mxu1 %v9291_v28  ;;  %2502 = vmatmul.mubr.bf16.vlgmr.msra.gmra.mrb[8].mxu0 %v10699_v19  ;;  %v9346_v28 = vcombine.low %v1276_v15, %v1280_v17  ;;  %v9541_v30 = vcombine.high %v251_v25, %v255_v26  ;;  %v9540_v38 = vcombine.low %v251_v25, %v255_v26 }
 0x101   :  { %2593 = vmatpush1.bf16.msra.mxu0 %v9354_v33  ;;  %2624 = vmatprep.mubr.bf16.mxu0 %v10572_v1  ;;  %v1320_v1 = vld [vmem:[#allocation7 + $0x538] sm:$0xff]  ;;  %v259_v33 = vld [vmem:[#allocation5 + $0x440] sm:$0xff] }
 0x102   :  { %2594 = vmatprep.subr.bf16.mxu0 %v9363_v35  ;;  %v9387_v57 = vcombine.high %v1316_v53, %v1320_v1  ;;  %v9386_v0 = vcombine.low %v1316_v53, %v1320_v1  ;;  %v92_v35 = vld [vmem:[#allocation3 + $0x8] sm:$0xff]  ;;  %v275_v53 = vld [vmem:[#allocation5 + $0x4c0] sm:$0xff] }
 0x103   :  { %2568 = vmatpush1.bf16.msra.mxu1 %v9290_v34  ;;  %v263_v34 = vld [vmem:[#allocation5 + $0x460] sm:$0xff] }
 0x104   :  { %2569 = vmatprep.subr.bf16.mxu1 %v9299_v36  ;;  %v9412_v36 = vcombine.low %v123_v23, %v127_v24  ;;  %v9549_v40 = vcombine.high %v259_v33, %v263_v34  ;;  %v9548_v48 = vcombine.low %v259_v33, %v263_v34 }
 0x105   :  { %2595 = vmatpush1.bf16.msra.mxu0 %v9362_v41  ;;  %v139_v41 = vld [vmem:[#allocation5 + $0x80] sm:$0xff] }
 0x106   :  { %2596 = vmatprep.subr.bf16.mxu0 %v9371_v43  ;;  %v10711_v43 = vpack.c.bf16 %v92_v35, %v92_v35  ;;  %v195_v35 = vld [vmem:[#allocation5 + $0x240] sm:$0xff] }
 0x107   :  { %2570 = vmatpush1.bf16.msra.mxu1 %v9298_v42  ;;  %v143_v42 = vld [vmem:[#allocation5 + $0xa0] sm:$0xff] }
 0x108   :  { %2571 = vmatprep.subr.bf16.mxu1 %v9307_v44  ;;  %v267_v44 = vld [vmem:[#allocation5 + $0x480] sm:$0xff]  ;;  %v9428_v1 = vcombine.low %v139_v41, %v143_v42 }
 0x109   :  { %2597 = vmatpush1.bf16.msra.mxu0 %v9370_v49  ;;  %v9429_v49 = vcombine.high %v139_v41, %v143_v42 }
 0x10a   :  { %2598 = vmatprep.subr.bf16.mxu0 %v9379_v51  ;;  %v147_v51 = vld [vmem:[#allocation5 + $0xc0] sm:$0xff] }
 0x10b   :  { %2572 = vmatpush1.bf16.msra.mxu1 %v9306_v50  ;;  %v9557_v50 = vcombine.high %v267_v44, %v271_v45 }
 0x10c   :  { %2573 = vmatprep.subr.bf16.mxu1 %v9315_v52  ;;  %v151_v52 = vld [vmem:[#allocation5 + $0xe0] sm:$0xff] }
 0x10d   :  { %2599 = vmatpush1.bf16.msra.mxu0 %v9378_v59  ;;  %v9437_v54 = vcombine.high %v147_v51, %v151_v52  ;;  %v155_v59 = vld [vmem:[#allocation5 + $0x100] sm:$0xff]  ;;  %v9436_v60 = vcombine.low %v147_v51, %v151_v52 }
 0x10e   :  { %2600 = vmatprep.subr.bf16.mxu0 %v9387_v57  ;;  %v283_v57 = vld [vmem:[#allocation5 + $0x500] sm:$0xff] }
 0x10f   :  { %2574 = vmatpush1.bf16.msra.mxu1 %v9314_v56  ;;  %v159_v56 = vld [vmem:[#allocation5 + $0x120] sm:$0xff] }
 0x110   :  { %2575 = vmatprep.subr.bf16.mxu1 %v9323_v58  ;;  %v287_v58 = vld [vmem:[#allocation5 + $0x520] sm:$0xff]  ;;  %v9445_v62 = vcombine.high %v155_v59, %v159_v56  ;;  %v9444_v5 = vcombine.low %v155_v59, %v159_v56 }
 0x111   :  { %2601 = vmatpush1.bf16.msra.mxu0 %v9386_v0  ;;  %v9573_v63 = vcombine.high %v283_v57, %v287_v58  ;;  %v163_v0 = vld [vmem:[#allocation5 + $0x140] sm:$0xff]  ;;  %v9572_v6 = vcombine.low %v283_v57, %v287_v58 }
 0x112   :  { %2602 = vmatprep.subr.bf16.mxu0 %v9395_v3  ;;  %v291_v3 = vld [vmem:[#allocation5 + $0x540] sm:$0xff] }
 0x113   :  { %2576 = vmatpush1.bf16.msra.mxu1 %v9322_v2  ;;  %v167_v2 = vld [vmem:[#allocation5 + $0x160] sm:$0xff] }
 0x114   :  { %2577 = vmatprep.subr.bf16.mxu1 %v9331_v4  ;;  %v295_v4 = vld [vmem:[#allocation5 + $0x560] sm:$0xff]  ;;  %v9453_v7 = vcombine.high %v163_v0, %v167_v2  ;;  %v9452_v13 = vcombine.low %v163_v0, %v167_v2 }
 0x115   :  { %2603 = vmatpush1.bf16.msra.mxu0 %v9394_v9  ;;  %v9581_v8 = vcombine.high %v291_v3, %v295_v4  ;;  %v171_v9 = vld [vmem:[#allocation5 + $0x180] sm:$0xff]  ;;  %v9580_v14 = vcombine.low %v291_v3, %v295_v4 }
 0x116   :  { %2604 = vmatprep.subr.bf16.mxu0 %v9403_v11  ;;  %v299_v11 = vld [vmem:[#allocation5 + $0x580] sm:$0xff] }
 0x117   :  { %2578 = vmatpush1.bf16.msra.mxu1 %v9330_v10  ;;  %v175_v10 = vld [vmem:[#allocation5 + $0x1a0] sm:$0xff] }
 0x118   :  { %2579 = vmatprep.subr.bf16.mxu1 %v9339_v12  ;;  %v303_v12 = vld [vmem:[#allocation5 + $0x5a0] sm:$0xff]  ;;  %v9461_v15 = vcombine.high %v171_v9, %v175_v10  ;;  %v9460_v23 = vcombine.low %v171_v9, %v175_v10 }
 0x119   :  { %2605 = vmatpush1.bf16.msra.mxu0 %v9402_v18  ;;  %v9589_v17 = vcombine.high %v299_v11, %v303_v12  ;;  %v179_v18 = vld [vmem:[#allocation5 + $0x1c0] sm:$0xff]  ;;  %v9588_v24 = vcombine.low %v299_v11, %v303_v12 }
 0x11a   :  { %2606 = vmatprep.subr.bf16.mxu0 %v9411_v21  ;;  %v307_v21 = vld [vmem:[#allocation5 + $0x5c0] sm:$0xff] }
 0x11b   :  { %2580 = vmatpush1.bf16.msra.mxu1 %v9338_v20  ;;  %v183_v20 = vld [vmem:[#allocation5 + $0x1e0] sm:$0xff] }
 0x11c   :  { %2581 = vmatprep.subr.bf16.mxu1 %v9347_v22  ;;  %v311_v22 = vld [vmem:[#allocation5 + $0x5e0] sm:$0xff]  ;;  %v9469_v25 = vcombine.high %v179_v18, %v183_v20  ;;  %v9468_v31 = vcombine.low %v179_v18, %v183_v20 }
 0x11d   :  { %2607 = vmatpush1.bf16.msra.mxu0 %v9410_v27  ;;  %v9597_v26 = vcombine.high %v307_v21, %v311_v22  ;;  %v187_v27 = vld [vmem:[#allocation5 + $0x200] sm:$0xff]  ;;  %v9596_v32 = vcombine.low %v307_v21, %v311_v22 }
 0x11e   :  { %7753 = vmatprep.subr.bf16.mxu0 %v9413_v29  ;;  %v315_v29 = vld [vmem:[#allocation5 + $0x600] sm:$0xff] }
 0x11f   :  { %2582 = vmatpush1.bf16.msra.mxu1 %v9346_v28  ;;  %v191_v28 = vld [vmem:[#allocation5 + $0x220] sm:$0xff] }
 0x120   :  { %7794 = vmatprep.subr.bf16.mxu1 %v9541_v30  ;;  %2625 = vmatmul.mubr.bf16.vlgmr.msra.gmra.mrb[12].mxu0 %v10692_v16  ;;  %v279_v16 = vld [vmem:[#allocation5 + $0x4e0] sm:$0xff]  ;;  %v9477_v33 = vcombine.high %v187_v27, %v191_v28 }
 0x121   :  { %7754 = vmatpush1.bf16.msra.mxu0 %v9412_v36  ;;  %7785 = vmatprep.mubr.bf16.mxu0 %v10711_v43  ;;  %v9565_v55 = vcombine.high %v275_v53, %v279_v16  ;;  %v9564_v61 = vcombine.low %v275_v53, %v279_v16  ;;  %v319_v30 = vld [vmem:[#allocation5 + $0x620] sm:$0xff] }
 0x122   :  { %2584 = vmatmul.mubr.bf16.vlgmr.msra.gmra.mrb[12].mxu1 %v10699_v19  ;;  %7755 = vmatprep.subr.bf16.mxu0 %v9421_v39  ;;  %v9556_v19 = vcombine.low %v267_v44, %v271_v45  ;;  %v9605_v34 = vcombine.high %v315_v29, %v319_v30  ;;  %v199_v36 = vld [vmem:[#allocation5 + $0x260] sm:$0xff]  ;;  %v9476_v39 = vcombine.low %v187_v27, %v191_v28 }
 0x123   :  { %7795 = vmatpush1.bf16.msra.mxu1 %v9540_v38  ;;  %7826 = vmatprep.mubr.bf16.mxu1 %v10714_v46  ;;  %v327_v38 = vld [vmem:[#allocation5 + $0x660] sm:$0xff]  ;;  %v9485_v41 = vcombine.high %v195_v35, %v199_v36 }
 0x124   :  { %7796 = vmatprep.subr.bf16.mxu1 %v9549_v40  ;;  %v9604_v40 = vcombine.low %v315_v29, %v319_v30  ;;  %v9613_v42 = vcombine.high %v323_v37, %v327_v38  ;;  %v203_v44 = vld [vmem:[#allocation5 + $0x280] sm:$0xff] }
 0x125   :  { %7756 = vmatpush1.bf16.msra.mxu0 %v9420_v47  ;;  %v207_v45 = vld [vmem:[#allocation5 + $0x2a0] sm:$0xff] }
 0x126   :  { %7757 = vmatprep.subr.bf16.mxu0 %v9429_v49  ;;  %v331_v47 = vld [vmem:[#allocation5 + $0x680] sm:$0xff]  ;;  %v9484_v49 = vcombine.low %v195_v35, %v199_v36  ;;  %v9493_v51 = vcombine.high %v203_v44, %v207_v45 }
 0x127   :  { %7797 = vmatpush1.bf16.msra.mxu1 %v9548_v48  ;;  %v335_v48 = vld [vmem:[#allocation5 + $0x6a0] sm:$0xff] }
 0x128   :  { %7798 = vmatprep.subr.bf16.mxu1 %v9557_v50  ;;  %v9612_v50 = vcombine.low %v323_v37, %v327_v38  ;;  %v9621_v52 = vcombine.high %v331_v47, %v335_v48  ;;  %v211_v53 = vld [vmem:[#allocation5 + $0x2c0] sm:$0xff] }
 0x129   :  { %7758 = vmatpush1.bf16.msra.mxu0 %v9428_v1  ;;  %v215_v16 = vld [vmem:[#allocation5 + $0x2e0] sm:$0xff] }
 0x12a   :  { %7759 = vmatprep.subr.bf16.mxu0 %v9437_v54  ;;  %v339_v1 = vld [vmem:[#allocation5 + $0x6c0] sm:$0xff]  ;;  %v9492_v54 = vcombine.low %v203_v44, %v207_v45  ;;  %v9501_v59 = vcombine.high %v211_v53, %v215_v16 }
 0x12b   :  { %7799 = vmatpush1.bf16.msra.mxu1 %v9556_v19  ;;  %v343_v19 = vld [vmem:[#allocation5 + $0x6e0] sm:$0xff] }
 0x12c   :  { %7800 = vmatprep.subr.bf16.mxu1 %v9565_v55  ;;  %v9620_v55 = vcombine.low %v331_v47, %v335_v48  ;;  %v9629_v56 = vcombine.high %v339_v1, %v343_v19  ;;  %v219_v57 = vld [vmem:[#allocation5 + $0x300] sm:$0xff] }
 0x12d   :  { %7760 = vmatpush1.bf16.msra.mxu0 %v9436_v60  ;;  %v223_v58 = vld [vmem:[#allocation5 + $0x320] sm:$0xff] }
 0x12e   :  { %7761 = vmatprep.subr.bf16.mxu0 %v9445_v62  ;;  %v347_v60 = vld [vmem:[#allocation5 + $0x700] sm:$0xff]  ;;  %v9500_v62 = vcombine.low %v211_v53, %v215_v16  ;;  %v9509_v0 = vcombine.high %v219_v57, %v223_v58  ;;  %v98_v53 = vld [vmem:[#allocation3 + $0x38] sm:$0xff] }
 0x12f   :  { %7801 = vmatpush1.bf16.msra.mxu1 %v9564_v61  ;;  %v351_v61 = vld [vmem:[#allocation5 + $0x720] sm:$0xff] }
 0x130   :  { %7802 = vmatprep.subr.bf16.mxu1 %v9573_v63  ;;  %v9628_v63 = vcombine.low %v339_v1, %v343_v19  ;;  %v9637_v2 = vcombine.high %v347_v60, %v351_v61  ;;  %v227_v3 = vld [vmem:[#allocation5 + $0x340] sm:$0xff] }
 0x131   :  { %7762 = vmatpush1.bf16.msra.mxu0 %v9444_v5  ;;  %v231_v4 = vld [vmem:[#allocation5 + $0x360] sm:$0xff] }
 0x132   :  { %7763 = vmatprep.subr.bf16.mxu0 %v9453_v7  ;;  %v355_v5 = vld [vmem:[#allocation5 + $0x740] sm:$0xff]  ;;  %v9508_v7 = vcombine.low %v219_v57, %v223_v58  ;;  %v9517_v9 = vcombine.high %v227_v3, %v231_v4  ;;  %v10730_v58 = vpack.c.bf16 %v98_v53, %v98_v53 }
 0x133   :  { %7803 = vmatpush1.bf16.msra.mxu1 %v9572_v6  ;;  %v359_v6 = vld [vmem:[#allocation5 + $0x760] sm:$0xff] }
 0x134   :  { %7804 = vmatprep.subr.bf16.mxu1 %v9581_v8  ;;  %v9636_v8 = vcombine.low %v347_v60, %v351_v61  ;;  %v9645_v10 = vcombine.high %v355_v5, %v359_v6  ;;  %v235_v11 = vld [vmem:[#allocation5 + $0x380] sm:$0xff] }
 0x135   :  { %7764 = vmatpush1.bf16.msra.mxu0 %v9452_v13  ;;  %v239_v12 = vld [vmem:[#allocation5 + $0x3a0] sm:$0xff] }
 0x136   :  { %7765 = vmatprep.subr.bf16.mxu0 %v9461_v15  ;;  %v363_v13 = vld [vmem:[#allocation5 + $0x780] sm:$0xff]  ;;  %v9516_v15 = vcombine.low %v227_v3, %v231_v4  ;;  %v9525_v18 = vcombine.high %v235_v11, %v239_v12  ;;  %v9524_v27 = vcombine.low %v235_v11, %v239_v12 }
 0x137   :  { %7805 = vmatpush1.bf16.msra.mxu1 %v9580_v14  ;;  %v367_v14 = vld [vmem:[#allocation5 + $0x7a0] sm:$0xff] }
 0x138   :  { %7806 = vmatprep.subr.bf16.mxu1 %v9589_v17  ;;  %v9644_v17 = vcombine.low %v355_v5, %v359_v6  ;;  %v9653_v20 = vcombine.high %v363_v13, %v367_v14  ;;  %v243_v21 = vld [vmem:[#allocation5 + $0x3c0] sm:$0xff]  ;;  %v9652_v29 = vcombine.low %v363_v13, %v367_v14 }
 0x139   :  { %7766 = vmatpush1.bf16.msra.mxu0 %v9460_v23  ;;  %v247_v22 = vld [vmem:[#allocation5 + $0x3e0] sm:$0xff] }
 0x13a   :  { %7767 = vmatprep.subr.bf16.mxu0 %v9469_v25  ;;  %v375_v25 = vld [vmem:[#allocation5 + $0x7e0] sm:$0xff]  ;;  %v9533_v30 = vcombine.high %v243_v21, %v247_v22  ;;  %v9532_v37 = vcombine.low %v243_v21, %v247_v22 }
 0x13b   :  { %7807 = vmatpush1.bf16.msra.mxu1 %v9588_v24  ;;  %v371_v24 = vld [vmem:[#allocation5 + $0x7c0] sm:$0xff] }
 0x13c   :  { %7808 = vmatprep.subr.bf16.mxu1 %v9597_v26  ;;  %v507_v35 = vld [vmem:[#allocation5 + $0xc00] sm:$0xff] }
 0x13d   :  { %7768 = vmatpush1.bf16.msra.mxu0 %v9468_v31  ;;  %v511_v36 = vld [vmem:[#allocation5 + $0xc20] sm:$0xff] }
 0x13e   :  { %7769 = vmatprep.subr.bf16.mxu0 %v9477_v33  ;;  %v379_v33 = vld [vmem:[#allocation5 + $0x800] sm:$0xff]  ;;  %v9796_v16 = vcombine.low %v507_v35, %v511_v36 }
 0x13f   :  { %7809 = vmatpush1.bf16.msra.mxu1 %v9596_v32  ;;  %v9661_v32 = vcombine.high %v371_v24, %v375_v25  ;;  %v91_v38 = vld [vmem:[#allocation3] sm:$0xff] }
 0x140   :  { %7810 = vmatprep.subr.bf16.mxu1 %v9605_v34  ;;  %v383_v34 = vld [vmem:[#allocation5 + $0x820] sm:$0xff]  ;;  %v10723_v47 = vpack.c.bf16 %v91_v38, %v91_v38 }
 0x141   :  { %7770 = vmatpush1.bf16.msra.mxu0 %v9476_v39  ;;  %v9660_v39 = vcombine.low %v371_v24, %v375_v25  ;;  %v387_v44 = vld [vmem:[#allocation5 + $0x840] sm:$0xff] }
 0x142   :  { %7771 = vmatprep.subr.bf16.mxu0 %v9485_v41  ;;  %v9669_v41 = vcombine.high %v379_v33, %v383_v34  ;;  %v391_v45 = vld [vmem:[#allocation5 + $0x860] sm:$0xff] }
 0x143   :  { %7811 = vmatpush1.bf16.msra.mxu1 %v9604_v40  ;;  %v93_v40 = vld [vmem:[#allocation3 + $0x10] sm:$0xff]  ;;  %v515_v48 = vld [vmem:[#allocation5 + $0xc40] sm:$0xff]  ;;  %v9677_v1 = vcombine.high %v387_v44, %v391_v45  ;;  %v9676_v60 = vcombine.low %v387_v44, %v391_v45 }
 0x144   :  { %7812 = vmatprep.subr.bf16.mxu1 %v9613_v42  ;;  %v9797_v42 = vcombine.high %v507_v35, %v511_v36  ;;  %v527_v57 = vld [vmem:[#allocation5 + $0xca0] sm:$0xff] }
 0x145   :  { %7772 = vmatpush1.bf16.msra.mxu0 %v9484_v49  ;;  %v519_v49 = vld [vmem:[#allocation5 + $0xc60] sm:$0xff] }
 0x146   :  { %7773 = vmatprep.subr.bf16.mxu0 %v9493_v51  ;;  %v10725_v51 = vpack.c.bf16 %v93_v40, %v93_v40  ;;  %v9805_v19 = vcombine.high %v515_v48, %v519_v49  ;;  %v9804_v61 = vcombine.low %v515_v48, %v519_v49  ;;  %v531_v3 = vld [vmem:[#allocation5 + $0xcc0] sm:$0xff] }
 0x147   :  { %7813 = vmatpush1.bf16.msra.mxu1 %v9612_v50  ;;  %v96_v50 = vld [vmem:[#allocation3 + $0x28] sm:$0xff]  ;;  %v535_v4 = vld [vmem:[#allocation5 + $0xce0] sm:$0xff] }
 0x148   :  { %7814 = vmatprep.subr.bf16.mxu1 %v9621_v52  ;;  %v9668_v52 = vcombine.low %v379_v33, %v383_v34  ;;  %v539_v11 = vld [vmem:[#allocation5 + $0xd00] sm:$0xff]  ;;  %v9820_v14 = vcombine.low %v531_v3, %v535_v4 }
 0x149   :  { %7774 = vmatpush1.bf16.msra.mxu0 %v9492_v54  ;;  %v395_v54 = vld [vmem:[#allocation5 + $0x880] sm:$0xff] }
 0x14a   :  { %7775 = vmatprep.subr.bf16.mxu0 %v9501_v59  ;;  %v10727_v59 = vpack.c.bf16 %v96_v50, %v96_v50  ;;  %v543_v12 = vld [vmem:[#allocation5 + $0xd20] sm:$0xff] }
 0x14b   :  { %7815 = vmatpush1.bf16.msra.mxu1 %v9620_v55  ;;  %v399_v55 = vld [vmem:[#allocation5 + $0x8a0] sm:$0xff]  ;;  %v9828_v25 = vcombine.low %v539_v11, %v543_v12 }
 0x14c   :  { %7816 = vmatprep.subr.bf16.mxu1 %v9629_v56  ;;  %v523_v56 = vld [vmem:[#allocation5 + $0xc80] sm:$0xff]  ;;  %v9684_v5 = vcombine.low %v395_v54, %v399_v55 }
 0x14d   :  { %7776 = vmatpush1.bf16.msra.mxu0 %v9500_v62  ;;  %v9685_v62 = vcombine.high %v395_v54, %v399_v55  ;;  %v9812_v6 = vcombine.low %v523_v56, %v527_v57  ;;  %v547_v21 = vld [vmem:[#allocation5 + $0xd40] sm:$0xff] }
 0x14e   :  { %7777 = vmatprep.subr.bf16.mxu0 %v9509_v0  ;;  %v403_v0 = vld [vmem:[#allocation5 + $0x8c0] sm:$0xff] }
 0x14f   :  { %7817 = vmatpush1.bf16.msra.mxu1 %v9628_v63  ;;  %v9813_v63 = vcombine.high %v523_v56, %v527_v57  ;;  %v551_v22 = vld [vmem:[#allocation5 + $0xd60] sm:$0xff] }
 0x150   :  { %7818 = vmatprep.subr.bf16.mxu1 %v9637_v2  ;;  %v407_v2 = vld [vmem:[#allocation5 + $0x8e0] sm:$0xff]  ;;  %v9836_v34 = vcombine.low %v547_v21, %v551_v22 }
 0x151   :  { %7778 = vmatpush1.bf16.msra.mxu0 %v9508_v7  ;;  %v9693_v7 = vcombine.high %v403_v0, %v407_v2  ;;  %v9692_v13 = vcombine.low %v403_v0, %v407_v2  ;;  %v435_v38 = vld [vmem:[#allocation5 + $0x9c0] sm:$0xff] }
 0x152   :  { %7779 = vmatprep.subr.bf16.mxu0 %v9517_v9  ;;  %v411_v9 = vld [vmem:[#allocation5 + $0x900] sm:$0xff] }
 0x153   :  { %7819 = vmatpush1.bf16.msra.mxu1 %v9636_v8  ;;  %v9821_v8 = vcombine.high %v531_v3, %v535_v4  ;;  %v567_v44 = vld [vmem:[#allocation5 + $0xde0] sm:$0xff] }
 0x154   :  { %7820 = vmatprep.subr.bf16.mxu1 %v9645_v10  ;;  %v415_v10 = vld [vmem:[#allocation5 + $0x920] sm:$0xff] }
 0x155   :  { %v10719_v23 = vpop.f32.mrb[0].mxu1  ;;  %7780 = vmatpush1.bf16.msra.mxu0 %v9516_v15  ;;  %v9701_v15 = vcombine.high %v411_v9, %v415_v10  ;;  %v9700_v24 = vcombine.low %v411_v9, %v415_v10  ;;  %v575_v54 = vld [vmem:[#allocation5 + $0xe20] sm:$0xff] }
 0x156   :  { %v10721_v26 = vpop.f32.mrb[1].mxu1  ;;  %7781 = vmatprep.subr.bf16.mxu0 %v9525_v18  ;;  %v419_v18 = vld [vmem:[#allocation5 + $0x940] sm:$0xff] }
 0x157   :  { %v2384_v28 = vpop.f32.mrb[2].mxu1  ;;  %7821 = vmatpush1.bf16.msra.mxu1 %v9644_v17  ;;  %v9829_v17 = vcombine.high %v539_v11, %v543_v12 }
 0x158   :  { %v2385_v31 = vpop.f32.mrb[3].mxu1  ;;  %7822 = vmatprep.subr.bf16.mxu1 %v9653_v20  ;;  %v423_v20 = vld [vmem:[#allocation5 + $0x960] sm:$0xff]  ;;  %v9837_v28 = vcombine.high %v547_v21, %v551_v22 }
 0x159   :  { %7782 = vmatpush1.bf16.msra.mxu0 %v9524_v27  ;;  %v9709_v27 = vcombine.high %v419_v18, %v423_v20  ;;  %v555_v31 = vld [vmem:[#allocation5 + $0xd80] sm:$0xff]  ;;  %v9708_v33 = vcombine.low %v419_v18, %v423_v20 }
 0x15a   :  { %7783 = vmatprep.subr.bf16.mxu0 %v9533_v30  ;;  %v431_v30 = vld [vmem:[#allocation5 + $0x9a0] sm:$0xff] }
 0x15b   :  { %7823 = vmatpush1.bf16.msra.mxu1 %v9652_v29  ;;  %v427_v29 = vld [vmem:[#allocation5 + $0x980] sm:$0xff] }
 0x15c   :  { %7824 = vmatprep.subr.bf16.mxu1 %v9661_v32  ;;  %v559_v32 = vld [vmem:[#allocation5 + $0xda0] sm:$0xff]  ;;  %v9717_v35 = vcombine.high %v427_v29, %v431_v30  ;;  %v9716_v49 = vcombine.low %v427_v29, %v431_v30 }
 0x15d   :  { %7784 = vmatpush1.bf16.msra.mxu0 %v9532_v37  ;;  %v9845_v37 = vcombine.high %v555_v31, %v559_v32 }
 0x15e   :  { %7835 = vmatprep.subr.bf16.mxu0 %v9669_v41 }
 0x15f   :  { %7825 = vmatpush1.bf16.msra.mxu1 %v9660_v39  ;;  %v439_v39 = vld [vmem:[#allocation5 + $0x9e0] sm:$0xff] }
 0x160   :  { %7876 = vmatprep.subr.bf16.mxu1 %v9797_v42  ;;  %7786 = vmatmul.mubr.bf16.vlgmr.msra.gmra.mrb[16].mxu0 %v10723_v47  ;;  %v563_v42 = vld [vmem:[#allocation5 + $0xdc0] sm:$0xff]  ;;  %v9725_v53 = vcombine.high %v435_v38, %v439_v39  ;;  %v9724_v55 = vcombine.low %v435_v38, %v439_v39 }
 0x161   :  { %7836 = vmatpush1.bf16.msra.mxu0 %v9668_v52  ;;  %7867 = vmatprep.mubr.bf16.mxu0 %v10727_v59  ;;  %v9844_v52 = vcombine.low %v555_v31, %v559_v32 }
 0x162   :  { %7827 = vmatmul.mubr.bf16.vlgmr.msra.gmra.mrb[16].mxu1 %v10725_v51  ;;  %7837 = vmatprep.subr.bf16.mxu0 %v9677_v1  ;;  %v443_v1 = vld [vmem:[#allocation5 + $0xa00] sm:$0xff] }
 0x163   :  { %7877 = vmatpush1.bf16.msra.mxu1 %v9796_v16  ;;  %7908 = vmatprep.mubr.bf16.mxu1 %v10730_v58  ;;  %v9853_v16 = vcombine.high %v563_v42, %v567_v44 }
 0x164   :  { %7878 = vmatprep.subr.bf16.mxu1 %v9805_v19  ;;  %v447_v19 = vld [vmem:[#allocation5 + $0xa20] sm:$0xff] }
 0x165   :  { %7838 = vmatpush1.bf16.msra.mxu0 %v9676_v60  ;;  %v9733_v56 = vcombine.high %v443_v1, %v447_v19  ;;  %v451_v60 = vld [vmem:[#allocation5 + $0xa40] sm:$0xff]  ;;  %v9732_v0 = vcombine.low %v443_v1, %v447_v19 }
 0x166   :  { %7839 = vmatprep.subr.bf16.mxu0 %v9685_v62  ;;  %v579_v62 = vld [vmem:[#allocation5 + $0xe40] sm:$0xff] }
 0x167   :  { %7879 = vmatpush1.bf16.msra.mxu1 %v9804_v61  ;;  %v455_v61 = vld [vmem:[#allocation5 + $0xa60] sm:$0xff] }
 0x168   :  { %7880 = vmatprep.subr.bf16.mxu1 %v9813_v63  ;;  %v583_v63 = vld [vmem:[#allocation5 + $0xe60] sm:$0xff]  ;;  %v9741_v3 = vcombine.high %v451_v60, %v455_v61  ;;  %v9740_v9 = vcombine.low %v451_v60, %v455_v61 }
 0x169   :  { %7840 = vmatpush1.bf16.msra.mxu0 %v9684_v5  ;;  %v9869_v4 = vcombine.high %v579_v62, %v583_v63  ;;  %v459_v5 = vld [vmem:[#allocation5 + $0xa80] sm:$0xff]  ;;  %v9868_v10 = vcombine.low %v579_v62, %v583_v63 }
 0x16a   :  { %7841 = vmatprep.subr.bf16.mxu0 %v9693_v7  ;;  %v587_v7 = vld [vmem:[#allocation5 + $0xe80] sm:$0xff] }
 0x16b   :  { %7881 = vmatpush1.bf16.msra.mxu1 %v9812_v6  ;;  %v463_v6 = vld [vmem:[#allocation5 + $0xaa0] sm:$0xff] }
 0x16c   :  { %7882 = vmatprep.subr.bf16.mxu1 %v9821_v8  ;;  %v591_v8 = vld [vmem:[#allocation5 + $0xea0] sm:$0xff]  ;;  %v9749_v11 = vcombine.high %v459_v5, %v463_v6  ;;  %v9748_v18 = vcombine.low %v459_v5, %v463_v6 }
 0x16d   :  { %7842 = vmatpush1.bf16.msra.mxu0 %v9692_v13  ;;  %v9877_v12 = vcombine.high %v587_v7, %v591_v8  ;;  %v467_v13 = vld [vmem:[#allocation5 + $0xac0] sm:$0xff]  ;;  %v9876_v20 = vcombine.low %v587_v7, %v591_v8 }
 0x16e   :  { %7843 = vmatprep.subr.bf16.mxu0 %v9701_v15  ;;  %v595_v15 = vld [vmem:[#allocation5 + $0xec0] sm:$0xff] }
 0x16f   :  { %7883 = vmatpush1.bf16.msra.mxu1 %v9820_v14  ;;  %v471_v14 = vld [vmem:[#allocation5 + $0xae0] sm:$0xff] }
 0x170   :  { %7884 = vmatprep.subr.bf16.mxu1 %v9829_v17  ;;  %v599_v17 = vld [vmem:[#allocation5 + $0xee0] sm:$0xff]  ;;  %v9757_v21 = vcombine.high %v467_v13, %v471_v14  ;;  %v9756_v29 = vcombine.low %v467_v13, %v471_v14  ;;  %v97_v14 = vld [vmem:[#allocation3 + $0x30] sm:$0xff] }
 0x171   :  { %7844 = vmatpush1.bf16.msra.mxu0 %v9700_v24  ;;  %v9885_v22 = vcombine.high %v595_v15, %v599_v17  ;;  %v475_v24 = vld [vmem:[#allocation5 + $0xb00] sm:$0xff]  ;;  %v9884_v30 = vcombine.low %v595_v15, %v599_v17 }
 0x172   :  { %7845 = vmatprep.subr.bf16.mxu0 %v9709_v27  ;;  %v603_v27 = vld [vmem:[#allocation5 + $0xf00] sm:$0xff] }
 0x173   :  { %7885 = vmatpush1.bf16.msra.mxu1 %v9828_v25  ;;  %v2339_v36 = vpop.f32.mrb[0].mxu0  ;;  %v479_v25 = vld [vmem:[#allocation5 + $0xb20] sm:$0xff] }
 0x174   :  { %7886 = vmatprep.subr.bf16.mxu1 %v9837_v28  ;;  %v10736_v40 = vadd.f32 %v10719_v23, %v2339_v36  ;;  %v2341_v41 = vpop.f32.mrb[1].mxu0  ;;  %v571_v23 = vld [vmem:[#allocation5 + $0xe00] sm:$0xff]  ;;  %v9765_v31 = vcombine.high %v475_v24, %v479_v25 }
 0x175   :  { %v10739_v45 = vadd.f32 %v10721_v26, %v2341_v41  ;;  %v2343_v48 = vpop.f32.mrb[2].mxu0  ;;  %7846 = vmatpush1.bf16.msra.mxu0 %v9708_v33  ;;  %v9852_v26 = vcombine.low %v563_v42, %v567_v44  ;;  %v9861_v57 = vcombine.high %v571_v23, %v575_v54  ;;  %v9860_v2 = vcombine.low %v571_v23, %v575_v54  ;;  %v607_v28 = vld [vmem:[#allocation5 + $0xf20] sm:$0xff] }
 0x176   :  { %v2344_v50 = vpop.f32.mrb[3].mxu0  ;;  %7847 = vmatprep.subr.bf16.mxu0 %v9717_v35  ;;  %v9893_v32 = vcombine.high %v603_v27, %v607_v28  ;;  %v483_v33 = vld [vmem:[#allocation5 + $0xb40] sm:$0xff]  ;;  %v9892_v38 = vcombine.low %v603_v27, %v607_v28  ;;  %v10747_v27 = vpack.c.bf16 %v97_v14, %v97_v14 }
 0x177   :  { %7887 = vmatpush1.bf16.msra.mxu1 %v9836_v34  ;;  %v487_v34 = vld [vmem:[#allocation5 + $0xb60] sm:$0xff] }
 0x178   :  { %7888 = vmatprep.subr.bf16.mxu1 %v9845_v37  ;;  %v611_v35 = vld [vmem:[#allocation5 + $0xf40] sm:$0xff]  ;;  %v9764_v37 = vcombine.low %v475_v24, %v479_v25  ;;  %v9773_v39 = vcombine.high %v483_v33, %v487_v34  ;;  %v9772_v50 = vcombine.low %v483_v33, %v487_v34  ;;  %v100_v25 = vld [vmem:[#allocation3 + $0x48] sm:$0xff] }
 0x179   :  { %7848 = vmatpush1.bf16.msra.mxu0 %v9716_v49  ;;  %v615_v36 = vld [vmem:[#allocation5 + $0xf60] sm:$0xff] }
 0x17a   :  { %7849 = vmatprep.subr.bf16.mxu0 %v9725_v53  ;;  %v9901_v41 = vcombine.high %v611_v35, %v615_v36  ;;  %v491_v42 = vld [vmem:[#allocation5 + $0xb80] sm:$0xff] }
 0x17b   :  { %7889 = vmatpush1.bf16.msra.mxu1 %v9844_v52  ;;  %v495_v44 = vld [vmem:[#allocation5 + $0xba0] sm:$0xff]  ;;  %v9900_v52 = vcombine.low %v611_v35, %v615_v36  ;;  %v10749_v35 = vpack.c.bf16 %v100_v25, %v100_v25 }
 0x17c   :  { %7890 = vmatprep.subr.bf16.mxu1 %v9853_v16  ;;  %v619_v48 = vld [vmem:[#allocation5 + $0xf80] sm:$0xff]  ;;  %v9781_v53 = vcombine.high %v491_v42, %v495_v44  ;;  %v9780_v62 = vcombine.low %v491_v42, %v495_v44 }
 0x17d   :  { %7850 = vmatpush1.bf16.msra.mxu0 %v9724_v55  ;;  %v623_v49 = vld [vmem:[#allocation5 + $0xfa0] sm:$0xff] }
 0x17e   :  { %7851 = vmatprep.subr.bf16.mxu0 %v9733_v56  ;;  %v9909_v1 = vcombine.high %v619_v48, %v623_v49  ;;  %v499_v19 = vld [vmem:[#allocation5 + $0xbc0] sm:$0xff] }
 0x17f   :  { %7891 = vmatpush1.bf16.msra.mxu1 %v9852_v26  ;;  %v503_v23 = vld [vmem:[#allocation5 + $0xbe0] sm:$0xff] }
 0x180   :  { %7892 = vmatprep.subr.bf16.mxu1 %v9861_v57  ;;  %v627_v26 = vld [vmem:[#allocation5 + $0xfc0] sm:$0xff] }
 0x181   :  { %7852 = vmatpush1.bf16.msra.mxu0 %v9732_v0  ;;  %v631_v56 = vld [vmem:[#allocation5 + $0xfe0] sm:$0xff] }
 0x182   :  { %7853 = vmatprep.subr.bf16.mxu0 %v9741_v3  ;;  %v9908_v3 = vcombine.low %v619_v48, %v623_v49  ;;  %v9917_v6 = vcombine.high %v627_v26, %v631_v56  ;;  %v635_v7 = vld [vmem:[#allocation5 + $0x1000] sm:$0xff]  ;;  %v9916_v13 = vcombine.low %v627_v26, %v631_v56 }
 0x183   :  { %7893 = vmatpush1.bf16.msra.mxu1 %v9860_v2  ;;  %v639_v8 = vld [vmem:[#allocation5 + $0x1020] sm:$0xff] }
 0x184   :  { %7894 = vmatprep.subr.bf16.mxu1 %v9869_v4  ;;  %v9789_v4 = vcombine.high %v499_v19, %v503_v23  ;;  %v9925_v15 = vcombine.high %v635_v7, %v639_v8  ;;  %v775_v24 = vld [vmem:[#allocation5 + $0x1460] sm:$0xff]  ;;  %v9924_v28 = vcombine.low %v635_v7, %v639_v8 }
 0x185   :  { %7854 = vmatpush1.bf16.msra.mxu0 %v9740_v9  ;;  %v763_v9 = vld [vmem:[#allocation5 + $0x1400] sm:$0xff] }
 0x186   :  { %7855 = vmatprep.subr.bf16.mxu0 %v9749_v11  ;;  %v9788_v11 = vcombine.low %v499_v19, %v503_v23  ;;  %v651_v33 = vld [vmem:[#allocation5 + $0x1080] sm:$0xff] }
 0x187   :  { %7895 = vmatpush1.bf16.msra.mxu1 %v9868_v10  ;;  %v767_v10 = vld [vmem:[#allocation5 + $0x1420] sm:$0xff] }
 0x188   :  { %7896 = vmatprep.subr.bf16.mxu1 %v9877_v12  ;;  %v95_v12 = vld [vmem:[#allocation3 + $0x20] sm:$0xff]  ;;  %v10053_v17 = vcombine.high %v763_v9, %v767_v10 }
 0x189   :  { %7856 = vmatpush1.bf16.msra.mxu0 %v9748_v18  ;;  %v643_v18 = vld [vmem:[#allocation5 + $0x1040] sm:$0xff] }
 0x18a   :  { %7857 = vmatprep.subr.bf16.mxu0 %v9757_v21  ;;  %v10745_v21 = vpack.c.bf16 %v95_v12, %v95_v12  ;;  %v655_v34 = vld [vmem:[#allocation5 + $0x10a0] sm:$0xff] }
 0x18b   :  { %7897 = vmatpush1.bf16.msra.mxu1 %v9876_v20  ;;  %v647_v20 = vld [vmem:[#allocation5 + $0x1060] sm:$0xff]  ;;  %v9941_v42 = vcombine.high %v651_v33, %v655_v34 }
 0x18c   :  { %7898 = vmatprep.subr.bf16.mxu1 %v9885_v22  ;;  %v771_v22 = vld [vmem:[#allocation5 + $0x1440] sm:$0xff] }
 0x18d   :  { %7858 = vmatpush1.bf16.msra.mxu0 %v9756_v29  ;;  %v102_v29 = vld [vmem:[#allocation3 + $0x58] sm:$0xff]  ;;  %v779_v36 = vld [vmem:[#allocation5 + $0x1480] sm:$0xff] }
 0x18e   :  { %7859 = vmatprep.subr.bf16.mxu0 %v9765_v31  ;;  %v9933_v31 = vcombine.high %v643_v18, %v647_v20  ;;  %v659_v48 = vld [vmem:[#allocation5 + $0x10c0] sm:$0xff] }
 0x18f   :  { %7899 = vmatpush1.bf16.msra.mxu1 %v9884_v30  ;;  %v10052_v30 = vcombine.low %v763_v9, %v767_v10  ;;  %v663_v49 = vld [vmem:[#allocation5 + $0x10e0] sm:$0xff] }
 0x190   :  { %7900 = vmatprep.subr.bf16.mxu1 %v9893_v32  ;;  %v10061_v32 = vcombine.high %v771_v22, %v775_v24  ;;  %v667_v23 = vld [vmem:[#allocation5 + $0x1100] sm:$0xff]  ;;  %v9948_v56 = vcombine.low %v659_v48, %v663_v49 }
 0x191   :  { %7860 = vmatpush1.bf16.msra.mxu0 %v9764_v37  ;;  %v783_v37 = vld [vmem:[#allocation5 + $0x14a0] sm:$0xff] }
 0x192   :  { %7861 = vmatprep.subr.bf16.mxu0 %v9773_v39  ;;  %v9932_v39 = vcombine.low %v643_v18, %v647_v20  ;;  %v10069_v44 = vcombine.high %v779_v36, %v783_v37  ;;  %v799_v26 = vld [vmem:[#allocation5 + $0x1520] sm:$0xff] }
 0x193   :  { %7901 = vmatpush1.bf16.msra.mxu1 %v9892_v38  ;;  %v2462_v16 = vpop.f32.mrb[4].mxu0  ;;  %v10752_v38 = vpack.c.bf16 %v102_v29, %v102_v29  ;;  %v683_v9 = vld [vmem:[#allocation5 + $0x1180] sm:$0xff] }
 0x194   :  { %7902 = vmatprep.subr.bf16.mxu1 %v9901_v41  ;;  %v2464_v55 = vpop.f32.mrb[5].mxu0  ;;  %v10060_v41 = vcombine.low %v771_v22, %v775_v24  ;;  %v687_v10 = vld [vmem:[#allocation5 + $0x11a0] sm:$0xff] }
 0x195   :  { %v2421_v54 = vpop.f32.mrb[4].mxu1  ;;  %v2466_v61 = vpop.f32.mrb[6].mxu0  ;;  %7862 = vmatpush1.bf16.msra.mxu0 %v9772_v50  ;;  %v787_v50 = vld [vmem:[#allocation5 + $0x14c0] sm:$0xff]  ;;  %v9972_v29 = vcombine.low %v683_v9, %v687_v10 }
 0x196   :  { %v10741_v57 = vadd.f32 %v2462_v16, %v2421_v54  ;;  %v2423_v60 = vpop.f32.mrb[5].mxu1  ;;  %v2467_v2 = vpop.f32.mrb[7].mxu0  ;;  %7863 = vmatprep.subr.bf16.mxu0 %v9781_v53  ;;  %v9940_v53 = vcombine.low %v651_v33, %v655_v34  ;;  %v10068_v16 = vcombine.low %v779_v36, %v783_v37  ;;  %v671_v54 = vld [vmem:[#allocation5 + $0x1120] sm:$0xff] }
 0x197   :  { %v10743_v63 = vadd.f32 %v2464_v55, %v2423_v60  ;;  %v2425_v0 = vpop.f32.mrb[6].mxu1  ;;  %7903 = vmatpush1.bf16.msra.mxu1 %v9900_v52  ;;  %v791_v52 = vld [vmem:[#allocation5 + $0x14e0] sm:$0xff]  ;;  %v9957_v61 = vcombine.high %v667_v23, %v671_v54 }
 0x198   :  { %v2426_v5 = vpop.f32.mrb[7].mxu1  ;;  %7904 = vmatprep.subr.bf16.mxu1 %v9909_v1  ;;  %v9949_v1 = vcombine.high %v659_v48, %v663_v49  ;;  %v10077_v19 = vcombine.high %v787_v50, %v791_v52  ;;  %v795_v55 = vld [vmem:[#allocation5 + $0x1500] sm:$0xff]  ;;  %v10076_v60 = vcombine.low %v787_v50, %v791_v52 }
 0x199   :  { %7864 = vmatpush1.bf16.msra.mxu0 %v9780_v62  ;;  %v10085_v62 = vcombine.high %v795_v55, %v799_v26  ;;  %v675_v0 = vld [vmem:[#allocation5 + $0x1140] sm:$0xff]  ;;  %v9956_v5 = vcombine.low %v667_v23, %v671_v54 }
 0x19a   :  { %7865 = vmatprep.subr.bf16.mxu0 %v9789_v4  ;;  %v679_v2 = vld [vmem:[#allocation5 + $0x1160] sm:$0xff] }
 0x19b   :  { %7905 = vmatpush1.bf16.msra.mxu1 %v9908_v3  ;;  %v803_v3 = vld [vmem:[#allocation5 + $0x1540] sm:$0xff]  ;;  %v9965_v7 = vcombine.high %v675_v0, %v679_v2 }
 0x19c   :  { %7906 = vmatprep.subr.bf16.mxu1 %v9917_v6  ;;  %v807_v4 = vld [vmem:[#allocation5 + $0x1560] sm:$0xff]  ;;  %v10084_v6 = vcombine.low %v795_v55, %v799_v26 }
 0x19d   :  { %7866 = vmatpush1.bf16.msra.mxu0 %v9788_v11  ;;  %v10093_v8 = vcombine.high %v803_v3, %v807_v4  ;;  %v811_v11 = vld [vmem:[#allocation5 + $0x1580] sm:$0xff]  ;;  %v10092_v14 = vcombine.low %v803_v3, %v807_v4 }
 0x19e   :  { %7917 = vmatprep.subr.bf16.mxu0 %v9925_v15  ;;  %v815_v12 = vld [vmem:[#allocation5 + $0x15a0] sm:$0xff]  ;;  %v9973_v15 = vcombine.high %v683_v9, %v687_v10 }
 0x19f   :  { %7907 = vmatpush1.bf16.msra.mxu1 %v9916_v13  ;;  %v9964_v13 = vcombine.low %v675_v0, %v679_v2  ;;  %v691_v18 = vld [vmem:[#allocation5 + $0x11c0] sm:$0xff] }
 0x1a0   :  { %7958 = vmatprep.subr.bf16.mxu1 %v10053_v17  ;;  %7868 = vmatmul.mubr.bf16.vlgmr.msra.gmra.mrb[20].mxu0 %v10745_v21  ;;  %v10101_v17 = vcombine.high %v811_v11, %v815_v12  ;;  %v695_v20 = vld [vmem:[#allocation5 + $0x11e0] sm:$0xff] }
 0x1a1   :  { %7918 = vmatpush1.bf16.msra.mxu0 %v9924_v28  ;;  %7949 = vmatprep.mubr.bf16.mxu0 %v10749_v35  ;;  %v819_v24 = vld [vmem:[#allocation5 + $0x15c0] sm:$0xff] }
 0x1a2   :  { %7909 = vmatmul.mubr.bf16.vlgmr.msra.gmra.mrb[20].mxu1 %v10747_v27  ;;  %7919 = vmatprep.subr.bf16.mxu0 %v9933_v31  ;;  %v823_v25 = vld [vmem:[#allocation5 + $0x15e0] sm:$0xff]  ;;  %v10100_v31 = vcombine.low %v811_v11, %v815_v12 }
 0x1a3   :  { %7959 = vmatpush1.bf16.msra.mxu1 %v10052_v30  ;;  %7990 = vmatprep.mubr.bf16.mxu1 %v10752_v38  ;;  %v10109_v34 = vcombine.high %v819_v24, %v823_v25  ;;  %v699_v36 = vld [vmem:[#allocation5 + $0x1200] sm:$0xff] }
 0x1a4   :  { %7960 = vmatprep.subr.bf16.mxu1 %v10061_v32  ;;  %v9981_v32 = vcombine.high %v691_v18, %v695_v20  ;;  %v703_v37 = vld [vmem:[#allocation5 + $0x1220] sm:$0xff] }
 0x1a5   :  { %7920 = vmatpush1.bf16.msra.mxu0 %v9932_v39  ;;  %v827_v39 = vld [vmem:[#allocation5 + $0x1600] sm:$0xff]  ;;  %v9989_v48 = vcombine.high %v699_v36, %v703_v37 }
 0x1a6   :  { %7921 = vmatprep.subr.bf16.mxu0 %v9941_v42  ;;  %v9980_v42 = vcombine.low %v691_v18, %v695_v20  ;;  %v707_v50 = vld [vmem:[#allocation5 + $0x1240] sm:$0xff] }
 0x1a7   :  { %7961 = vmatpush1.bf16.msra.mxu1 %v10060_v41  ;;  %v831_v41 = vld [vmem:[#allocation5 + $0x1620] sm:$0xff] }
 0x1a8   :  { %7962 = vmatprep.subr.bf16.mxu1 %v10069_v44  ;;  %v10108_v44 = vcombine.low %v819_v24, %v823_v25  ;;  %v10117_v49 = vcombine.high %v827_v39, %v831_v41  ;;  %v711_v52 = vld [vmem:[#allocation5 + $0x1260] sm:$0xff] }
 0x1a9   :  { %7922 = vmatpush1.bf16.msra.mxu0 %v9940_v53  ;;  %v835_v53 = vld [vmem:[#allocation5 + $0x1640] sm:$0xff]  ;;  %v9997_v23 = vcombine.high %v707_v50, %v711_v52 }
 0x1aa   :  { %7923 = vmatprep.subr.bf16.mxu0 %v9949_v1  ;;  %v9988_v1 = vcombine.low %v699_v36, %v703_v37  ;;  %v715_v55 = vld [vmem:[#allocation5 + $0x1280] sm:$0xff] }
 0x1ab   :  { %7963 = vmatpush1.bf16.msra.mxu1 %v10068_v16  ;;  %v839_v16 = vld [vmem:[#allocation5 + $0x1660] sm:$0xff] }
 0x1ac   :  { %7964 = vmatprep.subr.bf16.mxu1 %v10077_v19  ;;  %v10116_v19 = vcombine.low %v827_v39, %v831_v41  ;;  %v10125_v54 = vcombine.high %v835_v53, %v839_v16  ;;  %v719_v26 = vld [vmem:[#allocation5 + $0x12a0] sm:$0xff] }
 0x1ad   :  { %7924 = vmatpush1.bf16.msra.mxu0 %v9948_v56  ;;  %v843_v56 = vld [vmem:[#allocation5 + $0x1680] sm:$0xff]  ;;  %v10005_v0 = vcombine.high %v715_v55, %v719_v26 }
 0x1ae   :  { %7925 = vmatprep.subr.bf16.mxu0 %v9957_v61  ;;  %v9996_v61 = vcombine.low %v707_v50, %v711_v52  ;;  %v723_v3 = vld [vmem:[#allocation5 + $0x12c0] sm:$0xff] }
 0x1af   :  { %7965 = vmatpush1.bf16.msra.mxu1 %v10076_v60  ;;  %v847_v60 = vld [vmem:[#allocation5 + $0x16a0] sm:$0xff] }
 0x1b0   :  { %7966 = vmatprep.subr.bf16.mxu1 %v10085_v62  ;;  %v10124_v62 = vcombine.low %v835_v53, %v839_v16  ;;  %v10133_v2 = vcombine.high %v843_v56, %v847_v60  ;;  %v727_v4 = vld [vmem:[#allocation5 + $0x12e0] sm:$0xff] }
 0x1b1   :  { %7926 = vmatpush1.bf16.msra.mxu0 %v9956_v5  ;;  %v851_v5 = vld [vmem:[#allocation5 + $0x16c0] sm:$0xff]  ;;  %v10013_v9 = vcombine.high %v723_v3, %v727_v4 }
 0x1b2   :  { %7927 = vmatprep.subr.bf16.mxu0 %v9965_v7  ;;  %v10004_v7 = vcombine.low %v715_v55, %v719_v26  ;;  %v731_v11 = vld [vmem:[#allocation5 + $0x1300] sm:$0xff] }
 0x1b3   :  { %7967 = vmatpush1.bf16.msra.mxu1 %v10084_v6  ;;  %v855_v6 = vld [vmem:[#allocation5 + $0x16e0] sm:$0xff] }
 0x1b4   :  { %7968 = vmatprep.subr.bf16.mxu1 %v10093_v8  ;;  %v10132_v8 = vcombine.low %v843_v56, %v847_v60  ;;  %v10141_v10 = vcombine.high %v851_v5, %v855_v6  ;;  %v735_v12 = vld [vmem:[#allocation5 + $0x1320] sm:$0xff] }
 0x1b5   :  { %v10757_v22 = vpop.f32.mrb[8].mxu1  ;;  %7928 = vmatpush1.bf16.msra.mxu0 %v9964_v13  ;;  %v859_v13 = vld [vmem:[#allocation5 + $0x1700] sm:$0xff]  ;;  %v10021_v18 = vcombine.high %v731_v11, %v735_v12 }
 0x1b6   :  { %v10759_v28 = vpop.f32.mrb[9].mxu1  ;;  %7929 = vmatprep.subr.bf16.mxu0 %v9973_v15  ;;  %v10012_v15 = vcombine.low %v723_v3, %v727_v4  ;;  %v739_v24 = vld [vmem:[#allocation5 + $0x1340] sm:$0xff] }
 0x1b7   :  { %v2548_v30 = vpop.f32.mrb[10].mxu1  ;;  %7969 = vmatpush1.bf16.msra.mxu1 %v10092_v14  ;;  %v863_v14 = vld [vmem:[#allocation5 + $0x1720] sm:$0xff] }
 0x1b8   :  { %v2549_v33 = vpop.f32.mrb[11].mxu1  ;;  %7970 = vmatprep.subr.bf16.mxu1 %v10101_v17  ;;  %v10140_v17 = vcombine.low %v851_v5, %v855_v6  ;;  %v10149_v20 = vcombine.high %v859_v13, %v863_v14  ;;  %v743_v25 = vld [vmem:[#allocation5 + $0x1360] sm:$0xff]  ;;  %v101_v6 = vld [vmem:[#allocation3 + $0x50] sm:$0xff] }
 0x1b9   :  { %7930 = vmatpush1.bf16.msra.mxu0 %v9972_v29  ;;  %v867_v29 = vld [vmem:[#allocation5 + $0x1740] sm:$0xff]  ;;  %v10029_v33 = vcombine.high %v739_v24, %v743_v25 }
 0x1ba   :  { %7931 = vmatprep.subr.bf16.mxu0 %v9981_v32  ;;  %v871_v30 = vld [vmem:[#allocation5 + $0x1760] sm:$0xff]  ;;  %v10148_v32 = vcombine.low %v859_v13, %v863_v14  ;;  %v104_v14 = vld [vmem:[#allocation3 + $0x68] sm:$0xff] }
 0x1bb   :  { %7971 = vmatpush1.bf16.msra.mxu1 %v10100_v31  ;;  %v10020_v31 = vcombine.low %v731_v11, %v735_v12  ;;  %v747_v36 = vld [vmem:[#allocation5 + $0x1380] sm:$0xff] }
 0x1bc   :  { %7972 = vmatprep.subr.bf16.mxu1 %v10109_v34  ;;  %v10157_v34 = vcombine.high %v867_v29, %v871_v30  ;;  %v751_v37 = vld [vmem:[#allocation5 + $0x13a0] sm:$0xff] }
 0x1bd   :  { %7932 = vmatpush1.bf16.msra.mxu0 %v9980_v42  ;;  %v875_v39 = vld [vmem:[#allocation5 + $0x1780] sm:$0xff]  ;;  %v10028_v42 = vcombine.low %v739_v24, %v743_v25  ;;  %v10036_v26 = vcombine.low %v747_v36, %v751_v37 }
 0x1be   :  { %7933 = vmatprep.subr.bf16.mxu0 %v9989_v48  ;;  %v879_v41 = vld [vmem:[#allocation5 + $0x17a0] sm:$0xff]  ;;  %v10037_v48 = vcombine.high %v747_v36, %v751_v37 }
 0x1bf   :  { %7973 = vmatpush1.bf16.msra.mxu1 %v10108_v44  ;;  %v10156_v44 = vcombine.low %v867_v29, %v871_v30  ;;  %v10165_v50 = vcombine.high %v875_v39, %v879_v41  ;;  %v755_v52 = vld [vmem:[#allocation5 + $0x13c0] sm:$0xff]  ;;  %v10164_v60 = vcombine.low %v875_v39, %v879_v41 }
 0x1c0   :  { %7974 = vmatprep.subr.bf16.mxu1 %v10117_v49  ;;  %v759_v53 = vld [vmem:[#allocation5 + $0x13e0] sm:$0xff] }
 0x1c1   :  { %7934 = vmatpush1.bf16.msra.mxu0 %v9988_v1  ;;  %v1023_v3 = vld [vmem:[#allocation5 + $0x1c20] sm:$0xff]  ;;  %v10044_v4 = vcombine.low %v755_v52, %v759_v53 }
 0x1c2   :  { %7935 = vmatprep.subr.bf16.mxu0 %v9997_v23  ;;  %v887_v23 = vld [vmem:[#allocation5 + $0x17e0] sm:$0xff] }
 0x1c3   :  { %7975 = vmatpush1.bf16.msra.mxu1 %v10116_v19  ;;  %v883_v19 = vld [vmem:[#allocation5 + $0x17c0] sm:$0xff] }
 0x1c4   :  { %7976 = vmatprep.subr.bf16.mxu1 %v10125_v54  ;;  %v99_v5 = vld [vmem:[#allocation3 + $0x40] sm:$0xff] }
 0x1c5   :  { %7936 = vmatpush1.bf16.msra.mxu0 %v9996_v61  ;;  %v10045_v61 = vcombine.high %v755_v52, %v759_v53  ;;  %v10767_v11 = vpack.c.bf16 %v99_v5, %v99_v5  ;;  %v1027_v12 = vld [vmem:[#allocation5 + $0x1c40] sm:$0xff] }
 0x1c6   :  { %7937 = vmatprep.subr.bf16.mxu0 %v10005_v0  ;;  %v891_v0 = vld [vmem:[#allocation5 + $0x1800] sm:$0xff] }
 0x1c7   :  { %7977 = vmatpush1.bf16.msra.mxu1 %v10124_v62  ;;  %v10173_v62 = vcombine.high %v883_v19, %v887_v23  ;;  %v1031_v13 = vld [vmem:[#allocation5 + $0x1c60] sm:$0xff] }
 0x1c8   :  { %7978 = vmatprep.subr.bf16.mxu1 %v10133_v2  ;;  %v895_v2 = vld [vmem:[#allocation5 + $0x1820] sm:$0xff]  ;;  %v10317_v25 = vcombine.high %v1027_v12, %v1031_v13  ;;  %v10316_v37 = vcombine.low %v1027_v12, %v1031_v13 }
 0x1c9   :  { %7938 = vmatpush1.bf16.msra.mxu0 %v10004_v7  ;;  %v10181_v7 = vcombine.high %v891_v0, %v895_v2  ;;  %v907_v29 = vld [vmem:[#allocation5 + $0x1880] sm:$0xff] }
 0x1ca   :  { %7939 = vmatprep.subr.bf16.mxu0 %v10013_v9  ;;  %v899_v9 = vld [vmem:[#allocation5 + $0x1840] sm:$0xff] }
 0x1cb   :  { %7979 = vmatpush1.bf16.msra.mxu1 %v10132_v8  ;;  %v911_v30 = vld [vmem:[#allocation5 + $0x18a0] sm:$0xff] }
 0x1cc   :  { %7980 = vmatprep.subr.bf16.mxu1 %v10141_v10  ;;  %v903_v10 = vld [vmem:[#allocation5 + $0x1860] sm:$0xff]  ;;  %v10197_v39 = vcombine.high %v907_v29, %v911_v30 }
 0x1cd   :  { %7940 = vmatpush1.bf16.msra.mxu0 %v10012_v15  ;;  %v10769_v15 = vpack.c.bf16 %v101_v6, %v101_v6  ;;  %v10189_v24 = vcombine.high %v899_v9, %v903_v10  ;;  %v10188_v36 = vcombine.low %v899_v9, %v903_v10  ;;  %v1067_v9 = vld [vmem:[#allocation5 + $0x1d80] sm:$0xff] }
 0x1ce   :  { %7941 = vmatprep.subr.bf16.mxu0 %v10021_v18  ;;  %v106_v18 = vld [vmem:[#allocation3 + $0x78] sm:$0xff]  ;;  %v1071_v10 = vld [vmem:[#allocation5 + $0x1da0] sm:$0xff] }
 0x1cf   :  { %7981 = vmatpush1.bf16.msra.mxu1 %v10140_v17  ;;  %v10180_v17 = vcombine.low %v891_v0, %v895_v2  ;;  %v931_v0 = vld [vmem:[#allocation5 + $0x1940] sm:$0xff] }
 0x1d0   :  { %7982 = vmatprep.subr.bf16.mxu1 %v10149_v20  ;;  %v935_v2 = vld [vmem:[#allocation5 + $0x1960] sm:$0xff] }
 0x1d1   :  { %7942 = vmatpush1.bf16.msra.mxu0 %v10020_v31  ;;  %v10771_v31 = vpack.c.bf16 %v104_v14, %v104_v14  ;;  %v10220_v12 = vcombine.low %v931_v0, %v935_v2 }
 0x1d2   :  { %7943 = vmatprep.subr.bf16.mxu0 %v10029_v33  ;;  %v1039_v33 = vld [vmem:[#allocation5 + $0x1ca0] sm:$0xff] }
 0x1d3   :  { %7983 = vmatpush1.bf16.msra.mxu1 %v10148_v32  ;;  %v2503_v49 = vpop.f32.mrb[8].mxu0  ;;  %v1035_v32 = vld [vmem:[#allocation5 + $0x1c80] sm:$0xff] }
 0x1d4   :  { %7984 = vmatprep.subr.bf16.mxu1 %v10157_v34  ;;  %v10762_v16 = vadd.f32 %v10757_v22, %v2503_v49  ;;  %v2505_v1 = vpop.f32.mrb[9].mxu0  ;;  %v1019_v22 = vld [vmem:[#allocation5 + $0x1c00] sm:$0xff]  ;;  %v10774_v34 = vpack.c.bf16 %v106_v18, %v106_v18  ;;  %v10325_v41 = vcombine.high %v1035_v32, %v1039_v33  ;;  %v10324_v52 = vcombine.low %v1035_v32, %v1039_v33 }
 0x1d5   :  { %v10765_v54 = vadd.f32 %v10759_v28, %v2505_v1  ;;  %v2507_v55 = vpop.f32.mrb[10].mxu0  ;;  %7944 = vmatpush1.bf16.msra.mxu0 %v10028_v42  ;;  %v10172_v28 = vcombine.low %v883_v19, %v887_v23  ;;  %v10309_v8 = vcombine.high %v1019_v22, %v1023_v3  ;;  %v10308_v20 = vcombine.low %v1019_v22, %v1023_v3  ;;  %v915_v42 = vld [vmem:[#allocation5 + $0x18c0] sm:$0xff] }
 0x1d6   :  { %v2508_v56 = vpop.f32.mrb[11].mxu0  ;;  %7945 = vmatprep.subr.bf16.mxu0 %v10037_v48  ;;  %v1043_v48 = vld [vmem:[#allocation5 + $0x1cc0] sm:$0xff]  ;;  %v10357_v18 = vcombine.high %v1067_v9, %v1071_v10 }
 0x1d7   :  { %7985 = vmatpush1.bf16.msra.mxu1 %v10156_v44  ;;  %v919_v44 = vld [vmem:[#allocation5 + $0x18e0] sm:$0xff] }
 0x1d8   :  { %7986 = vmatprep.subr.bf16.mxu1 %v10165_v50  ;;  %v1047_v49 = vld [vmem:[#allocation5 + $0x1ce0] sm:$0xff]  ;;  %v10196_v50 = vcombine.low %v907_v29, %v911_v30  ;;  %v10205_v53 = vcombine.high %v915_v42, %v919_v44  ;;  %v10204_v56 = vcombine.low %v915_v42, %v919_v44 }
 0x1d9   :  { %7946 = vmatpush1.bf16.msra.mxu0 %v10036_v26  ;;  %v10333_v1 = vcombine.high %v1043_v48, %v1047_v49  ;;  %v923_v19 = vld [vmem:[#allocation5 + $0x1900] sm:$0xff] }
 0x1da   :  { %7947 = vmatprep.subr.bf16.mxu0 %v10045_v61  ;;  %v927_v23 = vld [vmem:[#allocation5 + $0x1920] sm:$0xff] }
 0x1db   :  { %7987 = vmatpush1.bf16.msra.mxu1 %v10164_v60  ;;  %v1051_v55 = vld [vmem:[#allocation5 + $0x1d00] sm:$0xff]  ;;  %v10332_v60 = vcombine.low %v1043_v48, %v1047_v49  ;;  %v10213_v61 = vcombine.high %v923_v19, %v927_v23  ;;  %v10356_v48 = vcombine.low %v1067_v9, %v1071_v10 }
 0x1dc   :  { %7988 = vmatprep.subr.bf16.mxu1 %v10173_v62  ;;  %v1055_v26 = vld [vmem:[#allocation5 + $0x1d20] sm:$0xff] }
 0x1dd   :  { %7948 = vmatpush1.bf16.msra.mxu0 %v10044_v4  ;;  %v10341_v62 = vcombine.high %v1051_v55, %v1055_v26  ;;  %v1059_v22 = vld [vmem:[#allocation5 + $0x1d40] sm:$0xff]  ;;  %v10212_v4 = vcombine.low %v923_v19, %v927_v23  ;;  %v10340_v5 = vcombine.low %v1051_v55, %v1055_v26 }
 0x1de   :  { %7999 = vmatprep.subr.bf16.mxu0 %v10181_v7  ;;  %v1063_v3 = vld [vmem:[#allocation5 + $0x1d60] sm:$0xff] }
 0x1df   :  { %7989 = vmatpush1.bf16.msra.mxu1 %v10172_v28  ;;  %v10221_v28 = vcombine.high %v931_v0, %v935_v2  ;;  %v10349_v6 = vcombine.high %v1059_v22, %v1063_v3  ;;  %v939_v7 = vld [vmem:[#allocation5 + $0x1980] sm:$0xff]  ;;  %v10348_v13 = vcombine.low %v1059_v22, %v1063_v3 }
 0x1e0   :  { %8040 = vmatprep.subr.bf16.mxu1 %v10309_v8  ;;  %7950 = vmatmul.mubr.bf16.vlgmr.msra.gmra.mrb[24].mxu0 %v10767_v11  ;;  %v943_v8 = vld [vmem:[#allocation5 + $0x19a0] sm:$0xff] }
 0x1e1   :  { %8000 = vmatpush1.bf16.msra.mxu0 %v10180_v17  ;;  %8031 = vmatprep.mubr.bf16.mxu0 %v10771_v31  ;;  %v10229_v14 = vcombine.high %v939_v7, %v943_v8  ;;  %v1075_v30 = vld [vmem:[#allocation5 + $0x1dc0] sm:$0xff] }
 0x1e2   :  { %7991 = vmatmul.mubr.bf16.vlgmr.msra.gmra.mrb[24].mxu1 %v10769_v15  ;;  %8001 = vmatprep.subr.bf16.mxu0 %v10189_v24  ;;  %v951_v24 = vld [vmem:[#allocation5 + $0x19e0] sm:$0xff] }
 0x1e3   :  { %8041 = vmatpush1.bf16.msra.mxu1 %v10308_v20  ;;  %8072 = vmatprep.mubr.bf16.mxu1 %v10774_v34  ;;  %v947_v20 = vld [vmem:[#allocation5 + $0x19c0] sm:$0xff] }
 0x1e4   :  { %8042 = vmatprep.subr.bf16.mxu1 %v10317_v25  ;;  %v1079_v32 = vld [vmem:[#allocation5 + $0x1de0] sm:$0xff]  ;;  %v10237_v49 = vcombine.high %v947_v20, %v951_v24  ;;  %v10236_v55 = vcombine.low %v947_v20, %v951_v24 }
 0x1e5   :  { %8002 = vmatpush1.bf16.msra.mxu0 %v10188_v36  ;;  %v1083_v19 = vld [vmem:[#allocation5 + $0x1e00] sm:$0xff]  ;;  %v10364_v26 = vcombine.low %v1075_v30, %v1079_v32 }
 0x1e6   :  { %8003 = vmatprep.subr.bf16.mxu0 %v10197_v39  ;;  %v10228_v39 = vcombine.low %v939_v7, %v943_v8  ;;  %v1087_v23 = vld [vmem:[#allocation5 + $0x1e20] sm:$0xff] }
 0x1e7   :  { %8043 = vmatpush1.bf16.msra.mxu1 %v10316_v37  ;;  %v1091_v0 = vld [vmem:[#allocation5 + $0x1e40] sm:$0xff]  ;;  %v10372_v3 = vcombine.low %v1083_v19, %v1087_v23 }
 0x1e8   :  { %8044 = vmatprep.subr.bf16.mxu1 %v10325_v41  ;;  %v1095_v2 = vld [vmem:[#allocation5 + $0x1e60] sm:$0xff] }
 0x1e9   :  { %8004 = vmatpush1.bf16.msra.mxu0 %v10196_v50  ;;  %v1099_v7 = vld [vmem:[#allocation5 + $0x1e80] sm:$0xff]  ;;  %v10380_v10 = vcombine.low %v1091_v0, %v1095_v2 }
 0x1ea   :  { %8005 = vmatprep.subr.bf16.mxu0 %v10205_v53  ;;  %v955_v53 = vld [vmem:[#allocation5 + $0x1a00] sm:$0xff] }
 0x1eb   :  { %8045 = vmatpush1.bf16.msra.mxu1 %v10324_v52  ;;  %v10365_v52 = vcombine.high %v1075_v30, %v1079_v32  ;;  %v1103_v8 = vld [vmem:[#allocation5 + $0x1ea0] sm:$0xff] }
 0x1ec   :  { %8046 = vmatprep.subr.bf16.mxu1 %v10333_v1  ;;  %v959_v1 = vld [vmem:[#allocation5 + $0x1a20] sm:$0xff] }
 0x1ed   :  { %8006 = vmatpush1.bf16.msra.mxu0 %v10204_v56  ;;  %v10245_v56 = vcombine.high %v955_v53, %v959_v1  ;;  %v10244_v22 = vcombine.low %v955_v53, %v959_v1  ;;  %v1111_v20 = vld [vmem:[#allocation5 + $0x1ee0] sm:$0xff] }
 0x1ee   :  { %8007 = vmatprep.subr.bf16.mxu0 %v10213_v61  ;;  %v963_v61 = vld [vmem:[#allocation5 + $0x1a40] sm:$0xff] }
 0x1ef   :  { %8047 = vmatpush1.bf16.msra.mxu1 %v10332_v60  ;;  %v10373_v60 = vcombine.high %v1083_v19, %v1087_v23  ;;  %v987_v32 = vld [vmem:[#allocation5 + $0x1b00] sm:$0xff] }
 0x1f0   :  { %8048 = vmatprep.subr.bf16.mxu1 %v10341_v62  ;;  %v967_v62 = vld [vmem:[#allocation5 + $0x1a60] sm:$0xff] }
 0x1f1   :  { %8008 = vmatpush1.bf16.msra.mxu0 %v10212_v4  ;;  %v10253_v4 = vcombine.high %v963_v61, %v967_v62  ;;  %v10252_v9 = vcombine.low %v963_v61, %v967_v62  ;;  %v1123_v53 = vld [vmem:[#allocation5 + $0x1f40] sm:$0xff] }
 0x1f2   :  { %8009 = vmatprep.subr.bf16.mxu0 %v10221_v28  ;;  %v971_v28 = vld [vmem:[#allocation5 + $0x1a80] sm:$0xff] }
 0x1f3   :  { %8049 = vmatpush1.bf16.msra.mxu1 %v10340_v5  ;;  %v2626_v17 = vpop.f32.mrb[12].mxu0  ;;  %v10381_v5 = vcombine.high %v1091_v0, %v1095_v2  ;;  %v1127_v1 = vld [vmem:[#allocation5 + $0x1f60] sm:$0xff] }
 0x1f4   :  { %8050 = vmatprep.subr.bf16.mxu1 %v10349_v6  ;;  %v2628_v29 = vpop.f32.mrb[13].mxu0  ;;  %v975_v6 = vld [vmem:[#allocation5 + $0x1aa0] sm:$0xff]  ;;  %v10412_v2 = vcombine.low %v1123_v53, %v1127_v1 }
 0x1f5   :  { %v2585_v25 = vpop.f32.mrb[12].mxu1  ;;  %v2630_v37 = vpop.f32.mrb[14].mxu0  ;;  %8010 = vmatpush1.bf16.msra.mxu0 %v10220_v12  ;;  %v10261_v12 = vcombine.high %v971_v28, %v975_v6  ;;  %v10260_v24 = vcombine.low %v971_v28, %v975_v6  ;;  %v1131_v61 = vld [vmem:[#allocation5 + $0x1f80] sm:$0xff] }
 0x1f6   :  { %v10779_v33 = vadd.f32 %v2626_v17, %v2585_v25  ;;  %v2587_v36 = vpop.f32.mrb[13].mxu1  ;;  %v2631_v44 = vpop.f32.mrb[15].mxu0  ;;  %8011 = vmatprep.subr.bf16.mxu0 %v10229_v14  ;;  %v979_v14 = vld [vmem:[#allocation5 + $0x1ac0] sm:$0xff]  ;;  %v10388_v25 = vcombine.low %v1099_v7, %v1103_v8 }
 0x1f7   :  { %v10781_v41 = vadd.f32 %v2628_v29, %v2587_v36  ;;  %v2589_v42 = vpop.f32.mrb[14].mxu1  ;;  %8051 = vmatpush1.bf16.msra.mxu1 %v10348_v13  ;;  %v10389_v13 = vcombine.high %v1099_v7, %v1103_v8  ;;  %v983_v17 = vld [vmem:[#allocation5 + $0x1ae0] sm:$0xff] }
 0x1f8   :  { %v2590_v50 = vpop.f32.mrb[15].mxu1  ;;  %8052 = vmatprep.subr.bf16.mxu1 %v10357_v18  ;;  %v1107_v18 = vld [vmem:[#allocation5 + $0x1ec0] sm:$0xff]  ;;  %v10269_v29 = vcombine.high %v979_v14, %v983_v17  ;;  %v10268_v42 = vcombine.low %v979_v14, %v983_v17  ;;  %v252_v14 = vld [vmem:[#allocation5 + $0x408] sm:$0xff] }
 0x1f9   :  { %8012 = vmatpush1.bf16.msra.mxu0 %v10228_v39  ;;  %v10397_v30 = vcombine.high %v1107_v18, %v1111_v20  ;;  %v991_v36 = vld [vmem:[#allocation5 + $0x1b20] sm:$0xff]  ;;  %v10396_v44 = vcombine.low %v1107_v18, %v1111_v20  ;;  %v256_v17 = vld [vmem:[#allocation5 + $0x428] sm:$0xff] }
 0x1fa   :  { %8013 = vmatprep.subr.bf16.mxu0 %v10237_v49  ;;  %v1115_v37 = vld [vmem:[#allocation5 + $0x1f00] sm:$0xff]  ;;  %v10276_v19 = vcombine.low %v987_v32, %v991_v36 }
 0x1fb   :  { %8053 = vmatpush1.bf16.msra.mxu1 %v10356_v48  ;;  %v1119_v39 = vld [vmem:[#allocation5 + $0x1f20] sm:$0xff]  ;;  %v10277_v48 = vcombine.high %v987_v32, %v991_v36  ;;  %v132_v32 = vld [vmem:[#allocation5 + $0x48] sm:$0xff] }
 0x1fc   :  { %8054 = vmatprep.subr.bf16.mxu1 %v10365_v52  ;;  %v10405_v49 = vcombine.high %v1115_v37, %v1119_v39  ;;  %v995_v50 = vld [vmem:[#allocation5 + $0x1b40] sm:$0xff]  ;;  %v10404_v23 = vcombine.low %v1115_v37, %v1119_v39  ;;  %v136_v36 = vld [vmem:[#allocation5 + $0x68] sm:$0xff] }
 0x1fd   :  { %8014 = vmatpush1.bf16.msra.mxu0 %v10236_v55  ;;  %v999_v52 = vld [vmem:[#allocation5 + $0x1b60] sm:$0xff]  ;;  %v260_v39 = vld [vmem:[#allocation5 + $0x448] sm:$0xff] }
 0x1fe   :  { %8015 = vmatprep.subr.bf16.mxu0 %v10245_v56  ;;  %v10285_v55 = vcombine.high %v995_v50, %v999_v52  ;;  %v1003_v56 = vld [vmem:[#allocation5 + $0x1b80] sm:$0xff]  ;;  %v10284_v0 = vcombine.low %v995_v50, %v999_v52  ;;  %v9423_v50 = vcombine.high %v132_v32, %v136_v36 }
 0x1ff   :  { %8055 = vmatpush1.bf16.msra.mxu1 %v10364_v26  ;;  %v10413_v26 = vcombine.high %v1123_v53, %v1127_v1  ;;  %v1135_v62 = vld [vmem:[#allocation5 + $0x1fa0] sm:$0xff]  ;;  %v140_v53 = vld [vmem:[#allocation5 + $0x88] sm:$0xff] }
 0x200   :  { %8056 = vmatprep.subr.bf16.mxu1 %v10373_v60  ;;  %v1007_v60 = vld [vmem:[#allocation5 + $0x1ba0] sm:$0xff]  ;;  %v10420_v8 = vcombine.low %v1131_v61, %v1135_v62  ;;  %v144_v1 = vld [vmem:[#allocation5 + $0xa8] sm:$0xff] }
 0x201   :  { %8016 = vmatpush1.bf16.msra.mxu0 %v10244_v22  ;;  %v10293_v22 = vcombine.high %v1003_v56, %v1007_v60  ;;  %v1139_v28 = vld [vmem:[#allocation5 + $0x1fc0] sm:$0xff]  ;;  %v10292_v7 = vcombine.low %v1003_v56, %v1007_v60  ;;  %v9431_v56 = vcombine.high %v140_v53, %v144_v1 }
 0x202   :  { %8017 = vmatprep.subr.bf16.mxu0 %v10253_v4  ;;  %v1011_v4 = vld [vmem:[#allocation5 + $0x1bc0] sm:$0xff] }
 0x203   :  { %8057 = vmatpush1.bf16.msra.mxu1 %v10372_v3  ;;  %v10421_v3 = vcombine.high %v1131_v61, %v1135_v62  ;;  %v1143_v6 = vld [vmem:[#allocation5 + $0x1fe0] sm:$0xff]  ;;  %v148_v61 = vld [vmem:[#allocation5 + $0xc8] sm:$0xff] }
 0x204   :  { %8058 = vmatprep.subr.bf16.mxu1 %v10381_v5  ;;  %v1015_v5 = vld [vmem:[#allocation5 + $0x1be0] sm:$0xff]  ;;  %v152_v62 = vld [vmem:[#allocation5 + $0xe8] sm:$0xff] }
 0x205   :  { %8018 = vmatpush1.bf16.msra.mxu0 %v10252_v9  ;;  %v10301_v9 = vcombine.high %v1011_v4, %v1015_v5  ;;  %v10300_v18 = vcombine.low %v1011_v4, %v1015_v5  ;;  %v103_v20 = vld [vmem:[#allocation3 + $0x60] sm:$0xff]  ;;  %v9439_v4 = vcombine.high %v148_v61, %v152_v62 }
 0x206   :  { %8019 = vmatprep.subr.bf16.mxu0 %v10261_v12  ;;  %v124_v12 = vld [vmem:[#allocation5 + $0x8] sm:$0xff]  ;;  %v10783_v37 = vpack.c.bf16 %v103_v20, %v103_v20 }
 0x207   :  { %8059 = vmatpush1.bf16.msra.mxu1 %v10380_v10  ;;  %v10429_v10 = vcombine.high %v1139_v28, %v1143_v6  ;;  %v296_v20 = vld [vmem:[#allocation5 + $0x568] sm:$0xff] }
 0x208   :  { %8060 = vmatprep.subr.bf16.mxu1 %v10389_v13  ;;  %v128_v13 = vld [vmem:[#allocation5 + $0x28] sm:$0xff] }
 0x209   :  { %8020 = vmatpush1.bf16.msra.mxu0 %v10260_v24  ;;  %v10428_v24 = vcombine.low %v1139_v28, %v1143_v6  ;;  %v156_v28 = vld [vmem:[#allocation5 + $0x108] sm:$0xff] }
 0x20a   :  { %8021 = vmatprep.subr.bf16.mxu0 %v10269_v29  ;;  %v9415_v29 = vcombine.high %v124_v12, %v128_v13  ;;  %v160_v6 = vld [vmem:[#allocation5 + $0x128] sm:$0xff] }
 0x20b   :  { %8061 = vmatpush1.bf16.msra.mxu1 %v10388_v25  ;;  %v105_v25 = vld [vmem:[#allocation3 + $0x70] sm:$0xff] }
 0x20c   :  { %8062 = vmatprep.subr.bf16.mxu1 %v10397_v30  ;;  %v9543_v30 = vcombine.high %v252_v14, %v256_v17 }
 0x20d   :  { %8022 = vmatpush1.bf16.msra.mxu0 %v10268_v42  ;;  %v264_v42 = vld [vmem:[#allocation5 + $0x468] sm:$0xff] }
 0x20e   :  { %8023 = vmatprep.subr.bf16.mxu0 %v10277_v48  ;;  %v9414_v48 = vcombine.low %v124_v12, %v128_v13  ;;  %v9551_v52 = vcombine.high %v260_v39, %v264_v42  ;;  %v9447_v12 = vcombine.high %v156_v28, %v160_v6 }
 0x20f   :  { %8063 = vmatpush1.bf16.msra.mxu1 %v10396_v44  ;;  %v10785_v44 = vpack.c.bf16 %v105_v25, %v105_v25 }
 0x210   :  { %8064 = vmatprep.subr.bf16.mxu1 %v10405_v49  ;;  %v9542_v49 = vcombine.low %v252_v14, %v256_v17  ;;  %v164_v14 = vld [vmem:[#allocation5 + $0x148] sm:$0xff] }
 0x211   :  { %8024 = vmatpush1.bf16.msra.mxu0 %v10276_v19  ;;  %v268_v19 = vld [vmem:[#allocation5 + $0x488] sm:$0xff] }
 0x212   :  { %8025 = vmatprep.subr.bf16.mxu0 %v10285_v55  ;;  %v9422_v55 = vcombine.low %v132_v32, %v136_v36  ;;  %v168_v17 = vld [vmem:[#allocation5 + $0x168] sm:$0xff] }
 0x213   :  { %8065 = vmatpush1.bf16.msra.mxu1 %v10404_v23  ;;  %v272_v23 = vld [vmem:[#allocation5 + $0x4a8] sm:$0xff] }
 0x214   :  { %8066 = vmatprep.subr.bf16.mxu1 %v10413_v26  ;;  %v9550_v26 = vcombine.low %v260_v39, %v264_v42  ;;  %v9559_v60 = vcombine.high %v268_v19, %v272_v23  ;;  %v172_v32 = vld [vmem:[#allocation5 + $0x188] sm:$0xff] }
 0x215   :  { %8026 = vmatpush1.bf16.msra.mxu0 %v10284_v0  ;;  %v276_v0 = vld [vmem:[#allocation5 + $0x4c8] sm:$0xff] }
 0x216   :  { %8027 = vmatprep.subr.bf16.mxu0 %v10293_v22  ;;  %v9430_v22 = vcombine.low %v140_v53, %v144_v1  ;;  %v176_v36 = vld [vmem:[#allocation5 + $0x1a8] sm:$0xff] }
 0x217   :  { %8067 = vmatpush1.bf16.msra.mxu1 %v10412_v2  ;;  %v280_v2 = vld [vmem:[#allocation5 + $0x4e8] sm:$0xff] }
 0x218   :  { %8068 = vmatprep.subr.bf16.mxu1 %v10421_v3  ;;  %v9558_v3 = vcombine.low %v268_v19, %v272_v23  ;;  %v9567_v5 = vcombine.high %v276_v0, %v280_v2  ;;  %v300_v39 = vld [vmem:[#allocation5 + $0x588] sm:$0xff] }
 0x219   :  { %8028 = vmatpush1.bf16.msra.mxu0 %v10292_v7  ;;  %v284_v7 = vld [vmem:[#allocation5 + $0x508] sm:$0xff] }
 0x21a   :  { %8029 = vmatprep.subr.bf16.mxu0 %v10301_v9  ;;  %v9438_v9 = vcombine.low %v148_v61, %v152_v62  ;;  %v304_v42 = vld [vmem:[#allocation5 + $0x5a8] sm:$0xff] }
 0x21b   :  { %8069 = vmatpush1.bf16.msra.mxu1 %v10420_v8  ;;  %v288_v8 = vld [vmem:[#allocation5 + $0x528] sm:$0xff]  ;;  %v9591_v53 = vcombine.high %v300_v39, %v304_v42 }
 0x21c   :  { %8070 = vmatprep.subr.bf16.mxu1 %v10429_v10  ;;  %v9566_v10 = vcombine.low %v276_v0, %v280_v2  ;;  %v9575_v13 = vcombine.high %v284_v7, %v288_v8  ;;  %v9574_v25 = vcombine.low %v284_v7, %v288_v8  ;;  %v180_v1 = vld [vmem:[#allocation5 + $0x1c8] sm:$0xff]  ;;  %v9462_v2 = vcombine.low %v172_v32, %v176_v36 }
 0x21d   :  { %8030 = vmatpush1.bf16.msra.mxu0 %v10300_v18  ;;  %v292_v18 = vld [vmem:[#allocation5 + $0x548] sm:$0xff] }
 0x21e   :  { %8081 = vmatprep.subr.bf16.mxu0 %v9415_v29  ;;  %v9455_v29 = vcombine.high %v164_v14, %v168_v17  ;;  %v184_v19 = vld [vmem:[#allocation5 + $0x1e8] sm:$0xff] }
 0x21f   :  { %8071 = vmatpush1.bf16.msra.mxu1 %v10428_v24  ;;  %v9446_v24 = vcombine.low %v156_v28, %v160_v6  ;;  %v9471_v28 = vcombine.high %v180_v1, %v184_v19  ;;  %v188_v8 = vld [vmem:[#allocation5 + $0x208] sm:$0xff] }
 0x220   :  { %8122 = vmatprep.subr.bf16.mxu1 %v9543_v30  ;;  %8032 = vmatmul.mubr.bf16.vlgmr.msra.gmra.mrb[28].mxu0 %v10783_v37  ;;  %v9583_v30 = vcombine.high %v292_v18, %v296_v20 }
 0x221   :  { %8082 = vmatpush1.bf16.msra.mxu0 %v9414_v48  ;;  %8113 = vmatprep.mubr.bf16.mxu0 %v10711_v43  ;;  %v9454_v48 = vcombine.low %v164_v14, %v168_v17 }
 0x222   :  { %8073 = vmatmul.mubr.bf16.vlgmr.msra.gmra.mrb[28].mxu1 %v10785_v44  ;;  %8083 = vmatprep.subr.bf16.mxu0 %v9423_v50  ;;  %v9463_v50 = vcombine.high %v172_v32, %v176_v36 }
 0x223   :  { %8123 = vmatpush1.bf16.msra.mxu1 %v9542_v49  ;;  %8154 = vmatprep.mubr.bf16.mxu1 %v10714_v46  ;;  %v9582_v49 = vcombine.low %v292_v18, %v296_v20  ;;  %v196_v18 = vld [vmem:[#allocation5 + $0x248] sm:$0xff] }
 0x224   :  { %8124 = vmatprep.subr.bf16.mxu1 %v9551_v52  ;;  %v200_v20 = vld [vmem:[#allocation5 + $0x268] sm:$0xff] }
 0x225   :  { %8084 = vmatpush1.bf16.msra.mxu0 %v9422_v55  ;;  %v9487_v32 = vcombine.high %v196_v18, %v200_v20 }
 0x226   :  { %8085 = vmatprep.subr.bf16.mxu0 %v9431_v56  ;;  %v308_v56 = vld [vmem:[#allocation5 + $0x5c8] sm:$0xff] }
 0x227   :  { %8125 = vmatpush1.bf16.msra.mxu1 %v9550_v26 }
 0x228   :  { %8126 = vmatprep.subr.bf16.mxu1 %v9559_v60  ;;  %v312_v60 = vld [vmem:[#allocation5 + $0x5e8] sm:$0xff] }
 0x229   :  { %8086 = vmatpush1.bf16.msra.mxu0 %v9430_v22  ;;  %v9599_v7 = vcombine.high %v308_v56, %v312_v60 }
 0x22a   :  { %8087 = vmatprep.subr.bf16.mxu0 %v9439_v4 }
 0x22b   :  { %8127 = vmatpush1.bf16.msra.mxu1 %v9558_v3 }
 0x22c   :  { %8128 = vmatprep.subr.bf16.mxu1 %v9567_v5  ;;  %v9590_v5 = vcombine.low %v300_v39, %v304_v42  ;;  %v204_v39 = vld [vmem:[#allocation5 + $0x288] sm:$0xff] }
 0x22d   :  { %8088 = vmatpush1.bf16.msra.mxu0 %v9438_v9  ;;  %v192_v9 = vld [vmem:[#allocation5 + $0x228] sm:$0xff] }
 0x22e   :  { %8089 = vmatprep.subr.bf16.mxu0 %v9447_v12  ;;  %v9470_v12 = vcombine.low %v180_v1, %v184_v19  ;;  %v9479_v14 = vcombine.high %v188_v8, %v192_v9  ;;  %v208_v42 = vld [vmem:[#allocation5 + $0x2a8] sm:$0xff] }
 0x22f   :  { %8129 = vmatpush1.bf16.msra.mxu1 %v9566_v10  ;;  %v320_v10 = vld [vmem:[#allocation5 + $0x628] sm:$0xff] }
 0x230   :  { %8130 = vmatprep.subr.bf16.mxu1 %v9575_v13  ;;  %v9598_v13 = vcombine.low %v308_v56, %v312_v60  ;;  %v212_v19 = vld [vmem:[#allocation5 + $0x2c8] sm:$0xff]  ;;  %v9494_v56 = vcombine.low %v204_v39, %v208_v42 }
 0x231   :  { %8090 = vmatpush1.bf16.msra.mxu0 %v9446_v24  ;;  %v324_v24 = vld [vmem:[#allocation5 + $0x648] sm:$0xff] }
 0x232   :  { %8091 = vmatprep.subr.bf16.mxu0 %v9455_v29  ;;  %v9478_v29 = vcombine.low %v188_v8, %v192_v9  ;;  %v228_v8 = vld [vmem:[#allocation5 + $0x348] sm:$0xff] }
 0x233   :  { %8131 = vmatpush1.bf16.msra.mxu1 %v9574_v25  ;;  %v7787_v52 = vpop.f32.mrb[16].mxu0  ;;  %v328_v25 = vld [vmem:[#allocation5 + $0x668] sm:$0xff] }
 0x234   :  { %8132 = vmatprep.subr.bf16.mxu1 %v9583_v30  ;;  %v7788_v23 = vadd.f32 %v7787_v52, %v10736_v40  ;;  %v7789_v26 = vpop.f32.mrb[17].mxu0  ;;  %v9615_v36 = vcombine.high %v324_v24, %v328_v25  ;;  %v9614_v52 = vcombine.low %v324_v24, %v328_v25  ;;  %v232_v9 = vld [vmem:[#allocation5 + $0x368] sm:$0xff] }
 0x235   :  { %v7828_v55 = vpop.f32.mrb[16].mxu1  ;;  %v7790_v61 = vadd.f32 %v7789_v26, %v10739_v45  ;;  %v7791_v0 = vpop.f32.mrb[18].mxu0  ;;  %8092 = vmatpush1.bf16.msra.mxu0 %v9454_v48  ;;  %v316_v45 = vld [vmem:[#allocation5 + $0x608] sm:$0xff] }
 0x236   :  { %v7830_v62 = vpop.f32.mrb[17].mxu1  ;;  %v10793_v22 = vadd.f32 %v7828_v55, %v7788_v23  ;;  %v7792_v4 = vpop.f32.mrb[19].mxu0  ;;  %8093 = vmatprep.subr.bf16.mxu0 %v9463_v50  ;;  %v9607_v17 = vcombine.high %v316_v45, %v320_v10  ;;  %v9606_v30 = vcombine.low %v316_v45, %v320_v10  ;;  %v332_v48 = vld [vmem:[#allocation5 + $0x688] sm:$0xff]  ;;  %v9486_v50 = vcombine.low %v196_v18, %v200_v20 }
 0x237   :  { %v7832_v3 = vpop.f32.mrb[18].mxu1  ;;  %8133 = vmatpush1.bf16.msra.mxu1 %v9582_v49  ;;  %v10795_v6 = vadd.f32 %v7830_v62, %v7790_v61  ;;  %v336_v49 = vld [vmem:[#allocation5 + $0x6a8] sm:$0xff] }
 0x238   :  { %v7833_v40 = vpop.f32.mrb[19].mxu1  ;;  %8134 = vmatprep.subr.bf16.mxu1 %v9591_v53  ;;  %v9495_v53 = vcombine.high %v204_v39, %v208_v42  ;;  %v9623_v1 = vcombine.high %v332_v48, %v336_v49  ;;  %v216_v23 = vld [vmem:[#allocation5 + $0x2e8] sm:$0xff]  ;;  %v9622_v60 = vcombine.low %v332_v48, %v336_v49 }
 0x239   :  { %8094 = vmatpush1.bf16.msra.mxu0 %v9462_v2  ;;  %v340_v55 = vld [vmem:[#allocation5 + $0x6c8] sm:$0xff]  ;;  %v9503_v61 = vcombine.high %v212_v19, %v216_v23 }
 0x23a   :  { %8095 = vmatprep.subr.bf16.mxu0 %v9471_v28  ;;  %v344_v26 = vld [vmem:[#allocation5 + $0x6e8] sm:$0xff] }
 0x23b   :  { %8135 = vmatpush1.bf16.msra.mxu1 %v9590_v5  ;;  %v9631_v62 = vcombine.high %v340_v55, %v344_v26  ;;  %v220_v0 = vld [vmem:[#allocation5 + $0x308] sm:$0xff]  ;;  %v9502_v5 = vcombine.low %v212_v19, %v216_v23  ;;  %v9630_v28 = vcombine.low %v340_v55, %v344_v26 }
 0x23c   :  { %8136 = vmatprep.subr.bf16.mxu1 %v9599_v7  ;;  %v224_v2 = vld [vmem:[#allocation5 + $0x328] sm:$0xff] }
 0x23d   :  { %8096 = vmatpush1.bf16.msra.mxu0 %v9470_v12  ;;  %v348_v3 = vld [vmem:[#allocation5 + $0x708] sm:$0xff]  ;;  %v9511_v40 = vcombine.high %v220_v0, %v224_v2  ;;  %v9510_v12 = vcombine.low %v220_v0, %v224_v2 }
 0x23e   :  { %8097 = vmatprep.subr.bf16.mxu0 %v9479_v14  ;;  %v352_v4 = vld [vmem:[#allocation5 + $0x728] sm:$0xff]  ;;  %v9519_v14 = vcombine.high %v228_v8, %v232_v9 }
 0x23f   :  { %8137 = vmatpush1.bf16.msra.mxu1 %v9598_v13  ;;  %v9639_v7 = vcombine.high %v348_v3, %v352_v4  ;;  %v356_v45 = vld [vmem:[#allocation5 + $0x748] sm:$0xff]  ;;  %v9638_v13 = vcombine.low %v348_v3, %v352_v4 }
 0x240   :  { %8138 = vmatprep.subr.bf16.mxu1 %v9607_v17  ;;  %v360_v10 = vld [vmem:[#allocation5 + $0x768] sm:$0xff] }
 0x241   :  { %8098 = vmatpush1.bf16.msra.mxu0 %v9478_v29  ;;  %v9647_v17 = vcombine.high %v356_v45, %v360_v10  ;;  %v236_v18 = vld [vmem:[#allocation5 + $0x388] sm:$0xff]  ;;  %v9518_v29 = vcombine.low %v228_v8, %v232_v9 }
 0x242   :  { %8099 = vmatprep.subr.bf16.mxu0 %v9487_v32  ;;  %v240_v20 = vld [vmem:[#allocation5 + $0x3a8] sm:$0xff] }
 0x243   :  { %8139 = vmatpush1.bf16.msra.mxu1 %v9606_v30  ;;  %v364_v24 = vld [vmem:[#allocation5 + $0x788] sm:$0xff]  ;;  %v9646_v30 = vcombine.low %v356_v45, %v360_v10  ;;  %v9527_v32 = vcombine.high %v236_v18, %v240_v20 }
 0x244   :  { %8140 = vmatprep.subr.bf16.mxu1 %v9615_v36  ;;  %v368_v25 = vld [vmem:[#allocation5 + $0x7a8] sm:$0xff] }
 0x245   :  { %8100 = vmatpush1.bf16.msra.mxu0 %v9486_v50  ;;  %v9655_v36 = vcombine.high %v364_v24, %v368_v25  ;;  %v244_v39 = vld [vmem:[#allocation5 + $0x3c8] sm:$0xff]  ;;  %v9526_v50 = vcombine.low %v236_v18, %v240_v20 }
 0x246   :  { %8101 = vmatprep.subr.bf16.mxu0 %v9495_v53  ;;  %v248_v42 = vld [vmem:[#allocation5 + $0x3e8] sm:$0xff] }
 0x247   :  { %8141 = vmatpush1.bf16.msra.mxu1 %v9614_v52  ;;  %v372_v48 = vld [vmem:[#allocation5 + $0x7c8] sm:$0xff]  ;;  %v9654_v52 = vcombine.low %v364_v24, %v368_v25  ;;  %v9535_v53 = vcombine.high %v244_v39, %v248_v42 }
 0x248   :  { %8142 = vmatprep.subr.bf16.mxu1 %v9623_v1  ;;  %v376_v49 = vld [vmem:[#allocation5 + $0x7e8] sm:$0xff] }
 0x249   :  { %8102 = vmatpush1.bf16.msra.mxu0 %v9494_v56  ;;  %v9663_v1 = vcombine.high %v372_v48, %v376_v49  ;;  %v380_v19 = vld [vmem:[#allocation5 + $0x808] sm:$0xff]  ;;  %v9534_v56 = vcombine.low %v244_v39, %v248_v42 }
 0x24a   :  { %8103 = vmatprep.subr.bf16.mxu0 %v9503_v61  ;;  %v384_v23 = vld [vmem:[#allocation5 + $0x828] sm:$0xff] }
 0x24b   :  { %8143 = vmatpush1.bf16.msra.mxu1 %v9622_v60  ;;  %v508_v55 = vld [vmem:[#allocation5 + $0xc08] sm:$0xff]  ;;  %v9662_v60 = vcombine.low %v372_v48, %v376_v49  ;;  %v9671_v61 = vcombine.high %v380_v19, %v384_v23 }
 0x24c   :  { %8144 = vmatprep.subr.bf16.mxu1 %v9631_v62  ;;  %v512_v26 = vld [vmem:[#allocation5 + $0xc28] sm:$0xff] }
 0x24d   :  { %8104 = vmatpush1.bf16.msra.mxu0 %v9502_v5  ;;  %v9799_v62 = vcombine.high %v508_v55, %v512_v26  ;;  %v388_v0 = vld [vmem:[#allocation5 + $0x848] sm:$0xff]  ;;  %v9670_v5 = vcombine.low %v380_v19, %v384_v23 }
 0x24e   :  { %8105 = vmatprep.subr.bf16.mxu0 %v9511_v40  ;;  %v392_v2 = vld [vmem:[#allocation5 + $0x868] sm:$0xff] }
 0x24f   :  { %8145 = vmatpush1.bf16.msra.mxu1 %v9630_v28  ;;  %v516_v3 = vld [vmem:[#allocation5 + $0xc48] sm:$0xff]  ;;  %v9798_v28 = vcombine.low %v508_v55, %v512_v26  ;;  %v9679_v40 = vcombine.high %v388_v0, %v392_v2 }
 0x250   :  { %8146 = vmatprep.subr.bf16.mxu1 %v9639_v7  ;;  %v520_v4 = vld [vmem:[#allocation5 + $0xc68] sm:$0xff] }
 0x251   :  { %8106 = vmatpush1.bf16.msra.mxu0 %v9510_v12  ;;  %v9807_v7 = vcombine.high %v516_v3, %v520_v4  ;;  %v396_v8 = vld [vmem:[#allocation5 + $0x888] sm:$0xff]  ;;  %v9678_v12 = vcombine.low %v388_v0, %v392_v2 }
 0x252   :  { %8107 = vmatprep.subr.bf16.mxu0 %v9519_v14  ;;  %v400_v9 = vld [vmem:[#allocation5 + $0x8a8] sm:$0xff] }
 0x253   :  { %8147 = vmatpush1.bf16.msra.mxu1 %v9638_v13  ;;  %v524_v45 = vld [vmem:[#allocation5 + $0xc88] sm:$0xff]  ;;  %v9806_v13 = vcombine.low %v516_v3, %v520_v4  ;;  %v9687_v14 = vcombine.high %v396_v8, %v400_v9 }
 0x254   :  { %8148 = vmatprep.subr.bf16.mxu1 %v9647_v17  ;;  %v528_v10 = vld [vmem:[#allocation5 + $0xca8] sm:$0xff] }
 0x255   :  { %8108 = vmatpush1.bf16.msra.mxu0 %v9518_v29  ;;  %v9815_v17 = vcombine.high %v524_v45, %v528_v10  ;;  %v404_v18 = vld [vmem:[#allocation5 + $0x8c8] sm:$0xff]  ;;  %v9686_v29 = vcombine.low %v396_v8, %v400_v9 }
 0x256   :  { %8109 = vmatprep.subr.bf16.mxu0 %v9527_v32  ;;  %v408_v20 = vld [vmem:[#allocation5 + $0x8e8] sm:$0xff] }
 0x257   :  { %8149 = vmatpush1.bf16.msra.mxu1 %v9646_v30  ;;  %v532_v24 = vld [vmem:[#allocation5 + $0xcc8] sm:$0xff]  ;;  %v9814_v30 = vcombine.low %v524_v45, %v528_v10  ;;  %v9695_v32 = vcombine.high %v404_v18, %v408_v20 }
 0x258   :  { %8150 = vmatprep.subr.bf16.mxu1 %v9655_v36  ;;  %v536_v25 = vld [vmem:[#allocation5 + $0xce8] sm:$0xff] }
 0x259   :  { %8110 = vmatpush1.bf16.msra.mxu0 %v9526_v50  ;;  %v9823_v36 = vcombine.high %v532_v24, %v536_v25  ;;  %v412_v39 = vld [vmem:[#allocation5 + $0x908] sm:$0xff]  ;;  %v9694_v50 = vcombine.low %v404_v18, %v408_v20 }
 0x25a   :  { %8111 = vmatprep.subr.bf16.mxu0 %v9535_v53  ;;  %v416_v42 = vld [vmem:[#allocation5 + $0x928] sm:$0xff] }
 0x25b   :  { %8151 = vmatpush1.bf16.msra.mxu1 %v9654_v52  ;;  %v540_v48 = vld [vmem:[#allocation5 + $0xd08] sm:$0xff]  ;;  %v9822_v52 = vcombine.low %v532_v24, %v536_v25  ;;  %v9703_v53 = vcombine.high %v412_v39, %v416_v42 }
 0x25c   :  { %8152 = vmatprep.subr.bf16.mxu1 %v9663_v1  ;;  %v544_v49 = vld [vmem:[#allocation5 + $0xd28] sm:$0xff] }
 0x25d   :  { %8112 = vmatpush1.bf16.msra.mxu0 %v9534_v56  ;;  %v9831_v1 = vcombine.high %v540_v48, %v544_v49  ;;  %v420_v19 = vld [vmem:[#allocation5 + $0x948] sm:$0xff]  ;;  %v9702_v56 = vcombine.low %v412_v39, %v416_v42 }
 0x25e   :  { %8163 = vmatprep.subr.bf16.mxu0 %v9671_v61  ;;  %v424_v23 = vld [vmem:[#allocation5 + $0x968] sm:$0xff] }
 0x25f   :  { %8153 = vmatpush1.bf16.msra.mxu1 %v9662_v60  ;;  %v548_v55 = vld [vmem:[#allocation5 + $0xd48] sm:$0xff]  ;;  %v9830_v60 = vcombine.low %v540_v48, %v544_v49  ;;  %v9711_v61 = vcombine.high %v420_v19, %v424_v23 }
 0x260   :  { %8204 = vmatprep.subr.bf16.mxu1 %v9799_v62  ;;  %8114 = vmatmul.mubr.bf16.vlgmr.msra.gmra.mrb[32].mxu0 %v10723_v47  ;;  %v552_v26 = vld [vmem:[#allocation5 + $0xd68] sm:$0xff] }
 0x261   :  { %8164 = vmatpush1.bf16.msra.mxu0 %v9670_v5  ;;  %8195 = vmatprep.mubr.bf16.mxu0 %v10727_v59  ;;  %v9839_v62 = vcombine.high %v548_v55, %v552_v26  ;;  %v428_v0 = vld [vmem:[#allocation5 + $0x988] sm:$0xff]  ;;  %v9710_v5 = vcombine.low %v420_v19, %v424_v23 }
 0x262   :  { %8155 = vmatmul.mubr.bf16.vlgmr.msra.gmra.mrb[32].mxu1 %v10725_v51  ;;  %8165 = vmatprep.subr.bf16.mxu0 %v9679_v40  ;;  %v432_v2 = vld [vmem:[#allocation5 + $0x9a8] sm:$0xff] }
 0x263   :  { %8205 = vmatpush1.bf16.msra.mxu1 %v9798_v28  ;;  %8236 = vmatprep.mubr.bf16.mxu1 %v10730_v58  ;;  %v556_v3 = vld [vmem:[#allocation5 + $0xd88] sm:$0xff]  ;;  %v9838_v28 = vcombine.low %v548_v55, %v552_v26  ;;  %v9719_v40 = vcombine.high %v428_v0, %v432_v2  ;;  %v9718_v25 = vcombine.low %v428_v0, %v432_v2 }
 0x264   :  { %8206 = vmatprep.subr.bf16.mxu1 %v9807_v7  ;;  %v560_v4 = vld [vmem:[#allocation5 + $0xda8] sm:$0xff] }
 0x265   :  { %8166 = vmatpush1.bf16.msra.mxu0 %v9678_v12  ;;  %v9847_v8 = vcombine.high %v556_v3, %v560_v4  ;;  %v436_v9 = vld [vmem:[#allocation5 + $0x9c8] sm:$0xff] }
 0x266   :  { %8167 = vmatprep.subr.bf16.mxu0 %v9687_v14  ;;  %v440_v45 = vld [vmem:[#allocation5 + $0x9e8] sm:$0xff] }
 0x267   :  { %8207 = vmatpush1.bf16.msra.mxu1 %v9806_v13  ;;  %v564_v14 = vld [vmem:[#allocation5 + $0xdc8] sm:$0xff]  ;;  %v9727_v39 = vcombine.high %v436_v9, %v440_v45 }
 0x268   :  { %8208 = vmatprep.subr.bf16.mxu1 %v9815_v17  ;;  %v568_v17 = vld [vmem:[#allocation5 + $0xde8] sm:$0xff] }
 0x269   :  { %8168 = vmatpush1.bf16.msra.mxu0 %v9686_v29  ;;  %v9855_v48 = vcombine.high %v564_v14, %v568_v17  ;;  %v444_v49 = vld [vmem:[#allocation5 + $0xa08] sm:$0xff] }
 0x26a   :  { %8169 = vmatprep.subr.bf16.mxu0 %v9695_v32  ;;  %v452_v55 = vld [vmem:[#allocation5 + $0xa48] sm:$0xff] }
 0x26b   :  { %8209 = vmatpush1.bf16.msra.mxu1 %v9814_v30  ;;  %v456_v26 = vld [vmem:[#allocation5 + $0xa68] sm:$0xff] }
 0x26c   :  { %8210 = vmatprep.subr.bf16.mxu1 %v9823_v36  ;;  %v9846_v36 = vcombine.low %v556_v3, %v560_v4  ;;  %v9743_v0 = vcombine.high %v452_v55, %v456_v26  ;;  %v460_v3 = vld [vmem:[#allocation5 + $0xa88] sm:$0xff] }
 0x26d   :  { %8170 = vmatpush1.bf16.msra.mxu0 %v9694_v50  ;;  %v448_v50 = vld [vmem:[#allocation5 + $0xa28] sm:$0xff] }
 0x26e   :  { %8171 = vmatprep.subr.bf16.mxu0 %v9703_v53  ;;  %v9726_v53 = vcombine.low %v436_v9, %v440_v45  ;;  %v9735_v19 = vcombine.high %v444_v49, %v448_v50  ;;  %v464_v4 = vld [vmem:[#allocation5 + $0xaa8] sm:$0xff] }
 0x26f   :  { %8211 = vmatpush1.bf16.msra.mxu1 %v9822_v52  ;;  %v576_v52 = vld [vmem:[#allocation5 + $0xe28] sm:$0xff] }
 0x270   :  { %8212 = vmatprep.subr.bf16.mxu1 %v9831_v1  ;;  %v9854_v1 = vcombine.low %v564_v14, %v568_v17  ;;  %v468_v45 = vld [vmem:[#allocation5 + $0xac8] sm:$0xff]  ;;  %v9750_v14 = vcombine.low %v460_v3, %v464_v4 }
 0x271   :  { %8172 = vmatpush1.bf16.msra.mxu0 %v9702_v56  ;;  %v580_v56 = vld [vmem:[#allocation5 + $0xe48] sm:$0xff] }
 0x272   :  { %8173 = vmatprep.subr.bf16.mxu0 %v9711_v61  ;;  %v9734_v61 = vcombine.low %v444_v49, %v448_v50  ;;  %v484_v49 = vld [vmem:[#allocation5 + $0xb48] sm:$0xff] }
 0x273   :  { %8213 = vmatpush1.bf16.msra.mxu1 %v9830_v60  ;;  %v7869_v7 = vpop.f32.mrb[20].mxu0  ;;  %v584_v60 = vld [vmem:[#allocation5 + $0xe68] sm:$0xff] }
 0x274   :  { %8214 = vmatprep.subr.bf16.mxu1 %v9839_v62  ;;  %v7870_v10 = vadd.f32 %v7869_v7, %v10793_v22  ;;  %v7871_v13 = vpop.f32.mrb[21].mxu0  ;;  %v9871_v2 = vcombine.high %v580_v56, %v584_v60  ;;  %v9870_v7 = vcombine.low %v580_v56, %v584_v60  ;;  %v488_v50 = vld [vmem:[#allocation5 + $0xb68] sm:$0xff] }
 0x275   :  { %v7910_v12 = vpop.f32.mrb[20].mxu1  ;;  %v7872_v18 = vadd.f32 %v7871_v13, %v10795_v6  ;;  %v7873_v24 = vpop.f32.mrb[22].mxu0  ;;  %8174 = vmatpush1.bf16.msra.mxu0 %v9710_v5  ;;  %v572_v6 = vld [vmem:[#allocation5 + $0xe08] sm:$0xff] }
 0x276   :  { %v7912_v20 = vpop.f32.mrb[21].mxu1  ;;  %v10803_v29 = vadd.f32 %v7910_v12, %v7870_v10  ;;  %v7874_v32 = vpop.f32.mrb[23].mxu0  ;;  %8175 = vmatprep.subr.bf16.mxu0 %v9719_v40  ;;  %v9863_v23 = vcombine.high %v572_v6, %v576_v52  ;;  %v9862_v62 = vcombine.low %v572_v6, %v576_v52  ;;  %v588_v5 = vld [vmem:[#allocation5 + $0xe88] sm:$0xff]  ;;  %v9742_v40 = vcombine.low %v452_v55, %v456_v26 }
 0x277   :  { %v7914_v30 = vpop.f32.mrb[22].mxu1  ;;  %8215 = vmatpush1.bf16.msra.mxu1 %v9838_v28  ;;  %v10805_v42 = vadd.f32 %v7912_v20, %v7872_v18  ;;  %v592_v28 = vld [vmem:[#allocation5 + $0xea8] sm:$0xff] }
 0x278   :  { %v7915_v22 = vpop.f32.mrb[23].mxu1  ;;  %8216 = vmatprep.subr.bf16.mxu1 %v9847_v8  ;;  %v9751_v8 = vcombine.high %v460_v3, %v464_v4  ;;  %v9879_v9 = vcombine.high %v588_v5, %v592_v28  ;;  %v472_v10 = vld [vmem:[#allocation5 + $0xae8] sm:$0xff]  ;;  %v9878_v17 = vcombine.low %v588_v5, %v592_v28 }
 0x279   :  { %8176 = vmatpush1.bf16.msra.mxu0 %v9718_v25  ;;  %v596_v12 = vld [vmem:[#allocation5 + $0xec8] sm:$0xff]  ;;  %v9759_v18 = vcombine.high %v468_v45, %v472_v10 }
 0x27a   :  { %8177 = vmatprep.subr.bf16.mxu0 %v9727_v39  ;;  %v600_v13 = vld [vmem:[#allocation5 + $0xee8] sm:$0xff] }
 0x27b   :  { %8217 = vmatpush1.bf16.msra.mxu1 %v9846_v36  ;;  %v9887_v20 = vcombine.high %v596_v12, %v600_v13  ;;  %v476_v24 = vld [vmem:[#allocation5 + $0xb08] sm:$0xff]  ;;  %v9758_v36 = vcombine.low %v468_v45, %v472_v10  ;;  %v9886_v39 = vcombine.low %v596_v12, %v600_v13 }
 0x27c   :  { %8218 = vmatprep.subr.bf16.mxu1 %v9855_v48  ;;  %v480_v25 = vld [vmem:[#allocation5 + $0xb28] sm:$0xff] }
 0x27d   :  { %8178 = vmatpush1.bf16.msra.mxu0 %v9726_v53  ;;  %v604_v30 = vld [vmem:[#allocation5 + $0xf08] sm:$0xff]  ;;  %v9767_v22 = vcombine.high %v476_v24, %v480_v25  ;;  %v9766_v53 = vcombine.low %v476_v24, %v480_v25 }
 0x27e   :  { %8179 = vmatprep.subr.bf16.mxu0 %v9735_v19  ;;  %v608_v32 = vld [vmem:[#allocation5 + $0xf28] sm:$0xff]  ;;  %v9775_v19 = vcombine.high %v484_v49, %v488_v50 }
 0x27f   :  { %8219 = vmatpush1.bf16.msra.mxu1 %v9854_v1  ;;  %v9895_v48 = vcombine.high %v604_v30, %v608_v32  ;;  %v612_v6 = vld [vmem:[#allocation5 + $0xf48] sm:$0xff]  ;;  %v9894_v1 = vcombine.low %v604_v30, %v608_v32 }
 0x280   :  { %8220 = vmatprep.subr.bf16.mxu1 %v9863_v23  ;;  %v616_v52 = vld [vmem:[#allocation5 + $0xf68] sm:$0xff] }
 0x281   :  { %8180 = vmatpush1.bf16.msra.mxu0 %v9734_v61  ;;  %v9903_v23 = vcombine.high %v612_v6, %v616_v52  ;;  %v492_v55 = vld [vmem:[#allocation5 + $0xb88] sm:$0xff]  ;;  %v9774_v61 = vcombine.low %v484_v49, %v488_v50 }
 0x282   :  { %8181 = vmatprep.subr.bf16.mxu0 %v9743_v0  ;;  %v496_v26 = vld [vmem:[#allocation5 + $0xba8] sm:$0xff] }
 0x283   :  { %8221 = vmatpush1.bf16.msra.mxu1 %v9862_v62  ;;  %v620_v56 = vld [vmem:[#allocation5 + $0xf88] sm:$0xff]  ;;  %v9902_v62 = vcombine.low %v612_v6, %v616_v52  ;;  %v9783_v0 = vcombine.high %v492_v55, %v496_v26 }
 0x284   :  { %8222 = vmatprep.subr.bf16.mxu1 %v9871_v2  ;;  %v624_v60 = vld [vmem:[#allocation5 + $0xfa8] sm:$0xff] }
 0x285   :  { %8182 = vmatpush1.bf16.msra.mxu0 %v9742_v40  ;;  %v9911_v2 = vcombine.high %v620_v56, %v624_v60  ;;  %v500_v3 = vld [vmem:[#allocation5 + $0xbc8] sm:$0xff]  ;;  %v9782_v40 = vcombine.low %v492_v55, %v496_v26 }
 0x286   :  { %8183 = vmatprep.subr.bf16.mxu0 %v9751_v8  ;;  %v504_v4 = vld [vmem:[#allocation5 + $0xbe8] sm:$0xff] }
 0x287   :  { %8223 = vmatpush1.bf16.msra.mxu1 %v9870_v7  ;;  %v628_v5 = vld [vmem:[#allocation5 + $0xfc8] sm:$0xff]  ;;  %v9910_v7 = vcombine.low %v620_v56, %v624_v60  ;;  %v9791_v8 = vcombine.high %v500_v3, %v504_v4 }
 0x288   :  { %8224 = vmatprep.subr.bf16.mxu1 %v9879_v9  ;;  %v632_v28 = vld [vmem:[#allocation5 + $0xfe8] sm:$0xff] }
 0x289   :  { %8184 = vmatpush1.bf16.msra.mxu0 %v9750_v14  ;;  %v9919_v9 = vcombine.high %v628_v5, %v632_v28  ;;  %v636_v45 = vld [vmem:[#allocation5 + $0x1008] sm:$0xff]  ;;  %v9790_v14 = vcombine.low %v500_v3, %v504_v4 }
 0x28a   :  { %8185 = vmatprep.subr.bf16.mxu0 %v9759_v18  ;;  %v640_v10 = vld [vmem:[#allocation5 + $0x1028] sm:$0xff] }
 0x28b   :  { %8225 = vmatpush1.bf16.msra.mxu1 %v9878_v17  ;;  %v764_v12 = vld [vmem:[#allocation5 + $0x1408] sm:$0xff]  ;;  %v9918_v17 = vcombine.low %v628_v5, %v632_v28  ;;  %v9927_v18 = vcombine.high %v636_v45, %v640_v10 }
 0x28c   :  { %8226 = vmatprep.subr.bf16.mxu1 %v9887_v20  ;;  %v768_v13 = vld [vmem:[#allocation5 + $0x1428] sm:$0xff] }
 0x28d   :  { %8186 = vmatpush1.bf16.msra.mxu0 %v9758_v36  ;;  %v10055_v20 = vcombine.high %v764_v12, %v768_v13  ;;  %v644_v24 = vld [vmem:[#allocation5 + $0x1048] sm:$0xff]  ;;  %v9926_v36 = vcombine.low %v636_v45, %v640_v10 }
 0x28e   :  { %8187 = vmatprep.subr.bf16.mxu0 %v9767_v22  ;;  %v648_v25 = vld [vmem:[#allocation5 + $0x1068] sm:$0xff] }
 0x28f   :  { %8227 = vmatpush1.bf16.msra.mxu1 %v9886_v39  ;;  %v772_v30 = vld [vmem:[#allocation5 + $0x1448] sm:$0xff]  ;;  %v10054_v39 = vcombine.low %v764_v12, %v768_v13  ;;  %v9935_v22 = vcombine.high %v644_v24, %v648_v25 }
 0x290   :  { %8228 = vmatprep.subr.bf16.mxu1 %v9895_v48  ;;  %v776_v32 = vld [vmem:[#allocation5 + $0x1468] sm:$0xff] }
 0x291   :  { %8188 = vmatpush1.bf16.msra.mxu0 %v9766_v53  ;;  %v10063_v48 = vcombine.high %v772_v30, %v776_v32  ;;  %v652_v49 = vld [vmem:[#allocation5 + $0x1088] sm:$0xff]  ;;  %v9934_v53 = vcombine.low %v644_v24, %v648_v25 }
 0x292   :  { %8189 = vmatprep.subr.bf16.mxu0 %v9775_v19  ;;  %v656_v50 = vld [vmem:[#allocation5 + $0x10a8] sm:$0xff] }
 0x293   :  { %8229 = vmatpush1.bf16.msra.mxu1 %v9894_v1  ;;  %v780_v6 = vld [vmem:[#allocation5 + $0x1488] sm:$0xff]  ;;  %v10062_v1 = vcombine.low %v772_v30, %v776_v32  ;;  %v9943_v19 = vcombine.high %v652_v49, %v656_v50 }
 0x294   :  { %8230 = vmatprep.subr.bf16.mxu1 %v9903_v23  ;;  %v784_v52 = vld [vmem:[#allocation5 + $0x14a8] sm:$0xff] }
 0x295   :  { %8190 = vmatpush1.bf16.msra.mxu0 %v9774_v61  ;;  %v10071_v23 = vcombine.high %v780_v6, %v784_v52  ;;  %v660_v55 = vld [vmem:[#allocation5 + $0x10c8] sm:$0xff]  ;;  %v9942_v61 = vcombine.low %v652_v49, %v656_v50 }
 0x296   :  { %8191 = vmatprep.subr.bf16.mxu0 %v9783_v0  ;;  %v664_v26 = vld [vmem:[#allocation5 + $0x10e8] sm:$0xff] }
 0x297   :  { %8231 = vmatpush1.bf16.msra.mxu1 %v9902_v62  ;;  %v788_v56 = vld [vmem:[#allocation5 + $0x14c8] sm:$0xff]  ;;  %v10070_v62 = vcombine.low %v780_v6, %v784_v52  ;;  %v9951_v0 = vcombine.high %v660_v55, %v664_v26 }
 0x298   :  { %8232 = vmatprep.subr.bf16.mxu1 %v9911_v2  ;;  %v792_v60 = vld [vmem:[#allocation5 + $0x14e8] sm:$0xff] }
 0x299   :  { %8192 = vmatpush1.bf16.msra.mxu0 %v9782_v40  ;;  %v10079_v2 = vcombine.high %v788_v56, %v792_v60  ;;  %v668_v3 = vld [vmem:[#allocation5 + $0x1108] sm:$0xff]  ;;  %v9950_v40 = vcombine.low %v660_v55, %v664_v26 }
 0x29a   :  { %8193 = vmatprep.subr.bf16.mxu0 %v9791_v8  ;;  %v672_v4 = vld [vmem:[#allocation5 + $0x1128] sm:$0xff] }
 0x29b   :  { %8233 = vmatpush1.bf16.msra.mxu1 %v9910_v7  ;;  %v796_v5 = vld [vmem:[#allocation5 + $0x1508] sm:$0xff]  ;;  %v10078_v7 = vcombine.low %v788_v56, %v792_v60  ;;  %v9959_v8 = vcombine.high %v668_v3, %v672_v4 }
 0x29c   :  { %8234 = vmatprep.subr.bf16.mxu1 %v9919_v9  ;;  %v800_v28 = vld [vmem:[#allocation5 + $0x1528] sm:$0xff] }
 0x29d   :  { %8194 = vmatpush1.bf16.msra.mxu0 %v9790_v14  ;;  %v10087_v9 = vcombine.high %v796_v5, %v800_v28  ;;  %v676_v45 = vld [vmem:[#allocation5 + $0x1148] sm:$0xff]  ;;  %v9958_v14 = vcombine.low %v668_v3, %v672_v4 }
 0x29e   :  { %8245 = vmatprep.subr.bf16.mxu0 %v9927_v18  ;;  %v680_v10 = vld [vmem:[#allocation5 + $0x1168] sm:$0xff] }
 0x29f   :  { %8235 = vmatpush1.bf16.msra.mxu1 %v9918_v17  ;;  %v804_v12 = vld [vmem:[#allocation5 + $0x1548] sm:$0xff]  ;;  %v10086_v17 = vcombine.low %v796_v5, %v800_v28  ;;  %v9967_v18 = vcombine.high %v676_v45, %v680_v10 }
 0x2a0   :  { %8286 = vmatprep.subr.bf16.mxu1 %v10055_v20  ;;  %8196 = vmatmul.mubr.bf16.vlgmr.msra.gmra.mrb[36].mxu0 %v10745_v21  ;;  %v808_v13 = vld [vmem:[#allocation5 + $0x1568] sm:$0xff] }
 0x2a1   :  { %8246 = vmatpush1.bf16.msra.mxu0 %v9926_v36  ;;  %8277 = vmatprep.mubr.bf16.mxu0 %v10749_v35  ;;  %v10095_v20 = vcombine.high %v804_v12, %v808_v13  ;;  %v684_v24 = vld [vmem:[#allocation5 + $0x1188] sm:$0xff]  ;;  %v9966_v36 = vcombine.low %v676_v45, %v680_v10 }
 0x2a2   :  { %8237 = vmatmul.mubr.bf16.vlgmr.msra.gmra.mrb[36].mxu1 %v10747_v27  ;;  %8247 = vmatprep.subr.bf16.mxu0 %v9935_v22  ;;  %v688_v25 = vld [vmem:[#allocation5 + $0x11a8] sm:$0xff] }
 0x2a3   :  { %8287 = vmatpush1.bf16.msra.mxu1 %v10054_v39  ;;  %8318 = vmatprep.mubr.bf16.mxu1 %v10752_v38  ;;  %v812_v30 = vld [vmem:[#allocation5 + $0x1588] sm:$0xff]  ;;  %v10094_v39 = vcombine.low %v804_v12, %v808_v13  ;;  %v9975_v22 = vcombine.high %v684_v24, %v688_v25  ;;  %v9974_v60 = vcombine.low %v684_v24, %v688_v25 }
 0x2a4   :  { %8288 = vmatprep.subr.bf16.mxu1 %v10063_v48  ;;  %v816_v32 = vld [vmem:[#allocation5 + $0x15a8] sm:$0xff] }
 0x2a5   :  { %8248 = vmatpush1.bf16.msra.mxu0 %v9934_v53  ;;  %v10103_v49 = vcombine.high %v812_v30, %v816_v32  ;;  %v692_v50 = vld [vmem:[#allocation5 + $0x11c8] sm:$0xff] }
 0x2a6   :  { %8249 = vmatprep.subr.bf16.mxu0 %v9943_v19  ;;  %v696_v6 = vld [vmem:[#allocation5 + $0x11e8] sm:$0xff] }
 0x2a7   :  { %8289 = vmatpush1.bf16.msra.mxu1 %v10062_v1  ;;  %v820_v19 = vld [vmem:[#allocation5 + $0x15c8] sm:$0xff]  ;;  %v9983_v3 = vcombine.high %v692_v50, %v696_v6 }
 0x2a8   :  { %8290 = vmatprep.subr.bf16.mxu1 %v10071_v23  ;;  %v824_v23 = vld [vmem:[#allocation5 + $0x15e8] sm:$0xff] }
 0x2a9   :  { %8250 = vmatpush1.bf16.msra.mxu0 %v9942_v61  ;;  %v10111_v5 = vcombine.high %v820_v19, %v824_v23  ;;  %v700_v28 = vld [vmem:[#allocation5 + $0x1208] sm:$0xff] }
 0x2aa   :  { %8251 = vmatprep.subr.bf16.mxu0 %v9951_v0  ;;  %v708_v12 = vld [vmem:[#allocation5 + $0x1248] sm:$0xff] }
 0x2ab   :  { %8291 = vmatpush1.bf16.msra.mxu1 %v10070_v62  ;;  %v712_v13 = vld [vmem:[#allocation5 + $0x1268] sm:$0xff] }
 0x2ac   :  { %8292 = vmatprep.subr.bf16.mxu1 %v10079_v2  ;;  %v10102_v2 = vcombine.low %v812_v30, %v816_v32  ;;  %v9999_v24 = vcombine.high %v708_v12, %v712_v13  ;;  %v716_v30 = vld [vmem:[#allocation5 + $0x1288] sm:$0xff] }
 0x2ad   :  { %8252 = vmatpush1.bf16.msra.mxu0 %v9950_v40  ;;  %v704_v40 = vld [vmem:[#allocation5 + $0x1228] sm:$0xff] }
 0x2ae   :  { %8253 = vmatprep.subr.bf16.mxu0 %v9959_v8  ;;  %v9982_v8 = vcombine.low %v692_v50, %v696_v6  ;;  %v9991_v45 = vcombine.high %v700_v28, %v704_v40  ;;  %v720_v32 = vld [vmem:[#allocation5 + $0x12a8] sm:$0xff] }
 0x2af   :  { %8293 = vmatpush1.bf16.msra.mxu1 %v10078_v7  ;;  %v832_v7 = vld [vmem:[#allocation5 + $0x1628] sm:$0xff] }
 0x2b0   :  { %8294 = vmatprep.subr.bf16.mxu1 %v10087_v9  ;;  %v10110_v9 = vcombine.low %v820_v19, %v824_v23  ;;  %v724_v6 = vld [vmem:[#allocation5 + $0x12c8] sm:$0xff]  ;;  %v10006_v19 = vcombine.low %v716_v30, %v720_v32 }
 0x2b1   :  { %8254 = vmatpush1.bf16.msra.mxu0 %v9958_v14  ;;  %v836_v14 = vld [vmem:[#allocation5 + $0x1648] sm:$0xff] }
 0x2b2   :  { %8255 = vmatprep.subr.bf16.mxu0 %v9967_v18  ;;  %v9990_v18 = vcombine.low %v700_v28, %v704_v40  ;;  %v740_v28 = vld [vmem:[#allocation5 + $0x1348] sm:$0xff] }
 0x2b3   :  { %8295 = vmatpush1.bf16.msra.mxu1 %v10086_v17  ;;  %v7951_v48 = vpop.f32.mrb[24].mxu0  ;;  %v840_v17 = vld [vmem:[#allocation5 + $0x1668] sm:$0xff] }
 0x2b4   :  { %8296 = vmatprep.subr.bf16.mxu1 %v10095_v20  ;;  %v7952_v52 = vadd.f32 %v7951_v48, %v10803_v29  ;;  %v7953_v1 = vpop.f32.mrb[25].mxu0  ;;  %v10127_v25 = vcombine.high %v836_v14, %v840_v17  ;;  %v10126_v48 = vcombine.low %v836_v14, %v840_v17  ;;  %v744_v40 = vld [vmem:[#allocation5 + $0x1368] sm:$0xff] }
 0x2b5   :  { %v7992_v53 = vpop.f32.mrb[24].mxu1  ;;  %v7954_v55 = vadd.f32 %v7953_v1, %v10805_v42  ;;  %v7955_v56 = vpop.f32.mrb[26].mxu0  ;;  %8256 = vmatpush1.bf16.msra.mxu0 %v9966_v36  ;;  %v828_v42 = vld [vmem:[#allocation5 + $0x1608] sm:$0xff] }
 0x2b6   :  { %v7994_v26 = vpop.f32.mrb[25].mxu1  ;;  %v10813_v61 = vadd.f32 %v7992_v53, %v7952_v52  ;;  %v7956_v0 = vpop.f32.mrb[27].mxu0  ;;  %8257 = vmatprep.subr.bf16.mxu0 %v9975_v22  ;;  %v10119_v10 = vcombine.high %v828_v42, %v832_v7  ;;  %v10118_v20 = vcombine.low %v828_v42, %v832_v7  ;;  %v844_v36 = vld [vmem:[#allocation5 + $0x1688] sm:$0xff]  ;;  %v9998_v22 = vcombine.low %v708_v12, %v712_v13 }
 0x2b7   :  { %v7996_v62 = vpop.f32.mrb[26].mxu1  ;;  %8297 = vmatpush1.bf16.msra.mxu1 %v10094_v39  ;;  %v10815_v4 = vadd.f32 %v7994_v26, %v7954_v55  ;;  %v848_v39 = vld [vmem:[#allocation5 + $0x16a8] sm:$0xff] }
 0x2b8   :  { %v7997_v29 = vpop.f32.mrb[27].mxu1  ;;  %8298 = vmatprep.subr.bf16.mxu1 %v10103_v49  ;;  %v10007_v49 = vcombine.high %v716_v30, %v720_v32  ;;  %v10135_v50 = vcombine.high %v844_v36, %v848_v39  ;;  %v728_v52 = vld [vmem:[#allocation5 + $0x12e8] sm:$0xff]  ;;  %v10134_v23 = vcombine.low %v844_v36, %v848_v39 }
 0x2b9   :  { %8258 = vmatpush1.bf16.msra.mxu0 %v9974_v60  ;;  %v852_v53 = vld [vmem:[#allocation5 + $0x16c8] sm:$0xff]  ;;  %v10015_v55 = vcombine.high %v724_v6, %v728_v52 }
 0x2ba   :  { %8259 = vmatprep.subr.bf16.mxu0 %v9983_v3  ;;  %v856_v1 = vld [vmem:[#allocation5 + $0x16e8] sm:$0xff] }
 0x2bb   :  { %8299 = vmatpush1.bf16.msra.mxu1 %v10102_v2  ;;  %v10143_v26 = vcombine.high %v852_v53, %v856_v1  ;;  %v732_v56 = vld [vmem:[#allocation5 + $0x1308] sm:$0xff]  ;;  %v10014_v2 = vcombine.low %v724_v6, %v728_v52  ;;  %v10142_v3 = vcombine.low %v852_v53, %v856_v1 }
 0x2bc   :  { %8300 = vmatprep.subr.bf16.mxu1 %v10111_v5  ;;  %v736_v60 = vld [vmem:[#allocation5 + $0x1328] sm:$0xff] }
 0x2bd   :  { %8260 = vmatpush1.bf16.msra.mxu0 %v9982_v8  ;;  %v860_v62 = vld [vmem:[#allocation5 + $0x1708] sm:$0xff]  ;;  %v10023_v29 = vcombine.high %v732_v56, %v736_v60  ;;  %v10022_v8 = vcombine.low %v732_v56, %v736_v60 }
 0x2be   :  { %8261 = vmatprep.subr.bf16.mxu0 %v9991_v45  ;;  %v864_v0 = vld [vmem:[#allocation5 + $0x1728] sm:$0xff]  ;;  %v10031_v45 = vcombine.high %v740_v28, %v744_v40 }
 0x2bf   :  { %8301 = vmatpush1.bf16.msra.mxu1 %v10110_v9  ;;  %v10151_v5 = vcombine.high %v860_v62, %v864_v0  ;;  %v868_v42 = vld [vmem:[#allocation5 + $0x1748] sm:$0xff]  ;;  %v10150_v9 = vcombine.low %v860_v62, %v864_v0 }
 0x2c0   :  { %8302 = vmatprep.subr.bf16.mxu1 %v10119_v10  ;;  %v872_v7 = vld [vmem:[#allocation5 + $0x1768] sm:$0xff] }
 0x2c1   :  { %8262 = vmatpush1.bf16.msra.mxu0 %v9990_v18  ;;  %v10159_v10 = vcombine.high %v868_v42, %v872_v7  ;;  %v748_v12 = vld [vmem:[#allocation5 + $0x1388] sm:$0xff]  ;;  %v10030_v18 = vcombine.low %v740_v28, %v744_v40 }
 0x2c2   :  { %8263 = vmatprep.subr.bf16.mxu0 %v9999_v24  ;;  %v752_v13 = vld [vmem:[#allocation5 + $0x13a8] sm:$0xff] }
 0x2c3   :  { %8303 = vmatpush1.bf16.msra.mxu1 %v10118_v20  ;;  %v876_v14 = vld [vmem:[#allocation5 + $0x1788] sm:$0xff]  ;;  %v10158_v20 = vcombine.low %v868_v42, %v872_v7  ;;  %v10039_v24 = vcombine.high %v748_v12, %v752_v13 }
 0x2c4   :  { %8304 = vmatprep.subr.bf16.mxu1 %v10127_v25  ;;  %v880_v17 = vld [vmem:[#allocation5 + $0x17a8] sm:$0xff] }
 0x2c5   :  { %8264 = vmatpush1.bf16.msra.mxu0 %v9998_v22  ;;  %v10167_v25 = vcombine.high %v876_v14, %v880_v17  ;;  %v756_v30 = vld [vmem:[#allocation5 + $0x13c8] sm:$0xff]  ;;  %v10038_v22 = vcombine.low %v748_v12, %v752_v13 }
 0x2c6   :  { %8265 = vmatprep.subr.bf16.mxu0 %v10007_v49  ;;  %v760_v32 = vld [vmem:[#allocation5 + $0x13e8] sm:$0xff] }
 0x2c7   :  { %8305 = vmatpush1.bf16.msra.mxu1 %v10126_v48  ;;  %v884_v36 = vld [vmem:[#allocation5 + $0x17c8] sm:$0xff]  ;;  %v10166_v48 = vcombine.low %v876_v14, %v880_v17  ;;  %v10047_v49 = vcombine.high %v756_v30, %v760_v32 }
 0x2c8   :  { %8306 = vmatprep.subr.bf16.mxu1 %v10135_v50  ;;  %v888_v39 = vld [vmem:[#allocation5 + $0x17e8] sm:$0xff] }
 0x2c9   :  { %8266 = vmatpush1.bf16.msra.mxu0 %v10006_v19  ;;  %v10175_v50 = vcombine.high %v884_v36, %v888_v39  ;;  %v892_v6 = vld [vmem:[#allocation5 + $0x1808] sm:$0xff]  ;;  %v10046_v19 = vcombine.low %v756_v30, %v760_v32 }
 0x2ca   :  { %8267 = vmatprep.subr.bf16.mxu0 %v10015_v55  ;;  %v896_v52 = vld [vmem:[#allocation5 + $0x1828] sm:$0xff] }
 0x2cb   :  { %8307 = vmatpush1.bf16.msra.mxu1 %v10134_v23  ;;  %v1020_v53 = vld [vmem:[#allocation5 + $0x1c08] sm:$0xff]  ;;  %v10174_v23 = vcombine.low %v884_v36, %v888_v39  ;;  %v10183_v55 = vcombine.high %v892_v6, %v896_v52 }
 0x2cc   :  { %8308 = vmatprep.subr.bf16.mxu1 %v10143_v26  ;;  %v1024_v1 = vld [vmem:[#allocation5 + $0x1c28] sm:$0xff] }
 0x2cd   :  { %8268 = vmatpush1.bf16.msra.mxu0 %v10014_v2  ;;  %v10311_v26 = vcombine.high %v1020_v53, %v1024_v1  ;;  %v900_v56 = vld [vmem:[#allocation5 + $0x1848] sm:$0xff]  ;;  %v10182_v2 = vcombine.low %v892_v6, %v896_v52 }
 0x2ce   :  { %8269 = vmatprep.subr.bf16.mxu0 %v10023_v29  ;;  %v904_v60 = vld [vmem:[#allocation5 + $0x1868] sm:$0xff] }
 0x2cf   :  { %8309 = vmatpush1.bf16.msra.mxu1 %v10142_v3  ;;  %v1028_v62 = vld [vmem:[#allocation5 + $0x1c48] sm:$0xff]  ;;  %v10310_v3 = vcombine.low %v1020_v53, %v1024_v1  ;;  %v10191_v29 = vcombine.high %v900_v56, %v904_v60 }
 0x2d0   :  { %8310 = vmatprep.subr.bf16.mxu1 %v10151_v5  ;;  %v1032_v0 = vld [vmem:[#allocation5 + $0x1c68] sm:$0xff] }
 0x2d1   :  { %8270 = vmatpush1.bf16.msra.mxu0 %v10022_v8  ;;  %v10319_v5 = vcombine.high %v1028_v62, %v1032_v0  ;;  %v908_v28 = vld [vmem:[#allocation5 + $0x1888] sm:$0xff]  ;;  %v10190_v8 = vcombine.low %v900_v56, %v904_v60 }
 0x2d2   :  { %8271 = vmatprep.subr.bf16.mxu0 %v10031_v45  ;;  %v912_v40 = vld [vmem:[#allocation5 + $0x18a8] sm:$0xff] }
 0x2d3   :  { %8311 = vmatpush1.bf16.msra.mxu1 %v10150_v9  ;;  %v1036_v42 = vld [vmem:[#allocation5 + $0x1c88] sm:$0xff]  ;;  %v10318_v9 = vcombine.low %v1028_v62, %v1032_v0  ;;  %v10199_v45 = vcombine.high %v908_v28, %v912_v40 }
 0x2d4   :  { %8312 = vmatprep.subr.bf16.mxu1 %v10159_v10  ;;  %v1040_v7 = vld [vmem:[#allocation5 + $0x1ca8] sm:$0xff] }
 0x2d5   :  { %8272 = vmatpush1.bf16.msra.mxu0 %v10030_v18  ;;  %v10327_v10 = vcombine.high %v1036_v42, %v1040_v7  ;;  %v916_v12 = vld [vmem:[#allocation5 + $0x18c8] sm:$0xff]  ;;  %v10198_v18 = vcombine.low %v908_v28, %v912_v40 }
 0x2d6   :  { %8273 = vmatprep.subr.bf16.mxu0 %v10039_v24  ;;  %v920_v13 = vld [vmem:[#allocation5 + $0x18e8] sm:$0xff] }
 0x2d7   :  { %8313 = vmatpush1.bf16.msra.mxu1 %v10158_v20  ;;  %v1044_v14 = vld [vmem:[#allocation5 + $0x1cc8] sm:$0xff]  ;;  %v10326_v20 = vcombine.low %v1036_v42, %v1040_v7  ;;  %v10207_v24 = vcombine.high %v916_v12, %v920_v13 }
 0x2d8   :  { %8314 = vmatprep.subr.bf16.mxu1 %v10167_v25  ;;  %v1048_v17 = vld [vmem:[#allocation5 + $0x1ce8] sm:$0xff] }
 0x2d9   :  { %8274 = vmatpush1.bf16.msra.mxu0 %v10038_v22  ;;  %v10335_v25 = vcombine.high %v1044_v14, %v1048_v17  ;;  %v924_v30 = vld [vmem:[#allocation5 + $0x1908] sm:$0xff]  ;;  %v9067_v22 = vlaneseq }
 0x2da   :  { %8275 = vmatprep.subr.bf16.mxu0 %v10047_v49  ;;  %v928_v32 = vld [vmem:[#allocation5 + $0x1928] sm:$0xff]  ;;  %v10334_v49 = vcombine.low %v1044_v14, %v1048_v17 }
 0x2db   :  { %8315 = vmatpush1.bf16.msra.mxu1 %v10166_v48  ;;  %v1052_v36 = vld [vmem:[#allocation5 + $0x1d08] sm:$0xff]  ;;  %v10206_v48 = vcombine.low %v916_v12, %v920_v13  ;;  %v10821_v1 = vshrl.u32 %v9067_v22, 7 }
 0x2dc   :  { %8316 = vmatprep.subr.bf16.mxu1 %v10175_v50  ;;  %v1056_v39 = vld [vmem:[#allocation5 + $0x1d28] sm:$0xff]  ;;  %v10215_v50 = vcombine.high %v924_v30, %v928_v32 }
 0x2dd   :  { %8276 = vmatpush1.bf16.msra.mxu0 %v10046_v19  ;;  %v10343_v6 = vcombine.high %v1052_v36, %v1056_v39  ;;  %v932_v52 = vld [vmem:[#allocation5 + $0x1948] sm:$0xff]  ;;  %v9073_v28 = vsub.s32 1, %v10821_v1 }
 0x2de   :  { %8327 = vmatprep.subr.bf16.mxu0 %v10183_v55  ;;  %v936_v53 = vld [vmem:[#allocation5 + $0x1968] sm:$0xff]  ;;  %v10214_v55 = vcombine.low %v924_v30, %v928_v32 }
 0x2df   :  { %8317 = vmatpush1.bf16.msra.mxu1 %v10174_v23  ;;  %v1060_v19 = vld [vmem:[#allocation5 + $0x1d48] sm:$0xff]  ;;  %v10223_v56 = vcombine.high %v932_v52, %v936_v53  ;;  %v10222_v40 = vcombine.low %v932_v52, %v936_v53 }
 0x2e0   :  { %8368 = vmatprep.subr.bf16.mxu1 %v10311_v26  ;;  %8278 = vmatmul.mubr.bf16.vlgmr.msra.gmra.mrb[40].mxu0 %v10767_v11  ;;  %v1064_v23 = vld [vmem:[#allocation5 + $0x1d68] sm:$0xff]  ;;  %v10342_v26 = vcombine.low %v1052_v36, %v1056_v39 }
 0x2e1   :  { %8328 = vmatpush1.bf16.msra.mxu0 %v10182_v2  ;;  %8359 = vmatprep.mubr.bf16.mxu0 %v10771_v31  ;;  %v10351_v60 = vcombine.high %v1060_v19, %v1064_v23  ;;  %v940_v62 = vld [vmem:[#allocation5 + $0x1988] sm:$0xff]  ;;  %v9069_v2 = vsub.s32 0, %v10821_v1  ;;  %v10350_v42 = vcombine.low %v1060_v19, %v1064_v23 }
 0x2e2   :  { %8319 = vmatmul.mubr.bf16.vlgmr.msra.gmra.mrb[40].mxu1 %v10769_v15  ;;  %8329 = vmatprep.subr.bf16.mxu0 %v10191_v29  ;;  %v944_v0 = vld [vmem:[#allocation5 + $0x19a8] sm:$0xff] }
 0x2e3   :  { %8369 = vmatpush1.bf16.msra.mxu1 %v10310_v3  ;;  %8400 = vmatprep.mubr.bf16.mxu1 %v10774_v34  ;;  %v1068_v3 = vld [vmem:[#allocation5 + $0x1d88] sm:$0xff]  ;;  %v10231_v7 = vcombine.high %v940_v62, %v944_v0  ;;  %v10230_v36 = vcombine.low %v940_v62, %v944_v0 }
 0x2e4   :  { %8370 = vmatprep.subr.bf16.mxu1 %v10319_v5  ;;  %v1072_v29 = vld [vmem:[#allocation5 + $0x1da8] sm:$0xff]  ;;  %v9065_v5 = vld [vmem:[#allocation8] sm:$0xff] }
 0x2e5   :  { %8330 = vmatpush1.bf16.msra.mxu0 %v10190_v8  ;;  %v9070_v14 = vrot.slane %v9065_v5, %v9069_v2  ;;  %v9074_v30 = vrot.slane %v9065_v5, %v9073_v28  ;;  %v9139_v22 = vld [vmem:[#allocation10] sm:$0xff] }
 0x2e6   :  { %8331 = vmatprep.subr.bf16.mxu0 %v10199_v45  ;;  %v948_v45 = vld [vmem:[#allocation5 + $0x19c8] sm:$0xff] }
 0x2e7   :  { %8371 = vmatpush1.bf16.msra.mxu1 %v10318_v9  ;;  %v10359_v9 = vcombine.high %v1068_v3, %v1072_v29  ;;  %v956_v19 = vld [vmem:[#allocation5 + $0x1a08] sm:$0xff] }
 0x2e8   :  { %8372 = vmatprep.subr.bf16.mxu1 %v10327_v10  ;;  %v952_v10 = vld [vmem:[#allocation5 + $0x19e8] sm:$0xff] }
 0x2e9   :  { %8332 = vmatpush1.bf16.msra.mxu0 %v10198_v18  ;;  %v1076_v18 = vld [vmem:[#allocation5 + $0x1dc8] sm:$0xff]  ;;  %v10238_v62 = vcombine.low %v948_v45, %v952_v10 }
 0x2ea   :  { %8333 = vmatprep.subr.bf16.mxu0 %v10207_v24  ;;  %v960_v23 = vld [vmem:[#allocation5 + $0x1a28] sm:$0xff] }
 0x2eb   :  { %8373 = vmatpush1.bf16.msra.mxu1 %v10326_v20  ;;  %v1080_v20 = vld [vmem:[#allocation5 + $0x1de8] sm:$0xff] }
 0x2ec   :  { %8374 = vmatprep.subr.bf16.mxu1 %v10335_v25  ;;  %v10367_v53 = vcombine.high %v1076_v18, %v1080_v20  ;;  %v10366_v0 = vcombine.low %v1076_v18, %v1080_v20  ;;  %v972_v20 = vld [vmem:[#allocation5 + $0x1a88] sm:$0xff] }
 0x2ed   :  { %8334 = vmatpush1.bf16.msra.mxu0 %v10206_v48 }
 0x2ee   :  { %8335 = vmatprep.subr.bf16.mxu0 %v10215_v50  ;;  %v10358_v50 = vcombine.low %v1068_v3, %v1072_v29  ;;  %v10247_v3 = vcombine.high %v956_v19, %v960_v23 }
 0x2ef   :  { %8375 = vmatpush1.bf16.msra.mxu1 %v10334_v49 }
 0x2f0   :  { %8376 = vmatprep.subr.bf16.mxu1 %v10343_v6 }
 0x2f1   :  { %8336 = vmatpush1.bf16.msra.mxu0 %v10214_v55  ;;  %v1084_v55 = vld [vmem:[#allocation5 + $0x1e08] sm:$0xff] }
 0x2f2   :  { %8337 = vmatprep.subr.bf16.mxu0 %v10223_v56  ;;  %v9144_v56 = vrot.slane %v9139_v22, %v9069_v2 }
 0x2f3   :  { %8377 = vmatpush1.bf16.msra.mxu1 %v10342_v26  ;;  %v8033_v8 = vpop.f32.mrb[28].mxu0  ;;  %v1088_v26 = vld [vmem:[#allocation5 + $0x1e28] sm:$0xff] }
 0x2f4   :  { %8378 = vmatprep.subr.bf16.mxu1 %v10351_v60  ;;  %v8034_v12 = vadd.f32 %v8033_v8, %v10813_v61  ;;  %v8035_v17 = vpop.f32.mrb[29].mxu0  ;;  %v10239_v61 = vcombine.high %v948_v45, %v952_v10  ;;  %v968_v8 = vld [vmem:[#allocation5 + $0x1a68] sm:$0xff]  ;;  %v10246_v45 = vcombine.low %v956_v19, %v960_v23 }
 0x2f5   :  { %v8074_v13 = vpop.f32.mrb[28].mxu1  ;;  %v8036_v24 = vadd.f32 %v8035_v17, %v10815_v4  ;;  %v8037_v32 = vpop.f32.mrb[30].mxu0  ;;  %8338 = vmatpush1.bf16.msra.mxu0 %v10222_v40  ;;  %v9148_v40 = vrot.slane %v9139_v22, %v9073_v28  ;;  %v10374_v28 = vcombine.low %v1084_v55, %v1088_v26 }
 0x2f6   :  { %v8076_v25 = vpop.f32.mrb[29].mxu1  ;;  %v8075_v39 = vadd.f32 %v8074_v13, %v8034_v12  ;;  %v8038_v49 = vpop.f32.mrb[31].mxu0  ;;  %8339 = vmatprep.subr.bf16.mxu0 %v10231_v7  ;;  %v964_v7 = vld [vmem:[#allocation5 + $0x1a48] sm:$0xff] }
 0x2f7   :  { %v8078_v48 = vpop.f32.mrb[30].mxu1  ;;  %8379 = vmatpush1.bf16.msra.mxu1 %v10350_v42  ;;  %v8077_v6 = vadd.f32 %v8076_v25, %v8036_v24  ;;  %v10375_v42 = vcombine.high %v1084_v55, %v1088_v26  ;;  %v1092_v12 = vld [vmem:[#allocation5 + $0x1e48] sm:$0xff]  ;;  %v10255_v17 = vcombine.high %v964_v7, %v968_v8 }
 0x2f8   :  { %v8079_v52 = vpop.f32.mrb[31].mxu1  ;;  %8380 = vmatprep.subr.bf16.mxu1 %v10359_v9  ;;  %v9107_v4 = vadd.f32 %v9070_v14, %v8075_v39  ;;  %v1096_v13 = vld [vmem:[#allocation5 + $0x1e68] sm:$0xff] }
 0x2f9   :  { %v9108_v60 = vadd.f32 %v9074_v30, %v8077_v6  ;;  %8340 = vmatpush1.bf16.msra.mxu0 %v10230_v36  ;;  %v10383_v18 = vcombine.high %v1092_v12, %v1096_v13  ;;  %v976_v24 = vld [vmem:[#allocation5 + $0x1aa8] sm:$0xff]  ;;  %v10254_v36 = vcombine.low %v964_v7, %v968_v8  ;;  %v10382_v39 = vcombine.low %v1092_v12, %v1096_v13 }
 0x2fa   :  { %vm9115_vm0 = vcmp.gt.f32.partialorder %v9107_v4, 0.0  ;;  %v9123_v5 = vmul.f32 0.2, %v9107_v4  ;;  %8341 = vmatprep.subr.bf16.mxu0 %v10239_v61  ;;  %v1100_v30 = vld [vmem:[#allocation5 + $0x1e88] sm:$0xff]  ;;  %v10263_v22 = vcombine.high %v972_v20, %v976_v24  ;;  %v10262_v52 = vcombine.low %v972_v20, %v976_v24 }
 0x2fb   :  { %8381 = vmatpush1.bf16.msra.mxu1 %v10358_v50  ;;  %vm9116_vm1 = vcmp.gt.f32.partialorder %v9108_v60, 0.0  ;;  %v9124_v29 = vmul.f32 0.2, %v9108_v60  ;;  %v1104_v32 = vld [vmem:[#allocation5 + $0x1ea8] sm:$0xff] }
 0x2fc   :  { %8382 = vmatprep.subr.bf16.mxu1 %v10367_v53  ;;  %v9131_v9 = vsel %vm9115_vm0, %v9107_v4, %v9123_v5  ;;  %v10391_v48 = vcombine.high %v1100_v30, %v1104_v32  ;;  %v980_v49 = vld [vmem:[#allocation5 + $0x1ac8] sm:$0xff]  ;;  %v10390_v53 = vcombine.low %v1100_v30, %v1104_v32 }
 0x2fd   :  { %v9181_v2 = vmul.f32 %v9144_v56, %v9131_v9  ;;  %v9132_v14 = vsel %vm9116_vm1, %v9108_v60, %v9124_v29  ;;  %8342 = vmatpush1.bf16.msra.mxu0 %v10238_v62  ;;  %v984_v50 = vld [vmem:[#allocation5 + $0x1ae8] sm:$0xff] }
 0x2fe   :  { %v9182_v10 = vmul.f32 %v9148_v40, %v9132_v14  ;;  %8343 = vmatprep.subr.bf16.mxu0 %v10247_v3  ;;  %v1108_v61 = vld [vmem:[#allocation5 + $0x1ec8] sm:$0xff]  ;;  %v10271_v19 = vcombine.high %v980_v49, %v984_v50  ;;  %v10270_v60 = vcombine.low %v980_v49, %v984_v50  ;;  %v125_v49 = vld [vmem:[#allocation5 + $0x10] sm:$0xff] }
 0x2ff   :  { %8383 = vmatpush1.bf16.msra.mxu1 %v10366_v0  ;;  %v1112_v6 = vld [vmem:[#allocation5 + $0x1ee8] sm:$0xff]  ;;  %v129_v50 = vld [vmem:[#allocation5 + $0x30] sm:$0xff] }
 0x300   :  { %8384 = vmatprep.subr.bf16.mxu1 %v10375_v42  ;;  %v10827_v25 = vadd.f32 %v9182_v10, %v9181_v2  ;;  %v10399_v23 = vcombine.high %v1108_v61, %v1112_v6  ;;  %v988_v4 = vld [vmem:[#allocation5 + $0x1b08] sm:$0xff]  ;;  %v10398_v62 = vcombine.low %v1108_v61, %v1112_v6  ;;  %v253_v61 = vld [vmem:[#allocation5 + $0x410] sm:$0xff] }
 0x301   :  { %8344 = vmatpush1.bf16.msra.mxu0 %v10246_v45  ;;  %v992_v55 = vld [vmem:[#allocation5 + $0x1b28] sm:$0xff]  ;;  %v257_v6 = vld [vmem:[#allocation5 + $0x430] sm:$0xff] }
 0x302   :  { %8345 = vmatprep.subr.bf16.mxu0 %v10255_v17  ;;  %v1116_v26 = vld [vmem:[#allocation5 + $0x1f08] sm:$0xff]  ;;  %v10279_v0 = vcombine.high %v988_v4, %v992_v55  ;;  %v10278_v7 = vcombine.low %v988_v4, %v992_v55  ;;  %v133_v4 = vld [vmem:[#allocation5 + $0x50] sm:$0xff] }
 0x303   :  { %8385 = vmatpush1.bf16.msra.mxu1 %v10374_v28  ;;  %v1120_v56 = vld [vmem:[#allocation5 + $0x1f28] sm:$0xff]  ;;  %v137_v55 = vld [vmem:[#allocation5 + $0x70] sm:$0xff] }
 0x304   :  { %8386 = vmatprep.subr.bf16.mxu1 %v10383_v18  ;;  %v10407_v5 = vcombine.high %v1116_v26, %v1120_v56  ;;  %v996_v40 = vld [vmem:[#allocation5 + $0x1b48] sm:$0xff]  ;;  %v10406_v8 = vcombine.low %v1116_v26, %v1120_v56  ;;  %v261_v26 = vld [vmem:[#allocation5 + $0x450] sm:$0xff] }
 0x305   :  { %8346 = vmatpush1.bf16.msra.mxu0 %v10254_v36  ;;  %v1000_v3 = vld [vmem:[#allocation5 + $0x1b68] sm:$0xff]  ;;  %v265_v56 = vld [vmem:[#allocation5 + $0x470] sm:$0xff] }
 0x306   :  { %8347 = vmatprep.subr.bf16.mxu0 %v10263_v22  ;;  %v1124_v29 = vld [vmem:[#allocation5 + $0x1f48] sm:$0xff]  ;;  %v10287_v9 = vcombine.high %v996_v40, %v1000_v3  ;;  %v10286_v10 = vcombine.low %v996_v40, %v1000_v3  ;;  %v141_v40 = vld [vmem:[#allocation5 + $0x90] sm:$0xff] }
 0x307   :  { %8387 = vmatpush1.bf16.msra.mxu1 %v10382_v39  ;;  %v1128_v42 = vld [vmem:[#allocation5 + $0x1f68] sm:$0xff]  ;;  %v145_v3 = vld [vmem:[#allocation5 + $0xb0] sm:$0xff] }
 0x308   :  { %8388 = vmatprep.subr.bf16.mxu1 %v10391_v48  ;;  %v10415_v12 = vcombine.high %v1124_v29, %v1128_v42  ;;  %v1004_v13 = vld [vmem:[#allocation5 + $0x1b88] sm:$0xff]  ;;  %v10414_v28 = vcombine.low %v1124_v29, %v1128_v42  ;;  %v269_v29 = vld [vmem:[#allocation5 + $0x490] sm:$0xff] }
 0x309   :  { %8348 = vmatpush1.bf16.msra.mxu0 %v10262_v52  ;;  %v1008_v2 = vld [vmem:[#allocation5 + $0x1ba8] sm:$0xff]  ;;  %v273_v42 = vld [vmem:[#allocation5 + $0x4b0] sm:$0xff] }
 0x30a   :  { %8349 = vmatprep.subr.bf16.mxu0 %v10271_v19  ;;  %v1132_v14 = vld [vmem:[#allocation5 + $0x1f88] sm:$0xff]  ;;  %v10295_v17 = vcombine.high %v1004_v13, %v1008_v2  ;;  %v10294_v36 = vcombine.low %v1004_v13, %v1008_v2  ;;  %v9417_v19 = vcombine.high %v125_v49, %v129_v50  ;;  %v149_v13 = vld [vmem:[#allocation5 + $0xd0] sm:$0xff] }
 0x30b   :  { %8389 = vmatpush1.bf16.msra.mxu1 %v10390_v53  ;;  %v1136_v45 = vld [vmem:[#allocation5 + $0x1fa8] sm:$0xff]  ;;  %v153_v2 = vld [vmem:[#allocation5 + $0xf0] sm:$0xff] }
 0x30c   :  { %8390 = vmatprep.subr.bf16.mxu1 %v10399_v23  ;;  %v10423_v18 = vcombine.high %v1132_v14, %v1136_v45  ;;  %v1012_v20 = vld [vmem:[#allocation5 + $0x1bc8] sm:$0xff]  ;;  %v10422_v39 = vcombine.low %v1132_v14, %v1136_v45  ;;  %v9545_v23 = vcombine.high %v253_v61, %v257_v6  ;;  %v277_v14 = vld [vmem:[#allocation5 + $0x4d0] sm:$0xff] }
 0x30d   :  { %8350 = vmatpush1.bf16.msra.mxu0 %v10270_v60  ;;  %v1016_v24 = vld [vmem:[#allocation5 + $0x1be8] sm:$0xff]  ;;  %v9416_v60 = vcombine.low %v125_v49, %v129_v50  ;;  %v281_v45 = vld [vmem:[#allocation5 + $0x4f0] sm:$0xff] }
 0x30e   :  { %8351 = vmatprep.subr.bf16.mxu0 %v10279_v0  ;;  %v1140_v30 = vld [vmem:[#allocation5 + $0x1fc8] sm:$0xff]  ;;  %v10303_v22 = vcombine.high %v1012_v20, %v1016_v24  ;;  %v10302_v52 = vcombine.low %v1012_v20, %v1016_v24  ;;  %v9425_v0 = vcombine.high %v133_v4, %v137_v55  ;;  %v157_v20 = vld [vmem:[#allocation5 + $0x110] sm:$0xff] }
 0x30f   :  { %8391 = vmatpush1.bf16.msra.mxu1 %v10398_v62  ;;  %v1144_v32 = vld [vmem:[#allocation5 + $0x1fe8] sm:$0xff]  ;;  %v9544_v62 = vcombine.low %v253_v61, %v257_v6  ;;  %v161_v24 = vld [vmem:[#allocation5 + $0x130] sm:$0xff] }
 0x310   :  { %8392 = vmatprep.subr.bf16.mxu1 %v10407_v5  ;;  %v10431_v48 = vcombine.high %v1140_v30, %v1144_v32  ;;  %v10430_v53 = vcombine.low %v1140_v30, %v1144_v32  ;;  %v9553_v5 = vcombine.high %v261_v26, %v265_v56  ;;  %v285_v30 = vld [vmem:[#allocation5 + $0x510] sm:$0xff] }
 0x311   :  { %8352 = vmatpush1.bf16.msra.mxu0 %v10278_v7  ;;  %v9424_v7 = vcombine.low %v133_v4, %v137_v55  ;;  %v289_v32 = vld [vmem:[#allocation5 + $0x530] sm:$0xff] }
 0x312   :  { %8353 = vmatprep.subr.bf16.mxu0 %v10287_v9  ;;  %v9433_v9 = vcombine.high %v141_v40, %v145_v3  ;;  %v165_v49 = vld [vmem:[#allocation5 + $0x150] sm:$0xff] }
 0x313   :  { %8393 = vmatpush1.bf16.msra.mxu1 %v10406_v8  ;;  %v9552_v8 = vcombine.low %v261_v26, %v265_v56  ;;  %v169_v50 = vld [vmem:[#allocation5 + $0x170] sm:$0xff] }
 0x314   :  { %8394 = vmatprep.subr.bf16.mxu1 %v10415_v12  ;;  %v9561_v12 = vcombine.high %v269_v29, %v273_v42  ;;  %v293_v61 = vld [vmem:[#allocation5 + $0x550] sm:$0xff] }
 0x315   :  { %8354 = vmatpush1.bf16.msra.mxu0 %v10286_v10  ;;  %v9432_v10 = vcombine.low %v141_v40, %v145_v3  ;;  %v297_v6 = vld [vmem:[#allocation5 + $0x570] sm:$0xff] }
 0x316   :  { %8355 = vmatprep.subr.bf16.mxu0 %v10295_v17  ;;  %v9441_v17 = vcombine.high %v149_v13, %v153_v2  ;;  %v173_v4 = vld [vmem:[#allocation5 + $0x190] sm:$0xff] }
 0x317   :  { %8395 = vmatpush1.bf16.msra.mxu1 %v10414_v28  ;;  %v9560_v28 = vcombine.low %v269_v29, %v273_v42  ;;  %v177_v55 = vld [vmem:[#allocation5 + $0x1b0] sm:$0xff] }
 0x318   :  { %8396 = vmatprep.subr.bf16.mxu1 %v10423_v18  ;;  %v9569_v18 = vcombine.high %v277_v14, %v281_v45  ;;  %v301_v26 = vld [vmem:[#allocation5 + $0x590] sm:$0xff] }
 0x319   :  { %8356 = vmatpush1.bf16.msra.mxu0 %v10294_v36  ;;  %v9440_v36 = vcombine.low %v149_v13, %v153_v2  ;;  %v305_v56 = vld [vmem:[#allocation5 + $0x5b0] sm:$0xff] }
 0x31a   :  { %8357 = vmatprep.subr.bf16.mxu0 %v10303_v22  ;;  %v9449_v22 = vcombine.high %v157_v20, %v161_v24  ;;  %v9593_v40 = vcombine.high %v301_v26, %v305_v56  ;;  %v181_v3 = vld [vmem:[#allocation5 + $0x1d0] sm:$0xff] }
 0x31b   :  { %8397 = vmatpush1.bf16.msra.mxu1 %v10422_v39  ;;  %v9568_v39 = vcombine.low %v277_v14, %v281_v45  ;;  %v185_v29 = vld [vmem:[#allocation5 + $0x1f0] sm:$0xff]  ;;  %v9464_v45 = vcombine.low %v173_v4, %v177_v55 }
 0x31c   :  { %8398 = vmatprep.subr.bf16.mxu1 %v10431_v48  ;;  %v9577_v48 = vcombine.high %v285_v30, %v289_v32 }
 0x31d   :  { %8358 = vmatpush1.bf16.msra.mxu0 %v10302_v52  ;;  %v9448_v52 = vcombine.low %v157_v20, %v161_v24  ;;  %v9473_v20 = vcombine.high %v181_v3, %v185_v29 }
 0x31e   :  { %8409 = vmatprep.subr.bf16.mxu0 %v9417_v19  ;;  %v9457_v19 = vcombine.high %v165_v49, %v169_v50 }
 0x31f   :  { %8399 = vmatpush1.bf16.msra.mxu1 %v10430_v53  ;;  %v9576_v53 = vcombine.low %v285_v30, %v289_v32  ;;  %v189_v32 = vld [vmem:[#allocation5 + $0x210] sm:$0xff] }
 0x320   :  { %8450 = vmatprep.subr.bf16.mxu1 %v9545_v23  ;;  %8360 = vmatmul.mubr.bf16.vlgmr.msra.gmra.mrb[44].mxu0 %v10783_v37  ;;  %v9585_v23 = vcombine.high %v293_v61, %v297_v6 }
 0x321   :  { %8410 = vmatpush1.bf16.msra.mxu0 %v9416_v60  ;;  %8441 = vmatprep.mubr.bf16.mxu0 %v10711_v43  ;;  %v9456_v60 = vcombine.low %v165_v49, %v169_v50 }
 0x322   :  { %8401 = vmatmul.mubr.bf16.vlgmr.msra.gmra.mrb[44].mxu1 %v10785_v44  ;;  %8411 = vmatprep.subr.bf16.mxu0 %v9425_v0  ;;  %v9465_v0 = vcombine.high %v173_v4, %v177_v55 }
 0x323   :  { %8451 = vmatpush1.bf16.msra.mxu1 %v9544_v62  ;;  %8482 = vmatprep.mubr.bf16.mxu1 %v10714_v46  ;;  %v9584_v62 = vcombine.low %v293_v61, %v297_v6  ;;  %v197_v61 = vld [vmem:[#allocation5 + $0x250] sm:$0xff] }
 0x324   :  { %8452 = vmatprep.subr.bf16.mxu1 %v9553_v5  ;;  %v201_v6 = vld [vmem:[#allocation5 + $0x270] sm:$0xff] }
 0x325   :  { %8412 = vmatpush1.bf16.msra.mxu0 %v9424_v7  ;;  %v9489_v4 = vcombine.high %v197_v61, %v201_v6 }
 0x326   :  { %8413 = vmatprep.subr.bf16.mxu0 %v9433_v9  ;;  %v309_v9 = vld [vmem:[#allocation5 + $0x5d0] sm:$0xff] }
 0x327   :  { %8453 = vmatpush1.bf16.msra.mxu1 %v9552_v8 }
 0x328   :  { %8454 = vmatprep.subr.bf16.mxu1 %v9561_v12  ;;  %v313_v12 = vld [vmem:[#allocation5 + $0x5f0] sm:$0xff] }
 0x329   :  { %8414 = vmatpush1.bf16.msra.mxu0 %v9432_v10  ;;  %v9601_v30 = vcombine.high %v309_v9, %v313_v12 }
 0x32a   :  { %8415 = vmatprep.subr.bf16.mxu0 %v9441_v17 }
 0x32b   :  { %8455 = vmatpush1.bf16.msra.mxu1 %v9560_v28 }
 0x32c   :  { %8456 = vmatprep.subr.bf16.mxu1 %v9569_v18  ;;  %v9592_v18 = vcombine.low %v301_v26, %v305_v56  ;;  %v205_v26 = vld [vmem:[#allocation5 + $0x290] sm:$0xff] }
 0x32d   :  { %8416 = vmatpush1.bf16.msra.mxu0 %v9440_v36  ;;  %v193_v36 = vld [vmem:[#allocation5 + $0x230] sm:$0xff] }
 0x32e   :  { %8417 = vmatprep.subr.bf16.mxu0 %v9449_v22  ;;  %v9472_v22 = vcombine.low %v181_v3, %v185_v29  ;;  %v9481_v49 = vcombine.high %v189_v32, %v193_v36  ;;  %v209_v56 = vld [vmem:[#allocation5 + $0x2b0] sm:$0xff] }
 0x32f   :  { %8457 = vmatpush1.bf16.msra.mxu1 %v9568_v39  ;;  %v321_v39 = vld [vmem:[#allocation5 + $0x630] sm:$0xff] }
 0x330   :  { %8458 = vmatprep.subr.bf16.mxu1 %v9577_v48  ;;  %v9600_v48 = vcombine.low %v309_v9, %v313_v12  ;;  %v213_v29 = vld [vmem:[#allocation5 + $0x2d0] sm:$0xff]  ;;  %v9496_v9 = vcombine.low %v205_v26, %v209_v56 }
 0x331   :  { %8418 = vmatpush1.bf16.msra.mxu0 %v9448_v52  ;;  %v325_v52 = vld [vmem:[#allocation5 + $0x650] sm:$0xff] }
 0x332   :  { %8419 = vmatprep.subr.bf16.mxu0 %v9457_v19  ;;  %v9480_v19 = vcombine.low %v189_v32, %v193_v36  ;;  %v229_v32 = vld [vmem:[#allocation5 + $0x350] sm:$0xff] }
 0x333   :  { %8459 = vmatpush1.bf16.msra.mxu1 %v9576_v53  ;;  %v8115_v5 = vpop.f32.mrb[32].mxu0  ;;  %v329_v53 = vld [vmem:[#allocation5 + $0x670] sm:$0xff] }
 0x334   :  { %8460 = vmatprep.subr.bf16.mxu1 %v9585_v23  ;;  %v8116_v42 = vadd.f32 %v8115_v5, %v10741_v57  ;;  %v8117_v8 = vpop.f32.mrb[33].mxu0  ;;  %v9617_v55 = vcombine.high %v325_v52, %v329_v53  ;;  %v9616_v5 = vcombine.low %v325_v52, %v329_v53  ;;  %v233_v36 = vld [vmem:[#allocation5 + $0x370] sm:$0xff] }
 0x335   :  { %v8156_v7 = vpop.f32.mrb[32].mxu1  ;;  %v8118_v13 = vadd.f32 %v8117_v8, %v10743_v63  ;;  %v8119_v14 = vpop.f32.mrb[34].mxu0  ;;  %8420 = vmatpush1.bf16.msra.mxu0 %v9456_v60  ;;  %v317_v63 = vld [vmem:[#allocation5 + $0x610] sm:$0xff] }
 0x336   :  { %v8158_v2 = vpop.f32.mrb[33].mxu1  ;;  %v10835_v10 = vadd.f32 %v8156_v7, %v8116_v42  ;;  %v8120_v17 = vpop.f32.mrb[35].mxu0  ;;  %8421 = vmatprep.subr.bf16.mxu0 %v9465_v0  ;;  %v9609_v50 = vcombine.high %v317_v63, %v321_v39  ;;  %v9608_v23 = vcombine.low %v317_v63, %v321_v39  ;;  %v333_v60 = vld [vmem:[#allocation5 + $0x690] sm:$0xff]  ;;  %v9488_v0 = vcombine.low %v197_v61, %v201_v6 }
 0x337   :  { %v8160_v28 = vpop.f32.mrb[34].mxu1  ;;  %8461 = vmatpush1.bf16.msra.mxu1 %v9584_v62  ;;  %v10837_v24 = vadd.f32 %v8158_v2, %v8118_v13  ;;  %v337_v62 = vld [vmem:[#allocation5 + $0x6b0] sm:$0xff] }
 0x338   :  { %v8161_v57 = vpop.f32.mrb[35].mxu1  ;;  %8462 = vmatprep.subr.bf16.mxu1 %v9593_v40  ;;  %v9497_v40 = vcombine.high %v205_v26, %v209_v56  ;;  %v9625_v3 = vcombine.high %v333_v60, %v337_v62  ;;  %v217_v42 = vld [vmem:[#allocation5 + $0x2f0] sm:$0xff]  ;;  %v9624_v12 = vcombine.low %v333_v60, %v337_v62 }
 0x339   :  { %8422 = vmatpush1.bf16.msra.mxu0 %v9464_v45  ;;  %v341_v7 = vld [vmem:[#allocation5 + $0x6d0] sm:$0xff]  ;;  %v9505_v13 = vcombine.high %v213_v29, %v217_v42 }
 0x33a   :  { %8423 = vmatprep.subr.bf16.mxu0 %v9473_v20  ;;  %v345_v8 = vld [vmem:[#allocation5 + $0x6f0] sm:$0xff] }
 0x33b   :  { %8463 = vmatpush1.bf16.msra.mxu1 %v9592_v18  ;;  %v9633_v2 = vcombine.high %v341_v7, %v345_v8  ;;  %v221_v14 = vld [vmem:[#allocation5 + $0x310] sm:$0xff]  ;;  %v9504_v18 = vcombine.low %v213_v29, %v217_v42  ;;  %v9632_v20 = vcombine.low %v341_v7, %v345_v8 }
 0x33c   :  { %8464 = vmatprep.subr.bf16.mxu1 %v9601_v30  ;;  %v225_v45 = vld [vmem:[#allocation5 + $0x330] sm:$0xff] }
 0x33d   :  { %8424 = vmatpush1.bf16.msra.mxu0 %v9472_v22  ;;  %v349_v28 = vld [vmem:[#allocation5 + $0x710] sm:$0xff]  ;;  %v9513_v57 = vcombine.high %v221_v14, %v225_v45  ;;  %v9512_v22 = vcombine.low %v221_v14, %v225_v45 }
 0x33e   :  { %8425 = vmatprep.subr.bf16.mxu0 %v9481_v49  ;;  %v353_v17 = vld [vmem:[#allocation5 + $0x730] sm:$0xff]  ;;  %v9521_v49 = vcombine.high %v229_v32, %v233_v36 }
 0x33f   :  { %8465 = vmatpush1.bf16.msra.mxu1 %v9600_v48  ;;  %v9641_v30 = vcombine.high %v349_v28, %v353_v17  ;;  %v357_v63 = vld [vmem:[#allocation5 + $0x750] sm:$0xff]  ;;  %v9640_v48 = vcombine.low %v349_v28, %v353_v17 }
 0x340   :  { %8466 = vmatprep.subr.bf16.mxu1 %v9609_v50  ;;  %v361_v39 = vld [vmem:[#allocation5 + $0x770] sm:$0xff] }
 0x341   :  { %8426 = vmatpush1.bf16.msra.mxu0 %v9480_v19  ;;  %v9649_v50 = vcombine.high %v357_v63, %v361_v39  ;;  %v237_v61 = vld [vmem:[#allocation5 + $0x390] sm:$0xff]  ;;  %v9520_v19 = vcombine.low %v229_v32, %v233_v36 }
 0x342   :  { %8427 = vmatprep.subr.bf16.mxu0 %v9489_v4  ;;  %v241_v6 = vld [vmem:[#allocation5 + $0x3b0] sm:$0xff] }
 0x343   :  { %8467 = vmatpush1.bf16.msra.mxu1 %v9608_v23  ;;  %v365_v52 = vld [vmem:[#allocation5 + $0x790] sm:$0xff]  ;;  %v9648_v23 = vcombine.low %v357_v63, %v361_v39  ;;  %v9529_v4 = vcombine.high %v237_v61, %v241_v6 }
 0x344   :  { %8468 = vmatprep.subr.bf16.mxu1 %v9617_v55  ;;  %v369_v53 = vld [vmem:[#allocation5 + $0x7b0] sm:$0xff] }
 0x345   :  { %8428 = vmatpush1.bf16.msra.mxu0 %v9488_v0  ;;  %v9657_v55 = vcombine.high %v365_v52, %v369_v53  ;;  %v245_v26 = vld [vmem:[#allocation5 + $0x3d0] sm:$0xff]  ;;  %v9528_v0 = vcombine.low %v237_v61, %v241_v6 }
 0x346   :  { %8429 = vmatprep.subr.bf16.mxu0 %v9497_v40  ;;  %v249_v56 = vld [vmem:[#allocation5 + $0x3f0] sm:$0xff] }
 0x347   :  { %8469 = vmatpush1.bf16.msra.mxu1 %v9616_v5  ;;  %v373_v60 = vld [vmem:[#allocation5 + $0x7d0] sm:$0xff]  ;;  %v9656_v5 = vcombine.low %v365_v52, %v369_v53  ;;  %v9537_v40 = vcombine.high %v245_v26, %v249_v56 }
 0x348   :  { %8470 = vmatprep.subr.bf16.mxu1 %v9625_v3  ;;  %v377_v62 = vld [vmem:[#allocation5 + $0x7f0] sm:$0xff] }
 0x349   :  { %8430 = vmatpush1.bf16.msra.mxu0 %v9496_v9  ;;  %v9665_v3 = vcombine.high %v373_v60, %v377_v62  ;;  %v381_v29 = vld [vmem:[#allocation5 + $0x810] sm:$0xff]  ;;  %v9536_v9 = vcombine.low %v245_v26, %v249_v56 }
 0x34a   :  { %8431 = vmatprep.subr.bf16.mxu0 %v9505_v13  ;;  %v385_v42 = vld [vmem:[#allocation5 + $0x830] sm:$0xff] }
 0x34b   :  { %8471 = vmatpush1.bf16.msra.mxu1 %v9624_v12  ;;  %v509_v7 = vld [vmem:[#allocation5 + $0xc10] sm:$0xff]  ;;  %v9664_v12 = vcombine.low %v373_v60, %v377_v62  ;;  %v9673_v13 = vcombine.high %v381_v29, %v385_v42 }
 0x34c   :  { %8472 = vmatprep.subr.bf16.mxu1 %v9633_v2  ;;  %v513_v8 = vld [vmem:[#allocation5 + $0xc30] sm:$0xff] }
 0x34d   :  { %8432 = vmatpush1.bf16.msra.mxu0 %v9504_v18  ;;  %v9801_v2 = vcombine.high %v509_v7, %v513_v8  ;;  %v389_v14 = vld [vmem:[#allocation5 + $0x850] sm:$0xff]  ;;  %v9672_v18 = vcombine.low %v381_v29, %v385_v42 }
 0x34e   :  { %8433 = vmatprep.subr.bf16.mxu0 %v9513_v57  ;;  %v393_v45 = vld [vmem:[#allocation5 + $0x870] sm:$0xff] }
 0x34f   :  { %8473 = vmatpush1.bf16.msra.mxu1 %v9632_v20  ;;  %v517_v28 = vld [vmem:[#allocation5 + $0xc50] sm:$0xff]  ;;  %v9800_v20 = vcombine.low %v509_v7, %v513_v8  ;;  %v9681_v57 = vcombine.high %v389_v14, %v393_v45 }
 0x350   :  { %8474 = vmatprep.subr.bf16.mxu1 %v9641_v30  ;;  %v521_v17 = vld [vmem:[#allocation5 + $0xc70] sm:$0xff] }
 0x351   :  { %8434 = vmatpush1.bf16.msra.mxu0 %v9512_v22  ;;  %v9809_v30 = vcombine.high %v517_v28, %v521_v17  ;;  %v397_v32 = vld [vmem:[#allocation5 + $0x890] sm:$0xff]  ;;  %v9680_v22 = vcombine.low %v389_v14, %v393_v45 }
 0x352   :  { %8435 = vmatprep.subr.bf16.mxu0 %v9521_v49  ;;  %v401_v36 = vld [vmem:[#allocation5 + $0x8b0] sm:$0xff] }
 0x353   :  { %8475 = vmatpush1.bf16.msra.mxu1 %v9640_v48  ;;  %v525_v63 = vld [vmem:[#allocation5 + $0xc90] sm:$0xff]  ;;  %v9808_v48 = vcombine.low %v517_v28, %v521_v17  ;;  %v9689_v49 = vcombine.high %v397_v32, %v401_v36 }
 0x354   :  { %8476 = vmatprep.subr.bf16.mxu1 %v9649_v50  ;;  %v529_v39 = vld [vmem:[#allocation5 + $0xcb0] sm:$0xff] }
 0x355   :  { %8436 = vmatpush1.bf16.msra.mxu0 %v9520_v19  ;;  %v9817_v50 = vcombine.high %v525_v63, %v529_v39  ;;  %v405_v61 = vld [vmem:[#allocation5 + $0x8d0] sm:$0xff]  ;;  %v9688_v19 = vcombine.low %v397_v32, %v401_v36 }
 0x356   :  { %8437 = vmatprep.subr.bf16.mxu0 %v9529_v4  ;;  %v409_v6 = vld [vmem:[#allocation5 + $0x8f0] sm:$0xff] }
 0x357   :  { %8477 = vmatpush1.bf16.msra.mxu1 %v9648_v23  ;;  %v533_v52 = vld [vmem:[#allocation5 + $0xcd0] sm:$0xff]  ;;  %v9816_v23 = vcombine.low %v525_v63, %v529_v39  ;;  %v9697_v4 = vcombine.high %v405_v61, %v409_v6 }
 0x358   :  { %8478 = vmatprep.subr.bf16.mxu1 %v9657_v55  ;;  %v537_v53 = vld [vmem:[#allocation5 + $0xcf0] sm:$0xff] }
 0x359   :  { %8438 = vmatpush1.bf16.msra.mxu0 %v9528_v0  ;;  %v9825_v55 = vcombine.high %v533_v52, %v537_v53  ;;  %v413_v26 = vld [vmem:[#allocation5 + $0x910] sm:$0xff]  ;;  %v9696_v0 = vcombine.low %v405_v61, %v409_v6 }
 0x35a   :  { %8439 = vmatprep.subr.bf16.mxu0 %v9537_v40  ;;  %v417_v56 = vld [vmem:[#allocation5 + $0x930] sm:$0xff] }
 0x35b   :  { %8479 = vmatpush1.bf16.msra.mxu1 %v9656_v5  ;;  %v541_v60 = vld [vmem:[#allocation5 + $0xd10] sm:$0xff]  ;;  %v9824_v5 = vcombine.low %v533_v52, %v537_v53  ;;  %v9705_v40 = vcombine.high %v413_v26, %v417_v56 }
 0x35c   :  { %8480 = vmatprep.subr.bf16.mxu1 %v9665_v3  ;;  %v545_v62 = vld [vmem:[#allocation5 + $0xd30] sm:$0xff] }
 0x35d   :  { %8440 = vmatpush1.bf16.msra.mxu0 %v9536_v9  ;;  %v9833_v3 = vcombine.high %v541_v60, %v545_v62  ;;  %v421_v29 = vld [vmem:[#allocation5 + $0x950] sm:$0xff]  ;;  %v9704_v9 = vcombine.low %v413_v26, %v417_v56 }
 0x35e   :  { %8491 = vmatprep.subr.bf16.mxu0 %v9673_v13  ;;  %v425_v42 = vld [vmem:[#allocation5 + $0x970] sm:$0xff] }
 0x35f   :  { %8481 = vmatpush1.bf16.msra.mxu1 %v9664_v12  ;;  %v549_v7 = vld [vmem:[#allocation5 + $0xd50] sm:$0xff]  ;;  %v9832_v12 = vcombine.low %v541_v60, %v545_v62  ;;  %v9713_v13 = vcombine.high %v421_v29, %v425_v42 }
 0x360   :  { %8532 = vmatprep.subr.bf16.mxu1 %v9801_v2  ;;  %8442 = vmatmul.mubr.bf16.vlgmr.msra.gmra.mrb[48].mxu0 %v10723_v47  ;;  %v553_v8 = vld [vmem:[#allocation5 + $0xd70] sm:$0xff] }
 0x361   :  { %8492 = vmatpush1.bf16.msra.mxu0 %v9672_v18  ;;  %8523 = vmatprep.mubr.bf16.mxu0 %v10727_v59  ;;  %v9841_v2 = vcombine.high %v549_v7, %v553_v8  ;;  %v429_v14 = vld [vmem:[#allocation5 + $0x990] sm:$0xff]  ;;  %v9712_v18 = vcombine.low %v421_v29, %v425_v42 }
 0x362   :  { %8483 = vmatmul.mubr.bf16.vlgmr.msra.gmra.mrb[48].mxu1 %v10725_v51  ;;  %8493 = vmatprep.subr.bf16.mxu0 %v9681_v57  ;;  %v433_v45 = vld [vmem:[#allocation5 + $0x9b0] sm:$0xff] }
 0x363   :  { %8533 = vmatpush1.bf16.msra.mxu1 %v9800_v20  ;;  %8564 = vmatprep.mubr.bf16.mxu1 %v10730_v58  ;;  %v557_v28 = vld [vmem:[#allocation5 + $0xd90] sm:$0xff]  ;;  %v9840_v20 = vcombine.low %v549_v7, %v553_v8  ;;  %v9721_v57 = vcombine.high %v429_v14, %v433_v45  ;;  %v9720_v53 = vcombine.low %v429_v14, %v433_v45 }
 0x364   :  { %8534 = vmatprep.subr.bf16.mxu1 %v9809_v30  ;;  %v561_v17 = vld [vmem:[#allocation5 + $0xdb0] sm:$0xff] }
 0x365   :  { %8494 = vmatpush1.bf16.msra.mxu0 %v9680_v22  ;;  %v9849_v32 = vcombine.high %v557_v28, %v561_v17  ;;  %v437_v36 = vld [vmem:[#allocation5 + $0x9d0] sm:$0xff] }
 0x366   :  { %8495 = vmatprep.subr.bf16.mxu0 %v9689_v49  ;;  %v441_v63 = vld [vmem:[#allocation5 + $0x9f0] sm:$0xff] }
 0x367   :  { %8535 = vmatpush1.bf16.msra.mxu1 %v9808_v48  ;;  %v565_v49 = vld [vmem:[#allocation5 + $0xdd0] sm:$0xff]  ;;  %v9729_v26 = vcombine.high %v437_v36, %v441_v63 }
 0x368   :  { %8536 = vmatprep.subr.bf16.mxu1 %v9817_v50  ;;  %v569_v50 = vld [vmem:[#allocation5 + $0xdf0] sm:$0xff] }
 0x369   :  { %8496 = vmatpush1.bf16.msra.mxu0 %v9688_v19  ;;  %v9857_v60 = vcombine.high %v565_v49, %v569_v50  ;;  %v445_v62 = vld [vmem:[#allocation5 + $0xa10] sm:$0xff] }
 0x36a   :  { %8497 = vmatprep.subr.bf16.mxu0 %v9697_v4  ;;  %v453_v7 = vld [vmem:[#allocation5 + $0xa50] sm:$0xff] }
 0x36b   :  { %8537 = vmatpush1.bf16.msra.mxu1 %v9816_v23  ;;  %v457_v8 = vld [vmem:[#allocation5 + $0xa70] sm:$0xff] }
 0x36c   :  { %8538 = vmatprep.subr.bf16.mxu1 %v9825_v55  ;;  %v9848_v55 = vcombine.low %v557_v28, %v561_v17  ;;  %v9745_v14 = vcombine.high %v453_v7, %v457_v8  ;;  %v461_v28 = vld [vmem:[#allocation5 + $0xa90] sm:$0xff] }
 0x36d   :  { %8498 = vmatpush1.bf16.msra.mxu0 %v9696_v0  ;;  %v449_v0 = vld [vmem:[#allocation5 + $0xa30] sm:$0xff] }
 0x36e   :  { %8499 = vmatprep.subr.bf16.mxu0 %v9705_v40  ;;  %v9728_v40 = vcombine.low %v437_v36, %v441_v63  ;;  %v9737_v29 = vcombine.high %v445_v62, %v449_v0  ;;  %v465_v17 = vld [vmem:[#allocation5 + $0xab0] sm:$0xff] }
 0x36f   :  { %8539 = vmatpush1.bf16.msra.mxu1 %v9824_v5  ;;  %v577_v5 = vld [vmem:[#allocation5 + $0xe30] sm:$0xff] }
 0x370   :  { %8540 = vmatprep.subr.bf16.mxu1 %v9833_v3  ;;  %v9856_v3 = vcombine.low %v565_v49, %v569_v50  ;;  %v469_v63 = vld [vmem:[#allocation5 + $0xad0] sm:$0xff]  ;;  %v9752_v49 = vcombine.low %v461_v28, %v465_v17 }
 0x371   :  { %8500 = vmatpush1.bf16.msra.mxu0 %v9704_v9  ;;  %v581_v9 = vld [vmem:[#allocation5 + $0xe50] sm:$0xff] }
 0x372   :  { %8501 = vmatprep.subr.bf16.mxu0 %v9713_v13  ;;  %v9736_v13 = vcombine.low %v445_v62, %v449_v0  ;;  %v485_v62 = vld [vmem:[#allocation5 + $0xb50] sm:$0xff] }
 0x373   :  { %8541 = vmatpush1.bf16.msra.mxu1 %v9832_v12  ;;  %v8197_v30 = vpop.f32.mrb[36].mxu0  ;;  %v585_v12 = vld [vmem:[#allocation5 + $0xe70] sm:$0xff] }
 0x374   :  { %8542 = vmatprep.subr.bf16.mxu1 %v9841_v2  ;;  %v8198_v39 = vadd.f32 %v8197_v30, %v10835_v10  ;;  %v8199_v48 = vpop.f32.mrb[37].mxu0  ;;  %v9873_v45 = vcombine.high %v581_v9, %v585_v12  ;;  %v9872_v30 = vcombine.low %v581_v9, %v585_v12  ;;  %v489_v0 = vld [vmem:[#allocation5 + $0xb70] sm:$0xff] }
 0x375   :  { %v8238_v22 = vpop.f32.mrb[36].mxu1  ;;  %v8200_v61 = vadd.f32 %v8199_v48, %v10837_v24  ;;  %v8201_v52 = vpop.f32.mrb[38].mxu0  ;;  %8502 = vmatpush1.bf16.msra.mxu0 %v9712_v18  ;;  %v573_v24 = vld [vmem:[#allocation5 + $0xe10] sm:$0xff] }
 0x376   :  { %v8240_v6 = vpop.f32.mrb[37].mxu1  ;;  %v10845_v19 = vadd.f32 %v8238_v22, %v8198_v39  ;;  %v8202_v4 = vpop.f32.mrb[39].mxu0  ;;  %8503 = vmatprep.subr.bf16.mxu0 %v9721_v57  ;;  %v9865_v42 = vcombine.high %v573_v24, %v577_v5  ;;  %v9864_v2 = vcombine.low %v573_v24, %v577_v5  ;;  %v589_v18 = vld [vmem:[#allocation5 + $0xe90] sm:$0xff]  ;;  %v9744_v57 = vcombine.low %v453_v7, %v457_v8 }
 0x377   :  { %v8242_v23 = vpop.f32.mrb[38].mxu1  ;;  %8543 = vmatpush1.bf16.msra.mxu1 %v9840_v20  ;;  %v10847_v56 = vadd.f32 %v8240_v6, %v8200_v61  ;;  %v593_v20 = vld [vmem:[#allocation5 + $0xeb0] sm:$0xff] }
 0x378   :  { %v8243_v10 = vpop.f32.mrb[39].mxu1  ;;  %8544 = vmatprep.subr.bf16.mxu1 %v9849_v32  ;;  %v9753_v32 = vcombine.high %v461_v28, %v465_v17  ;;  %v9881_v36 = vcombine.high %v589_v18, %v593_v20  ;;  %v473_v39 = vld [vmem:[#allocation5 + $0xaf0] sm:$0xff]  ;;  %v9880_v50 = vcombine.low %v589_v18, %v593_v20 }
 0x379   :  { %8504 = vmatpush1.bf16.msra.mxu0 %v9720_v53  ;;  %v597_v22 = vld [vmem:[#allocation5 + $0xed0] sm:$0xff]  ;;  %v9761_v61 = vcombine.high %v469_v63, %v473_v39 }
 0x37a   :  { %8505 = vmatprep.subr.bf16.mxu0 %v9729_v26  ;;  %v601_v48 = vld [vmem:[#allocation5 + $0xef0] sm:$0xff] }
 0x37b   :  { %8545 = vmatpush1.bf16.msra.mxu1 %v9848_v55  ;;  %v9889_v6 = vcombine.high %v597_v22, %v601_v48  ;;  %v477_v52 = vld [vmem:[#allocation5 + $0xb10] sm:$0xff]  ;;  %v9760_v55 = vcombine.low %v469_v63, %v473_v39  ;;  %v9888_v26 = vcombine.low %v597_v22, %v601_v48 }
 0x37c   :  { %8546 = vmatprep.subr.bf16.mxu1 %v9857_v60  ;;  %v481_v53 = vld [vmem:[#allocation5 + $0xb30] sm:$0xff] }
 0x37d   :  { %8506 = vmatpush1.bf16.msra.mxu0 %v9728_v40  ;;  %v605_v23 = vld [vmem:[#allocation5 + $0xf10] sm:$0xff]  ;;  %v9769_v10 = vcombine.high %v477_v52, %v481_v53  ;;  %v9768_v40 = vcombine.low %v477_v52, %v481_v53 }
 0x37e   :  { %8507 = vmatprep.subr.bf16.mxu0 %v9737_v29  ;;  %v609_v4 = vld [vmem:[#allocation5 + $0xf30] sm:$0xff]  ;;  %v9777_v29 = vcombine.high %v485_v62, %v489_v0 }
 0x37f   :  { %8547 = vmatpush1.bf16.msra.mxu1 %v9856_v3  ;;  %v9897_v60 = vcombine.high %v605_v23, %v609_v4  ;;  %v613_v24 = vld [vmem:[#allocation5 + $0xf50] sm:$0xff]  ;;  %v9896_v3 = vcombine.low %v605_v23, %v609_v4 }
 0x380   :  { %8548 = vmatprep.subr.bf16.mxu1 %v9865_v42  ;;  %v617_v5 = vld [vmem:[#allocation5 + $0xf70] sm:$0xff] }
 0x381   :  { %8508 = vmatpush1.bf16.msra.mxu0 %v9736_v13  ;;  %v9905_v42 = vcombine.high %v613_v24, %v617_v5  ;;  %v493_v7 = vld [vmem:[#allocation5 + $0xb90] sm:$0xff]  ;;  %v9776_v13 = vcombine.low %v485_v62, %v489_v0 }
 0x382   :  { %8509 = vmatprep.subr.bf16.mxu0 %v9745_v14  ;;  %v497_v8 = vld [vmem:[#allocation5 + $0xbb0] sm:$0xff] }
 0x383   :  { %8549 = vmatpush1.bf16.msra.mxu1 %v9864_v2  ;;  %v621_v9 = vld [vmem:[#allocation5 + $0xf90] sm:$0xff]  ;;  %v9904_v2 = vcombine.low %v613_v24, %v617_v5  ;;  %v9785_v14 = vcombine.high %v493_v7, %v497_v8 }
 0x384   :  { %8550 = vmatprep.subr.bf16.mxu1 %v9873_v45  ;;  %v625_v12 = vld [vmem:[#allocation5 + $0xfb0] sm:$0xff] }
 0x385   :  { %8510 = vmatpush1.bf16.msra.mxu0 %v9744_v57  ;;  %v9913_v45 = vcombine.high %v621_v9, %v625_v12  ;;  %v501_v28 = vld [vmem:[#allocation5 + $0xbd0] sm:$0xff]  ;;  %v9784_v57 = vcombine.low %v493_v7, %v497_v8 }
 0x386   :  { %8511 = vmatprep.subr.bf16.mxu0 %v9753_v32  ;;  %v505_v17 = vld [vmem:[#allocation5 + $0xbf0] sm:$0xff] }
 0x387   :  { %8551 = vmatpush1.bf16.msra.mxu1 %v9872_v30  ;;  %v629_v18 = vld [vmem:[#allocation5 + $0xfd0] sm:$0xff]  ;;  %v9912_v30 = vcombine.low %v621_v9, %v625_v12  ;;  %v9793_v32 = vcombine.high %v501_v28, %v505_v17 }
 0x388   :  { %8552 = vmatprep.subr.bf16.mxu1 %v9881_v36  ;;  %v633_v20 = vld [vmem:[#allocation5 + $0xff0] sm:$0xff] }
 0x389   :  { %8512 = vmatpush1.bf16.msra.mxu0 %v9752_v49  ;;  %v9921_v36 = vcombine.high %v629_v18, %v633_v20  ;;  %v637_v63 = vld [vmem:[#allocation5 + $0x1010] sm:$0xff]  ;;  %v9792_v49 = vcombine.low %v501_v28, %v505_v17 }
 0x38a   :  { %8513 = vmatprep.subr.bf16.mxu0 %v9761_v61  ;;  %v641_v39 = vld [vmem:[#allocation5 + $0x1030] sm:$0xff] }
 0x38b   :  { %8553 = vmatpush1.bf16.msra.mxu1 %v9880_v50  ;;  %v765_v22 = vld [vmem:[#allocation5 + $0x1410] sm:$0xff]  ;;  %v9920_v50 = vcombine.low %v629_v18, %v633_v20  ;;  %v9929_v61 = vcombine.high %v637_v63, %v641_v39 }
 0x38c   :  { %8554 = vmatprep.subr.bf16.mxu1 %v9889_v6  ;;  %v769_v48 = vld [vmem:[#allocation5 + $0x1430] sm:$0xff] }
 0x38d   :  { %8514 = vmatpush1.bf16.msra.mxu0 %v9760_v55  ;;  %v10057_v6 = vcombine.high %v765_v22, %v769_v48  ;;  %v645_v52 = vld [vmem:[#allocation5 + $0x1050] sm:$0xff]  ;;  %v9928_v55 = vcombine.low %v637_v63, %v641_v39 }
 0x38e   :  { %8515 = vmatprep.subr.bf16.mxu0 %v9769_v10  ;;  %v649_v53 = vld [vmem:[#allocation5 + $0x1070] sm:$0xff] }
 0x38f   :  { %8555 = vmatpush1.bf16.msra.mxu1 %v9888_v26  ;;  %v773_v23 = vld [vmem:[#allocation5 + $0x1450] sm:$0xff]  ;;  %v10056_v26 = vcombine.low %v765_v22, %v769_v48  ;;  %v9937_v10 = vcombine.high %v645_v52, %v649_v53 }
 0x390   :  { %8556 = vmatprep.subr.bf16.mxu1 %v9897_v60  ;;  %v777_v4 = vld [vmem:[#allocation5 + $0x1470] sm:$0xff] }
 0x391   :  { %8516 = vmatpush1.bf16.msra.mxu0 %v9768_v40  ;;  %v10065_v60 = vcombine.high %v773_v23, %v777_v4  ;;  %v653_v62 = vld [vmem:[#allocation5 + $0x1090] sm:$0xff]  ;;  %v9936_v40 = vcombine.low %v645_v52, %v649_v53 }
 0x392   :  { %8517 = vmatprep.subr.bf16.mxu0 %v9777_v29  ;;  %v657_v0 = vld [vmem:[#allocation5 + $0x10b0] sm:$0xff] }
 0x393   :  { %8557 = vmatpush1.bf16.msra.mxu1 %v9896_v3  ;;  %v781_v24 = vld [vmem:[#allocation5 + $0x1490] sm:$0xff]  ;;  %v10064_v3 = vcombine.low %v773_v23, %v777_v4  ;;  %v9945_v29 = vcombine.high %v653_v62, %v657_v0 }
 0x394   :  { %8558 = vmatprep.subr.bf16.mxu1 %v9905_v42  ;;  %v785_v5 = vld [vmem:[#allocation5 + $0x14b0] sm:$0xff] }
 0x395   :  { %8518 = vmatpush1.bf16.msra.mxu0 %v9776_v13  ;;  %v10073_v42 = vcombine.high %v781_v24, %v785_v5  ;;  %v661_v7 = vld [vmem:[#allocation5 + $0x10d0] sm:$0xff]  ;;  %v9944_v13 = vcombine.low %v653_v62, %v657_v0 }
 0x396   :  { %8519 = vmatprep.subr.bf16.mxu0 %v9785_v14  ;;  %v665_v8 = vld [vmem:[#allocation5 + $0x10f0] sm:$0xff] }
 0x397   :  { %8559 = vmatpush1.bf16.msra.mxu1 %v9904_v2  ;;  %v789_v9 = vld [vmem:[#allocation5 + $0x14d0] sm:$0xff]  ;;  %v10072_v2 = vcombine.low %v781_v24, %v785_v5  ;;  %v9953_v14 = vcombine.high %v661_v7, %v665_v8 }
 0x398   :  { %8560 = vmatprep.subr.bf16.mxu1 %v9913_v45  ;;  %v793_v12 = vld [vmem:[#allocation5 + $0x14f0] sm:$0xff] }
 0x399   :  { %8520 = vmatpush1.bf16.msra.mxu0 %v9784_v57  ;;  %v10081_v45 = vcombine.high %v789_v9, %v793_v12  ;;  %v669_v28 = vld [vmem:[#allocation5 + $0x1110] sm:$0xff]  ;;  %v9952_v57 = vcombine.low %v661_v7, %v665_v8 }
 0x39a   :  { %8521 = vmatprep.subr.bf16.mxu0 %v9793_v32  ;;  %v673_v17 = vld [vmem:[#allocation5 + $0x1130] sm:$0xff] }
 0x39b   :  { %8561 = vmatpush1.bf16.msra.mxu1 %v9912_v30  ;;  %v797_v18 = vld [vmem:[#allocation5 + $0x1510] sm:$0xff]  ;;  %v10080_v30 = vcombine.low %v789_v9, %v793_v12  ;;  %v9961_v32 = vcombine.high %v669_v28, %v673_v17 }
 0x39c   :  { %8562 = vmatprep.subr.bf16.mxu1 %v9921_v36  ;;  %v801_v20 = vld [vmem:[#allocation5 + $0x1530] sm:$0xff] }
 0x39d   :  { %8522 = vmatpush1.bf16.msra.mxu0 %v9792_v49  ;;  %v10089_v36 = vcombine.high %v797_v18, %v801_v20  ;;  %v677_v63 = vld [vmem:[#allocation5 + $0x1150] sm:$0xff]  ;;  %v9960_v49 = vcombine.low %v669_v28, %v673_v17 }
 0x39e   :  { %8573 = vmatprep.subr.bf16.mxu0 %v9929_v61  ;;  %v681_v39 = vld [vmem:[#allocation5 + $0x1170] sm:$0xff] }
 0x39f   :  { %8563 = vmatpush1.bf16.msra.mxu1 %v9920_v50  ;;  %v805_v22 = vld [vmem:[#allocation5 + $0x1550] sm:$0xff]  ;;  %v10088_v50 = vcombine.low %v797_v18, %v801_v20  ;;  %v9969_v61 = vcombine.high %v677_v63, %v681_v39 }
 0x3a0   :  { %8614 = vmatprep.subr.bf16.mxu1 %v10057_v6  ;;  %8524 = vmatmul.mubr.bf16.vlgmr.msra.gmra.mrb[52].mxu0 %v10745_v21  ;;  %v809_v48 = vld [vmem:[#allocation5 + $0x1570] sm:$0xff] }
 0x3a1   :  { %8574 = vmatpush1.bf16.msra.mxu0 %v9928_v55  ;;  %8605 = vmatprep.mubr.bf16.mxu0 %v10749_v35  ;;  %v10097_v6 = vcombine.high %v805_v22, %v809_v48  ;;  %v685_v52 = vld [vmem:[#allocation5 + $0x1190] sm:$0xff]  ;;  %v9968_v55 = vcombine.low %v677_v63, %v681_v39 }
 0x3a2   :  { %8565 = vmatmul.mubr.bf16.vlgmr.msra.gmra.mrb[52].mxu1 %v10747_v27  ;;  %8575 = vmatprep.subr.bf16.mxu0 %v9937_v10  ;;  %v689_v53 = vld [vmem:[#allocation5 + $0x11b0] sm:$0xff] }
 0x3a3   :  { %8615 = vmatpush1.bf16.msra.mxu1 %v10056_v26  ;;  %8646 = vmatprep.mubr.bf16.mxu1 %v10752_v38  ;;  %v813_v23 = vld [vmem:[#allocation5 + $0x1590] sm:$0xff]  ;;  %v10096_v26 = vcombine.low %v805_v22, %v809_v48  ;;  %v9977_v10 = vcombine.high %v685_v52, %v689_v53  ;;  %v9976_v12 = vcombine.low %v685_v52, %v689_v53 }
 0x3a4   :  { %8616 = vmatprep.subr.bf16.mxu1 %v10065_v60  ;;  %v817_v4 = vld [vmem:[#allocation5 + $0x15b0] sm:$0xff] }
 0x3a5   :  { %8576 = vmatpush1.bf16.msra.mxu0 %v9936_v40  ;;  %v10105_v62 = vcombine.high %v813_v23, %v817_v4  ;;  %v693_v0 = vld [vmem:[#allocation5 + $0x11d0] sm:$0xff] }
 0x3a6   :  { %8577 = vmatprep.subr.bf16.mxu0 %v9945_v29  ;;  %v697_v24 = vld [vmem:[#allocation5 + $0x11f0] sm:$0xff] }
 0x3a7   :  { %8617 = vmatpush1.bf16.msra.mxu1 %v10064_v3  ;;  %v821_v29 = vld [vmem:[#allocation5 + $0x15d0] sm:$0xff]  ;;  %v9985_v28 = vcombine.high %v693_v0, %v697_v24 }
 0x3a8   :  { %8618 = vmatprep.subr.bf16.mxu1 %v10073_v42  ;;  %v825_v42 = vld [vmem:[#allocation5 + $0x15f0] sm:$0xff] }
 0x3a9   :  { %8578 = vmatpush1.bf16.msra.mxu0 %v9944_v13  ;;  %v10113_v18 = vcombine.high %v821_v29, %v825_v42  ;;  %v701_v20 = vld [vmem:[#allocation5 + $0x1210] sm:$0xff] }
 0x3aa   :  { %8579 = vmatprep.subr.bf16.mxu0 %v9953_v14  ;;  %v709_v22 = vld [vmem:[#allocation5 + $0x1250] sm:$0xff] }
 0x3ab   :  { %8619 = vmatpush1.bf16.msra.mxu1 %v10072_v2  ;;  %v713_v48 = vld [vmem:[#allocation5 + $0x1270] sm:$0xff] }
 0x3ac   :  { %8620 = vmatprep.subr.bf16.mxu1 %v10081_v45  ;;  %v10104_v45 = vcombine.low %v813_v23, %v817_v4  ;;  %v10001_v52 = vcombine.high %v709_v22, %v713_v48  ;;  %v717_v23 = vld [vmem:[#allocation5 + $0x1290] sm:$0xff] }
 0x3ad   :  { %8580 = vmatpush1.bf16.msra.mxu0 %v9952_v57  ;;  %v705_v57 = vld [vmem:[#allocation5 + $0x1230] sm:$0xff] }
 0x3ae   :  { %8581 = vmatprep.subr.bf16.mxu0 %v9961_v32  ;;  %v9984_v32 = vcombine.low %v693_v0, %v697_v24  ;;  %v9993_v63 = vcombine.high %v701_v20, %v705_v57  ;;  %v721_v4 = vld [vmem:[#allocation5 + $0x12b0] sm:$0xff] }
 0x3af   :  { %8621 = vmatpush1.bf16.msra.mxu1 %v10080_v30  ;;  %v833_v30 = vld [vmem:[#allocation5 + $0x1630] sm:$0xff] }
 0x3b0   :  { %8622 = vmatprep.subr.bf16.mxu1 %v10089_v36  ;;  %v10112_v36 = vcombine.low %v821_v29, %v825_v42  ;;  %v725_v24 = vld [vmem:[#allocation5 + $0x12d0] sm:$0xff]  ;;  %v10008_v29 = vcombine.low %v717_v23, %v721_v4 }
 0x3b1   :  { %8582 = vmatpush1.bf16.msra.mxu0 %v9960_v49  ;;  %v837_v49 = vld [vmem:[#allocation5 + $0x1650] sm:$0xff] }
 0x3b2   :  { %8583 = vmatprep.subr.bf16.mxu0 %v9969_v61  ;;  %v9992_v61 = vcombine.low %v701_v20, %v705_v57  ;;  %v741_v20 = vld [vmem:[#allocation5 + $0x1350] sm:$0xff] }
 0x3b3   :  { %8623 = vmatpush1.bf16.msra.mxu1 %v10088_v50  ;;  %v8279_v60 = vpop.f32.mrb[40].mxu0  ;;  %v841_v50 = vld [vmem:[#allocation5 + $0x1670] sm:$0xff] }
 0x3b4   :  { %8624 = vmatprep.subr.bf16.mxu1 %v10097_v6  ;;  %v8280_v5 = vadd.f32 %v8279_v60, %v10845_v19  ;;  %v8281_v3 = vpop.f32.mrb[41].mxu0  ;;  %v10129_v53 = vcombine.high %v837_v49, %v841_v50  ;;  %v10128_v60 = vcombine.low %v837_v49, %v841_v50  ;;  %v745_v57 = vld [vmem:[#allocation5 + $0x1370] sm:$0xff] }
 0x3b5   :  { %v8320_v40 = vpop.f32.mrb[40].mxu1  ;;  %v8282_v7 = vadd.f32 %v8281_v3, %v10847_v56  ;;  %v8283_v9 = vpop.f32.mrb[42].mxu0  ;;  %8584 = vmatpush1.bf16.msra.mxu0 %v9968_v55  ;;  %v829_v56 = vld [vmem:[#allocation5 + $0x1610] sm:$0xff] }
 0x3b6   :  { %v8322_v8 = vpop.f32.mrb[41].mxu1  ;;  %v10855_v13 = vadd.f32 %v8320_v40, %v8280_v5  ;;  %v8284_v14 = vpop.f32.mrb[43].mxu0  ;;  %8585 = vmatprep.subr.bf16.mxu0 %v9977_v10  ;;  %v10121_v39 = vcombine.high %v829_v56, %v833_v30  ;;  %v10120_v6 = vcombine.low %v829_v56, %v833_v30  ;;  %v845_v55 = vld [vmem:[#allocation5 + $0x1690] sm:$0xff]  ;;  %v10000_v10 = vcombine.low %v709_v22, %v713_v48 }
 0x3b7   :  { %v8324_v2 = vpop.f32.mrb[42].mxu1  ;;  %8625 = vmatpush1.bf16.msra.mxu1 %v10096_v26  ;;  %v10857_v17 = vadd.f32 %v8322_v8, %v8282_v7  ;;  %v849_v26 = vld [vmem:[#allocation5 + $0x16b0] sm:$0xff] }
 0x3b8   :  { %v8325_v19 = vpop.f32.mrb[43].mxu1  ;;  %8626 = vmatprep.subr.bf16.mxu1 %v10105_v62  ;;  %v10009_v62 = vcombine.high %v717_v23, %v721_v4  ;;  %v10137_v0 = vcombine.high %v845_v55, %v849_v26  ;;  %v729_v5 = vld [vmem:[#allocation5 + $0x12f0] sm:$0xff]  ;;  %v10136_v42 = vcombine.low %v845_v55, %v849_v26 }
 0x3b9   :  { %8586 = vmatpush1.bf16.msra.mxu0 %v9976_v12  ;;  %v853_v40 = vld [vmem:[#allocation5 + $0x16d0] sm:$0xff]  ;;  %v10017_v7 = vcombine.high %v725_v24, %v729_v5 }
 0x3ba   :  { %8587 = vmatprep.subr.bf16.mxu0 %v9985_v28  ;;  %v857_v3 = vld [vmem:[#allocation5 + $0x16f0] sm:$0xff] }
 0x3bb   :  { %8627 = vmatpush1.bf16.msra.mxu1 %v10104_v45  ;;  %v10145_v8 = vcombine.high %v853_v40, %v857_v3  ;;  %v733_v9 = vld [vmem:[#allocation5 + $0x1310] sm:$0xff]  ;;  %v10016_v45 = vcombine.low %v725_v24, %v729_v5  ;;  %v10144_v28 = vcombine.low %v853_v40, %v857_v3 }
 0x3bc   :  { %8628 = vmatprep.subr.bf16.mxu1 %v10113_v18  ;;  %v737_v12 = vld [vmem:[#allocation5 + $0x1330] sm:$0xff] }
 0x3bd   :  { %8588 = vmatpush1.bf16.msra.mxu0 %v9984_v32  ;;  %v861_v2 = vld [vmem:[#allocation5 + $0x1710] sm:$0xff]  ;;  %v10025_v19 = vcombine.high %v733_v9, %v737_v12  ;;  %v10024_v32 = vcombine.low %v733_v9, %v737_v12 }
 0x3be   :  { %8589 = vmatprep.subr.bf16.mxu0 %v9993_v63  ;;  %v865_v14 = vld [vmem:[#allocation5 + $0x1730] sm:$0xff]  ;;  %v10033_v63 = vcombine.high %v741_v20, %v745_v57 }
 0x3bf   :  { %8629 = vmatpush1.bf16.msra.mxu1 %v10112_v36  ;;  %v10153_v18 = vcombine.high %v861_v2, %v865_v14  ;;  %v869_v56 = vld [vmem:[#allocation5 + $0x1750] sm:$0xff]  ;;  %v10152_v36 = vcombine.low %v861_v2, %v865_v14 }
 0x3c0   :  { %8630 = vmatprep.subr.bf16.mxu1 %v10121_v39  ;;  %v873_v30 = vld [vmem:[#allocation5 + $0x1770] sm:$0xff] }
 0x3c1   :  { %8590 = vmatpush1.bf16.msra.mxu0 %v9992_v61  ;;  %v10161_v39 = vcombine.high %v869_v56, %v873_v30  ;;  %v749_v22 = vld [vmem:[#allocation5 + $0x1390] sm:$0xff]  ;;  %v10032_v61 = vcombine.low %v741_v20, %v745_v57 }
 0x3c2   :  { %8591 = vmatprep.subr.bf16.mxu0 %v10001_v52  ;;  %v753_v48 = vld [vmem:[#allocation5 + $0x13b0] sm:$0xff] }
 0x3c3   :  { %8631 = vmatpush1.bf16.msra.mxu1 %v10120_v6  ;;  %v877_v49 = vld [vmem:[#allocation5 + $0x1790] sm:$0xff]  ;;  %v10160_v6 = vcombine.low %v869_v56, %v873_v30  ;;  %v10041_v52 = vcombine.high %v749_v22, %v753_v48 }
 0x3c4   :  { %8632 = vmatprep.subr.bf16.mxu1 %v10129_v53  ;;  %v881_v50 = vld [vmem:[#allocation5 + $0x17b0] sm:$0xff] }
 0x3c5   :  { %8592 = vmatpush1.bf16.msra.mxu0 %v10000_v10  ;;  %v10169_v53 = vcombine.high %v877_v49, %v881_v50  ;;  %v757_v23 = vld [vmem:[#allocation5 + $0x13d0] sm:$0xff]  ;;  %v10040_v10 = vcombine.low %v749_v22, %v753_v48 }
 0x3c6   :  { %8593 = vmatprep.subr.bf16.mxu0 %v10009_v62  ;;  %v761_v4 = vld [vmem:[#allocation5 + $0x13f0] sm:$0xff] }
 0x3c7   :  { %8633 = vmatpush1.bf16.msra.mxu1 %v10128_v60  ;;  %v885_v55 = vld [vmem:[#allocation5 + $0x17d0] sm:$0xff]  ;;  %v10168_v60 = vcombine.low %v877_v49, %v881_v50  ;;  %v10049_v62 = vcombine.high %v757_v23, %v761_v4 }
 0x3c8   :  { %8634 = vmatprep.subr.bf16.mxu1 %v10137_v0  ;;  %v889_v26 = vld [vmem:[#allocation5 + $0x17f0] sm:$0xff] }
 0x3c9   :  { %8594 = vmatpush1.bf16.msra.mxu0 %v10008_v29  ;;  %v10177_v0 = vcombine.high %v885_v55, %v889_v26  ;;  %v893_v24 = vld [vmem:[#allocation5 + $0x1810] sm:$0xff]  ;;  %v10048_v29 = vcombine.low %v757_v23, %v761_v4 }
 0x3ca   :  { %8595 = vmatprep.subr.bf16.mxu0 %v10017_v7  ;;  %v897_v5 = vld [vmem:[#allocation5 + $0x1830] sm:$0xff] }
 0x3cb   :  { %8635 = vmatpush1.bf16.msra.mxu1 %v10136_v42  ;;  %v1021_v40 = vld [vmem:[#allocation5 + $0x1c10] sm:$0xff]  ;;  %v10176_v42 = vcombine.low %v885_v55, %v889_v26  ;;  %v10185_v7 = vcombine.high %v893_v24, %v897_v5 }
 0x3cc   :  { %8636 = vmatprep.subr.bf16.mxu1 %v10145_v8  ;;  %v1025_v3 = vld [vmem:[#allocation5 + $0x1c30] sm:$0xff] }
 0x3cd   :  { %8596 = vmatpush1.bf16.msra.mxu0 %v10016_v45  ;;  %v10313_v8 = vcombine.high %v1021_v40, %v1025_v3  ;;  %v901_v9 = vld [vmem:[#allocation5 + $0x1850] sm:$0xff]  ;;  %v10184_v45 = vcombine.low %v893_v24, %v897_v5 }
 0x3ce   :  { %8597 = vmatprep.subr.bf16.mxu0 %v10025_v19  ;;  %v905_v12 = vld [vmem:[#allocation5 + $0x1870] sm:$0xff] }
 0x3cf   :  { %8637 = vmatpush1.bf16.msra.mxu1 %v10144_v28  ;;  %v1029_v2 = vld [vmem:[#allocation5 + $0x1c50] sm:$0xff]  ;;  %v10312_v28 = vcombine.low %v1021_v40, %v1025_v3  ;;  %v10193_v19 = vcombine.high %v901_v9, %v905_v12 }
 0x3d0   :  { %8638 = vmatprep.subr.bf16.mxu1 %v10153_v18  ;;  %v1033_v14 = vld [vmem:[#allocation5 + $0x1c70] sm:$0xff] }
 0x3d1   :  { %8598 = vmatpush1.bf16.msra.mxu0 %v10024_v32  ;;  %v10321_v18 = vcombine.high %v1029_v2, %v1033_v14  ;;  %v909_v20 = vld [vmem:[#allocation5 + $0x1890] sm:$0xff]  ;;  %v10192_v32 = vcombine.low %v901_v9, %v905_v12 }
 0x3d2   :  { %8599 = vmatprep.subr.bf16.mxu0 %v10033_v63  ;;  %v913_v57 = vld [vmem:[#allocation5 + $0x18b0] sm:$0xff] }
 0x3d3   :  { %8639 = vmatpush1.bf16.msra.mxu1 %v10152_v36  ;;  %v1037_v56 = vld [vmem:[#allocation5 + $0x1c90] sm:$0xff]  ;;  %v10320_v36 = vcombine.low %v1029_v2, %v1033_v14  ;;  %v10201_v63 = vcombine.high %v909_v20, %v913_v57  ;;  %v9077_v2 = vsub.s32 2, %v10821_v1 }
 0x3d4   :  { %8640 = vmatprep.subr.bf16.mxu1 %v10161_v39  ;;  %v1041_v30 = vld [vmem:[#allocation5 + $0x1cb0] sm:$0xff] }
 0x3d5   :  { %8600 = vmatpush1.bf16.msra.mxu0 %v10032_v61  ;;  %v10329_v39 = vcombine.high %v1037_v56, %v1041_v30  ;;  %v917_v22 = vld [vmem:[#allocation5 + $0x18d0] sm:$0xff]  ;;  %v10200_v61 = vcombine.low %v909_v20, %v913_v57 }
 0x3d6   :  { %8601 = vmatprep.subr.bf16.mxu0 %v10041_v52  ;;  %v921_v48 = vld [vmem:[#allocation5 + $0x18f0] sm:$0xff] }
 0x3d7   :  { %8641 = vmatpush1.bf16.msra.mxu1 %v10160_v6  ;;  %v1045_v49 = vld [vmem:[#allocation5 + $0x1cd0] sm:$0xff]  ;;  %v10328_v6 = vcombine.low %v1037_v56, %v1041_v30  ;;  %v10209_v52 = vcombine.high %v917_v22, %v921_v48 }
 0x3d8   :  { %8642 = vmatprep.subr.bf16.mxu1 %v10169_v53  ;;  %v1049_v50 = vld [vmem:[#allocation5 + $0x1cf0] sm:$0xff] }
 0x3d9   :  { %8602 = vmatpush1.bf16.msra.mxu0 %v10040_v10  ;;  %v10337_v53 = vcombine.high %v1045_v49, %v1049_v50  ;;  %v925_v23 = vld [vmem:[#allocation5 + $0x1910] sm:$0xff]  ;;  %v10208_v10 = vcombine.low %v917_v22, %v921_v48 }
 0x3da   :  { %8603 = vmatprep.subr.bf16.mxu0 %v10049_v62  ;;  %v929_v4 = vld [vmem:[#allocation5 + $0x1930] sm:$0xff] }
 0x3db   :  { %8643 = vmatpush1.bf16.msra.mxu1 %v10168_v60  ;;  %v1053_v55 = vld [vmem:[#allocation5 + $0x1d10] sm:$0xff]  ;;  %v10336_v60 = vcombine.low %v1045_v49, %v1049_v50  ;;  %v10217_v62 = vcombine.high %v925_v23, %v929_v4 }
 0x3dc   :  { %8644 = vmatprep.subr.bf16.mxu1 %v10177_v0  ;;  %v1057_v26 = vld [vmem:[#allocation5 + $0x1d30] sm:$0xff] }
 0x3dd   :  { %8604 = vmatpush1.bf16.msra.mxu0 %v10048_v29  ;;  %v10345_v0 = vcombine.high %v1053_v55, %v1057_v26  ;;  %v933_v24 = vld [vmem:[#allocation5 + $0x1950] sm:$0xff]  ;;  %v10216_v29 = vcombine.low %v925_v23, %v929_v4 }
 0x3de   :  { %8655 = vmatprep.subr.bf16.mxu0 %v10185_v7  ;;  %v937_v5 = vld [vmem:[#allocation5 + $0x1970] sm:$0xff] }
 0x3df   :  { %8645 = vmatpush1.bf16.msra.mxu1 %v10176_v42  ;;  %v1061_v40 = vld [vmem:[#allocation5 + $0x1d50] sm:$0xff]  ;;  %v10344_v42 = vcombine.low %v1053_v55, %v1057_v26  ;;  %v10225_v7 = vcombine.high %v933_v24, %v937_v5 }
 0x3e0   :  { %8696 = vmatprep.subr.bf16.mxu1 %v10313_v8  ;;  %8606 = vmatmul.mubr.bf16.vlgmr.msra.gmra.mrb[56].mxu0 %v10767_v11  ;;  %v1065_v3 = vld [vmem:[#allocation5 + $0x1d70] sm:$0xff] }
 0x3e1   :  { %8656 = vmatpush1.bf16.msra.mxu0 %v10184_v45  ;;  %8687 = vmatprep.mubr.bf16.mxu0 %v10771_v31  ;;  %v10353_v8 = vcombine.high %v1061_v40, %v1065_v3  ;;  %v941_v9 = vld [vmem:[#allocation5 + $0x1990] sm:$0xff] }
 0x3e2   :  { %8647 = vmatmul.mubr.bf16.vlgmr.msra.gmra.mrb[56].mxu1 %v10769_v15  ;;  %8657 = vmatprep.subr.bf16.mxu0 %v10193_v19  ;;  %v945_v12 = vld [vmem:[#allocation5 + $0x19b0] sm:$0xff]  ;;  %v10224_v19 = vcombine.low %v933_v24, %v937_v5 }
 0x3e3   :  { %8697 = vmatpush1.bf16.msra.mxu1 %v10312_v28  ;;  %8728 = vmatprep.mubr.bf16.mxu1 %v10774_v34  ;;  %v1069_v14 = vld [vmem:[#allocation5 + $0x1d90] sm:$0xff]  ;;  %v9081_v28 = vsub.s32 3, %v10821_v1  ;;  %v10233_v20 = vcombine.high %v941_v9, %v945_v12  ;;  %v10232_v23 = vcombine.low %v941_v9, %v945_v12 }
 0x3e4   :  { %8698 = vmatprep.subr.bf16.mxu1 %v10321_v18  ;;  %v1073_v45 = vld [vmem:[#allocation5 + $0x1db0] sm:$0xff]  ;;  %v10352_v18 = vcombine.low %v1061_v40, %v1065_v3 }
 0x3e5   :  { %8658 = vmatpush1.bf16.msra.mxu0 %v10192_v32  ;;  %v10361_v56 = vcombine.high %v1069_v14, %v1073_v45  ;;  %v949_v30 = vld [vmem:[#allocation5 + $0x19d0] sm:$0xff] }
 0x3e6   :  { %8659 = vmatprep.subr.bf16.mxu0 %v10201_v63  ;;  %v953_v32 = vld [vmem:[#allocation5 + $0x19f0] sm:$0xff] }
 0x3e7   :  { %8699 = vmatpush1.bf16.msra.mxu1 %v10320_v36  ;;  %v1077_v49 = vld [vmem:[#allocation5 + $0x1dd0] sm:$0xff] }
 0x3e8   :  { %8700 = vmatprep.subr.bf16.mxu1 %v10329_v39  ;;  %v10445_v39 = vld [vmem:[#allocation8] sm:$0xff]  ;;  %v1081_v50 = vld [vmem:[#allocation5 + $0x1df0] sm:$0xff] }
 0x3e9   :  { %8660 = vmatpush1.bf16.msra.mxu0 %v10200_v61  ;;  %v9078_v22 = vrot.slane %v10445_v39, %v9077_v2  ;;  %v957_v24 = vld [vmem:[#allocation5 + $0x1a10] sm:$0xff]  ;;  %v10368_v9 = vcombine.low %v1077_v49, %v1081_v50 }
 0x3ea   :  { %8661 = vmatprep.subr.bf16.mxu0 %v10209_v52  ;;  %v9082_v52 = vrot.slane %v10445_v39, %v9081_v28  ;;  %v961_v5 = vld [vmem:[#allocation5 + $0x1a30] sm:$0xff] }
 0x3eb   :  { %8701 = vmatpush1.bf16.msra.mxu1 %v10328_v6  ;;  %v1089_v3 = vld [vmem:[#allocation5 + $0x1e30] sm:$0xff] }
 0x3ec   :  { %8702 = vmatprep.subr.bf16.mxu1 %v10337_v53 }
 0x3ed   :  { %8662 = vmatpush1.bf16.msra.mxu0 %v10208_v10  ;;  %v10360_v10 = vcombine.low %v1069_v14, %v1073_v45  ;;  %v10249_v14 = vcombine.high %v957_v24, %v961_v5 }
 0x3ee   :  { %8663 = vmatprep.subr.bf16.mxu0 %v10217_v62 }
 0x3ef   :  { %8703 = vmatpush1.bf16.msra.mxu1 %v10336_v60 }
 0x3f0   :  { %8704 = vmatprep.subr.bf16.mxu1 %v10345_v0  ;;  %v10369_v0 = vcombine.high %v1077_v49, %v1081_v50  ;;  %v973_v49 = vld [vmem:[#allocation5 + $0x1a90] sm:$0xff] }
 0x3f1   :  { %8664 = vmatpush1.bf16.msra.mxu0 %v10216_v29  ;;  %v10446_v29 = vld [vmem:[#allocation10] sm:$0xff]  ;;  %v977_v50 = vld [vmem:[#allocation5 + $0x1ab0] sm:$0xff] }
 0x3f2   :  { %8665 = vmatprep.subr.bf16.mxu0 %v10225_v7 }
 0x3f3   :  { %8705 = vmatpush1.bf16.msra.mxu1 %v10344_v42  ;;  %v8361_v57 = vpop.f32.mrb[44].mxu0  ;;  %v9152_v42 = vrot.slane %v10446_v29, %v9077_v2 }
 0x3f4   :  { %8706 = vmatprep.subr.bf16.mxu1 %v10353_v8  ;;  %v8362_v36 = vadd.f32 %v8361_v57, %v10855_v13  ;;  %v8363_v48 = vpop.f32.mrb[45].mxu0  ;;  %v10241_v13 = vcombine.high %v949_v30, %v953_v32  ;;  %v10240_v8 = vcombine.low %v949_v30, %v953_v32  ;;  %v969_v57 = vld [vmem:[#allocation5 + $0x1a70] sm:$0xff]  ;;  %v10248_v30 = vcombine.low %v957_v24, %v961_v5 }
 0x3f5   :  { %v8402_v63 = vpop.f32.mrb[44].mxu1  ;;  %v8364_v61 = vadd.f32 %v8363_v48, %v10857_v17  ;;  %v8365_v53 = vpop.f32.mrb[46].mxu0  ;;  %8666 = vmatpush1.bf16.msra.mxu0 %v10224_v19  ;;  %v1085_v17 = vld [vmem:[#allocation5 + $0x1e10] sm:$0xff]  ;;  %v9156_v19 = vrot.slane %v10446_v29, %v9081_v28 }
 0x3f6   :  { %v8404_v6 = vpop.f32.mrb[45].mxu1  ;;  %v8403_v4 = vadd.f32 %v8402_v63, %v8362_v36  ;;  %v8366_v26 = vpop.f32.mrb[47].mxu0  ;;  %8667 = vmatprep.subr.bf16.mxu0 %v10233_v20  ;;  %v965_v20 = vld [vmem:[#allocation5 + $0x1a50] sm:$0xff]  ;;  %v10376_v28 = vcombine.low %v1085_v17, %v1089_v3 }
 0x3f7   :  { %v8406_v55 = vpop.f32.mrb[46].mxu1  ;;  %8707 = vmatpush1.bf16.msra.mxu1 %v10352_v18  ;;  %v8405_v60 = vadd.f32 %v8404_v6, %v8364_v61  ;;  %v10377_v18 = vcombine.high %v1085_v17, %v1089_v3  ;;  %v1093_v36 = vld [vmem:[#allocation5 + $0x1e50] sm:$0xff]  ;;  %v10256_v53 = vcombine.low %v965_v20, %v969_v57 }
 0x3f8   :  { %v8407_v62 = vpop.f32.mrb[47].mxu1  ;;  %8708 = vmatprep.subr.bf16.mxu1 %v10361_v56  ;;  %v9109_v40 = vadd.f32 %v9078_v22, %v8403_v4  ;;  %v1097_v63 = vld [vmem:[#allocation5 + $0x1e70] sm:$0xff]  ;;  %v10257_v22 = vcombine.high %v965_v20, %v969_v57  ;;  %v10265_v55 = vcombine.high %v973_v49, %v977_v50 }
 0x3f9   :  { %v9110_v7 = vadd.f32 %v9082_v52, %v8405_v60  ;;  %8668 = vmatpush1.bf16.msra.mxu0 %v10232_v23  ;;  %v10385_v48 = vcombine.high %v1093_v36, %v1097_v63  ;;  %v1101_v6 = vld [vmem:[#allocation5 + $0x1e90] sm:$0xff]  ;;  %v10384_v4 = vcombine.low %v1093_v36, %v1097_v63 }
 0x3fa   :  { %vm9117_vm2 = vcmp.gt.f32.partialorder %v9109_v40, 0.0  ;;  %v9125_v12 = vmul.f32 0.2, %v9109_v40  ;;  %8669 = vmatprep.subr.bf16.mxu0 %v10241_v13  ;;  %v1105_v52 = vld [vmem:[#allocation5 + $0x1eb0] sm:$0xff] }
 0x3fb   :  { %8709 = vmatpush1.bf16.msra.mxu1 %v10360_v10  ;;  %vm9118_vm3 = vcmp.gt.f32.partialorder %v9110_v7, 0.0  ;;  %v9126_v45 = vmul.f32 0.2, %v9110_v7  ;;  %v10393_v26 = vcombine.high %v1101_v6, %v1105_v52  ;;  %v981_v10 = vld [vmem:[#allocation5 + $0x1ad0] sm:$0xff] }
 0x3fc   :  { %8710 = vmatprep.subr.bf16.mxu1 %v10369_v0  ;;  %v9133_v56 = vsel %vm9117_vm2, %v9109_v40, %v9125_v12  ;;  %v985_v13 = vld [vmem:[#allocation5 + $0x1af0] sm:$0xff]  ;;  %v10264_v0 = vcombine.low %v973_v49, %v977_v50 }
 0x3fd   :  { %v9183_v2 = vmul.f32 %v9152_v42, %v9133_v56  ;;  %v9134_v39 = vsel %vm9118_vm3, %v9110_v7, %v9126_v45  ;;  %8670 = vmatpush1.bf16.msra.mxu0 %v10240_v8  ;;  %v1109_v60 = vld [vmem:[#allocation5 + $0x1ed0] sm:$0xff]  ;;  %v10273_v24 = vcombine.high %v981_v10, %v985_v13  ;;  %v10272_v42 = vcombine.low %v981_v10, %v985_v13  ;;  %v254_v10 = vld [vmem:[#allocation5 + $0x418] sm:$0xff] }
 0x3fe   :  { %v9184_v32 = vmul.f32 %v9156_v19, %v9134_v39  ;;  %8671 = vmatprep.subr.bf16.mxu0 %v10249_v14  ;;  %v1113_v62 = vld [vmem:[#allocation5 + $0x1ef0] sm:$0xff]  ;;  %v258_v13 = vld [vmem:[#allocation5 + $0x438] sm:$0xff] }
 0x3ff   :  { %8711 = vmatpush1.bf16.msra.mxu1 %v10368_v9  ;;  %v9190_v61 = vadd.f32 %v10827_v25, %v9183_v2  ;;  %v10392_v25 = vcombine.low %v1101_v6, %v1105_v52  ;;  %v10401_v5 = vcombine.high %v1109_v60, %v1113_v62  ;;  %v989_v40 = vld [vmem:[#allocation5 + $0x1b10] sm:$0xff]  ;;  %v10400_v7 = vcombine.low %v1109_v60, %v1113_v62 }
 0x400   :  { %8712 = vmatprep.subr.bf16.mxu1 %v10377_v18  ;;  %v993_v17 = vld [vmem:[#allocation5 + $0x1b30] sm:$0xff] }
 0x401   :  { %8672 = vmatpush1.bf16.msra.mxu0 %v10248_v30  ;;  %v10868_v23 = vadd.f32 %v9190_v61, %v9184_v32  ;;  %v1117_v3 = vld [vmem:[#allocation5 + $0x1f10] sm:$0xff]  ;;  %v10281_v8 = vcombine.high %v989_v40, %v993_v17  ;;  %v10280_v18 = vcombine.low %v989_v40, %v993_v17  ;;  %v262_v40 = vld [vmem:[#allocation5 + $0x458] sm:$0xff] }
 0x402   :  { %8673 = vmatprep.subr.bf16.mxu0 %v10257_v22  ;;  %v1121_v29 = vld [vmem:[#allocation5 + $0x1f30] sm:$0xff]  ;;  %v266_v17 = vld [vmem:[#allocation5 + $0x478] sm:$0xff] }
 0x403   :  { %8713 = vmatpush1.bf16.msra.mxu1 %v10376_v28  ;;  %v10409_v9 = vcombine.high %v1117_v3, %v1121_v29  ;;  %v997_v12 = vld [vmem:[#allocation5 + $0x1b50] sm:$0xff]  ;;  %v10408_v20 = vcombine.low %v1117_v3, %v1121_v29  ;;  %v9546_v29 = vcombine.low %v254_v10, %v258_v13 }
 0x404   :  { %8714 = vmatprep.subr.bf16.mxu1 %v10385_v48  ;;  %v1001_v19 = vld [vmem:[#allocation5 + $0x1b70] sm:$0xff] }
 0x405   :  { %8674 = vmatpush1.bf16.msra.mxu0 %v10256_v53  ;;  %v1125_v14 = vld [vmem:[#allocation5 + $0x1f50] sm:$0xff]  ;;  %v10289_v57 = vcombine.high %v997_v12, %v1001_v19  ;;  %v10288_v30 = vcombine.low %v997_v12, %v1001_v19  ;;  %v270_v12 = vld [vmem:[#allocation5 + $0x498] sm:$0xff] }
 0x406   :  { %8675 = vmatprep.subr.bf16.mxu0 %v10265_v55  ;;  %v1129_v45 = vld [vmem:[#allocation5 + $0x1f70] sm:$0xff]  ;;  %v126_v55 = vld [vmem:[#allocation5 + $0x18] sm:$0xff] }
 0x407   :  { %8715 = vmatpush1.bf16.msra.mxu1 %v10384_v4  ;;  %v10417_v56 = vcombine.high %v1125_v14, %v1129_v45  ;;  %v1005_v36 = vld [vmem:[#allocation5 + $0x1b90] sm:$0xff]  ;;  %v10416_v32 = vcombine.low %v1125_v14, %v1129_v45  ;;  %v274_v19 = vld [vmem:[#allocation5 + $0x4b8] sm:$0xff]  ;;  %v9554_v45 = vcombine.low %v262_v40, %v266_v17 }
 0x408   :  { %8716 = vmatprep.subr.bf16.mxu1 %v10393_v26  ;;  %v1009_v63 = vld [vmem:[#allocation5 + $0x1bb0] sm:$0xff]  ;;  %v130_v26 = vld [vmem:[#allocation5 + $0x38] sm:$0xff] }
 0x409   :  { %8676 = vmatpush1.bf16.msra.mxu0 %v10264_v0  ;;  %v1133_v2 = vld [vmem:[#allocation5 + $0x1f90] sm:$0xff]  ;;  %v10297_v28 = vcombine.high %v1005_v36, %v1009_v63  ;;  %v10296_v6 = vcombine.low %v1005_v36, %v1009_v63  ;;  %v9419_v0 = vcombine.high %v126_v55, %v130_v26  ;;  %v9418_v3 = vcombine.low %v126_v55, %v130_v26  ;;  %v278_v36 = vld [vmem:[#allocation5 + $0x4d8] sm:$0xff] }
 0x40a   :  { %8677 = vmatprep.subr.bf16.mxu0 %v10273_v24  ;;  %v1137_v39 = vld [vmem:[#allocation5 + $0x1fb0] sm:$0xff]  ;;  %v134_v24 = vld [vmem:[#allocation5 + $0x58] sm:$0xff] }
 0x40b   :  { %8717 = vmatpush1.bf16.msra.mxu1 %v10392_v25  ;;  %v10425_v22 = vcombine.high %v1133_v2, %v1137_v39  ;;  %v1013_v48 = vld [vmem:[#allocation5 + $0x1bd0] sm:$0xff]  ;;  %v10424_v52 = vcombine.low %v1133_v2, %v1137_v39  ;;  %v9547_v25 = vcombine.high %v254_v10, %v258_v13  ;;  %v282_v63 = vld [vmem:[#allocation5 + $0x4f8] sm:$0xff]  ;;  %v9562_v39 = vcombine.low %v270_v12, %v274_v19 }
 0x40c   :  { %8718 = vmatprep.subr.bf16.mxu1 %v10401_v5  ;;  %v1017_v49 = vld [vmem:[#allocation5 + $0x1bf0] sm:$0xff]  ;;  %v138_v5 = vld [vmem:[#allocation5 + $0x78] sm:$0xff] }
 0x40d   :  { %8678 = vmatpush1.bf16.msra.mxu0 %v10272_v42  ;;  %v1141_v50 = vld [vmem:[#allocation5 + $0x1fd0] sm:$0xff]  ;;  %v10305_v53 = vcombine.high %v1013_v48, %v1017_v49  ;;  %v10304_v60 = vcombine.low %v1013_v48, %v1017_v49  ;;  %v9427_v42 = vcombine.high %v134_v24, %v138_v5  ;;  %v9426_v14 = vcombine.low %v134_v24, %v138_v5  ;;  %v286_v48 = vld [vmem:[#allocation5 + $0x518] sm:$0xff] }
 0x40e   :  { %8679 = vmatprep.subr.bf16.mxu0 %v10281_v8  ;;  %v1145_v61 = vld [vmem:[#allocation5 + $0x1ff0] sm:$0xff]  ;;  %v142_v8 = vld [vmem:[#allocation5 + $0x98] sm:$0xff] }
 0x40f   :  { %8719 = vmatpush1.bf16.msra.mxu1 %v10400_v7  ;;  %v10433_v4 = vcombine.high %v1141_v50, %v1145_v61  ;;  %v10432_v62 = vcombine.low %v1141_v50, %v1145_v61  ;;  %v9555_v7 = vcombine.high %v262_v40, %v266_v17  ;;  %v290_v49 = vld [vmem:[#allocation5 + $0x538] sm:$0xff] }
 0x410   :  { %8720 = vmatprep.subr.bf16.mxu1 %v10409_v9  ;;  %v146_v9 = vld [vmem:[#allocation5 + $0xb8] sm:$0xff]  ;;  %v9578_v26 = vcombine.low %v286_v48, %v290_v49 }
 0x411   :  { %8680 = vmatpush1.bf16.msra.mxu0 %v10280_v18  ;;  %v9435_v18 = vcombine.high %v142_v8, %v146_v9  ;;  %v9434_v2 = vcombine.low %v142_v8, %v146_v9 }
 0x412   :  { %8681 = vmatprep.subr.bf16.mxu0 %v10289_v57  ;;  %v150_v57 = vld [vmem:[#allocation5 + $0xd8] sm:$0xff] }
 0x413   :  { %8721 = vmatpush1.bf16.msra.mxu1 %v10408_v20  ;;  %v9563_v20 = vcombine.high %v270_v12, %v274_v19  ;;  %v310_v12 = vld [vmem:[#allocation5 + $0x5d8] sm:$0xff] }
 0x414   :  { %8722 = vmatprep.subr.bf16.mxu1 %v10417_v56  ;;  %v154_v56 = vld [vmem:[#allocation5 + $0xf8] sm:$0xff] }
 0x415   :  { %8682 = vmatpush1.bf16.msra.mxu0 %v10288_v30  ;;  %v9443_v30 = vcombine.high %v150_v57, %v154_v56  ;;  %v9442_v50 = vcombine.low %v150_v57, %v154_v56  ;;  %v314_v19 = vld [vmem:[#allocation5 + $0x5f8] sm:$0xff] }
 0x416   :  { %8683 = vmatprep.subr.bf16.mxu0 %v10297_v28  ;;  %v158_v28 = vld [vmem:[#allocation5 + $0x118] sm:$0xff] }
 0x417   :  { %8723 = vmatpush1.bf16.msra.mxu1 %v10416_v32  ;;  %v9571_v32 = vcombine.high %v278_v36, %v282_v63 }
 0x418   :  { %8724 = vmatprep.subr.bf16.mxu1 %v10425_v22  ;;  %v162_v22 = vld [vmem:[#allocation5 + $0x138] sm:$0xff] }
 0x419   :  { %8684 = vmatpush1.bf16.msra.mxu0 %v10296_v6  ;;  %v9451_v61 = vcombine.high %v158_v28, %v162_v22  ;;  %v166_v6 = vld [vmem:[#allocation5 + $0x158] sm:$0xff]  ;;  %v9450_v55 = vcombine.low %v158_v28, %v162_v22 }
 0x41a   :  { %8685 = vmatprep.subr.bf16.mxu0 %v10305_v53  ;;  %v294_v53 = vld [vmem:[#allocation5 + $0x558] sm:$0xff] }
 0x41b   :  { %8725 = vmatpush1.bf16.msra.mxu1 %v10424_v52  ;;  %v170_v52 = vld [vmem:[#allocation5 + $0x178] sm:$0xff] }
 0x41c   :  { %8726 = vmatprep.subr.bf16.mxu1 %v10433_v4  ;;  %v298_v4 = vld [vmem:[#allocation5 + $0x578] sm:$0xff]  ;;  %v9459_v10 = vcombine.high %v166_v6, %v170_v52  ;;  %v9458_v24 = vcombine.low %v166_v6, %v170_v52 }
 0x41d   :  { %8686 = vmatpush1.bf16.msra.mxu0 %v10304_v60  ;;  %v9587_v13 = vcombine.high %v294_v53, %v298_v4  ;;  %v174_v60 = vld [vmem:[#allocation5 + $0x198] sm:$0xff]  ;;  %v9586_v5 = vcombine.low %v294_v53, %v298_v4 }
 0x41e   :  { %8737 = vmatprep.subr.bf16.mxu0 %v9419_v0  ;;  %v302_v0 = vld [vmem:[#allocation5 + $0x598] sm:$0xff] }
 0x41f   :  { %8727 = vmatpush1.bf16.msra.mxu1 %v10432_v62  ;;  %v178_v62 = vld [vmem:[#allocation5 + $0x1b8] sm:$0xff] }
 0x420   :  { %8778 = vmatprep.subr.bf16.mxu1 %v9547_v25  ;;  %8688 = vmatmul.mubr.bf16.vlgmr.msra.gmra.mrb[60].mxu0 %v10783_v37  ;;  %v306_v25 = vld [vmem:[#allocation5 + $0x5b8] sm:$0xff]  ;;  %v9467_v40 = vcombine.high %v174_v60, %v178_v62 }
 0x421   :  { %8738 = vmatpush1.bf16.msra.mxu0 %v9418_v3  ;;  %8769 = vmatprep.mubr.bf16.mxu0 %v10711_v43  ;;  %v9570_v43 = vcombine.low %v278_v36, %v282_v63  ;;  %v9595_v3 = vcombine.high %v302_v0, %v306_v25  ;;  %v9594_v63 = vcombine.low %v302_v0, %v306_v25  ;;  %v194_v28 = vld [vmem:[#allocation5 + $0x238] sm:$0xff] }
 0x422   :  { %8729 = vmatmul.mubr.bf16.vlgmr.msra.gmra.mrb[60].mxu1 %v10785_v44  ;;  %8739 = vmatprep.subr.bf16.mxu0 %v9427_v42  ;;  %v186_v42 = vld [vmem:[#allocation5 + $0x1f8] sm:$0xff] }
 0x423   :  { %8779 = vmatpush1.bf16.msra.mxu1 %v9546_v29  ;;  %8810 = vmatprep.mubr.bf16.mxu1 %v10714_v46  ;;  %v9579_v46 = vcombine.high %v286_v48, %v290_v49  ;;  %v182_v29 = vld [vmem:[#allocation5 + $0x1d8] sm:$0xff]  ;;  %v9602_v49 = vcombine.low %v310_v12, %v314_v19 }
 0x424   :  { %8780 = vmatprep.subr.bf16.mxu1 %v9555_v7  ;;  %v322_v22 = vld [vmem:[#allocation5 + $0x638] sm:$0xff]  ;;  %v9474_v48 = vcombine.low %v182_v29, %v186_v42 }
 0x425   :  { %8740 = vmatpush1.bf16.msra.mxu0 %v9426_v14  ;;  %v326_v6 = vld [vmem:[#allocation5 + $0x658] sm:$0xff] }
 0x426   :  { %8741 = vmatprep.subr.bf16.mxu0 %v9435_v18  ;;  %v330_v52 = vld [vmem:[#allocation5 + $0x678] sm:$0xff] }
 0x427   :  { %8781 = vmatpush1.bf16.msra.mxu1 %v9554_v45  ;;  %v9618_v25 = vcombine.low %v326_v6, %v330_v52 }
 0x428   :  { %8782 = vmatprep.subr.bf16.mxu1 %v9563_v20  ;;  %v9466_v20 = vcombine.low %v174_v60, %v178_v62  ;;  %v334_v60 = vld [vmem:[#allocation5 + $0x698] sm:$0xff] }
 0x429   :  { %8742 = vmatpush1.bf16.msra.mxu0 %v9434_v2  ;;  %v9475_v2 = vcombine.high %v182_v29, %v186_v42  ;;  %v338_v62 = vld [vmem:[#allocation5 + $0x6b8] sm:$0xff] }
 0x42a   :  { %8743 = vmatprep.subr.bf16.mxu0 %v9443_v30  ;;  %v9603_v30 = vcombine.high %v310_v12, %v314_v19  ;;  %v346_v29 = vld [vmem:[#allocation5 + $0x6f8] sm:$0xff] }
 0x42b   :  { %8783 = vmatpush1.bf16.msra.mxu1 %v9562_v39  ;;  %v222_v12 = vld [vmem:[#allocation5 + $0x318] sm:$0xff] }
 0x42c   :  { %8784 = vmatprep.subr.bf16.mxu1 %v9571_v32  ;;  %v190_v32 = vld [vmem:[#allocation5 + $0x218] sm:$0xff] }
 0x42d   :  { %8744 = vmatpush1.bf16.msra.mxu0 %v9442_v50  ;;  %v9483_v50 = vcombine.high %v190_v32, %v194_v28  ;;  %v9482_v53 = vcombine.low %v190_v32, %v194_v28  ;;  %v226_v19 = vld [vmem:[#allocation5 + $0x338] sm:$0xff] }
 0x42e   :  { %8745 = vmatprep.subr.bf16.mxu0 %v9451_v61  ;;  %v198_v61 = vld [vmem:[#allocation5 + $0x258] sm:$0xff]  ;;  %v9514_v32 = vcombine.low %v222_v12, %v226_v19 }
 0x42f   :  { %8785 = vmatpush1.bf16.msra.mxu1 %v9570_v43 }
 0x430   :  { %8786 = vmatprep.subr.bf16.mxu1 %v9579_v46  ;;  %v202_v46 = vld [vmem:[#allocation5 + $0x278] sm:$0xff] }
 0x431   :  { %8746 = vmatpush1.bf16.msra.mxu0 %v9450_v55  ;;  %v9491_v55 = vcombine.high %v198_v61, %v202_v46  ;;  %v9490_v0 = vcombine.low %v198_v61, %v202_v46 }
 0x432   :  { %8747 = vmatprep.subr.bf16.mxu0 %v9459_v10  ;;  %v206_v10 = vld [vmem:[#allocation5 + $0x298] sm:$0xff] }
 0x433   :  { %8787 = vmatpush1.bf16.msra.mxu1 %v9578_v26  ;;  %v8443_v17 = vpop.f32.mrb[48].mxu0  ;;  %v9619_v26 = vcombine.high %v326_v6, %v330_v52 }
 0x434   :  { %8788 = vmatprep.subr.bf16.mxu1 %v9587_v13  ;;  %v8444_v7 = vadd.f32 %v8443_v17, %v10762_v16  ;;  %v8445_v9 = vpop.f32.mrb[49].mxu0  ;;  %v210_v13 = vld [vmem:[#allocation5 + $0x2b8] sm:$0xff] }
 0x435   :  { %v8484_v8 = vpop.f32.mrb[48].mxu1  ;;  %v8446_v14 = vadd.f32 %v8445_v9, %v10765_v54  ;;  %v8447_v18 = vpop.f32.mrb[50].mxu0  ;;  %8748 = vmatpush1.bf16.msra.mxu0 %v9458_v24  ;;  %v318_v54 = vld [vmem:[#allocation5 + $0x618] sm:$0xff]  ;;  %v9499_v24 = vcombine.high %v206_v10, %v210_v13  ;;  %v9498_v42 = vcombine.low %v206_v10, %v210_v13 }
 0x436   :  { %v8486_v45 = vpop.f32.mrb[49].mxu1  ;;  %v10876_v57 = vadd.f32 %v8484_v8, %v8444_v7  ;;  %v8448_v36 = vpop.f32.mrb[51].mxu0  ;;  %8749 = vmatprep.subr.bf16.mxu0 %v9467_v40  ;;  %v9611_v43 = vcombine.high %v318_v54, %v322_v22  ;;  %v9610_v4 = vcombine.low %v318_v54, %v322_v22  ;;  %v214_v40 = vld [vmem:[#allocation5 + $0x2d8] sm:$0xff]  ;;  %v9626_v7 = vcombine.low %v334_v60, %v338_v62 }
 0x437   :  { %v8488_v56 = vpop.f32.mrb[50].mxu1  ;;  %8789 = vmatpush1.bf16.msra.mxu1 %v9586_v5  ;;  %v10878_v39 = vadd.f32 %v8486_v45, %v8446_v14  ;;  %v9627_v5 = vcombine.high %v334_v60, %v338_v62  ;;  %v218_v17 = vld [vmem:[#allocation5 + $0x2f8] sm:$0xff] }
 0x438   :  { %v8489_v16 = vpop.f32.mrb[51].mxu1  ;;  %8790 = vmatprep.subr.bf16.mxu1 %v9595_v3  ;;  %v342_v3 = vld [vmem:[#allocation5 + $0x6d8] sm:$0xff]  ;;  %v9507_v8 = vcombine.high %v214_v40, %v218_v17  ;;  %v9506_v18 = vcombine.low %v214_v40, %v218_v17  ;;  %v9515_v56 = vcombine.high %v222_v12, %v226_v19 }
 0x439   :  { %8750 = vmatpush1.bf16.msra.mxu0 %v9466_v20  ;;  %v9635_v9 = vcombine.high %v342_v3, %v346_v29  ;;  %v350_v14 = vld [vmem:[#allocation5 + $0x718] sm:$0xff]  ;;  %v9634_v20 = vcombine.low %v342_v3, %v346_v29 }
 0x43a   :  { %8751 = vmatprep.subr.bf16.mxu0 %v9475_v2  ;;  %v354_v45 = vld [vmem:[#allocation5 + $0x738] sm:$0xff] }
 0x43b   :  { %8791 = vmatpush1.bf16.msra.mxu1 %v9594_v63  ;;  %v9643_v36 = vcombine.high %v350_v14, %v354_v45  ;;  %v230_v63 = vld [vmem:[#allocation5 + $0x358] sm:$0xff]  ;;  %v9642_v28 = vcombine.low %v350_v14, %v354_v45 }
 0x43c   :  { %8792 = vmatprep.subr.bf16.mxu1 %v9603_v30  ;;  %v234_v2 = vld [vmem:[#allocation5 + $0x378] sm:$0xff] }
 0x43d   :  { %8752 = vmatpush1.bf16.msra.mxu0 %v9474_v48  ;;  %v358_v16 = vld [vmem:[#allocation5 + $0x758] sm:$0xff]  ;;  %v9523_v54 = vcombine.high %v230_v63, %v234_v2  ;;  %v9522_v61 = vcombine.low %v230_v63, %v234_v2 }
 0x43e   :  { %8753 = vmatprep.subr.bf16.mxu0 %v9483_v50  ;;  %v362_v30 = vld [vmem:[#allocation5 + $0x778] sm:$0xff] }
 0x43f   :  { %8793 = vmatpush1.bf16.msra.mxu1 %v9602_v49  ;;  %v9651_v22 = vcombine.high %v358_v16, %v362_v30  ;;  %v238_v48 = vld [vmem:[#allocation5 + $0x398] sm:$0xff]  ;;  %v9650_v46 = vcombine.low %v358_v16, %v362_v30 }
 0x440   :  { %8794 = vmatprep.subr.bf16.mxu1 %v9611_v43  ;;  %v242_v49 = vld [vmem:[#allocation5 + $0x3b8] sm:$0xff] }
 0x441   :  { %8754 = vmatpush1.bf16.msra.mxu0 %v9482_v53  ;;  %v366_v50 = vld [vmem:[#allocation5 + $0x798] sm:$0xff]  ;;  %v9531_v6 = vcombine.high %v238_v48, %v242_v49  ;;  %v9530_v10 = vcombine.low %v238_v48, %v242_v49 }
 0x442   :  { %8755 = vmatprep.subr.bf16.mxu0 %v9491_v55  ;;  %v370_v43 = vld [vmem:[#allocation5 + $0x7b8] sm:$0xff] }
 0x443   :  { %8795 = vmatpush1.bf16.msra.mxu1 %v9610_v4  ;;  %v9659_v52 = vcombine.high %v366_v50, %v370_v43  ;;  %v246_v53 = vld [vmem:[#allocation5 + $0x3d8] sm:$0xff]  ;;  %v9658_v13 = vcombine.low %v366_v50, %v370_v43 }
 0x444   :  { %8796 = vmatprep.subr.bf16.mxu1 %v9619_v26  ;;  %v250_v4 = vld [vmem:[#allocation5 + $0x3f8] sm:$0xff] }
 0x445   :  { %8756 = vmatpush1.bf16.msra.mxu0 %v9490_v0  ;;  %v374_v55 = vld [vmem:[#allocation5 + $0x7d8] sm:$0xff]  ;;  %v9539_v60 = vcombine.high %v246_v53, %v250_v4  ;;  %v9538_v40 = vcombine.low %v246_v53, %v250_v4 }
 0x446   :  { %8757 = vmatprep.subr.bf16.mxu0 %v9499_v24  ;;  %v378_v26 = vld [vmem:[#allocation5 + $0x7f8] sm:$0xff] }
 0x447   :  { %8797 = vmatpush1.bf16.msra.mxu1 %v9618_v25  ;;  %v9667_v62 = vcombine.high %v374_v55, %v378_v26  ;;  %v382_v0 = vld [vmem:[#allocation5 + $0x818] sm:$0xff]  ;;  %v9666_v17 = vcombine.low %v374_v55, %v378_v26 }
 0x448   :  { %8798 = vmatprep.subr.bf16.mxu1 %v9627_v5  ;;  %v386_v25 = vld [vmem:[#allocation5 + $0x838] sm:$0xff] }
 0x449   :  { %8758 = vmatpush1.bf16.msra.mxu0 %v9498_v42  ;;  %v510_v24 = vld [vmem:[#allocation5 + $0xc18] sm:$0xff]  ;;  %v9675_v3 = vcombine.high %v382_v0, %v386_v25  ;;  %v9674_v12 = vcombine.low %v382_v0, %v386_v25 }
 0x44a   :  { %8759 = vmatprep.subr.bf16.mxu0 %v9507_v8  ;;  %v514_v5 = vld [vmem:[#allocation5 + $0xc38] sm:$0xff] }
 0x44b   :  { %8799 = vmatpush1.bf16.msra.mxu1 %v9626_v7  ;;  %v9803_v29 = vcombine.high %v510_v24, %v514_v5  ;;  %v390_v42 = vld [vmem:[#allocation5 + $0x858] sm:$0xff]  ;;  %v9802_v19 = vcombine.low %v510_v24, %v514_v5 }
 0x44c   :  { %8800 = vmatprep.subr.bf16.mxu1 %v9635_v9  ;;  %v394_v7 = vld [vmem:[#allocation5 + $0x878] sm:$0xff] }
 0x44d   :  { %8760 = vmatpush1.bf16.msra.mxu0 %v9506_v18  ;;  %v518_v8 = vld [vmem:[#allocation5 + $0xc58] sm:$0xff]  ;;  %v9683_v14 = vcombine.high %v390_v42, %v394_v7  ;;  %v9682_v63 = vcombine.low %v390_v42, %v394_v7 }
 0x44e   :  { %8761 = vmatprep.subr.bf16.mxu0 %v9515_v56  ;;  %v522_v9 = vld [vmem:[#allocation5 + $0xc78] sm:$0xff] }
 0x44f   :  { %8801 = vmatpush1.bf16.msra.mxu1 %v9634_v20  ;;  %v9811_v45 = vcombine.high %v518_v8, %v522_v9  ;;  %v398_v18 = vld [vmem:[#allocation5 + $0x898] sm:$0xff]  ;;  %v9810_v2 = vcombine.low %v518_v8, %v522_v9 }
 0x450   :  { %8802 = vmatprep.subr.bf16.mxu1 %v9643_v36  ;;  %v402_v20 = vld [vmem:[#allocation5 + $0x8b8] sm:$0xff] }
 0x451   :  { %8762 = vmatpush1.bf16.msra.mxu0 %v9514_v32  ;;  %v526_v56 = vld [vmem:[#allocation5 + $0xc98] sm:$0xff]  ;;  %v9691_v16 = vcombine.high %v398_v18, %v402_v20 }
 0x452   :  { %8763 = vmatprep.subr.bf16.mxu0 %v9523_v54  ;;  %v530_v36 = vld [vmem:[#allocation5 + $0xcb8] sm:$0xff] }
 0x453   :  { %8803 = vmatpush1.bf16.msra.mxu1 %v9642_v28  ;;  %v9819_v30 = vcombine.high %v526_v56, %v530_v36  ;;  %v406_v32 = vld [vmem:[#allocation5 + $0x8d8] sm:$0xff] }
 0x454   :  { %8804 = vmatprep.subr.bf16.mxu1 %v9651_v22  ;;  %v410_v28 = vld [vmem:[#allocation5 + $0x8f8] sm:$0xff] }
 0x455   :  { %8764 = vmatpush1.bf16.msra.mxu0 %v9522_v61  ;;  %v534_v54 = vld [vmem:[#allocation5 + $0xcd8] sm:$0xff]  ;;  %v9699_v48 = vcombine.high %v406_v32, %v410_v28 }
 0x456   :  { %8765 = vmatprep.subr.bf16.mxu0 %v9531_v6  ;;  %v538_v22 = vld [vmem:[#allocation5 + $0xcf8] sm:$0xff]  ;;  %v9698_v6 = vcombine.low %v406_v32, %v410_v28 }
 0x457   :  { %8805 = vmatpush1.bf16.msra.mxu1 %v9650_v46  ;;  %v9827_v49 = vcombine.high %v534_v54, %v538_v22  ;;  %v414_v50 = vld [vmem:[#allocation5 + $0x918] sm:$0xff] }
 0x458   :  { %8806 = vmatprep.subr.bf16.mxu1 %v9659_v52  ;;  %v418_v43 = vld [vmem:[#allocation5 + $0x938] sm:$0xff] }
 0x459   :  { %8766 = vmatpush1.bf16.msra.mxu0 %v9530_v10  ;;  %v542_v61 = vld [vmem:[#allocation5 + $0xd18] sm:$0xff]  ;;  %v9707_v52 = vcombine.high %v414_v50, %v418_v43  ;;  %v9706_v10 = vcombine.low %v414_v50, %v418_v43 }
 0x45a   :  { %8767 = vmatprep.subr.bf16.mxu0 %v9539_v60  ;;  %v546_v46 = vld [vmem:[#allocation5 + $0xd38] sm:$0xff] }
 0x45b   :  { %8807 = vmatpush1.bf16.msra.mxu1 %v9658_v13  ;;  %v422_v53 = vld [vmem:[#allocation5 + $0x958] sm:$0xff]  ;;  %v9834_v13 = vcombine.low %v542_v61, %v546_v46 }
 0x45c   :  { %8808 = vmatprep.subr.bf16.mxu1 %v9667_v62  ;;  %v426_v4 = vld [vmem:[#allocation5 + $0x978] sm:$0xff] }
 0x45d   :  { %8768 = vmatpush1.bf16.msra.mxu0 %v9538_v40  ;;  %v550_v55 = vld [vmem:[#allocation5 + $0xd58] sm:$0xff]  ;;  %v9715_v60 = vcombine.high %v422_v53, %v426_v4  ;;  %v9714_v40 = vcombine.low %v422_v53, %v426_v4 }
 0x45e   :  { %8819 = vmatprep.subr.bf16.mxu0 %v9675_v3  ;;  %v554_v26 = vld [vmem:[#allocation5 + $0xd78] sm:$0xff] }
 0x45f   :  { %8809 = vmatpush1.bf16.msra.mxu1 %v9666_v17  ;;  %v9843_v62 = vcombine.high %v550_v55, %v554_v26  ;;  %v430_v0 = vld [vmem:[#allocation5 + $0x998] sm:$0xff]  ;;  %v9842_v17 = vcombine.low %v550_v55, %v554_v26 }
 0x460   :  { %8860 = vmatprep.subr.bf16.mxu1 %v9803_v29  ;;  %8770 = vmatmul.mubr.bf16.vlgmr.msra.gmra.mrb[64].mxu0 %v10723_v47  ;;  %v9690_v47 = vcombine.low %v398_v18, %v402_v20  ;;  %v434_v25 = vld [vmem:[#allocation5 + $0x9b8] sm:$0xff] }
 0x461   :  { %8820 = vmatpush1.bf16.msra.mxu0 %v9674_v12  ;;  %8851 = vmatprep.mubr.bf16.mxu0 %v10727_v59  ;;  %v9826_v59 = vcombine.low %v534_v54, %v538_v22  ;;  %v558_v24 = vld [vmem:[#allocation5 + $0xd98] sm:$0xff]  ;;  %v9723_v3 = vcombine.high %v430_v0, %v434_v25 }
 0x462   :  { %8811 = vmatmul.mubr.bf16.vlgmr.msra.gmra.mrb[64].mxu1 %v10725_v51  ;;  %8821 = vmatprep.subr.bf16.mxu0 %v9683_v14  ;;  %v9818_v51 = vcombine.low %v526_v56, %v530_v36  ;;  %v562_v5 = vld [vmem:[#allocation5 + $0xdb8] sm:$0xff]  ;;  %v9722_v36 = vcombine.low %v430_v0, %v434_v25 }
 0x463   :  { %8861 = vmatpush1.bf16.msra.mxu1 %v9802_v19  ;;  %8892 = vmatprep.mubr.bf16.mxu1 %v10730_v58  ;;  %v9835_v58 = vcombine.high %v542_v61, %v546_v46  ;;  %v9851_v42 = vcombine.high %v558_v24, %v562_v5  ;;  %v438_v7 = vld [vmem:[#allocation5 + $0x9d8] sm:$0xff] }
 0x464   :  { %8862 = vmatprep.subr.bf16.mxu1 %v9811_v45  ;;  %v442_v8 = vld [vmem:[#allocation5 + $0x9f8] sm:$0xff] }
 0x465   :  { %8822 = vmatpush1.bf16.msra.mxu0 %v9682_v63  ;;  %v566_v14 = vld [vmem:[#allocation5 + $0xdd8] sm:$0xff]  ;;  %v9731_v32 = vcombine.high %v438_v7, %v442_v8 }
 0x466   :  { %8823 = vmatprep.subr.bf16.mxu0 %v9691_v16  ;;  %v570_v45 = vld [vmem:[#allocation5 + $0xdf8] sm:$0xff] }
 0x467   :  { %8863 = vmatpush1.bf16.msra.mxu1 %v9810_v2  ;;  %v9859_v54 = vcombine.high %v566_v14, %v570_v45  ;;  %v446_v22 = vld [vmem:[#allocation5 + $0xa18] sm:$0xff] }
 0x468   :  { %8864 = vmatprep.subr.bf16.mxu1 %v9819_v30  ;;  %v9850_v30 = vcombine.low %v558_v24, %v562_v5  ;;  %v454_v61 = vld [vmem:[#allocation5 + $0xa58] sm:$0xff] }
 0x469   :  { %8824 = vmatpush1.bf16.msra.mxu0 %v9690_v47  ;;  %v450_v47 = vld [vmem:[#allocation5 + $0xa38] sm:$0xff] }
 0x46a   :  { %8825 = vmatprep.subr.bf16.mxu0 %v9699_v48  ;;  %v9730_v48 = vcombine.low %v438_v7, %v442_v8  ;;  %v9739_v50 = vcombine.high %v446_v22, %v450_v47  ;;  %v458_v46 = vld [vmem:[#allocation5 + $0xa78] sm:$0xff] }
 0x46b   :  { %8865 = vmatpush1.bf16.msra.mxu1 %v9818_v51  ;;  %v578_v51 = vld [vmem:[#allocation5 + $0xe38] sm:$0xff]  ;;  %v9747_v53 = vcombine.high %v454_v61, %v458_v46 }
 0x46c   :  { %8866 = vmatprep.subr.bf16.mxu1 %v9827_v49  ;;  %v9858_v49 = vcombine.low %v566_v14, %v570_v45  ;;  %v462_v55 = vld [vmem:[#allocation5 + $0xa98] sm:$0xff] }
 0x46d   :  { %8826 = vmatpush1.bf16.msra.mxu0 %v9698_v6  ;;  %v582_v6 = vld [vmem:[#allocation5 + $0xe58] sm:$0xff] }
 0x46e   :  { %8827 = vmatprep.subr.bf16.mxu0 %v9707_v52  ;;  %v9738_v52 = vcombine.low %v446_v22, %v450_v47  ;;  %v466_v26 = vld [vmem:[#allocation5 + $0xab8] sm:$0xff] }
 0x46f   :  { %8867 = vmatpush1.bf16.msra.mxu1 %v9826_v59  ;;  %v586_v59 = vld [vmem:[#allocation5 + $0xe78] sm:$0xff]  ;;  %v9755_v0 = vcombine.high %v462_v55, %v466_v26 }
 0x470   :  { %8868 = vmatprep.subr.bf16.mxu1 %v9835_v58  ;;  %v9875_v4 = vcombine.high %v582_v6, %v586_v59  ;;  %v470_v24 = vld [vmem:[#allocation5 + $0xad8] sm:$0xff] }
 0x471   :  { %8828 = vmatpush1.bf16.msra.mxu0 %v9706_v10  ;;  %v590_v10 = vld [vmem:[#allocation5 + $0xe98] sm:$0xff] }
 0x472   :  { %8829 = vmatprep.subr.bf16.mxu0 %v9715_v60  ;;  %v9746_v60 = vcombine.low %v454_v61, %v458_v46  ;;  %v474_v5 = vld [vmem:[#allocation5 + $0xaf8] sm:$0xff] }
 0x473   :  { %8869 = vmatpush1.bf16.msra.mxu1 %v9834_v13  ;;  %v8525_v29 = vpop.f32.mrb[52].mxu0  ;;  %v594_v13 = vld [vmem:[#allocation5 + $0xeb8] sm:$0xff]  ;;  %v9762_v14 = vcombine.low %v470_v24, %v474_v5 }
 0x474   :  { %8870 = vmatprep.subr.bf16.mxu1 %v9843_v62  ;;  %v8526_v9 = vadd.f32 %v8525_v29, %v10876_v57  ;;  %v8527_v19 = vpop.f32.mrb[53].mxu0  ;;  %v9874_v62 = vcombine.low %v582_v6, %v586_v59  ;;  %v9883_v25 = vcombine.high %v590_v10, %v594_v13  ;;  %v9882_v29 = vcombine.low %v590_v10, %v594_v13  ;;  %v478_v8 = vld [vmem:[#allocation5 + $0xb18] sm:$0xff] }
 0x475   :  { %v8566_v12 = vpop.f32.mrb[52].mxu1  ;;  %v8528_v18 = vadd.f32 %v8527_v19, %v10878_v39  ;;  %v8529_v56 = vpop.f32.mrb[54].mxu0  ;;  %8830 = vmatpush1.bf16.msra.mxu0 %v9714_v40  ;;  %v574_v39 = vld [vmem:[#allocation5 + $0xe18] sm:$0xff] }
 0x476   :  { %v8568_v20 = vpop.f32.mrb[53].mxu1  ;;  %v10886_v63 = vadd.f32 %v8566_v12, %v8526_v9  ;;  %v8530_v16 = vpop.f32.mrb[55].mxu0  ;;  %8831 = vmatprep.subr.bf16.mxu0 %v9723_v3  ;;  %v9867_v43 = vcombine.high %v574_v39, %v578_v51  ;;  %v9866_v58 = vcombine.low %v574_v39, %v578_v51  ;;  %v598_v40 = vld [vmem:[#allocation5 + $0xed8] sm:$0xff]  ;;  %v9754_v3 = vcombine.low %v462_v55, %v466_v26 }
 0x477   :  { %v8570_v2 = vpop.f32.mrb[54].mxu1  ;;  %8871 = vmatpush1.bf16.msra.mxu1 %v9842_v17  ;;  %v10888_v28 = vadd.f32 %v8568_v20, %v8528_v18  ;;  %v602_v17 = vld [vmem:[#allocation5 + $0xef8] sm:$0xff] }
 0x478   :  { %v8571_v57 = vpop.f32.mrb[55].mxu1  ;;  %8872 = vmatprep.subr.bf16.mxu1 %v9851_v42  ;;  %v9763_v42 = vcombine.high %v470_v24, %v474_v5  ;;  %v9891_v7 = vcombine.high %v598_v40, %v602_v17  ;;  %v482_v9 = vld [vmem:[#allocation5 + $0xb38] sm:$0xff]  ;;  %v9890_v45 = vcombine.low %v598_v40, %v602_v17 }
 0x479   :  { %8832 = vmatpush1.bf16.msra.mxu0 %v9722_v36  ;;  %v606_v12 = vld [vmem:[#allocation5 + $0xf18] sm:$0xff]  ;;  %v9771_v18 = vcombine.high %v478_v8, %v482_v9 }
 0x47a   :  { %8833 = vmatprep.subr.bf16.mxu0 %v9731_v32  ;;  %v610_v19 = vld [vmem:[#allocation5 + $0xf38] sm:$0xff] }
 0x47b   :  { %8873 = vmatpush1.bf16.msra.mxu1 %v9850_v30  ;;  %v9899_v20 = vcombine.high %v606_v12, %v610_v19  ;;  %v486_v56 = vld [vmem:[#allocation5 + $0xb58] sm:$0xff]  ;;  %v9770_v30 = vcombine.low %v478_v8, %v482_v9  ;;  %v9898_v32 = vcombine.low %v606_v12, %v610_v19 }
 0x47c   :  { %8874 = vmatprep.subr.bf16.mxu1 %v9859_v54  ;;  %v490_v36 = vld [vmem:[#allocation5 + $0xb78] sm:$0xff] }
 0x47d   :  { %8834 = vmatpush1.bf16.msra.mxu0 %v9730_v48  ;;  %v614_v2 = vld [vmem:[#allocation5 + $0xf58] sm:$0xff]  ;;  %v9779_v57 = vcombine.high %v486_v56, %v490_v36  ;;  %v9778_v48 = vcombine.low %v486_v56, %v490_v36 }
 0x47e   :  { %8835 = vmatprep.subr.bf16.mxu0 %v9739_v50  ;;  %v618_v16 = vld [vmem:[#allocation5 + $0xf78] sm:$0xff] }
 0x47f   :  { %8875 = vmatpush1.bf16.msra.mxu1 %v9858_v49  ;;  %v9907_v54 = vcombine.high %v614_v2, %v618_v16  ;;  %v494_v22 = vld [vmem:[#allocation5 + $0xb98] sm:$0xff]  ;;  %v9906_v49 = vcombine.low %v614_v2, %v618_v16 }
 0x480   :  { %8876 = vmatprep.subr.bf16.mxu1 %v9867_v43  ;;  %v498_v47 = vld [vmem:[#allocation5 + $0xbb8] sm:$0xff] }
 0x481   :  { %8836 = vmatpush1.bf16.msra.mxu0 %v9738_v52  ;;  %v622_v39 = vld [vmem:[#allocation5 + $0xf98] sm:$0xff]  ;;  %v9787_v50 = vcombine.high %v494_v22, %v498_v47  ;;  %v9786_v52 = vcombine.low %v494_v22, %v498_v47 }
 0x482   :  { %8837 = vmatprep.subr.bf16.mxu0 %v9747_v53  ;;  %v626_v51 = vld [vmem:[#allocation5 + $0xfb8] sm:$0xff] }
 0x483   :  { %8877 = vmatpush1.bf16.msra.mxu1 %v9866_v58  ;;  %v9915_v43 = vcombine.high %v622_v39, %v626_v51  ;;  %v502_v61 = vld [vmem:[#allocation5 + $0xbd8] sm:$0xff]  ;;  %v9914_v58 = vcombine.low %v622_v39, %v626_v51 }
 0x484   :  { %8878 = vmatprep.subr.bf16.mxu1 %v9875_v4  ;;  %v506_v46 = vld [vmem:[#allocation5 + $0xbf8] sm:$0xff] }
 0x485   :  { %8838 = vmatpush1.bf16.msra.mxu0 %v9746_v60  ;;  %v630_v6 = vld [vmem:[#allocation5 + $0xfd8] sm:$0xff]  ;;  %v9795_v53 = vcombine.high %v502_v61, %v506_v46  ;;  %v9794_v60 = vcombine.low %v502_v61, %v506_v46 }
 0x486   :  { %8839 = vmatprep.subr.bf16.mxu0 %v9755_v0  ;;  %v634_v59 = vld [vmem:[#allocation5 + $0xff8] sm:$0xff] }
 0x487   :  { %8879 = vmatpush1.bf16.msra.mxu1 %v9874_v62  ;;  %v9923_v4 = vcombine.high %v630_v6, %v634_v59  ;;  %v638_v55 = vld [vmem:[#allocation5 + $0x1018] sm:$0xff]  ;;  %v9922_v62 = vcombine.low %v630_v6, %v634_v59 }
 0x488   :  { %8880 = vmatprep.subr.bf16.mxu1 %v9883_v25  ;;  %v642_v26 = vld [vmem:[#allocation5 + $0x1038] sm:$0xff] }
 0x489   :  { %8840 = vmatpush1.bf16.msra.mxu0 %v9754_v3  ;;  %v766_v10 = vld [vmem:[#allocation5 + $0x1418] sm:$0xff]  ;;  %v9931_v0 = vcombine.high %v638_v55, %v642_v26  ;;  %v9930_v3 = vcombine.low %v638_v55, %v642_v26 }
 0x48a   :  { %8841 = vmatprep.subr.bf16.mxu0 %v9763_v42  ;;  %v770_v13 = vld [vmem:[#allocation5 + $0x1438] sm:$0xff] }
 0x48b   :  { %8881 = vmatpush1.bf16.msra.mxu1 %v9882_v29  ;;  %v10059_v25 = vcombine.high %v766_v10, %v770_v13  ;;  %v646_v24 = vld [vmem:[#allocation5 + $0x1058] sm:$0xff]  ;;  %v10058_v29 = vcombine.low %v766_v10, %v770_v13 }
 0x48c   :  { %8882 = vmatprep.subr.bf16.mxu1 %v9891_v7  ;;  %v650_v5 = vld [vmem:[#allocation5 + $0x1078] sm:$0xff] }
 0x48d   :  { %8842 = vmatpush1.bf16.msra.mxu0 %v9762_v14  ;;  %v774_v40 = vld [vmem:[#allocation5 + $0x1458] sm:$0xff]  ;;  %v9939_v42 = vcombine.high %v646_v24, %v650_v5  ;;  %v9938_v14 = vcombine.low %v646_v24, %v650_v5 }
 0x48e   :  { %8843 = vmatprep.subr.bf16.mxu0 %v9771_v18  ;;  %v778_v17 = vld [vmem:[#allocation5 + $0x1478] sm:$0xff] }
 0x48f   :  { %8883 = vmatpush1.bf16.msra.mxu1 %v9890_v45  ;;  %v10067_v7 = vcombine.high %v774_v40, %v778_v17  ;;  %v654_v8 = vld [vmem:[#allocation5 + $0x1098] sm:$0xff]  ;;  %v10066_v45 = vcombine.low %v774_v40, %v778_v17 }
 0x490   :  { %8884 = vmatprep.subr.bf16.mxu1 %v9899_v20  ;;  %v658_v9 = vld [vmem:[#allocation5 + $0x10b8] sm:$0xff] }
 0x491   :  { %8844 = vmatpush1.bf16.msra.mxu0 %v9770_v30  ;;  %v782_v12 = vld [vmem:[#allocation5 + $0x1498] sm:$0xff]  ;;  %v9947_v18 = vcombine.high %v654_v8, %v658_v9 }
 0x492   :  { %8845 = vmatprep.subr.bf16.mxu0 %v9779_v57  ;;  %v786_v19 = vld [vmem:[#allocation5 + $0x14b8] sm:$0xff] }
 0x493   :  { %8885 = vmatpush1.bf16.msra.mxu1 %v9898_v32  ;;  %v10075_v20 = vcombine.high %v782_v12, %v786_v19  ;;  %v662_v56 = vld [vmem:[#allocation5 + $0x10d8] sm:$0xff] }
 0x494   :  { %8886 = vmatprep.subr.bf16.mxu1 %v9907_v54  ;;  %v666_v36 = vld [vmem:[#allocation5 + $0x10f8] sm:$0xff] }
 0x495   :  { %8846 = vmatpush1.bf16.msra.mxu0 %v9778_v48  ;;  %v790_v2 = vld [vmem:[#allocation5 + $0x14d8] sm:$0xff]  ;;  %v9955_v30 = vcombine.high %v662_v56, %v666_v36  ;;  %v9954_v39 = vcombine.low %v662_v56, %v666_v36 }
 0x496   :  { %8847 = vmatprep.subr.bf16.mxu0 %v9787_v50  ;;  %v794_v16 = vld [vmem:[#allocation5 + $0x14f8] sm:$0xff] }
 0x497   :  { %8887 = vmatpush1.bf16.msra.mxu1 %v9906_v49  ;;  %v10083_v32 = vcombine.high %v790_v2, %v794_v16  ;;  %v670_v57 = vld [vmem:[#allocation5 + $0x1118] sm:$0xff] }
 0x498   :  { %8888 = vmatprep.subr.bf16.mxu1 %v9915_v43  ;;  %v674_v54 = vld [vmem:[#allocation5 + $0x1138] sm:$0xff] }
 0x499   :  { %8848 = vmatpush1.bf16.msra.mxu0 %v9786_v52  ;;  %v798_v22 = vld [vmem:[#allocation5 + $0x1518] sm:$0xff]  ;;  %v9963_v51 = vcombine.high %v670_v57, %v674_v54  ;;  %v9962_v61 = vcombine.low %v670_v57, %v674_v54 }
 0x49a   :  { %8849 = vmatprep.subr.bf16.mxu0 %v9795_v53  ;;  %v802_v47 = vld [vmem:[#allocation5 + $0x1538] sm:$0xff] }
 0x49b   :  { %8889 = vmatpush1.bf16.msra.mxu1 %v9914_v58  ;;  %v678_v48 = vld [vmem:[#allocation5 + $0x1158] sm:$0xff]  ;;  %v10090_v46 = vcombine.low %v798_v22, %v802_v47 }
 0x49c   :  { %8890 = vmatprep.subr.bf16.mxu1 %v9923_v4  ;;  %v682_v49 = vld [vmem:[#allocation5 + $0x1178] sm:$0xff] }
 0x49d   :  { %8850 = vmatpush1.bf16.msra.mxu0 %v9794_v60  ;;  %v806_v50 = vld [vmem:[#allocation5 + $0x1558] sm:$0xff]  ;;  %v9971_v6 = vcombine.high %v678_v48, %v682_v49  ;;  %v9970_v55 = vcombine.low %v678_v48, %v682_v49 }
 0x49e   :  { %8901 = vmatprep.subr.bf16.mxu0 %v9931_v0  ;;  %v810_v43 = vld [vmem:[#allocation5 + $0x1578] sm:$0xff] }
 0x49f   :  { %8891 = vmatpush1.bf16.msra.mxu1 %v9922_v62  ;;  %v10099_v59 = vcombine.high %v806_v50, %v810_v43  ;;  %v686_v52 = vld [vmem:[#allocation5 + $0x1198] sm:$0xff]  ;;  %v10098_v26 = vcombine.low %v806_v50, %v810_v43 }
 0x4a0   :  { %8942 = vmatprep.subr.bf16.mxu1 %v10059_v25  ;;  %8852 = vmatmul.mubr.bf16.vlgmr.msra.gmra.mrb[68].mxu0 %v10745_v21  ;;  %v9946_v21 = vcombine.low %v654_v8, %v658_v9  ;;  %v690_v58 = vld [vmem:[#allocation5 + $0x11b8] sm:$0xff] }
 0x4a1   :  { %8902 = vmatpush1.bf16.msra.mxu0 %v9930_v3  ;;  %8933 = vmatprep.mubr.bf16.mxu0 %v10749_v35  ;;  %v10082_v35 = vcombine.low %v790_v2, %v794_v16  ;;  %v814_v53 = vld [vmem:[#allocation5 + $0x1598] sm:$0xff]  ;;  %v9979_v10 = vcombine.high %v686_v52, %v690_v58 }
 0x4a2   :  { %8893 = vmatmul.mubr.bf16.vlgmr.msra.gmra.mrb[68].mxu1 %v10747_v27  ;;  %8903 = vmatprep.subr.bf16.mxu0 %v9939_v42  ;;  %v10074_v27 = vcombine.low %v782_v12, %v786_v19  ;;  %v818_v4 = vld [vmem:[#allocation5 + $0x15b8] sm:$0xff] }
 0x4a3   :  { %8943 = vmatpush1.bf16.msra.mxu1 %v10058_v29  ;;  %8974 = vmatprep.mubr.bf16.mxu1 %v10752_v38  ;;  %v10091_v38 = vcombine.high %v798_v22, %v802_v47  ;;  %v10107_v60 = vcombine.high %v814_v53, %v818_v4  ;;  %v694_v62 = vld [vmem:[#allocation5 + $0x11d8] sm:$0xff]  ;;  %v10106_v19 = vcombine.low %v814_v53, %v818_v4 }
 0x4a4   :  { %8944 = vmatprep.subr.bf16.mxu1 %v10067_v7  ;;  %v698_v0 = vld [vmem:[#allocation5 + $0x11f8] sm:$0xff]  ;;  %v9978_v7 = vcombine.low %v686_v52, %v690_v58 }
 0x4a5   :  { %8904 = vmatpush1.bf16.msra.mxu0 %v9938_v14  ;;  %v822_v40 = vld [vmem:[#allocation5 + $0x15d8] sm:$0xff]  ;;  %v9987_v14 = vcombine.high %v694_v62, %v698_v0  ;;  %v9986_v2 = vcombine.low %v694_v62, %v698_v0 }
 0x4a6   :  { %8905 = vmatprep.subr.bf16.mxu0 %v9947_v18  ;;  %v826_v17 = vld [vmem:[#allocation5 + $0x15f8] sm:$0xff] }
 0x4a7   :  { %8945 = vmatpush1.bf16.msra.mxu1 %v10066_v45  ;;  %v10115_v18 = vcombine.high %v822_v40, %v826_v17  ;;  %v706_v56 = vld [vmem:[#allocation5 + $0x1238] sm:$0xff]  ;;  %v10114_v16 = vcombine.low %v822_v40, %v826_v17 }
 0x4a8   :  { %8946 = vmatprep.subr.bf16.mxu1 %v10075_v20  ;;  %v702_v20 = vld [vmem:[#allocation5 + $0x1218] sm:$0xff] }
 0x4a9   :  { %8906 = vmatpush1.bf16.msra.mxu0 %v9946_v21  ;;  %v834_v36 = vld [vmem:[#allocation5 + $0x1638] sm:$0xff]  ;;  %v9995_v21 = vcombine.high %v702_v20, %v706_v56  ;;  %v9994_v22 = vcombine.low %v702_v20, %v706_v56 }
 0x4aa   :  { %8907 = vmatprep.subr.bf16.mxu0 %v9955_v30  ;;  %v710_v30 = vld [vmem:[#allocation5 + $0x1258] sm:$0xff] }
 0x4ab   :  { %8947 = vmatpush1.bf16.msra.mxu1 %v10074_v27  ;;  %v838_v57 = vld [vmem:[#allocation5 + $0x1658] sm:$0xff] }
 0x4ac   :  { %8948 = vmatprep.subr.bf16.mxu1 %v10083_v32  ;;  %v714_v32 = vld [vmem:[#allocation5 + $0x1278] sm:$0xff] }
 0x4ad   :  { %8908 = vmatpush1.bf16.msra.mxu0 %v9954_v39  ;;  %v842_v54 = vld [vmem:[#allocation5 + $0x1678] sm:$0xff]  ;;  %v10003_v39 = vcombine.high %v710_v30, %v714_v32  ;;  %v10002_v50 = vcombine.low %v710_v30, %v714_v32 }
 0x4ae   :  { %8909 = vmatprep.subr.bf16.mxu0 %v9963_v51  ;;  %v718_v51 = vld [vmem:[#allocation5 + $0x1298] sm:$0xff]  ;;  %v10130_v43 = vcombine.low %v838_v57, %v842_v54 }
 0x4af   :  { %8949 = vmatpush1.bf16.msra.mxu1 %v10082_v35  ;;  %v10131_v35 = vcombine.high %v838_v57, %v842_v54  ;;  %v846_v48 = vld [vmem:[#allocation5 + $0x1698] sm:$0xff] }
 0x4b0   :  { %8950 = vmatprep.subr.bf16.mxu1 %v10091_v38  ;;  %v722_v38 = vld [vmem:[#allocation5 + $0x12b8] sm:$0xff] }
 0x4b1   :  { %8910 = vmatpush1.bf16.msra.mxu0 %v9962_v61  ;;  %v850_v49 = vld [vmem:[#allocation5 + $0x16b8] sm:$0xff]  ;;  %v10011_v61 = vcombine.high %v718_v51, %v722_v38  ;;  %v10010_v53 = vcombine.low %v718_v51, %v722_v38 }
 0x4b2   :  { %8911 = vmatprep.subr.bf16.mxu0 %v9971_v6  ;;  %v726_v6 = vld [vmem:[#allocation5 + $0x12d8] sm:$0xff]  ;;  %v10138_v4 = vcombine.low %v846_v48, %v850_v49 }
 0x4b3   :  { %8951 = vmatpush1.bf16.msra.mxu1 %v10090_v46  ;;  %v8607_v13 = vpop.f32.mrb[56].mxu0  ;;  %v10139_v46 = vcombine.high %v846_v48, %v850_v49  ;;  %v854_v52 = vld [vmem:[#allocation5 + $0x16d8] sm:$0xff] }
 0x4b4   :  { %8952 = vmatprep.subr.bf16.mxu1 %v10099_v59  ;;  %v8608_v25 = vadd.f32 %v8607_v13, %v10886_v63  ;;  %v8609_v5 = vpop.f32.mrb[57].mxu0  ;;  %v730_v59 = vld [vmem:[#allocation5 + $0x12f8] sm:$0xff] }
 0x4b5   :  { %v8648_v24 = vpop.f32.mrb[56].mxu1  ;;  %v8610_v3 = vadd.f32 %v8609_v5, %v10888_v28  ;;  %v8611_v42 = vpop.f32.mrb[58].mxu0  ;;  %8912 = vmatpush1.bf16.msra.mxu0 %v9970_v55  ;;  %v830_v28 = vld [vmem:[#allocation5 + $0x1618] sm:$0xff]  ;;  %v10019_v55 = vcombine.high %v726_v6, %v730_v59  ;;  %v10018_v0 = vcombine.low %v726_v6, %v730_v59 }
 0x4b6   :  { %v8650_v29 = vpop.f32.mrb[57].mxu1  ;;  %v10896_v8 = vadd.f32 %v8648_v24, %v8608_v25  ;;  %v8612_v12 = vpop.f32.mrb[59].mxu0  ;;  %8913 = vmatprep.subr.bf16.mxu0 %v9979_v10  ;;  %v10123_v27 = vcombine.high %v830_v28, %v834_v36  ;;  %v10122_v47 = vcombine.low %v830_v28, %v834_v36  ;;  %v858_v58 = vld [vmem:[#allocation5 + $0x16f8] sm:$0xff] }
 0x4b7   :  { %v8652_v9 = vpop.f32.mrb[58].mxu1  ;;  %8953 = vmatpush1.bf16.msra.mxu1 %v10098_v26  ;;  %v10898_v45 = vadd.f32 %v8650_v29, %v8610_v3  ;;  %v10147_v26 = vcombine.high %v854_v52, %v858_v58  ;;  %v734_v10 = vld [vmem:[#allocation5 + $0x1318] sm:$0xff]  ;;  %v10146_v25 = vcombine.low %v854_v52, %v858_v58 }
 0x4b8   :  { %v8653_v63 = vpop.f32.mrb[59].mxu1  ;;  %8954 = vmatprep.subr.bf16.mxu1 %v10107_v60  ;;  %v738_v13 = vld [vmem:[#allocation5 + $0x1338] sm:$0xff] }
 0x4b9   :  { %8914 = vmatpush1.bf16.msra.mxu0 %v9978_v7  ;;  %v862_v60 = vld [vmem:[#allocation5 + $0x1718] sm:$0xff]  ;;  %v10027_v24 = vcombine.high %v734_v10, %v738_v13  ;;  %v10026_v42 = vcombine.low %v734_v10, %v738_v13 }
 0x4ba   :  { %8915 = vmatprep.subr.bf16.mxu0 %v9987_v14  ;;  %v866_v62 = vld [vmem:[#allocation5 + $0x1738] sm:$0xff] }
 0x4bb   :  { %8955 = vmatpush1.bf16.msra.mxu1 %v10106_v19  ;;  %v10155_v5 = vcombine.high %v862_v60, %v866_v62  ;;  %v742_v40 = vld [vmem:[#allocation5 + $0x1358] sm:$0xff]  ;;  %v10154_v7 = vcombine.low %v862_v60, %v866_v62 }
 0x4bc   :  { %8956 = vmatprep.subr.bf16.mxu1 %v10115_v18  ;;  %v746_v17 = vld [vmem:[#allocation5 + $0x1378] sm:$0xff] }
 0x4bd   :  { %8916 = vmatpush1.bf16.msra.mxu0 %v9986_v2  ;;  %v870_v3 = vld [vmem:[#allocation5 + $0x1758] sm:$0xff]  ;;  %v10035_v9 = vcombine.high %v742_v40, %v746_v17  ;;  %v10034_v20 = vcombine.low %v742_v40, %v746_v17 }
 0x4be   :  { %8917 = vmatprep.subr.bf16.mxu0 %v9995_v21  ;;  %v874_v29 = vld [vmem:[#allocation5 + $0x1778] sm:$0xff] }
 0x4bf   :  { %8957 = vmatpush1.bf16.msra.mxu1 %v10114_v16  ;;  %v10163_v12 = vcombine.high %v870_v3, %v874_v29  ;;  %v750_v19 = vld [vmem:[#allocation5 + $0x1398] sm:$0xff]  ;;  %v10162_v56 = vcombine.low %v870_v3, %v874_v29 }
 0x4c0   :  { %8958 = vmatprep.subr.bf16.mxu1 %v10123_v27  ;;  %v754_v14 = vld [vmem:[#allocation5 + $0x13b8] sm:$0xff] }
 0x4c1   :  { %8918 = vmatpush1.bf16.msra.mxu0 %v9994_v22  ;;  %v878_v63 = vld [vmem:[#allocation5 + $0x1798] sm:$0xff]  ;;  %v10043_v28 = vcombine.high %v750_v19, %v754_v14  ;;  %v10042_v30 = vcombine.low %v750_v19, %v754_v14 }
 0x4c2   :  { %8919 = vmatprep.subr.bf16.mxu0 %v10003_v39  ;;  %v882_v18 = vld [vmem:[#allocation5 + $0x17b8] sm:$0xff] }
 0x4c3   :  { %8959 = vmatpush1.bf16.msra.mxu1 %v10122_v47  ;;  %v10171_v36 = vcombine.high %v878_v63, %v882_v18  ;;  %v758_v2 = vld [vmem:[#allocation5 + $0x13d8] sm:$0xff]  ;;  %v10170_v32 = vcombine.low %v878_v63, %v882_v18 }
 0x4c4   :  { %8960 = vmatprep.subr.bf16.mxu1 %v10131_v35  ;;  %v762_v16 = vld [vmem:[#allocation5 + $0x13f8] sm:$0xff] }
 0x4c5   :  { %8920 = vmatpush1.bf16.msra.mxu0 %v10002_v50  ;;  %v886_v21 = vld [vmem:[#allocation5 + $0x17d8] sm:$0xff]  ;;  %v10051_v57 = vcombine.high %v758_v2, %v762_v16  ;;  %v10050_v51 = vcombine.low %v758_v2, %v762_v16 }
 0x4c6   :  { %8921 = vmatprep.subr.bf16.mxu0 %v10011_v61  ;;  %v890_v27 = vld [vmem:[#allocation5 + $0x17f8] sm:$0xff] }
 0x4c7   :  { %8961 = vmatpush1.bf16.msra.mxu1 %v10130_v43  ;;  %v10179_v54 = vcombine.high %v886_v21, %v890_v27  ;;  %v894_v22 = vld [vmem:[#allocation5 + $0x1818] sm:$0xff]  ;;  %v10178_v38 = vcombine.low %v886_v21, %v890_v27  ;;  %v9085_v21 = vsub.s32 4, %v10821_v1 }
 0x4c8   :  { %8962 = vmatprep.subr.bf16.mxu1 %v10139_v46  ;;  %v898_v47 = vld [vmem:[#allocation5 + $0x1838] sm:$0xff] }
 0x4c9   :  { %8922 = vmatpush1.bf16.msra.mxu0 %v10010_v53  ;;  %v1022_v39 = vld [vmem:[#allocation5 + $0x1c18] sm:$0xff]  ;;  %v10187_v48 = vcombine.high %v894_v22, %v898_v47  ;;  %v10186_v6 = vcombine.low %v894_v22, %v898_v47 }
 0x4ca   :  { %8923 = vmatprep.subr.bf16.mxu0 %v10019_v55  ;;  %v1026_v35 = vld [vmem:[#allocation5 + $0x1c38] sm:$0xff] }
 0x4cb   :  { %8963 = vmatpush1.bf16.msra.mxu1 %v10138_v4  ;;  %v10315_v49 = vcombine.high %v1022_v39, %v1026_v35  ;;  %v902_v50 = vld [vmem:[#allocation5 + $0x1858] sm:$0xff]  ;;  %v10314_v59 = vcombine.low %v1022_v39, %v1026_v35 }
 0x4cc   :  { %8964 = vmatprep.subr.bf16.mxu1 %v10147_v26  ;;  %v906_v43 = vld [vmem:[#allocation5 + $0x1878] sm:$0xff] }
 0x4cd   :  { %8924 = vmatpush1.bf16.msra.mxu0 %v10018_v0  ;;  %v1030_v61 = vld [vmem:[#allocation5 + $0x1c58] sm:$0xff]  ;;  %v10195_v52 = vcombine.high %v902_v50, %v906_v43  ;;  %v10194_v10 = vcombine.low %v902_v50, %v906_v43 }
 0x4ce   :  { %8925 = vmatprep.subr.bf16.mxu0 %v10027_v24  ;;  %v1034_v46 = vld [vmem:[#allocation5 + $0x1c78] sm:$0xff] }
 0x4cf   :  { %8965 = vmatpush1.bf16.msra.mxu1 %v10146_v25  ;;  %v10323_v58 = vcombine.high %v1030_v61, %v1034_v46  ;;  %v910_v53 = vld [vmem:[#allocation5 + $0x1898] sm:$0xff]  ;;  %v10322_v13 = vcombine.low %v1030_v61, %v1034_v46 }
 0x4d0   :  { %8966 = vmatprep.subr.bf16.mxu1 %v10155_v5  ;;  %v914_v4 = vld [vmem:[#allocation5 + $0x18b8] sm:$0xff] }
 0x4d1   :  { %8926 = vmatpush1.bf16.msra.mxu0 %v10026_v42  ;;  %v1038_v55 = vld [vmem:[#allocation5 + $0x1c98] sm:$0xff]  ;;  %v10203_v60 = vcombine.high %v910_v53, %v914_v4 }
 0x4d2   :  { %8927 = vmatprep.subr.bf16.mxu0 %v10035_v9  ;;  %v1042_v26 = vld [vmem:[#allocation5 + $0x1cb8] sm:$0xff] }
 0x4d3   :  { %8967 = vmatpush1.bf16.msra.mxu1 %v10154_v7  ;;  %v10331_v62 = vcombine.high %v1038_v55, %v1042_v26  ;;  %v918_v0 = vld [vmem:[#allocation5 + $0x18d8] sm:$0xff] }
 0x4d4   :  { %8968 = vmatprep.subr.bf16.mxu1 %v10163_v12  ;;  %v922_v25 = vld [vmem:[#allocation5 + $0x18f8] sm:$0xff] }
 0x4d5   :  { %8928 = vmatpush1.bf16.msra.mxu0 %v10034_v20  ;;  %v1046_v24 = vld [vmem:[#allocation5 + $0x1cd8] sm:$0xff]  ;;  %v10211_v40 = vcombine.high %v918_v0, %v922_v25  ;;  %v10210_v9 = vcombine.low %v918_v0, %v922_v25 }
 0x4d6   :  { %8929 = vmatprep.subr.bf16.mxu0 %v10043_v28  ;;  %v1050_v5 = vld [vmem:[#allocation5 + $0x1cf8] sm:$0xff] }
 0x4d7   :  { %8969 = vmatpush1.bf16.msra.mxu1 %v10162_v56  ;;  %v10339_v17 = vcombine.high %v1046_v24, %v1050_v5  ;;  %v926_v3 = vld [vmem:[#allocation5 + $0x1918] sm:$0xff] }
 0x4d8   :  { %8970 = vmatprep.subr.bf16.mxu1 %v10171_v36  ;;  %v930_v29 = vld [vmem:[#allocation5 + $0x1938] sm:$0xff] }
 0x4d9   :  { %8930 = vmatpush1.bf16.msra.mxu0 %v10042_v30  ;;  %v1054_v42 = vld [vmem:[#allocation5 + $0x1d18] sm:$0xff]  ;;  %v10219_v12 = vcombine.high %v926_v3, %v930_v29  ;;  %v10218_v20 = vcombine.low %v926_v3, %v930_v29 }
 0x4da   :  { %8931 = vmatprep.subr.bf16.mxu0 %v10051_v57  ;;  %v1058_v7 = vld [vmem:[#allocation5 + $0x1d38] sm:$0xff] }
 0x4db   :  { %8971 = vmatpush1.bf16.msra.mxu1 %v10170_v32  ;;  %v934_v19 = vld [vmem:[#allocation5 + $0x1958] sm:$0xff]  ;;  %v10346_v56 = vcombine.low %v1054_v42, %v1058_v7  ;;  %v9089_v32 = vsub.s32 5, %v10821_v1 }
 0x4dc   :  { %8972 = vmatprep.subr.bf16.mxu1 %v10179_v54  ;;  %v938_v14 = vld [vmem:[#allocation5 + $0x1978] sm:$0xff] }
 0x4dd   :  { %8932 = vmatpush1.bf16.msra.mxu0 %v10050_v51  ;;  %v1062_v63 = vld [vmem:[#allocation5 + $0x1d58] sm:$0xff]  ;;  %v10227_v28 = vcombine.high %v934_v19, %v938_v14  ;;  %v10226_v57 = vcombine.low %v934_v19, %v938_v14 }
 0x4de   :  { %8983 = vmatprep.subr.bf16.mxu0 %v10187_v48  ;;  %v1066_v18 = vld [vmem:[#allocation5 + $0x1d78] sm:$0xff] }
 0x4df   :  { %8973 = vmatpush1.bf16.msra.mxu1 %v10178_v38  ;;  %v10355_v36 = vcombine.high %v1062_v63, %v1066_v18  ;;  %v942_v2 = vld [vmem:[#allocation5 + $0x1998] sm:$0xff]  ;;  %v10354_v54 = vcombine.low %v1062_v63, %v1066_v18 }
 0x4e0   :  { %9024 = vmatprep.subr.bf16.mxu1 %v10315_v49  ;;  %8934 = vmatmul.mubr.bf16.vlgmr.msra.gmra.mrb[72].mxu0 %v10767_v11  ;;  %v10202_v11 = vcombine.low %v910_v53, %v914_v4  ;;  %v946_v16 = vld [vmem:[#allocation5 + $0x19b8] sm:$0xff]  ;;  %v10907_v49 = vld [vmem:[#allocation8] sm:$0xff] }
 0x4e1   :  { %8984 = vmatpush1.bf16.msra.mxu0 %v10186_v6  ;;  %9015 = vmatprep.mubr.bf16.mxu0 %v10771_v31  ;;  %v10338_v31 = vcombine.low %v1046_v24, %v1050_v5  ;;  %v1070_v27 = vld [vmem:[#allocation5 + $0x1d98] sm:$0xff]  ;;  %v10235_v22 = vcombine.high %v942_v2, %v946_v16  ;;  %v9086_v50 = vrot.slane %v10907_v49, %v9085_v21 }
 0x4e2   :  { %8975 = vmatmul.mubr.bf16.vlgmr.msra.gmra.mrb[72].mxu1 %v10769_v15  ;;  %8985 = vmatprep.subr.bf16.mxu0 %v10195_v52  ;;  %v10330_v15 = vcombine.low %v1038_v55, %v1042_v26  ;;  %v1074_v30 = vld [vmem:[#allocation5 + $0x1db8] sm:$0xff]  ;;  %v9090_v52 = vrot.slane %v10907_v49, %v9089_v32  ;;  %v10234_v53 = vcombine.low %v942_v2, %v946_v16 }
 0x4e3   :  { %9025 = vmatpush1.bf16.msra.mxu1 %v10314_v59  ;;  %9056 = vmatprep.mubr.bf16.mxu1 %v10774_v34  ;;  %v10347_v34 = vcombine.high %v1054_v42, %v1058_v7  ;;  %v10363_v39 = vcombine.high %v1070_v27, %v1074_v30  ;;  %v950_v35 = vld [vmem:[#allocation5 + $0x19d8] sm:$0xff]  ;;  %v10362_v26 = vcombine.low %v1070_v27, %v1074_v30 }
 0x4e4   :  { %9026 = vmatprep.subr.bf16.mxu1 %v10323_v58  ;;  %v954_v51 = vld [vmem:[#allocation5 + $0x19f8] sm:$0xff] }
 0x4e5   :  { %8986 = vmatpush1.bf16.msra.mxu0 %v10194_v10  ;;  %v1078_v61 = vld [vmem:[#allocation5 + $0x1dd8] sm:$0xff]  ;;  %v10243_v10 = vcombine.high %v950_v35, %v954_v51 }
 0x4e6   :  { %8987 = vmatprep.subr.bf16.mxu0 %v10203_v60  ;;  %v1082_v46 = vld [vmem:[#allocation5 + $0x1df8] sm:$0xff] }
 0x4e7   :  { %9027 = vmatpush1.bf16.msra.mxu1 %v10322_v13  ;;  %v958_v0 = vld [vmem:[#allocation5 + $0x1a18] sm:$0xff]  ;;  %v10370_v3 = vcombine.low %v1078_v61, %v1082_v46 }
 0x4e8   :  { %9028 = vmatprep.subr.bf16.mxu1 %v10331_v62  ;;  %v10371_v62 = vcombine.high %v1078_v61, %v1082_v46  ;;  %v962_v25 = vld [vmem:[#allocation5 + $0x1a38] sm:$0xff] }
 0x4e9   :  { %8988 = vmatpush1.bf16.msra.mxu0 %v10202_v11  ;;  %v1086_v24 = vld [vmem:[#allocation5 + $0x1e18] sm:$0xff]  ;;  %v10912_v11 = vld [vmem:[#allocation10] sm:$0xff]  ;;  %v10251_v42 = vcombine.high %v958_v0, %v962_v25  ;;  %v10250_v18 = vcombine.low %v958_v0, %v962_v25 }
 0x4ea   :  { %8989 = vmatprep.subr.bf16.mxu0 %v10211_v40  ;;  %v1090_v5 = vld [vmem:[#allocation5 + $0x1e38] sm:$0xff]  ;;  %v9164_v7 = vrot.slane %v10912_v11, %v9089_v32 }
 0x4eb   :  { %9029 = vmatpush1.bf16.msra.mxu1 %v10330_v15  ;;  %v9160_v15 = vrot.slane %v10912_v11, %v9085_v21  ;;  %v1094_v14 = vld [vmem:[#allocation5 + $0x1e58] sm:$0xff] }
 0x4ec   :  { %9030 = vmatprep.subr.bf16.mxu1 %v10339_v17  ;;  %v10242_v17 = vcombine.low %v950_v35, %v954_v51  ;;  %v1098_v63 = vld [vmem:[#allocation5 + $0x1e78] sm:$0xff] }
 0x4ed   :  { %8990 = vmatpush1.bf16.msra.mxu0 %v10210_v9  ;;  %v10387_v16 = vcombine.high %v1094_v14, %v1098_v63  ;;  %v974_v21 = vld [vmem:[#allocation5 + $0x1a98] sm:$0xff] }
 0x4ee   :  { %8991 = vmatprep.subr.bf16.mxu0 %v10219_v12  ;;  %v966_v12 = vld [vmem:[#allocation5 + $0x1a58] sm:$0xff] }
 0x4ef   :  { %9031 = vmatpush1.bf16.msra.mxu1 %v10338_v31  ;;  %v10379_v31 = vcombine.high %v1086_v24, %v1090_v5  ;;  %v978_v27 = vld [vmem:[#allocation5 + $0x1ab8] sm:$0xff] }
 0x4f0   :  { %9032 = vmatprep.subr.bf16.mxu1 %v10347_v34  ;;  %v970_v34 = vld [vmem:[#allocation5 + $0x1a78] sm:$0xff] }
 0x4f1   :  { %8992 = vmatpush1.bf16.msra.mxu0 %v10218_v20  ;;  %v1102_v32 = vld [vmem:[#allocation5 + $0x1e98] sm:$0xff] }
 0x4f2   :  { %8993 = vmatprep.subr.bf16.mxu0 %v10227_v28  ;;  %v10378_v28 = vcombine.low %v1086_v24, %v1090_v5  ;;  %v982_v51 = vld [vmem:[#allocation5 + $0x1ad8] sm:$0xff] }
 0x4f3   :  { %9033 = vmatpush1.bf16.msra.mxu1 %v10346_v56  ;;  %v8689_v47 = vpop.f32.mrb[60].mxu0  ;;  %v1006_v24 = vld [vmem:[#allocation5 + $0x1b98] sm:$0xff] }
 0x4f4   :  { %9034 = vmatprep.subr.bf16.mxu1 %v10355_v36  ;;  %v8690_v38 = vadd.f32 %v8689_v47, %v10896_v8  ;;  %v8691_v43 = vpop.f32.mrb[61].mxu0  ;;  %v10259_v36 = vcombine.high %v966_v12, %v970_v34  ;;  %v10386_v47 = vcombine.low %v1094_v14, %v1098_v63  ;;  %v1010_v5 = vld [vmem:[#allocation5 + $0x1bb8] sm:$0xff] }
 0x4f5   :  { %v8730_v48 = vpop.f32.mrb[60].mxu1  ;;  %v8692_v6 = vadd.f32 %v8691_v43, %v10898_v45  ;;  %v8693_v58 = vpop.f32.mrb[62].mxu0  ;;  %8994 = vmatpush1.bf16.msra.mxu0 %v10226_v57  ;;  %v1106_v57 = vld [vmem:[#allocation5 + $0x1eb8] sm:$0xff]  ;;  %v10266_v43 = vcombine.low %v974_v21, %v978_v27 }
 0x4f6   :  { %v8732_v59 = vpop.f32.mrb[61].mxu1  ;;  %v8731_v4 = vadd.f32 %v8730_v48, %v8690_v38  ;;  %v8694_v8 = vpop.f32.mrb[63].mxu0  ;;  %8995 = vmatprep.subr.bf16.mxu0 %v10235_v22  ;;  %v10395_v35 = vcombine.high %v1102_v32, %v1106_v57  ;;  %v986_v38 = vld [vmem:[#allocation5 + $0x1af8] sm:$0xff] }
 0x4f7   :  { %v8734_v55 = vpop.f32.mrb[62].mxu1  ;;  %9035 = vmatpush1.bf16.msra.mxu1 %v10354_v54  ;;  %v8733_v13 = vadd.f32 %v8732_v59, %v8692_v6  ;;  %v10258_v54 = vcombine.low %v966_v12, %v970_v34  ;;  %v1110_v48 = vld [vmem:[#allocation5 + $0x1ed8] sm:$0xff]  ;;  %v10275_v61 = vcombine.high %v982_v51, %v986_v38  ;;  %v10298_v34 = vcombine.low %v1006_v24, %v1010_v5 }
 0x4f8   :  { %v8735_v60 = vpop.f32.mrb[63].mxu1  ;;  %9036 = vmatprep.subr.bf16.mxu1 %v10363_v39  ;;  %v9111_v45 = vadd.f32 %v9086_v50, %v8731_v4  ;;  %v10267_v39 = vcombine.high %v974_v21, %v978_v27  ;;  %v1114_v50 = vld [vmem:[#allocation5 + $0x1ef8] sm:$0xff] }
 0x4f9   :  { %v9112_v40 = vadd.f32 %v9090_v52, %v8733_v13  ;;  %8996 = vmatpush1.bf16.msra.mxu0 %v10234_v53  ;;  %v10403_v46 = vcombine.high %v1110_v48, %v1114_v50  ;;  %v990_v6 = vld [vmem:[#allocation5 + $0x1b18] sm:$0xff]  ;;  %v10274_v53 = vcombine.low %v982_v51, %v986_v38  ;;  %v10402_v4 = vcombine.low %v1110_v48, %v1114_v50 }
 0x4fa   :  { %vm9119_vm4 = vcmp.gt.f32.partialorder %v9111_v45, 0.0  ;;  %v9127_v29 = vmul.f32 0.2, %v9111_v45  ;;  %8997 = vmatprep.subr.bf16.mxu0 %v10243_v10  ;;  %v994_v59 = vld [vmem:[#allocation5 + $0x1b38] sm:$0xff] }
 0x4fb   :  { %9037 = vmatpush1.bf16.msra.mxu1 %v10362_v26  ;;  %vm9120_vm5 = vcmp.gt.f32.partialorder %v9112_v40, 0.0  ;;  %v9128_v9 = vmul.f32 0.2, %v9112_v40  ;;  %v1118_v52 = vld [vmem:[#allocation5 + $0x1f18] sm:$0xff]  ;;  %v10283_v55 = vcombine.high %v990_v6, %v994_v59 }
 0x4fc   :  { %9038 = vmatprep.subr.bf16.mxu1 %v10371_v62  ;;  %v9135_v19 = vsel %vm9119_vm4, %v9111_v45, %v9127_v29  ;;  %v1122_v58 = vld [vmem:[#allocation5 + $0x1f38] sm:$0xff]  ;;  %v10282_v62 = vcombine.low %v990_v6, %v994_v59  ;;  %v10299_v29 = vcombine.high %v1006_v24, %v1010_v5 }
 0x4fd   :  { %8998 = vmatpush1.bf16.msra.mxu0 %v10242_v17  ;;  %v9136_v20 = vsel %vm9120_vm5, %v9112_v40, %v9128_v9  ;;  %v9185_v56 = vmul.f32 %v9160_v15, %v9135_v19  ;;  %v10411_v8 = vcombine.high %v1118_v52, %v1122_v58  ;;  %v998_v26 = vld [vmem:[#allocation5 + $0x1b58] sm:$0xff]  ;;  %v10410_v0 = vcombine.low %v1118_v52, %v1122_v58 }
 0x4fe   :  { %8999 = vmatprep.subr.bf16.mxu0 %v10251_v42  ;;  %v9186_v2 = vmul.f32 %v9164_v7, %v9136_v20  ;;  %v1002_v10 = vld [vmem:[#allocation5 + $0x1b78] sm:$0xff] }
 0x4ff   :  { %9039 = vmatpush1.bf16.msra.mxu1 %v10370_v3  ;;  %v9192_v30 = vadd.f32 %v10868_v23, %v9185_v56  ;;  %v10394_v23 = vcombine.low %v1102_v32, %v1106_v57  ;;  %v1126_v13 = vld [vmem:[#allocation5 + $0x1f58] sm:$0xff]  ;;  %v10291_v25 = vcombine.high %v998_v26, %v1002_v10  ;;  %v10290_v17 = vcombine.low %v998_v26, %v1002_v10 }
 0x500   :  { %9040 = vmatprep.subr.bf16.mxu1 %v10379_v31  ;;  %v1130_v60 = vld [vmem:[#allocation5 + $0x1f78] sm:$0xff] }
 0x501   :  { %9000 = vmatpush1.bf16.msra.mxu0 %v10250_v18  ;;  %v10917_v22 = vadd.f32 %v9192_v30, %v9186_v2  ;;  %v10419_v45 = vcombine.high %v1126_v13, %v1130_v60  ;;  %v1134_v15 = vld [vmem:[#allocation5 + $0x1f98] sm:$0xff]  ;;  %v10418_v3 = vcombine.low %v1126_v13, %v1130_v60  ;;  %v9093_v13 = vsub.s32 6, %v10821_v1 }
 0x502   :  { %9001 = vmatprep.subr.bf16.mxu0 %v10259_v36  ;;  %v1138_v40 = vld [vmem:[#allocation5 + $0x1fb8] sm:$0xff]  ;;  %v9097_v60 = vsub.s32 7, %v10821_v1 }
 0x503   :  { %9041 = vmatpush1.bf16.msra.mxu1 %v10378_v28  ;;  %v10427_v42 = vcombine.high %v1134_v15, %v1138_v40  ;;  %v1014_v7 = vld [vmem:[#allocation5 + $0x1bd8] sm:$0xff]  ;;  %v10426_v19 = vcombine.low %v1134_v15, %v1138_v40  ;;  %v9168_v1 = vrot.slane %v10912_v11, %v9093_v13 }
 0x504   :  { %9042 = vmatprep.subr.bf16.mxu1 %v10387_v16  ;;  %v1018_v9 = vld [vmem:[#allocation5 + $0x1bf8] sm:$0xff]  ;;  %v9098_v40 = vrot.slane %v10907_v49, %v9097_v60 }
 0x505   :  { %9002 = vmatpush1.bf16.msra.mxu0 %v10258_v54  ;;  %v1142_v31 = vld [vmem:[#allocation5 + $0x1fd8] sm:$0xff]  ;;  %v10307_v14 = vcombine.high %v1014_v7, %v1018_v9  ;;  %v10306_v18 = vcombine.low %v1014_v7, %v1018_v9 }
 0x506   :  { %9003 = vmatprep.subr.bf16.mxu0 %v10267_v39  ;;  %v1146_v12 = vld [vmem:[#allocation5 + $0x1ff8] sm:$0xff] }
 0x507   :  { %9043 = vmatpush1.bf16.msra.mxu1 %v10386_v47  ;;  %v10435_v63 = vcombine.high %v1142_v31, %v1146_v12  ;;  %v10434_v20 = vcombine.low %v1142_v31, %v1146_v12 }
 0x508   :  { %9044 = vmatprep.subr.bf16.mxu1 %v10395_v35 }
 0x509   :  { %9004 = vmatpush1.bf16.msra.mxu0 %v10266_v43 }
 0x50a   :  { %9005 = vmatprep.subr.bf16.mxu0 %v10275_v61 }
 0x50b   :  { %9045 = vmatpush1.bf16.msra.mxu1 %v10394_v23 }
 0x50c   :  { %9046 = vmatprep.subr.bf16.mxu1 %v10403_v46 }
 0x50d   :  { %9006 = vmatpush1.bf16.msra.mxu0 %v10274_v53 }
 0x50e   :  { %9007 = vmatprep.subr.bf16.mxu0 %v10283_v55 }
 0x50f   :  { %9047 = vmatpush1.bf16.msra.mxu1 %v10402_v4 }
 0x510   :  { %9048 = vmatprep.subr.bf16.mxu1 %v10411_v8 }
 0x511   :  { %9008 = vmatpush1.bf16.msra.mxu0 %v10282_v62 }
 0x512   :  { %9009 = vmatprep.subr.bf16.mxu0 %v10291_v25 }
 0x513   :  { %9049 = vmatpush1.bf16.msra.mxu1 %v10410_v0 }
 0x514   :  { %9050 = vmatprep.subr.bf16.mxu1 %v10419_v45  ;;  %v9094_v45 = vrot.slane %v10907_v49, %v9093_v13 }
 0x515   :  { %9010 = vmatpush1.bf16.msra.mxu0 %v10290_v17 }
 0x516   :  { %9011 = vmatprep.subr.bf16.mxu0 %v10299_v29 }
 0x517   :  { %9051 = vmatpush1.bf16.msra.mxu1 %v10418_v3 }
 0x518   :  { %9052 = vmatprep.subr.bf16.mxu1 %v10427_v42 }
 0x519   :  { %9012 = vmatpush1.bf16.msra.mxu0 %v10298_v34 }
 0x51a   :  { %9013 = vmatprep.subr.bf16.mxu0 %v10307_v14 }
 0x51b   :  { %9053 = vmatpush1.bf16.msra.mxu1 %v10426_v19  ;;  %v9172_v19 = vrot.slane %v10912_v11, %v9097_v60 }
 0x51c   :  { %9054 = vmatprep.subr.bf16.mxu1 %v10435_v63 }
 0x51d   :  { %9014 = vmatpush1.bf16.msra.mxu0 %v10306_v18 }
 0x51f   :  { %9055 = vmatpush1.bf16.msra.mxu1 %v10434_v20 }
 0x520   :  { %9016 = vmatmul.mubr.bf16.vlgmr.msra.gmra.mrb[76].mxu0 %v10783_v37 }
 0x522   :  { %9057 = vmatmul.mubr.bf16.vlgmr.msra.gmra.mrb[76].mxu1 %v10785_v44 }
 0x533   :  { %v8771_v56 = vpop.f32.mrb[64].mxu0 }
 0x534   :  { %v8772_v28 = vadd.f32 %v8771_v56, %v10779_v33  ;;  %v8773_v2 = vpop.f32.mrb[65].mxu0 }
 0x535   :  { %v8812_v36 = vpop.f32.mrb[64].mxu1  ;;  %v8774_v16 = vadd.f32 %v8773_v2, %v10781_v41  ;;  %v8775_v27 = vpop.f32.mrb[66].mxu0 }
 0x536   :  { %v8814_v21 = vpop.f32.mrb[65].mxu1  ;;  %v8813_v30 = vadd.f32 %v8812_v36, %v8772_v28  ;;  %v8776_v57 = vpop.f32.mrb[67].mxu0  ;;  %v10436_v36 = vld [vmem:[#allocation2] ss:$0 sm:$0xff] }
 0x537   :  { %v8816_v32 = vpop.f32.mrb[66].mxu1  ;;  %v8815_v54 = vadd.f32 %v8814_v21, %v8774_v16 }
 0x538   :  { %v8817_v47 = vpop.f32.mrb[67].mxu1 }
 0x573   :  { %v8853_v39 = vpop.f32.mrb[68].mxu0 }
 0x574   :  { %v8854_v35 = vadd.f32 %v8853_v39, %v8813_v30  ;;  %v8855_v37 = vpop.f32.mrb[69].mxu0 }
 0x575   :  { %v8894_v51 = vpop.f32.mrb[68].mxu1  ;;  %v8856_v38 = vadd.f32 %v8855_v37, %v8815_v54  ;;  %v8857_v48 = vpop.f32.mrb[70].mxu0 }
 0x576   :  { %v8896_v44 = vpop.f32.mrb[69].mxu1  ;;  %v8895_v50 = vadd.f32 %v8894_v51, %v8854_v35  ;;  %v8858_v43 = vpop.f32.mrb[71].mxu0 }
 0x577   :  { %v8898_v33 = vpop.f32.mrb[70].mxu1  ;;  %v8897_v23 = vadd.f32 %v8896_v44, %v8856_v38 }
 0x578   :  { %v8899_v61 = vpop.f32.mrb[71].mxu1 }
 0x5b3   :  { %v8935_v41 = vpop.f32.mrb[72].mxu0 }
 0x5b4   :  { %v8936_v46 = vadd.f32 %v8935_v41, %v8895_v50  ;;  %v8937_v59 = vpop.f32.mrb[73].mxu0 }
 0x5b5   :  { %v8976_v6 = vpop.f32.mrb[72].mxu1  ;;  %v8938_v52 = vadd.f32 %v8937_v59, %v8897_v23  ;;  %v8939_v53 = vpop.f32.mrb[74].mxu0 }
 0x5b6   :  { %v8978_v58 = vpop.f32.mrb[73].mxu1  ;;  %v8977_v4 = vadd.f32 %v8976_v6, %v8936_v46  ;;  %v8940_v8 = vpop.f32.mrb[75].mxu0 }
 0x5b7   :  { %v8980_v55 = vpop.f32.mrb[74].mxu1  ;;  %v8979_v26 = vadd.f32 %v8978_v58, %v8938_v52 }
 0x5b8   :  { %v8981_v10 = vpop.f32.mrb[75].mxu1 }
 0x5f3   :  { %v9017_v62 = vpop.f32.mrb[76].mxu0 }
 0x5f4   :  { %v9018_v0 = vadd.f32 %v9017_v62, %v8977_v4  ;;  %v9019_v24 = vpop.f32.mrb[77].mxu0 }
 0x5f5   :  { %v9058_v25 = vpop.f32.mrb[76].mxu1  ;;  %v9020_v5 = vadd.f32 %v9019_v24, %v8979_v26  ;;  %v9021_v17 = vpop.f32.mrb[78].mxu0 }
 0x5f6   :  { %v9060_v15 = vpop.f32.mrb[77].mxu1  ;;  %v9059_v3 = vadd.f32 %v9058_v25, %v9018_v0  ;;  %v9022_v42 = vpop.f32.mrb[79].mxu0 }
 0x5f7   :  { %v9062_v29 = vpop.f32.mrb[78].mxu1  ;;  %v9061_v7 = vadd.f32 %v9060_v15, %v9020_v5 }
 0x5f8   :  { %v9063_v9 = vpop.f32.mrb[79].mxu1  ;;  %v9113_v31 = vadd.f32 %v9094_v45, %v9059_v3 }
 0x5f9   :  { %v9114_v12 = vadd.f32 %v9098_v40, %v9061_v7 }
 0x5fa   :  { %vm9121_vm6 = vcmp.gt.f32.partialorder %v9113_v31, 0.0  ;;  %v9129_v34 = vmul.f32 0.2, %v9113_v31 }
 0x5fb   :  { %v9130_v14 = vmul.f32 0.2, %v9114_v12  ;;  %vm9122_vm7 = vcmp.gt.f32.partialorder %v9114_v12, 0.0 }
 0x5fc   :  { %v9137_v63 = vsel %vm9121_vm6, %v9113_v31, %v9129_v34 }
 0x5fd   :  { %v9138_v18 = vsel %vm9122_vm7, %v9114_v12, %v9130_v14  ;;  %v9187_v20 = vmul.f32 %v9168_v1, %v9137_v63 }
 0x5fe   :  { %v9188_v49 = vmul.f32 %v9172_v19, %v9138_v18 }
 0x5ff   :  { %v9194_v56 = vadd.f32 %v10917_v22, %v9187_v20 }
 0x601   :  { %v9195_v28 = vadd.f32 %v9194_v56, %v9188_v49 }
 0x603   :  { %9196 = vadd.xlane.f32.xlu0 %v9195_v28 }
 0x690   :  { %v9197_v2 = vpop.xlane.xlu0 %9196 }
 0x691   :  { %v9210_v16 = vadd.f32 %v10436_v36, %v9197_v2 }
 0x693   :  { %9212 = vst.msk [vmem:[%s10940_s7] sm:$0xff] %vm9211_vm8, %v9210_v16 }
 0x694   :  { %9217 = vsyncpa [#allocation4], 1 }
 0x695   :  { %9218 = vsyncpa [#allocation6], 1 }
 0x696   :  { %9219 = vsyncpa [#allocation9], 1 }

</bundles_post_ra>
